<compile_context>
chip_gen: v7x
topology: tpu7x:2x2x1
jax: 0.10.0
libtpu: 0.0.40
codegen_flags: <defaults>
</compile_context>

<pallas_src>
import functools

import jax
import jax.numpy as jnp
from jax import lax
from jax.experimental import pallas as pl
from jax.experimental.pallas import tpu as pltpu


def _round_up(x, m):
    return (x + m - 1) // m * m


# -----------------------------------------------------------------------------
# Fused kernel: all LSTM layers/directions + relu + fc in one pallas_call.
# -----------------------------------------------------------------------------
def make_fused_lstm_kernel(T, B, H, F, num_layers, num_dirs, C_pad):
    """Builds the fused kernel body for a static (T, B, H, F, L, D) config."""
    n_cells = num_layers * num_dirs

    def kernel(*refs):
        # ---- parse refs: inputs, then output, then scratch -----------------
        idx = 0
        x_ref = refs[idx]; idx += 1                       # (T, B, F)
        cell_refs = []
        for _ in range(n_cells):                          # per (layer, dir):
            cell_refs.append((refs[idx],                  #   wih_t (Din, 4H)
                              refs[idx + 1],              #   whh_t (H, 4H)
                              refs[idx + 2]))             #   bias  (1, 4H)
            idx += 3
        fc_w_ref = refs[idx]; idx += 1                    # (H, C_pad)
        fc_b_ref = refs[idx]; idx += 1                    # (1, C_pad)
        out_ref = refs[idx]; idx += 1                     # (L*D, B, C_pad)
        gx_scr = refs[idx]; idx += 1                      # (D, T, B, 4H)
        seq_scr = refs[idx]; idx += 1                     # (D, T, B, H)
        h_scr = refs[idx]; idx += 1                       # (B, H)
        c_scr = refs[idx]; idx += 1                       # (B, H)

        for l in range(num_layers):
            # ---- hoisted input projection: one big MXU matmul per direction.
            # Must be done for BOTH directions before the recurrences of this
            # layer overwrite seq_scr (the previous layer's outputs).
            for d in range(num_dirs):
                wih_ref, _, b_ref = cell_refs[l * num_dirs + d]
                if l == 0:
                    x_flat = x_ref[...].reshape(T * B, F)
                    gx = jnp.dot(x_flat, wih_ref[...],
                                 preferred_element_type=jnp.float32)
                else:
                    # layer input = concat(fwd_out, bwd_out) along features;
                    # implemented as a sum of per-direction row-sliced matmuls.
                    gx = jnp.zeros((T * B, 4 * H), jnp.float32)
                    for dp in range(num_dirs):
                        prev = seq_scr[dp].reshape(T * B, H)
                        gx = gx + jnp.dot(
                            prev, wih_ref[pl.ds(dp * H, H), :],
                            preferred_element_type=jnp.float32)
                gx = gx + b_ref[...]          # combined b_ih + b_hh, once
                gx_scr[d] = gx.reshape(T, B, 4 * H)

            # ---- serial recurrences (in-kernel time reversal for d == 1) ----
            for d in range(num_dirs):
                _, whh_ref, _ = cell_refs[l * num_dirs + d]
                h_scr[...] = jnp.zeros_like(h_scr)
                c_scr[...] = jnp.zeros_like(c_scr)

                def step(t, carry, d=d):
                    tt = t if d == 0 else T - 1 - t
                    g = gx_scr[d, tt] + jnp.dot(
                        h_scr[...], whh_ref[...],
                        preferred_element_type=jnp.float32)
                    # PyTorch gate order: i, f, g, o
                    i_g = jax.nn.sigmoid(g[:, 0 * H:1 * H])
                    f_g = jax.nn.sigmoid(g[:, 1 * H:2 * H])
                    g_g = jnp.tanh(g[:, 2 * H:3 * H])
                    o_g = jax.nn.sigmoid(g[:, 3 * H:4 * H])
                    c_new = f_g * c_scr[...] + i_g * g_g
                    h_new = o_g * jnp.tanh(c_new)
                    h_scr[...] = h_new
                    c_scr[...] = c_new
                    seq_scr[d, tt] = h_new
                    return carry

                # T is static and small -> fully unroll for bundle co-issue.
                lax.fori_loop(0, T, step, 0, unroll=True)

                # ---- fused relu + fc epilogue on hn of this (layer, dir) ----
                hr = jnp.maximum(h_scr[...], 0.0)
                out_ref[l * num_dirs + d] = (
                    jnp.dot(hr, fc_w_ref[...],
                            preferred_element_type=jnp.float32)
                    + fc_b_ref[...]).astype(out_ref.dtype)

        # TODO(synk): for large T*B the whole-sequence-resident design exceeds
        # the scoped VMEM limit; tile T with a grid axis (carry h/c in scratch)
        # and let BlockSpec double-buffer x / gx / out chunks.
        # TODO(synk): on v7x the two directions could run on separate
        # TensorCores (parallel grid axis / core_map); kept single-core here.

    return kernel


# -----------------------------------------------------------------------------
# Model: parameter init + forward (padding glue in JAX, all compute in Pallas).
# -----------------------------------------------------------------------------
def init_params(key, nfeatures, hidden_size, num_layers, nclasses,
                bidirectional=True):
    num_dirs = 2 if bidirectional else 1
    bound = 1.0 / jnp.sqrt(hidden_size)
    params = {"lstm": {}, "num_layers": num_layers, "num_dirs": num_dirs,
              "hidden_size": hidden_size, "nclasses": nclasses,
              "nfeatures": nfeatures}
    for l in range(num_layers):
        din = nfeatures if l == 0 else hidden_size * num_dirs
        for d in range(num_dirs):
            key, k1, k2, k3, k4 = jax.random.split(key, 5)
            w_ih = jax.random.uniform(k1, (4 * hidden_size, din),
                                      minval=-bound, maxval=bound,
                                      dtype=jnp.float32)
            w_hh = jax.random.uniform(k2, (4 * hidden_size, hidden_size),
                                      minval=-bound, maxval=bound,
                                      dtype=jnp.float32)
            b_ih = jax.random.uniform(k3, (4 * hidden_size,),
                                      minval=-bound, maxval=bound,
                                      dtype=jnp.float32)
            b_hh = jax.random.uniform(k4, (4 * hidden_size,),
                                      minval=-bound, maxval=bound,
                                      dtype=jnp.float32)
            params["lstm"][(l, d)] = (w_ih.T,                   # (din, 4H)
                                      w_hh.T,                   # (H, 4H)
                                      (b_ih + b_hh)[None, :])   # (1, 4H)
    key, k1, k2 = jax.random.split(key, 3)
    fb = 1.0 / jnp.sqrt(hidden_size)
    params["fc_w_t"] = jax.random.uniform(k1, (hidden_size, nclasses),
                                          minval=-fb, maxval=fb,
                                          dtype=jnp.float32)
    params["fc_b"] = jax.random.uniform(k2, (1, nclasses),
                                        minval=-fb, maxval=fb,
                                        dtype=jnp.float32)
    # TODO(synk): fc_intermediate (mlp_layers MLP) is built in __init__ but
    # never used in the reference forward, so it has no parameters here.
    return params


def lstm_baseline_forward(params, x):
    # x: (T, B, nfeatures)
    T, B, F = x.shape
    L = params["num_layers"]
    D = params["num_dirs"]
    H = params["hidden_size"]
    C = params["nclasses"]

    B_pad = _round_up(max(B, 8), 8)        # sublane-aligned batch
    C_pad = _round_up(max(C, 128), 128)    # lane-dense fc output

    # Pad batch with zeros (padded rows sliced away after the kernel).
    x_pad = jnp.zeros((T, B_pad, F), jnp.float32).at[:, :B, :].set(x)

    # Pad fc weight/bias to a lane-dense output slab.
    fc_w_pad = jnp.zeros((H, C_pad), jnp.float32).at[:, :C].set(params["fc_w_t"])
    fc_b_pad = jnp.zeros((1, C_pad), jnp.float32).at[:, :C].set(params["fc_b"])

    weight_args = []
    for l in range(L):
        for d in range(D):
            wih_t, whh_t, bias = params["lstm"][(l, d)]
            weight_args += [wih_t, whh_t, bias]

    vmem = pl.BlockSpec(memory_space=pltpu.MemorySpace.VMEM)
    n_in = 1 + 3 * L * D + 2
    kernel = make_fused_lstm_kernel(T, B_pad, H, F, L, D, C_pad)

    out_pad = pl.pallas_call(
        kernel,
        out_shape=jax.ShapeDtypeStruct((L * D, B_pad, C_pad), jnp.float32),
        in_specs=[vmem] * n_in,
        out_specs=vmem,
        scratch_shapes=[
            pltpu.VMEM((D, T, B_pad, 4 * H), jnp.float32),  # hoisted x-gates
            pltpu.VMEM((D, T, B_pad, H), jnp.float32),      # layer output seq
            pltpu.VMEM((B_pad, H), jnp.float32),            # h state
            pltpu.VMEM((B_pad, H), jnp.float32),            # c state
        ],
        compiler_params=pltpu.CompilerParams(
            vmem_limit_bytes=64 * 1024 * 1024),
    )(x_pad, *weight_args, fc_w_pad, fc_b_pad)

    # Slice away batch/class padding; row order == hn.view(-1, hidden_size).
    out = out_pad[:, :B, :C].reshape(L * D * B, C)
    return out


if __name__ == "__main__":
    # Small shapes consistent with the module's forward.
    nfeatures, hidden_size, num_layers, nclasses = 16, 32, 2, 5
    bidirectional = True
    seq_len, batch = 8, 2

    params = init_params(jax.random.PRNGKey(1), nfeatures, hidden_size,
                         num_layers, nclasses, bidirectional)

    x = jax.random.normal(jax.random.PRNGKey(0),
                          (seq_len, batch, nfeatures), dtype=jnp.float32)

    fwd = jax.jit(functools.partial(lstm_baseline_forward, params))
    out = fwd(x)
    jax.block_until_ready(out)

    expected_rows = num_layers * (2 if bidirectional else 1) * batch
    assert out.shape == (expected_rows, nclasses), out.shape
    assert bool(jnp.all(jnp.isfinite(out)))
    print("KERNEL_OK")
</pallas_src>

<mosaic_0001>
module attributes {stable_mosaic.version = 11 : i64} {
  func.func @kernel(%arg0: memref<8x8x16xf32, #tpu.memory_space<vmem>>, %arg1: memref<16x128xf32, #tpu.memory_space<vmem>>, %arg2: memref<32x128xf32, #tpu.memory_space<vmem>>, %arg3: memref<1x128xf32, #tpu.memory_space<vmem>>, %arg4: memref<16x128xf32, #tpu.memory_space<vmem>>, %arg5: memref<32x128xf32, #tpu.memory_space<vmem>>, %arg6: memref<1x128xf32, #tpu.memory_space<vmem>>, %arg7: memref<64x128xf32, #tpu.memory_space<vmem>>, %arg8: memref<32x128xf32, #tpu.memory_space<vmem>>, %arg9: memref<1x128xf32, #tpu.memory_space<vmem>>, %arg10: memref<64x128xf32, #tpu.memory_space<vmem>>, %arg11: memref<32x128xf32, #tpu.memory_space<vmem>>, %arg12: memref<1x128xf32, #tpu.memory_space<vmem>>, %arg13: memref<32x128xf32, #tpu.memory_space<vmem>>, %arg14: memref<1x128xf32, #tpu.memory_space<vmem>>, %arg15: memref<4x8x128xf32, #tpu.memory_space<vmem>>, %arg16: memref<2x8x8x128xf32, #tpu.memory_space<vmem>>, %arg17: memref<2x8x8x32xf32, #tpu.memory_space<vmem>>, %arg18: memref<8x32xf32, #tpu.memory_space<vmem>>, %arg19: memref<8x32xf32, #tpu.memory_space<vmem>>) attributes {dimension_semantics = [], scalar_prefetch = 0 : i64, scratch_operands = 4 : i64, tpu.core_type = #tpu.core_type<tc>} {
    %c0 = arith.constant 0 : index
    %c0_0 = arith.constant 0 : index
    %c0_1 = arith.constant 0 : index
    %0 = vector.load %arg0[%c0, %c0_0, %c0_1] : memref<8x8x16xf32, #tpu.memory_space<vmem>>, vector<8x8x16xf32>
    %1 = vector.shape_cast %0 : vector<8x8x16xf32> to vector<64x16xf32>
    %c0_2 = arith.constant 0 : index
    %c0_3 = arith.constant 0 : index
    %2 = vector.load %arg1[%c0_2, %c0_3] : memref<16x128xf32, #tpu.memory_space<vmem>>, vector<16x128xf32>
    %cst = arith.constant dense<0.000000e+00> : vector<64x128xf32>
    %3 = tpu.matmul %1, %2, %cst {dimension_numbers = #tpu.dot_dimension_numbers<[1], [0], [0], [1], [0, 0, 1, 1], [], []>} : vector<64x16xf32>, vector<16x128xf32>, vector<64x128xf32> -> vector<64x128xf32>
    %c0_4 = arith.constant 0 : index
    %c0_5 = arith.constant 0 : index
    %4 = vector.load %arg3[%c0_4, %c0_5] : memref<1x128xf32, #tpu.memory_space<vmem>>, vector<1x128xf32>
    %5 = vector.broadcast %4 : vector<1x128xf32> to vector<64x128xf32>
    %6 = arith.addf %3, %5 : vector<64x128xf32>
    %7 = vector.shape_cast %6 : vector<64x128xf32> to vector<8x8x128xf32>
    %c0_6 = arith.constant 0 : index
    %c0_7 = arith.constant 0 : index
    %c0_8 = arith.constant 0 : index
    %c0_9 = arith.constant 0 : index
    %8 = vector.load %arg16[%c0_6, %c0_7, %c0_8, %c0_9] : memref<2x8x8x128xf32, #tpu.memory_space<vmem>>, vector<1x8x8x128xf32>
    %9 = vector.shape_cast %8 : vector<1x8x8x128xf32> to vector<8x8x128xf32>
    %10 = vector.shape_cast %7 : vector<8x8x128xf32> to vector<1x8x8x128xf32>
    tpu.vector_store %arg16[%c0_6, %c0_7, %c0_8, %c0_9], %10 {strides = array<i32>} : memref<2x8x8x128xf32, #tpu.memory_space<vmem>>, vector<1x8x8x128xf32>,
    %c0_10 = arith.constant 0 : index
    %c0_11 = arith.constant 0 : index
    %c0_12 = arith.constant 0 : index
    %11 = vector.load %arg0[%c0_10, %c0_11, %c0_12] : memref<8x8x16xf32, #tpu.memory_space<vmem>>, vector<8x8x16xf32>
    %12 = vector.shape_cast %11 : vector<8x8x16xf32> to vector<64x16xf32>
    %c0_13 = arith.constant 0 : index
    %c0_14 = arith.constant 0 : index
    %13 = vector.load %arg4[%c0_13, %c0_14] : memref<16x128xf32, #tpu.memory_space<vmem>>, vector<16x128xf32>
    %cst_15 = arith.constant dense<0.000000e+00> : vector<64x128xf32>
    %14 = tpu.matmul %12, %13, %cst_15 {dimension_numbers = #tpu.dot_dimension_numbers<[1], [0], [0], [1], [0, 0, 1, 1], [], []>} : vector<64x16xf32>, vector<16x128xf32>, vector<64x128xf32> -> vector<64x128xf32>
    %c0_16 = arith.constant 0 : index
    %c0_17 = arith.constant 0 : index
    %15 = vector.load %arg6[%c0_16, %c0_17] : memref<1x128xf32, #tpu.memory_space<vmem>>, vector<1x128xf32>
    %16 = vector.broadcast %15 : vector<1x128xf32> to vector<64x128xf32>
    %17 = arith.addf %14, %16 : vector<64x128xf32>
    %18 = vector.shape_cast %17 : vector<64x128xf32> to vector<8x8x128xf32>
    %c1 = arith.constant 1 : index
    %c0_18 = arith.constant 0 : index
    %c0_19 = arith.constant 0 : index
    %c0_20 = arith.constant 0 : index
    %19 = vector.load %arg16[%c1, %c0_18, %c0_19, %c0_20] : memref<2x8x8x128xf32, #tpu.memory_space<vmem>>, vector<1x8x8x128xf32>
    %20 = vector.shape_cast %19 : vector<1x8x8x128xf32> to vector<8x8x128xf32>
    %21 = vector.shape_cast %18 : vector<8x8x128xf32> to vector<1x8x8x128xf32>
    tpu.vector_store %arg16[%c1, %c0_18, %c0_19, %c0_20], %21 {strides = array<i32>} : memref<2x8x8x128xf32, #tpu.memory_space<vmem>>, vector<1x8x8x128xf32>,
    %cst_21 = arith.constant 0.000000e+00 : f32
    %22 = vector.broadcast %cst_21 : f32 to vector<8x32xf32>
    %c0_22 = arith.constant 0 : index
    %c0_23 = arith.constant 0 : index
    %23 = vector.load %arg18[%c0_22, %c0_23] : memref<8x32xf32, #tpu.memory_space<vmem>>, vector<8x32xf32>
    tpu.vector_store %arg18[%c0_22, %c0_23], %22 {strides = array<i32>} : memref<8x32xf32, #tpu.memory_space<vmem>>, vector<8x32xf32>,
    %cst_24 = arith.constant 0.000000e+00 : f32
    %24 = vector.broadcast %cst_24 : f32 to vector<8x32xf32>
    %c0_25 = arith.constant 0 : index
    %c0_26 = arith.constant 0 : index
    %25 = vector.load %arg19[%c0_25, %c0_26] : memref<8x32xf32, #tpu.memory_space<vmem>>, vector<8x32xf32>
    tpu.vector_store %arg19[%c0_25, %c0_26], %24 {strides = array<i32>} : memref<8x32xf32, #tpu.memory_space<vmem>>, vector<8x32xf32>,
    %c0_i32 = arith.constant 0 : i32
    %c0_27 = arith.constant 0 : index
    %26 = arith.index_cast %c0_i32 : i32 to index
    %c0_28 = arith.constant 0 : index
    %c0_29 = arith.constant 0 : index
    %27 = vector.load %arg16[%c0_27, %26, %c0_28, %c0_29] : memref<2x8x8x128xf32, #tpu.memory_space<vmem>>, vector<1x1x8x128xf32>
    %28 = vector.shape_cast %27 : vector<1x1x8x128xf32> to vector<8x128xf32>
    %c0_30 = arith.constant 0 : index
    %c0_31 = arith.constant 0 : index
    %29 = vector.load %arg18[%c0_30, %c0_31] : memref<8x32xf32, #tpu.memory_space<vmem>>, vector<8x32xf32>
    %c0_32 = arith.constant 0 : index
    %c0_33 = arith.constant 0 : index
    %30 = vector.load %arg2[%c0_32, %c0_33] : memref<32x128xf32, #tpu.memory_space<vmem>>, vector<32x128xf32>
    %cst_34 = arith.constant dense<0.000000e+00> : vector<8x128xf32>
    %31 = tpu.matmul %29, %30, %cst_34 {dimension_numbers = #tpu.dot_dimension_numbers<[1], [0], [0], [1], [0, 0, 1, 1], [], []>} : vector<8x32xf32>, vector<32x128xf32>, vector<8x128xf32> -> vector<8x128xf32>
    %32 = arith.addf %28, %31 : vector<8x128xf32>
    %33 = vector.extract_strided_slice %32 {offsets = [0, 0], sizes = [8, 32], strides = [1, 1]} : vector<8x128xf32> to vector<8x32xf32>
    %34 = arith.negf %33 : vector<8x32xf32>
    %35 = math.exp %34 : vector<8x32xf32>
    %cst_35 = arith.constant 1.000000e+00 : f32
    %36 = vector.broadcast %cst_35 : f32 to vector<8x32xf32>
    %37 = arith.addf %36, %35 : vector<8x32xf32>
    %38 = arith.divf %36, %37 : vector<8x32xf32>
    %39 = vector.extract_strided_slice %32 {offsets = [0, 32], sizes = [8, 32], strides = [1, 1]} : vector<8x128xf32> to vector<8x32xf32>
    %40 = arith.negf %39 : vector<8x32xf32>
    %41 = math.exp %40 : vector<8x32xf32>
    %cst_36 = arith.constant 1.000000e+00 : f32
    %42 = vector.broadcast %cst_36 : f32 to vector<8x32xf32>
    %43 = arith.addf %42, %41 : vector<8x32xf32>
    %44 = arith.divf %42, %43 : vector<8x32xf32>
    %45 = vector.extract_strided_slice %32 {offsets = [0, 64], sizes = [8, 32], strides = [1, 1]} : vector<8x128xf32> to vector<8x32xf32>
    %46 = math.tanh %45 : vector<8x32xf32>
    %47 = vector.extract_strided_slice %32 {offsets = [0, 96], sizes = [8, 32], strides = [1, 1]} : vector<8x128xf32> to vector<8x32xf32>
    %48 = arith.negf %47 : vector<8x32xf32>
    %49 = math.exp %48 : vector<8x32xf32>
    %cst_37 = arith.constant 1.000000e+00 : f32
    %50 = vector.broadcast %cst_37 : f32 to vector<8x32xf32>
    %51 = arith.addf %50, %49 : vector<8x32xf32>
    %52 = arith.divf %50, %51 : vector<8x32xf32>
    %c0_38 = arith.constant 0 : index
    %c0_39 = arith.constant 0 : index
    %53 = vector.load %arg19[%c0_38, %c0_39] : memref<8x32xf32, #tpu.memory_space<vmem>>, vector<8x32xf32>
    %54 = arith.mulf %44, %53 : vector<8x32xf32>
    %55 = arith.mulf %38, %46 : vector<8x32xf32>
    %56 = arith.addf %54, %55 : vector<8x32xf32>
    %57 = math.tanh %56 : vector<8x32xf32>
    %58 = arith.mulf %52, %57 : vector<8x32xf32>
    %c0_40 = arith.constant 0 : index
    %c0_41 = arith.constant 0 : index
    %59 = vector.load %arg18[%c0_40, %c0_41] : memref<8x32xf32, #tpu.memory_space<vmem>>, vector<8x32xf32>
    tpu.vector_store %arg18[%c0_40, %c0_41], %58 {strides = array<i32>} : memref<8x32xf32, #tpu.memory_space<vmem>>, vector<8x32xf32>,
    %c0_42 = arith.constant 0 : index
    %c0_43 = arith.constant 0 : index
    %60 = vector.load %arg19[%c0_42, %c0_43] : memref<8x32xf32, #tpu.memory_space<vmem>>, vector<8x32xf32>
    tpu.vector_store %arg19[%c0_42, %c0_43], %56 {strides = array<i32>} : memref<8x32xf32, #tpu.memory_space<vmem>>, vector<8x32xf32>,
    %c0_44 = arith.constant 0 : index
    %61 = arith.index_cast %c0_i32 : i32 to index
    %c0_45 = arith.constant 0 : index
    %c0_46 = arith.constant 0 : index
    %62 = vector.load %arg17[%c0_44, %61, %c0_45, %c0_46] : memref<2x8x8x32xf32, #tpu.memory_space<vmem>>, vector<1x1x8x32xf32>
    %63 = vector.shape_cast %62 : vector<1x1x8x32xf32> to vector<8x32xf32>
    %64 = vector.shape_cast %58 : vector<8x32xf32> to vector<1x1x8x32xf32>
    tpu.vector_store %arg17[%c0_44, %61, %c0_45, %c0_46], %64 {strides = array<i32>} : memref<2x8x8x32xf32, #tpu.memory_space<vmem>>, vector<1x1x8x32xf32>,
    %c1_i32 = arith.constant 1 : i32
    %c0_47 = arith.constant 0 : index
    %65 = arith.index_cast %c1_i32 : i32 to index
    %c0_48 = arith.constant 0 : index
    %c0_49 = arith.constant 0 : index
    %66 = vector.load %arg16[%c0_47, %65, %c0_48, %c0_49] : memref<2x8x8x128xf32, #tpu.memory_space<vmem>>, vector<1x1x8x128xf32>
    %67 = vector.shape_cast %66 : vector<1x1x8x128xf32> to vector<8x128xf32>
    %c0_50 = arith.constant 0 : index
    %c0_51 = arith.constant 0 : index
    %68 = vector.load %arg18[%c0_50, %c0_51] : memref<8x32xf32, #tpu.memory_space<vmem>>, vector<8x32xf32>
    %c0_52 = arith.constant 0 : index
    %c0_53 = arith.constant 0 : index
    %69 = vector.load %arg2[%c0_52, %c0_53] : memref<32x128xf32, #tpu.memory_space<vmem>>, vector<32x128xf32>
    %cst_54 = arith.constant dense<0.000000e+00> : vector<8x128xf32>
    %70 = tpu.matmul %68, %69, %cst_54 {dimension_numbers = #tpu.dot_dimension_numbers<[1], [0], [0], [1], [0, 0, 1, 1], [], []>} : vector<8x32xf32>, vector<32x128xf32>, vector<8x128xf32> -> vector<8x128xf32>
    %71 = arith.addf %67, %70 : vector<8x128xf32>
    %72 = vector.extract_strided_slice %71 {offsets = [0, 0], sizes = [8, 32], strides = [1, 1]} : vector<8x128xf32> to vector<8x32xf32>
    %73 = arith.negf %72 : vector<8x32xf32>
    %74 = math.exp %73 : vector<8x32xf32>
    %cst_55 = arith.constant 1.000000e+00 : f32
    %75 = vector.broadcast %cst_55 : f32 to vector<8x32xf32>
    %76 = arith.addf %75, %74 : vector<8x32xf32>
    %77 = arith.divf %75, %76 : vector<8x32xf32>
    %78 = vector.extract_strided_slice %71 {offsets = [0, 32], sizes = [8, 32], strides = [1, 1]} : vector<8x128xf32> to vector<8x32xf32>
    %79 = arith.negf %78 : vector<8x32xf32>
    %80 = math.exp %79 : vector<8x32xf32>
    %cst_56 = arith.constant 1.000000e+00 : f32
    %81 = vector.broadcast %cst_56 : f32 to vector<8x32xf32>
    %82 = arith.addf %81, %80 : vector<8x32xf32>
    %83 = arith.divf %81, %82 : vector<8x32xf32>
    %84 = vector.extract_strided_slice %71 {offsets = [0, 64], sizes = [8, 32], strides = [1, 1]} : vector<8x128xf32> to vector<8x32xf32>
    %85 = math.tanh %84 : vector<8x32xf32>
    %86 = vector.extract_strided_slice %71 {offsets = [0, 96], sizes = [8, 32], strides = [1, 1]} : vector<8x128xf32> to vector<8x32xf32>
    %87 = arith.negf %86 : vector<8x32xf32>
    %88 = math.exp %87 : vector<8x32xf32>
    %cst_57 = arith.constant 1.000000e+00 : f32
    %89 = vector.broadcast %cst_57 : f32 to vector<8x32xf32>
    %90 = arith.addf %89, %88 : vector<8x32xf32>
    %91 = arith.divf %89, %90 : vector<8x32xf32>
    %c0_58 = arith.constant 0 : index
    %c0_59 = arith.constant 0 : index
    %92 = vector.load %arg19[%c0_58, %c0_59] : memref<8x32xf32, #tpu.memory_space<vmem>>, vector<8x32xf32>
    %93 = arith.mulf %83, %92 : vector<8x32xf32>
    %94 = arith.mulf %77, %85 : vector<8x32xf32>
    %95 = arith.addf %93, %94 : vector<8x32xf32>
    %96 = math.tanh %95 : vector<8x32xf32>
    %97 = arith.mulf %91, %96 : vector<8x32xf32>
    %c0_60 = arith.constant 0 : index
    %c0_61 = arith.constant 0 : index
    %98 = vector.load %arg18[%c0_60, %c0_61] : memref<8x32xf32, #tpu.memory_space<vmem>>, vector<8x32xf32>
    tpu.vector_store %arg18[%c0_60, %c0_61], %97 {strides = array<i32>} : memref<8x32xf32, #tpu.memory_space<vmem>>, vector<8x32xf32>,
    %c0_62 = arith.constant 0 : index
    %c0_63 = arith.constant 0 : index
    %99 = vector.load %arg19[%c0_62, %c0_63] : memref<8x32xf32, #tpu.memory_space<vmem>>, vector<8x32xf32>
    tpu.vector_store %arg19[%c0_62, %c0_63], %95 {strides = array<i32>} : memref<8x32xf32, #tpu.memory_space<vmem>>, vector<8x32xf32>,
    %c0_64 = arith.constant 0 : index
    %100 = arith.index_cast %c1_i32 : i32 to index
    %c0_65 = arith.constant 0 : index
    %c0_66 = arith.constant 0 : index
    %101 = vector.load %arg17[%c0_64, %100, %c0_65, %c0_66] : memref<2x8x8x32xf32, #tpu.memory_space<vmem>>, vector<1x1x8x32xf32>
    %102 = vector.shape_cast %101 : vector<1x1x8x32xf32> to vector<8x32xf32>
    %103 = vector.shape_cast %97 : vector<8x32xf32> to vector<1x1x8x32xf32>
    tpu.vector_store %arg17[%c0_64, %100, %c0_65, %c0_66], %103 {strides = array<i32>} : memref<2x8x8x32xf32, #tpu.memory_space<vmem>>, vector<1x1x8x32xf32>,
    %c2_i32 = arith.constant 2 : i32
    %c0_67 = arith.constant 0 : index
    %104 = arith.index_cast %c2_i32 : i32 to index
    %c0_68 = arith.constant 0 : index
    %c0_69 = arith.constant 0 : index
    %105 = vector.load %arg16[%c0_67, %104, %c0_68, %c0_69] : memref<2x8x8x128xf32, #tpu.memory_space<vmem>>, vector<1x1x8x128xf32>
    %106 = vector.shape_cast %105 : vector<1x1x8x128xf32> to vector<8x128xf32>
    %c0_70 = arith.constant 0 : index
    %c0_71 = arith.constant 0 : index
    %107 = vector.load %arg18[%c0_70, %c0_71] : memref<8x32xf32, #tpu.memory_space<vmem>>, vector<8x32xf32>
    %c0_72 = arith.constant 0 : index
    %c0_73 = arith.constant 0 : index
    %108 = vector.load %arg2[%c0_72, %c0_73] : memref<32x128xf32, #tpu.memory_space<vmem>>, vector<32x128xf32>
    %cst_74 = arith.constant dense<0.000000e+00> : vector<8x128xf32>
    %109 = tpu.matmul %107, %108, %cst_74 {dimension_numbers = #tpu.dot_dimension_numbers<[1], [0], [0], [1], [0, 0, 1, 1], [], []>} : vector<8x32xf32>, vector<32x128xf32>, vector<8x128xf32> -> vector<8x128xf32>
    %110 = arith.addf %106, %109 : vector<8x128xf32>
    %111 = vector.extract_strided_slice %110 {offsets = [0, 0], sizes = [8, 32], strides = [1, 1]} : vector<8x128xf32> to vector<8x32xf32>
    %112 = arith.negf %111 : vector<8x32xf32>
    %113 = math.exp %112 : vector<8x32xf32>
    %cst_75 = arith.constant 1.000000e+00 : f32
    %114 = vector.broadcast %cst_75 : f32 to vector<8x32xf32>
    %115 = arith.addf %114, %113 : vector<8x32xf32>
    %116 = arith.divf %114, %115 : vector<8x32xf32>
    %117 = vector.extract_strided_slice %110 {offsets = [0, 32], sizes = [8, 32], strides = [1, 1]} : vector<8x128xf32> to vector<8x32xf32>
    %118 = arith.negf %117 : vector<8x32xf32>
    %119 = math.exp %118 : vector<8x32xf32>
    %cst_76 = arith.constant 1.000000e+00 : f32
    %120 = vector.broadcast %cst_76 : f32 to vector<8x32xf32>
    %121 = arith.addf %120, %119 : vector<8x32xf32>
    %122 = arith.divf %120, %121 : vector<8x32xf32>
    %123 = vector.extract_strided_slice %110 {offsets = [0, 64], sizes = [8, 32], strides = [1, 1]} : vector<8x128xf32> to vector<8x32xf32>
    %124 = math.tanh %123 : vector<8x32xf32>
    %125 = vector.extract_strided_slice %110 {offsets = [0, 96], sizes = [8, 32], strides = [1, 1]} : vector<8x128xf32> to vector<8x32xf32>
    %126 = arith.negf %125 : vector<8x32xf32>
    %127 = math.exp %126 : vector<8x32xf32>
    %cst_77 = arith.constant 1.000000e+00 : f32
    %128 = vector.broadcast %cst_77 : f32 to vector<8x32xf32>
    %129 = arith.addf %128, %127 : vector<8x32xf32>
    %130 = arith.divf %128, %129 : vector<8x32xf32>
    %c0_78 = arith.constant 0 : index
    %c0_79 = arith.constant 0 : index
    %131 = vector.load %arg19[%c0_78, %c0_79] : memref<8x32xf32, #tpu.memory_space<vmem>>, vector<8x32xf32>
    %132 = arith.mulf %122, %131 : vector<8x32xf32>
    %133 = arith.mulf %116, %124 : vector<8x32xf32>
    %134 = arith.addf %132, %133 : vector<8x32xf32>
    %135 = math.tanh %134 : vector<8x32xf32>
    %136 = arith.mulf %130, %135 : vector<8x32xf32>
    %c0_80 = arith.constant 0 : index
    %c0_81 = arith.constant 0 : index
    %137 = vector.load %arg18[%c0_80, %c0_81] : memref<8x32xf32, #tpu.memory_space<vmem>>, vector<8x32xf32>
    tpu.vector_store %arg18[%c0_80, %c0_81], %136 {strides = array<i32>} : memref<8x32xf32, #tpu.memory_space<vmem>>, vector<8x32xf32>,
    %c0_82 = arith.constant 0 : index
    %c0_83 = arith.constant 0 : index
    %138 = vector.load %arg19[%c0_82, %c0_83] : memref<8x32xf32, #tpu.memory_space<vmem>>, vector<8x32xf32>
    tpu.vector_store %arg19[%c0_82, %c0_83], %134 {strides = array<i32>} : memref<8x32xf32, #tpu.memory_space<vmem>>, vector<8x32xf32>,
    %c0_84 = arith.constant 0 : index
    %139 = arith.index_cast %c2_i32 : i32 to index
    %c0_85 = arith.constant 0 : index
    %c0_86 = arith.constant 0 : index
    %140 = vector.load %arg17[%c0_84, %139, %c0_85, %c0_86] : memref<2x8x8x32xf32, #tpu.memory_space<vmem>>, vector<1x1x8x32xf32>
    %141 = vector.shape_cast %140 : vector<1x1x8x32xf32> to vector<8x32xf32>
    %142 = vector.shape_cast %136 : vector<8x32xf32> to vector<1x1x8x32xf32>
    tpu.vector_store %arg17[%c0_84, %139, %c0_85, %c0_86], %142 {strides = array<i32>} : memref<2x8x8x32xf32, #tpu.memory_space<vmem>>, vector<1x1x8x32xf32>,
    %c3_i32 = arith.constant 3 : i32
    %c0_87 = arith.constant 0 : index
    %143 = arith.index_cast %c3_i32 : i32 to index
    %c0_88 = arith.constant 0 : index
    %c0_89 = arith.constant 0 : index
    %144 = vector.load %arg16[%c0_87, %143, %c0_88, %c0_89] : memref<2x8x8x128xf32, #tpu.memory_space<vmem>>, vector<1x1x8x128xf32>
    %145 = vector.shape_cast %144 : vector<1x1x8x128xf32> to vector<8x128xf32>
    %c0_90 = arith.constant 0 : index
    %c0_91 = arith.constant 0 : index
    %146 = vector.load %arg18[%c0_90, %c0_91] : memref<8x32xf32, #tpu.memory_space<vmem>>, vector<8x32xf32>
    %c0_92 = arith.constant 0 : index
    %c0_93 = arith.constant 0 : index
    %147 = vector.load %arg2[%c0_92, %c0_93] : memref<32x128xf32, #tpu.memory_space<vmem>>, vector<32x128xf32>
    %cst_94 = arith.constant dense<0.000000e+00> : vector<8x128xf32>
    %148 = tpu.matmul %146, %147, %cst_94 {dimension_numbers = #tpu.dot_dimension_numbers<[1], [0], [0], [1], [0, 0, 1, 1], [], []>} : vector<8x32xf32>, vector<32x128xf32>, vector<8x128xf32> -> vector<8x128xf32>
    %149 = arith.addf %145, %148 : vector<8x128xf32>
    %150 = vector.extract_strided_slice %149 {offsets = [0, 0], sizes = [8, 32], strides = [1, 1]} : vector<8x128xf32> to vector<8x32xf32>
    %151 = arith.negf %150 : vector<8x32xf32>
    %152 = math.exp %151 : vector<8x32xf32>
    %cst_95 = arith.constant 1.000000e+00 : f32
    %153 = vector.broadcast %cst_95 : f32 to vector<8x32xf32>
    %154 = arith.addf %153, %152 : vector<8x32xf32>
    %155 = arith.divf %153, %154 : vector<8x32xf32>
    %156 = vector.extract_strided_slice %149 {offsets = [0, 32], sizes = [8, 32], strides = [1, 1]} : vector<8x128xf32> to vector<8x32xf32>
    %157 = arith.negf %156 : vector<8x32xf32>
    %158 = math.exp %157 : vector<8x32xf32>
    %cst_96 = arith.constant 1.000000e+00 : f32
    %159 = vector.broadcast %cst_96 : f32 to vector<8x32xf32>
    %160 = arith.addf %159, %158 : vector<8x32xf32>
    %161 = arith.divf %159, %160 : vector<8x32xf32>
    %162 = vector.extract_strided_slice %149 {offsets = [0, 64], sizes = [8, 32], strides = [1, 1]} : vector<8x128xf32> to vector<8x32xf32>
    %163 = math.tanh %162 : vector<8x32xf32>
    %164 = vector.extract_strided_slice %149 {offsets = [0, 96], sizes = [8, 32], strides = [1, 1]} : vector<8x128xf32> to vector<8x32xf32>
    %165 = arith.negf %164 : vector<8x32xf32>
    %166 = math.exp %165 : vector<8x32xf32>
    %cst_97 = arith.constant 1.000000e+00 : f32
    %167 = vector.broadcast %cst_97 : f32 to vector<8x32xf32>
    %168 = arith.addf %167, %166 : vector<8x32xf32>
    %169 = arith.divf %167, %168 : vector<8x32xf32>
    %c0_98 = arith.constant 0 : index
    %c0_99 = arith.constant 0 : index
    %170 = vector.load %arg19[%c0_98, %c0_99] : memref<8x32xf32, #tpu.memory_space<vmem>>, vector<8x32xf32>
    %171 = arith.mulf %161, %170 : vector<8x32xf32>
    %172 = arith.mulf %155, %163 : vector<8x32xf32>
    %173 = arith.addf %171, %172 : vector<8x32xf32>
    %174 = math.tanh %173 : vector<8x32xf32>
    %175 = arith.mulf %169, %174 : vector<8x32xf32>
    %c0_100 = arith.constant 0 : index
    %c0_101 = arith.constant 0 : index
    %176 = vector.load %arg18[%c0_100, %c0_101] : memref<8x32xf32, #tpu.memory_space<vmem>>, vector<8x32xf32>
    tpu.vector_store %arg18[%c0_100, %c0_101], %175 {strides = array<i32>} : memref<8x32xf32, #tpu.memory_space<vmem>>, vector<8x32xf32>,
    %c0_102 = arith.constant 0 : index
    %c0_103 = arith.constant 0 : index
    %177 = vector.load %arg19[%c0_102, %c0_103] : memref<8x32xf32, #tpu.memory_space<vmem>>, vector<8x32xf32>
    tpu.vector_store %arg19[%c0_102, %c0_103], %173 {strides = array<i32>} : memref<8x32xf32, #tpu.memory_space<vmem>>, vector<8x32xf32>,
    %c0_104 = arith.constant 0 : index
    %178 = arith.index_cast %c3_i32 : i32 to index
    %c0_105 = arith.constant 0 : index
    %c0_106 = arith.constant 0 : index
    %179 = vector.load %arg17[%c0_104, %178, %c0_105, %c0_106] : memref<2x8x8x32xf32, #tpu.memory_space<vmem>>, vector<1x1x8x32xf32>
    %180 = vector.shape_cast %179 : vector<1x1x8x32xf32> to vector<8x32xf32>
    %181 = vector.shape_cast %175 : vector<8x32xf32> to vector<1x1x8x32xf32>
    tpu.vector_store %arg17[%c0_104, %178, %c0_105, %c0_106], %181 {strides = array<i32>} : memref<2x8x8x32xf32, #tpu.memory_space<vmem>>, vector<1x1x8x32xf32>,
    %c4_i32 = arith.constant 4 : i32
    %c0_107 = arith.constant 0 : index
    %182 = arith.index_cast %c4_i32 : i32 to index
    %c0_108 = arith.constant 0 : index
    %c0_109 = arith.constant 0 : index
    %183 = vector.load %arg16[%c0_107, %182, %c0_108, %c0_109] : memref<2x8x8x128xf32, #tpu.memory_space<vmem>>, vector<1x1x8x128xf32>
    %184 = vector.shape_cast %183 : vector<1x1x8x128xf32> to vector<8x128xf32>
    %c0_110 = arith.constant 0 : index
    %c0_111 = arith.constant 0 : index
    %185 = vector.load %arg18[%c0_110, %c0_111] : memref<8x32xf32, #tpu.memory_space<vmem>>, vector<8x32xf32>
    %c0_112 = arith.constant 0 : index
    %c0_113 = arith.constant 0 : index
    %186 = vector.load %arg2[%c0_112, %c0_113] : memref<32x128xf32, #tpu.memory_space<vmem>>, vector<32x128xf32>
    %cst_114 = arith.constant dense<0.000000e+00> : vector<8x128xf32>
    %187 = tpu.matmul %185, %186, %cst_114 {dimension_numbers = #tpu.dot_dimension_numbers<[1], [0], [0], [1], [0, 0, 1, 1], [], []>} : vector<8x32xf32>, vector<32x128xf32>, vector<8x128xf32> -> vector<8x128xf32>
    %188 = arith.addf %184, %187 : vector<8x128xf32>
    %189 = vector.extract_strided_slice %188 {offsets = [0, 0], sizes = [8, 32], strides = [1, 1]} : vector<8x128xf32> to vector<8x32xf32>
    %190 = arith.negf %189 : vector<8x32xf32>
    %191 = math.exp %190 : vector<8x32xf32>
    %cst_115 = arith.constant 1.000000e+00 : f32
    %192 = vector.broadcast %cst_115 : f32 to vector<8x32xf32>
    %193 = arith.addf %192, %191 : vector<8x32xf32>
    %194 = arith.divf %192, %193 : vector<8x32xf32>
    %195 = vector.extract_strided_slice %188 {offsets = [0, 32], sizes = [8, 32], strides = [1, 1]} : vector<8x128xf32> to vector<8x32xf32>
    %196 = arith.negf %195 : vector<8x32xf32>
    %197 = math.exp %196 : vector<8x32xf32>
    %cst_116 = arith.constant 1.000000e+00 : f32
    %198 = vector.broadcast %cst_116 : f32 to vector<8x32xf32>
    %199 = arith.addf %198, %197 : vector<8x32xf32>
    %200 = arith.divf %198, %199 : vector<8x32xf32>
    %201 = vector.extract_strided_slice %188 {offsets = [0, 64], sizes = [8, 32], strides = [1, 1]} : vector<8x128xf32> to vector<8x32xf32>
    %202 = math.tanh %201 : vector<8x32xf32>
    %203 = vector.extract_strided_slice %188 {offsets = [0, 96], sizes = [8, 32], strides = [1, 1]} : vector<8x128xf32> to vector<8x32xf32>
    %204 = arith.negf %203 : vector<8x32xf32>
    %205 = math.exp %204 : vector<8x32xf32>
    %cst_117 = arith.constant 1.000000e+00 : f32
    %206 = vector.broadcast %cst_117 : f32 to vector<8x32xf32>
    %207 = arith.addf %206, %205 : vector<8x32xf32>
    %208 = arith.divf %206, %207 : vector<8x32xf32>
    %c0_118 = arith.constant 0 : index
    %c0_119 = arith.constant 0 : index
    %209 = vector.load %arg19[%c0_118, %c0_119] : memref<8x32xf32, #tpu.memory_space<vmem>>, vector<8x32xf32>
    %210 = arith.mulf %200, %209 : vector<8x32xf32>
    %211 = arith.mulf %194, %202 : vector<8x32xf32>
    %212 = arith.addf %210, %211 : vector<8x32xf32>
    %213 = math.tanh %212 : vector<8x32xf32>
    %214 = arith.mulf %208, %213 : vector<8x32xf32>
    %c0_120 = arith.constant 0 : index
    %c0_121 = arith.constant 0 : index
    %215 = vector.load %arg18[%c0_120, %c0_121] : memref<8x32xf32, #tpu.memory_space<vmem>>, vector<8x32xf32>
    tpu.vector_store %arg18[%c0_120, %c0_121], %214 {strides = array<i32>} : memref<8x32xf32, #tpu.memory_space<vmem>>, vector<8x32xf32>,
    %c0_122 = arith.constant 0 : index
    %c0_123 = arith.constant 0 : index
    %216 = vector.load %arg19[%c0_122, %c0_123] : memref<8x32xf32, #tpu.memory_space<vmem>>, vector<8x32xf32>
    tpu.vector_store %arg19[%c0_122, %c0_123], %212 {strides = array<i32>} : memref<8x32xf32, #tpu.memory_space<vmem>>, vector<8x32xf32>,
    %c0_124 = arith.constant 0 : index
    %217 = arith.index_cast %c4_i32 : i32 to index
    %c0_125 = arith.constant 0 : index
    %c0_126 = arith.constant 0 : index
    %218 = vector.load %arg17[%c0_124, %217, %c0_125, %c0_126] : memref<2x8x8x32xf32, #tpu.memory_space<vmem>>, vector<1x1x8x32xf32>
    %219 = vector.shape_cast %218 : vector<1x1x8x32xf32> to vector<8x32xf32>
    %220 = vector.shape_cast %214 : vector<8x32xf32> to vector<1x1x8x32xf32>
    tpu.vector_store %arg17[%c0_124, %217, %c0_125, %c0_126], %220 {strides = array<i32>} : memref<2x8x8x32xf32, #tpu.memory_space<vmem>>, vector<1x1x8x32xf32>,
    %c5_i32 = arith.constant 5 : i32
    %c0_127 = arith.constant 0 : index
    %221 = arith.index_cast %c5_i32 : i32 to index
    %c0_128 = arith.constant 0 : index
    %c0_129 = arith.constant 0 : index
    %222 = vector.load %arg16[%c0_127, %221, %c0_128, %c0_129] : memref<2x8x8x128xf32, #tpu.memory_space<vmem>>, vector<1x1x8x128xf32>
    %223 = vector.shape_cast %222 : vector<1x1x8x128xf32> to vector<8x128xf32>
    %c0_130 = arith.constant 0 : index
    %c0_131 = arith.constant 0 : index
    %224 = vector.load %arg18[%c0_130, %c0_131] : memref<8x32xf32, #tpu.memory_space<vmem>>, vector<8x32xf32>
    %c0_132 = arith.constant 0 : index
    %c0_133 = arith.constant 0 : index
    %225 = vector.load %arg2[%c0_132, %c0_133] : memref<32x128xf32, #tpu.memory_space<vmem>>, vector<32x128xf32>
    %cst_134 = arith.constant dense<0.000000e+00> : vector<8x128xf32>
    %226 = tpu.matmul %224, %225, %cst_134 {dimension_numbers = #tpu.dot_dimension_numbers<[1], [0], [0], [1], [0, 0, 1, 1], [], []>} : vector<8x32xf32>, vector<32x128xf32>, vector<8x128xf32> -> vector<8x128xf32>
    %227 = arith.addf %223, %226 : vector<8x128xf32>
    %228 = vector.extract_strided_slice %227 {offsets = [0, 0], sizes = [8, 32], strides = [1, 1]} : vector<8x128xf32> to vector<8x32xf32>
    %229 = arith.negf %228 : vector<8x32xf32>
    %230 = math.exp %229 : vector<8x32xf32>
    %cst_135 = arith.constant 1.000000e+00 : f32
    %231 = vector.broadcast %cst_135 : f32 to vector<8x32xf32>
    %232 = arith.addf %231, %230 : vector<8x32xf32>
    %233 = arith.divf %231, %232 : vector<8x32xf32>
    %234 = vector.extract_strided_slice %227 {offsets = [0, 32], sizes = [8, 32], strides = [1, 1]} : vector<8x128xf32> to vector<8x32xf32>
    %235 = arith.negf %234 : vector<8x32xf32>
    %236 = math.exp %235 : vector<8x32xf32>
    %cst_136 = arith.constant 1.000000e+00 : f32
    %237 = vector.broadcast %cst_136 : f32 to vector<8x32xf32>
    %238 = arith.addf %237, %236 : vector<8x32xf32>
    %239 = arith.divf %237, %238 : vector<8x32xf32>
    %240 = vector.extract_strided_slice %227 {offsets = [0, 64], sizes = [8, 32], strides = [1, 1]} : vector<8x128xf32> to vector<8x32xf32>
    %241 = math.tanh %240 : vector<8x32xf32>
    %242 = vector.extract_strided_slice %227 {offsets = [0, 96], sizes = [8, 32], strides = [1, 1]} : vector<8x128xf32> to vector<8x32xf32>
    %243 = arith.negf %242 : vector<8x32xf32>
    %244 = math.exp %243 : vector<8x32xf32>
    %cst_137 = arith.constant 1.000000e+00 : f32
    %245 = vector.broadcast %cst_137 : f32 to vector<8x32xf32>
    %246 = arith.addf %245, %244 : vector<8x32xf32>
    %247 = arith.divf %245, %246 : vector<8x32xf32>
    %c0_138 = arith.constant 0 : index
    %c0_139 = arith.constant 0 : index
    %248 = vector.load %arg19[%c0_138, %c0_139] : memref<8x32xf32, #tpu.memory_space<vmem>>, vector<8x32xf32>
    %249 = arith.mulf %239, %248 : vector<8x32xf32>
    %250 = arith.mulf %233, %241 : vector<8x32xf32>
    %251 = arith.addf %249, %250 : vector<8x32xf32>
    %252 = math.tanh %251 : vector<8x32xf32>
    %253 = arith.mulf %247, %252 : vector<8x32xf32>
    %c0_140 = arith.constant 0 : index
    %c0_141 = arith.constant 0 : index
    %254 = vector.load %arg18[%c0_140, %c0_141] : memref<8x32xf32, #tpu.memory_space<vmem>>, vector<8x32xf32>
    tpu.vector_store %arg18[%c0_140, %c0_141], %253 {strides = array<i32>} : memref<8x32xf32, #tpu.memory_space<vmem>>, vector<8x32xf32>,
    %c0_142 = arith.constant 0 : index
    %c0_143 = arith.constant 0 : index
    %255 = vector.load %arg19[%c0_142, %c0_143] : memref<8x32xf32, #tpu.memory_space<vmem>>, vector<8x32xf32>
    tpu.vector_store %arg19[%c0_142, %c0_143], %251 {strides = array<i32>} : memref<8x32xf32, #tpu.memory_space<vmem>>, vector<8x32xf32>,
    %c0_144 = arith.constant 0 : index
    %256 = arith.index_cast %c5_i32 : i32 to index
    %c0_145 = arith.constant 0 : index
    %c0_146 = arith.constant 0 : index
    %257 = vector.load %arg17[%c0_144, %256, %c0_145, %c0_146] : memref<2x8x8x32xf32, #tpu.memory_space<vmem>>, vector<1x1x8x32xf32>
    %258 = vector.shape_cast %257 : vector<1x1x8x32xf32> to vector<8x32xf32>
    %259 = vector.shape_cast %253 : vector<8x32xf32> to vector<1x1x8x32xf32>
    tpu.vector_store %arg17[%c0_144, %256, %c0_145, %c0_146], %259 {strides = array<i32>} : memref<2x8x8x32xf32, #tpu.memory_space<vmem>>, vector<1x1x8x32xf32>,
    %c6_i32 = arith.constant 6 : i32
    %c0_147 = arith.constant 0 : index
    %260 = arith.index_cast %c6_i32 : i32 to index
    %c0_148 = arith.constant 0 : index
    %c0_149 = arith.constant 0 : index
    %261 = vector.load %arg16[%c0_147, %260, %c0_148, %c0_149] : memref<2x8x8x128xf32, #tpu.memory_space<vmem>>, vector<1x1x8x128xf32>
    %262 = vector.shape_cast %261 : vector<1x1x8x128xf32> to vector<8x128xf32>
    %c0_150 = arith.constant 0 : index
    %c0_151 = arith.constant 0 : index
    %263 = vector.load %arg18[%c0_150, %c0_151] : memref<8x32xf32, #tpu.memory_space<vmem>>, vector<8x32xf32>
    %c0_152 = arith.constant 0 : index
    %c0_153 = arith.constant 0 : index
    %264 = vector.load %arg2[%c0_152, %c0_153] : memref<32x128xf32, #tpu.memory_space<vmem>>, vector<32x128xf32>
    %cst_154 = arith.constant dense<0.000000e+00> : vector<8x128xf32>
    %265 = tpu.matmul %263, %264, %cst_154 {dimension_numbers = #tpu.dot_dimension_numbers<[1], [0], [0], [1], [0, 0, 1, 1], [], []>} : vector<8x32xf32>, vector<32x128xf32>, vector<8x128xf32> -> vector<8x128xf32>
    %266 = arith.addf %262, %265 : vector<8x128xf32>
    %267 = vector.extract_strided_slice %266 {offsets = [0, 0], sizes = [8, 32], strides = [1, 1]} : vector<8x128xf32> to vector<8x32xf32>
    %268 = arith.negf %267 : vector<8x32xf32>
    %269 = math.exp %268 : vector<8x32xf32>
    %cst_155 = arith.constant 1.000000e+00 : f32
    %270 = vector.broadcast %cst_155 : f32 to vector<8x32xf32>
    %271 = arith.addf %270, %269 : vector<8x32xf32>
    %272 = arith.divf %270, %271 : vector<8x32xf32>
    %273 = vector.extract_strided_slice %266 {offsets = [0, 32], sizes = [8, 32], strides = [1, 1]} : vector<8x128xf32> to vector<8x32xf32>
    %274 = arith.negf %273 : vector<8x32xf32>
    %275 = math.exp %274 : vector<8x32xf32>
    %cst_156 = arith.constant 1.000000e+00 : f32
    %276 = vector.broadcast %cst_156 : f32 to vector<8x32xf32>
    %277 = arith.addf %276, %275 : vector<8x32xf32>
    %278 = arith.divf %276, %277 : vector<8x32xf32>
    %279 = vector.extract_strided_slice %266 {offsets = [0, 64], sizes = [8, 32], strides = [1, 1]} : vector<8x128xf32> to vector<8x32xf32>
    %280 = math.tanh %279 : vector<8x32xf32>
    %281 = vector.extract_strided_slice %266 {offsets = [0, 96], sizes = [8, 32], strides = [1, 1]} : vector<8x128xf32> to vector<8x32xf32>
    %282 = arith.negf %281 : vector<8x32xf32>
    %283 = math.exp %282 : vector<8x32xf32>
    %cst_157 = arith.constant 1.000000e+00 : f32
    %284 = vector.broadcast %cst_157 : f32 to vector<8x32xf32>
    %285 = arith.addf %284, %283 : vector<8x32xf32>
    %286 = arith.divf %284, %285 : vector<8x32xf32>
    %c0_158 = arith.constant 0 : index
    %c0_159 = arith.constant 0 : index
    %287 = vector.load %arg19[%c0_158, %c0_159] : memref<8x32xf32, #tpu.memory_space<vmem>>, vector<8x32xf32>
    %288 = arith.mulf %278, %287 : vector<8x32xf32>
    %289 = arith.mulf %272, %280 : vector<8x32xf32>
    %290 = arith.addf %288, %289 : vector<8x32xf32>
    %291 = math.tanh %290 : vector<8x32xf32>
    %292 = arith.mulf %286, %291 : vector<8x32xf32>
    %c0_160 = arith.constant 0 : index
    %c0_161 = arith.constant 0 : index
    %293 = vector.load %arg18[%c0_160, %c0_161] : memref<8x32xf32, #tpu.memory_space<vmem>>, vector<8x32xf32>
    tpu.vector_store %arg18[%c0_160, %c0_161], %292 {strides = array<i32>} : memref<8x32xf32, #tpu.memory_space<vmem>>, vector<8x32xf32>,
    %c0_162 = arith.constant 0 : index
    %c0_163 = arith.constant 0 : index
    %294 = vector.load %arg19[%c0_162, %c0_163] : memref<8x32xf32, #tpu.memory_space<vmem>>, vector<8x32xf32>
    tpu.vector_store %arg19[%c0_162, %c0_163], %290 {strides = array<i32>} : memref<8x32xf32, #tpu.memory_space<vmem>>, vector<8x32xf32>,
    %c0_164 = arith.constant 0 : index
    %295 = arith.index_cast %c6_i32 : i32 to index
    %c0_165 = arith.constant 0 : index
    %c0_166 = arith.constant 0 : index
    %296 = vector.load %arg17[%c0_164, %295, %c0_165, %c0_166] : memref<2x8x8x32xf32, #tpu.memory_space<vmem>>, vector<1x1x8x32xf32>
    %297 = vector.shape_cast %296 : vector<1x1x8x32xf32> to vector<8x32xf32>
    %298 = vector.shape_cast %292 : vector<8x32xf32> to vector<1x1x8x32xf32>
    tpu.vector_store %arg17[%c0_164, %295, %c0_165, %c0_166], %298 {strides = array<i32>} : memref<2x8x8x32xf32, #tpu.memory_space<vmem>>, vector<1x1x8x32xf32>,
    %c7_i32 = arith.constant 7 : i32
    %c0_167 = arith.constant 0 : index
    %299 = arith.index_cast %c7_i32 : i32 to index
    %c0_168 = arith.constant 0 : index
    %c0_169 = arith.constant 0 : index
    %300 = vector.load %arg16[%c0_167, %299, %c0_168, %c0_169] : memref<2x8x8x128xf32, #tpu.memory_space<vmem>>, vector<1x1x8x128xf32>
    %301 = vector.shape_cast %300 : vector<1x1x8x128xf32> to vector<8x128xf32>
    %c0_170 = arith.constant 0 : index
    %c0_171 = arith.constant 0 : index
    %302 = vector.load %arg18[%c0_170, %c0_171] : memref<8x32xf32, #tpu.memory_space<vmem>>, vector<8x32xf32>
    %c0_172 = arith.constant 0 : index
    %c0_173 = arith.constant 0 : index
    %303 = vector.load %arg2[%c0_172, %c0_173] : memref<32x128xf32, #tpu.memory_space<vmem>>, vector<32x128xf32>
    %cst_174 = arith.constant dense<0.000000e+00> : vector<8x128xf32>
    %304 = tpu.matmul %302, %303, %cst_174 {dimension_numbers = #tpu.dot_dimension_numbers<[1], [0], [0], [1], [0, 0, 1, 1], [], []>} : vector<8x32xf32>, vector<32x128xf32>, vector<8x128xf32> -> vector<8x128xf32>
    %305 = arith.addf %301, %304 : vector<8x128xf32>
    %306 = vector.extract_strided_slice %305 {offsets = [0, 0], sizes = [8, 32], strides = [1, 1]} : vector<8x128xf32> to vector<8x32xf32>
    %307 = arith.negf %306 : vector<8x32xf32>
    %308 = math.exp %307 : vector<8x32xf32>
    %cst_175 = arith.constant 1.000000e+00 : f32
    %309 = vector.broadcast %cst_175 : f32 to vector<8x32xf32>
    %310 = arith.addf %309, %308 : vector<8x32xf32>
    %311 = arith.divf %309, %310 : vector<8x32xf32>
    %312 = vector.extract_strided_slice %305 {offsets = [0, 32], sizes = [8, 32], strides = [1, 1]} : vector<8x128xf32> to vector<8x32xf32>
    %313 = arith.negf %312 : vector<8x32xf32>
    %314 = math.exp %313 : vector<8x32xf32>
    %cst_176 = arith.constant 1.000000e+00 : f32
    %315 = vector.broadcast %cst_176 : f32 to vector<8x32xf32>
    %316 = arith.addf %315, %314 : vector<8x32xf32>
    %317 = arith.divf %315, %316 : vector<8x32xf32>
    %318 = vector.extract_strided_slice %305 {offsets = [0, 64], sizes = [8, 32], strides = [1, 1]} : vector<8x128xf32> to vector<8x32xf32>
    %319 = math.tanh %318 : vector<8x32xf32>
    %320 = vector.extract_strided_slice %305 {offsets = [0, 96], sizes = [8, 32], strides = [1, 1]} : vector<8x128xf32> to vector<8x32xf32>
    %321 = arith.negf %320 : vector<8x32xf32>
    %322 = math.exp %321 : vector<8x32xf32>
    %cst_177 = arith.constant 1.000000e+00 : f32
    %323 = vector.broadcast %cst_177 : f32 to vector<8x32xf32>
    %324 = arith.addf %323, %322 : vector<8x32xf32>
    %325 = arith.divf %323, %324 : vector<8x32xf32>
    %c0_178 = arith.constant 0 : index
    %c0_179 = arith.constant 0 : index
    %326 = vector.load %arg19[%c0_178, %c0_179] : memref<8x32xf32, #tpu.memory_space<vmem>>, vector<8x32xf32>
    %327 = arith.mulf %317, %326 : vector<8x32xf32>
    %328 = arith.mulf %311, %319 : vector<8x32xf32>
    %329 = arith.addf %327, %328 : vector<8x32xf32>
    %330 = math.tanh %329 : vector<8x32xf32>
    %331 = arith.mulf %325, %330 : vector<8x32xf32>
    %c0_180 = arith.constant 0 : index
    %c0_181 = arith.constant 0 : index
    %332 = vector.load %arg18[%c0_180, %c0_181] : memref<8x32xf32, #tpu.memory_space<vmem>>, vector<8x32xf32>
    tpu.vector_store %arg18[%c0_180, %c0_181], %331 {strides = array<i32>} : memref<8x32xf32, #tpu.memory_space<vmem>>, vector<8x32xf32>,
    %c0_182 = arith.constant 0 : index
    %c0_183 = arith.constant 0 : index
    %333 = vector.load %arg19[%c0_182, %c0_183] : memref<8x32xf32, #tpu.memory_space<vmem>>, vector<8x32xf32>
    tpu.vector_store %arg19[%c0_182, %c0_183], %329 {strides = array<i32>} : memref<8x32xf32, #tpu.memory_space<vmem>>, vector<8x32xf32>,
    %c0_184 = arith.constant 0 : index
    %334 = arith.index_cast %c7_i32 : i32 to index
    %c0_185 = arith.constant 0 : index
    %c0_186 = arith.constant 0 : index
    %335 = vector.load %arg17[%c0_184, %334, %c0_185, %c0_186] : memref<2x8x8x32xf32, #tpu.memory_space<vmem>>, vector<1x1x8x32xf32>
    %336 = vector.shape_cast %335 : vector<1x1x8x32xf32> to vector<8x32xf32>
    %337 = vector.shape_cast %331 : vector<8x32xf32> to vector<1x1x8x32xf32>
    tpu.vector_store %arg17[%c0_184, %334, %c0_185, %c0_186], %337 {strides = array<i32>} : memref<2x8x8x32xf32, #tpu.memory_space<vmem>>, vector<1x1x8x32xf32>,
    %c8_i32 = arith.constant 8 : i32
    %c0_187 = arith.constant 0 : index
    %c0_188 = arith.constant 0 : index
    %338 = vector.load %arg18[%c0_187, %c0_188] : memref<8x32xf32, #tpu.memory_space<vmem>>, vector<8x32xf32>
    %cst_189 = arith.constant 0.000000e+00 : f32
    %339 = vector.broadcast %cst_189 : f32 to vector<8x32xf32>
    %340 = arith.maximumf %338, %339 : vector<8x32xf32>
    %c0_190 = arith.constant 0 : index
    %c0_191 = arith.constant 0 : index
    %341 = vector.load %arg13[%c0_190, %c0_191] : memref<32x128xf32, #tpu.memory_space<vmem>>, vector<32x128xf32>
    %cst_192 = arith.constant dense<0.000000e+00> : vector<8x128xf32>
    %342 = tpu.matmul %340, %341, %cst_192 {dimension_numbers = #tpu.dot_dimension_numbers<[1], [0], [0], [1], [0, 0, 1, 1], [], []>} : vector<8x32xf32>, vector<32x128xf32>, vector<8x128xf32> -> vector<8x128xf32>
    %c0_193 = arith.constant 0 : index
    %c0_194 = arith.constant 0 : index
    %343 = vector.load %arg14[%c0_193, %c0_194] : memref<1x128xf32, #tpu.memory_space<vmem>>, vector<1x128xf32>
    %344 = vector.broadcast %343 : vector<1x128xf32> to vector<8x128xf32>
    %345 = arith.addf %342, %344 : vector<8x128xf32>
    %c0_195 = arith.constant 0 : index
    %c0_196 = arith.constant 0 : index
    %c0_197 = arith.constant 0 : index
    %346 = vector.load %arg15[%c0_195, %c0_196, %c0_197] : memref<4x8x128xf32, #tpu.memory_space<vmem>>, vector<1x8x128xf32>
    %347 = vector.shape_cast %346 : vector<1x8x128xf32> to vector<8x128xf32>
    %348 = vector.shape_cast %345 : vector<8x128xf32> to vector<1x8x128xf32>
    tpu.vector_store %arg15[%c0_195, %c0_196, %c0_197], %348 {strides = array<i32>} : memref<4x8x128xf32, #tpu.memory_space<vmem>>, vector<1x8x128xf32>,
    %cst_198 = arith.constant 0.000000e+00 : f32
    %349 = vector.broadcast %cst_198 : f32 to vector<8x32xf32>
    %c0_199 = arith.constant 0 : index
    %c0_200 = arith.constant 0 : index
    %350 = vector.load %arg18[%c0_199, %c0_200] : memref<8x32xf32, #tpu.memory_space<vmem>>, vector<8x32xf32>
    tpu.vector_store %arg18[%c0_199, %c0_200], %349 {strides = array<i32>} : memref<8x32xf32, #tpu.memory_space<vmem>>, vector<8x32xf32>,
    %cst_201 = arith.constant 0.000000e+00 : f32
    %351 = vector.broadcast %cst_201 : f32 to vector<8x32xf32>
    %c0_202 = arith.constant 0 : index
    %c0_203 = arith.constant 0 : index
    %352 = vector.load %arg19[%c0_202, %c0_203] : memref<8x32xf32, #tpu.memory_space<vmem>>, vector<8x32xf32>
    tpu.vector_store %arg19[%c0_202, %c0_203], %351 {strides = array<i32>} : memref<8x32xf32, #tpu.memory_space<vmem>>, vector<8x32xf32>,
    %c0_i32_204 = arith.constant 0 : i32
    %c7_i32_205 = arith.constant 7 : i32
    %353 = arith.subi %c7_i32_205, %c0_i32_204 : i32
    %c1_206 = arith.constant 1 : index
    %354 = arith.index_cast %353 : i32 to index
    %c0_207 = arith.constant 0 : index
    %c0_208 = arith.constant 0 : index
    %355 = vector.load %arg16[%c1_206, %354, %c0_207, %c0_208] : memref<2x8x8x128xf32, #tpu.memory_space<vmem>>, vector<1x1x8x128xf32>
    %356 = vector.shape_cast %355 : vector<1x1x8x128xf32> to vector<8x128xf32>
    %c0_209 = arith.constant 0 : index
    %c0_210 = arith.constant 0 : index
    %357 = vector.load %arg18[%c0_209, %c0_210] : memref<8x32xf32, #tpu.memory_space<vmem>>, vector<8x32xf32>
    %c0_211 = arith.constant 0 : index
    %c0_212 = arith.constant 0 : index
    %358 = vector.load %arg5[%c0_211, %c0_212] : memref<32x128xf32, #tpu.memory_space<vmem>>, vector<32x128xf32>
    %cst_213 = arith.constant dense<0.000000e+00> : vector<8x128xf32>
    %359 = tpu.matmul %357, %358, %cst_213 {dimension_numbers = #tpu.dot_dimension_numbers<[1], [0], [0], [1], [0, 0, 1, 1], [], []>} : vector<8x32xf32>, vector<32x128xf32>, vector<8x128xf32> -> vector<8x128xf32>
    %360 = arith.addf %356, %359 : vector<8x128xf32>
    %361 = vector.extract_strided_slice %360 {offsets = [0, 0], sizes = [8, 32], strides = [1, 1]} : vector<8x128xf32> to vector<8x32xf32>
    %362 = arith.negf %361 : vector<8x32xf32>
    %363 = math.exp %362 : vector<8x32xf32>
    %cst_214 = arith.constant 1.000000e+00 : f32
    %364 = vector.broadcast %cst_214 : f32 to vector<8x32xf32>
    %365 = arith.addf %364, %363 : vector<8x32xf32>
    %366 = arith.divf %364, %365 : vector<8x32xf32>
    %367 = vector.extract_strided_slice %360 {offsets = [0, 32], sizes = [8, 32], strides = [1, 1]} : vector<8x128xf32> to vector<8x32xf32>
    %368 = arith.negf %367 : vector<8x32xf32>
    %369 = math.exp %368 : vector<8x32xf32>
    %cst_215 = arith.constant 1.000000e+00 : f32
    %370 = vector.broadcast %cst_215 : f32 to vector<8x32xf32>
    %371 = arith.addf %370, %369 : vector<8x32xf32>
    %372 = arith.divf %370, %371 : vector<8x32xf32>
    %373 = vector.extract_strided_slice %360 {offsets = [0, 64], sizes = [8, 32], strides = [1, 1]} : vector<8x128xf32> to vector<8x32xf32>
    %374 = math.tanh %373 : vector<8x32xf32>
    %375 = vector.extract_strided_slice %360 {offsets = [0, 96], sizes = [8, 32], strides = [1, 1]} : vector<8x128xf32> to vector<8x32xf32>
    %376 = arith.negf %375 : vector<8x32xf32>
    %377 = math.exp %376 : vector<8x32xf32>
    %cst_216 = arith.constant 1.000000e+00 : f32
    %378 = vector.broadcast %cst_216 : f32 to vector<8x32xf32>
    %379 = arith.addf %378, %377 : vector<8x32xf32>
    %380 = arith.divf %378, %379 : vector<8x32xf32>
    %c0_217 = arith.constant 0 : index
    %c0_218 = arith.constant 0 : index
    %381 = vector.load %arg19[%c0_217, %c0_218] : memref<8x32xf32, #tpu.memory_space<vmem>>, vector<8x32xf32>
    %382 = arith.mulf %372, %381 : vector<8x32xf32>
    %383 = arith.mulf %366, %374 : vector<8x32xf32>
    %384 = arith.addf %382, %383 : vector<8x32xf32>
    %385 = math.tanh %384 : vector<8x32xf32>
    %386 = arith.mulf %380, %385 : vector<8x32xf32>
    %c0_219 = arith.constant 0 : index
    %c0_220 = arith.constant 0 : index
    %387 = vector.load %arg18[%c0_219, %c0_220] : memref<8x32xf32, #tpu.memory_space<vmem>>, vector<8x32xf32>
    tpu.vector_store %arg18[%c0_219, %c0_220], %386 {strides = array<i32>} : memref<8x32xf32, #tpu.memory_space<vmem>>, vector<8x32xf32>,
    %c0_221 = arith.constant 0 : index
    %c0_222 = arith.constant 0 : index
    %388 = vector.load %arg19[%c0_221, %c0_222] : memref<8x32xf32, #tpu.memory_space<vmem>>, vector<8x32xf32>
    tpu.vector_store %arg19[%c0_221, %c0_222], %384 {strides = array<i32>} : memref<8x32xf32, #tpu.memory_space<vmem>>, vector<8x32xf32>,
    %c1_223 = arith.constant 1 : index
    %389 = arith.index_cast %353 : i32 to index
    %c0_224 = arith.constant 0 : index
    %c0_225 = arith.constant 0 : index
    %390 = vector.load %arg17[%c1_223, %389, %c0_224, %c0_225] : memref<2x8x8x32xf32, #tpu.memory_space<vmem>>, vector<1x1x8x32xf32>
    %391 = vector.shape_cast %390 : vector<1x1x8x32xf32> to vector<8x32xf32>
    %392 = vector.shape_cast %386 : vector<8x32xf32> to vector<1x1x8x32xf32>
    tpu.vector_store %arg17[%c1_223, %389, %c0_224, %c0_225], %392 {strides = array<i32>} : memref<2x8x8x32xf32, #tpu.memory_space<vmem>>, vector<1x1x8x32xf32>,
    %c1_i32_226 = arith.constant 1 : i32
    %c7_i32_227 = arith.constant 7 : i32
    %393 = arith.subi %c7_i32_227, %c1_i32_226 : i32
    %c1_228 = arith.constant 1 : index
    %394 = arith.index_cast %393 : i32 to index
    %c0_229 = arith.constant 0 : index
    %c0_230 = arith.constant 0 : index
    %395 = vector.load %arg16[%c1_228, %394, %c0_229, %c0_230] : memref<2x8x8x128xf32, #tpu.memory_space<vmem>>, vector<1x1x8x128xf32>
    %396 = vector.shape_cast %395 : vector<1x1x8x128xf32> to vector<8x128xf32>
    %c0_231 = arith.constant 0 : index
    %c0_232 = arith.constant 0 : index
    %397 = vector.load %arg18[%c0_231, %c0_232] : memref<8x32xf32, #tpu.memory_space<vmem>>, vector<8x32xf32>
    %c0_233 = arith.constant 0 : index
    %c0_234 = arith.constant 0 : index
    %398 = vector.load %arg5[%c0_233, %c0_234] : memref<32x128xf32, #tpu.memory_space<vmem>>, vector<32x128xf32>
    %cst_235 = arith.constant dense<0.000000e+00> : vector<8x128xf32>
    %399 = tpu.matmul %397, %398, %cst_235 {dimension_numbers = #tpu.dot_dimension_numbers<[1], [0], [0], [1], [0, 0, 1, 1], [], []>} : vector<8x32xf32>, vector<32x128xf32>, vector<8x128xf32> -> vector<8x128xf32>
    %400 = arith.addf %396, %399 : vector<8x128xf32>
    %401 = vector.extract_strided_slice %400 {offsets = [0, 0], sizes = [8, 32], strides = [1, 1]} : vector<8x128xf32> to vector<8x32xf32>
    %402 = arith.negf %401 : vector<8x32xf32>
    %403 = math.exp %402 : vector<8x32xf32>
    %cst_236 = arith.constant 1.000000e+00 : f32
    %404 = vector.broadcast %cst_236 : f32 to vector<8x32xf32>
    %405 = arith.addf %404, %403 : vector<8x32xf32>
    %406 = arith.divf %404, %405 : vector<8x32xf32>
    %407 = vector.extract_strided_slice %400 {offsets = [0, 32], sizes = [8, 32], strides = [1, 1]} : vector<8x128xf32> to vector<8x32xf32>
    %408 = arith.negf %407 : vector<8x32xf32>
    %409 = math.exp %408 : vector<8x32xf32>
    %cst_237 = arith.constant 1.000000e+00 : f32
    %410 = vector.broadcast %cst_237 : f32 to vector<8x32xf32>
    %411 = arith.addf %410, %409 : vector<8x32xf32>
    %412 = arith.divf %410, %411 : vector<8x32xf32>
    %413 = vector.extract_strided_slice %400 {offsets = [0, 64], sizes = [8, 32], strides = [1, 1]} : vector<8x128xf32> to vector<8x32xf32>
    %414 = math.tanh %413 : vector<8x32xf32>
    %415 = vector.extract_strided_slice %400 {offsets = [0, 96], sizes = [8, 32], strides = [1, 1]} : vector<8x128xf32> to vector<8x32xf32>
    %416 = arith.negf %415 : vector<8x32xf32>
    %417 = math.exp %416 : vector<8x32xf32>
    %cst_238 = arith.constant 1.000000e+00 : f32
    %418 = vector.broadcast %cst_238 : f32 to vector<8x32xf32>
    %419 = arith.addf %418, %417 : vector<8x32xf32>
    %420 = arith.divf %418, %419 : vector<8x32xf32>
    %c0_239 = arith.constant 0 : index
    %c0_240 = arith.constant 0 : index
    %421 = vector.load %arg19[%c0_239, %c0_240] : memref<8x32xf32, #tpu.memory_space<vmem>>, vector<8x32xf32>
    %422 = arith.mulf %412, %421 : vector<8x32xf32>
    %423 = arith.mulf %406, %414 : vector<8x32xf32>
    %424 = arith.addf %422, %423 : vector<8x32xf32>
    %425 = math.tanh %424 : vector<8x32xf32>
    %426 = arith.mulf %420, %425 : vector<8x32xf32>
    %c0_241 = arith.constant 0 : index
    %c0_242 = arith.constant 0 : index
    %427 = vector.load %arg18[%c0_241, %c0_242] : memref<8x32xf32, #tpu.memory_space<vmem>>, vector<8x32xf32>
    tpu.vector_store %arg18[%c0_241, %c0_242], %426 {strides = array<i32>} : memref<8x32xf32, #tpu.memory_space<vmem>>, vector<8x32xf32>,
    %c0_243 = arith.constant 0 : index
    %c0_244 = arith.constant 0 : index
    %428 = vector.load %arg19[%c0_243, %c0_244] : memref<8x32xf32, #tpu.memory_space<vmem>>, vector<8x32xf32>
    tpu.vector_store %arg19[%c0_243, %c0_244], %424 {strides = array<i32>} : memref<8x32xf32, #tpu.memory_space<vmem>>, vector<8x32xf32>,
    %c1_245 = arith.constant 1 : index
    %429 = arith.index_cast %393 : i32 to index
    %c0_246 = arith.constant 0 : index
    %c0_247 = arith.constant 0 : index
    %430 = vector.load %arg17[%c1_245, %429, %c0_246, %c0_247] : memref<2x8x8x32xf32, #tpu.memory_space<vmem>>, vector<1x1x8x32xf32>
    %431 = vector.shape_cast %430 : vector<1x1x8x32xf32> to vector<8x32xf32>
    %432 = vector.shape_cast %426 : vector<8x32xf32> to vector<1x1x8x32xf32>
    tpu.vector_store %arg17[%c1_245, %429, %c0_246, %c0_247], %432 {strides = array<i32>} : memref<2x8x8x32xf32, #tpu.memory_space<vmem>>, vector<1x1x8x32xf32>,
    %c2_i32_248 = arith.constant 2 : i32
    %c7_i32_249 = arith.constant 7 : i32
    %433 = arith.subi %c7_i32_249, %c2_i32_248 : i32
    %c1_250 = arith.constant 1 : index
    %434 = arith.index_cast %433 : i32 to index
    %c0_251 = arith.constant 0 : index
    %c0_252 = arith.constant 0 : index
    %435 = vector.load %arg16[%c1_250, %434, %c0_251, %c0_252] : memref<2x8x8x128xf32, #tpu.memory_space<vmem>>, vector<1x1x8x128xf32>
    %436 = vector.shape_cast %435 : vector<1x1x8x128xf32> to vector<8x128xf32>
    %c0_253 = arith.constant 0 : index
    %c0_254 = arith.constant 0 : index
    %437 = vector.load %arg18[%c0_253, %c0_254] : memref<8x32xf32, #tpu.memory_space<vmem>>, vector<8x32xf32>
    %c0_255 = arith.constant 0 : index
    %c0_256 = arith.constant 0 : index
    %438 = vector.load %arg5[%c0_255, %c0_256] : memref<32x128xf32, #tpu.memory_space<vmem>>, vector<32x128xf32>
    %cst_257 = arith.constant dense<0.000000e+00> : vector<8x128xf32>
    %439 = tpu.matmul %437, %438, %cst_257 {dimension_numbers = #tpu.dot_dimension_numbers<[1], [0], [0], [1], [0, 0, 1, 1], [], []>} : vector<8x32xf32>, vector<32x128xf32>, vector<8x128xf32> -> vector<8x128xf32>
    %440 = arith.addf %436, %439 : vector<8x128xf32>
    %441 = vector.extract_strided_slice %440 {offsets = [0, 0], sizes = [8, 32], strides = [1, 1]} : vector<8x128xf32> to vector<8x32xf32>
    %442 = arith.negf %441 : vector<8x32xf32>
    %443 = math.exp %442 : vector<8x32xf32>
    %cst_258 = arith.constant 1.000000e+00 : f32
    %444 = vector.broadcast %cst_258 : f32 to vector<8x32xf32>
    %445 = arith.addf %444, %443 : vector<8x32xf32>
    %446 = arith.divf %444, %445 : vector<8x32xf32>
    %447 = vector.extract_strided_slice %440 {offsets = [0, 32], sizes = [8, 32], strides = [1, 1]} : vector<8x128xf32> to vector<8x32xf32>
    %448 = arith.negf %447 : vector<8x32xf32>
    %449 = math.exp %448 : vector<8x32xf32>
    %cst_259 = arith.constant 1.000000e+00 : f32
    %450 = vector.broadcast %cst_259 : f32 to vector<8x32xf32>
    %451 = arith.addf %450, %449 : vector<8x32xf32>
    %452 = arith.divf %450, %451 : vector<8x32xf32>
    %453 = vector.extract_strided_slice %440 {offsets = [0, 64], sizes = [8, 32], strides = [1, 1]} : vector<8x128xf32> to vector<8x32xf32>
    %454 = math.tanh %453 : vector<8x32xf32>
    %455 = vector.extract_strided_slice %440 {offsets = [0, 96], sizes = [8, 32], strides = [1, 1]} : vector<8x128xf32> to vector<8x32xf32>
    %456 = arith.negf %455 : vector<8x32xf32>
    %457 = math.exp %456 : vector<8x32xf32>
    %cst_260 = arith.constant 1.000000e+00 : f32
    %458 = vector.broadcast %cst_260 : f32 to vector<8x32xf32>
    %459 = arith.addf %458, %457 : vector<8x32xf32>
    %460 = arith.divf %458, %459 : vector<8x32xf32>
    %c0_261 = arith.constant 0 : index
    %c0_262 = arith.constant 0 : index
    %461 = vector.load %arg19[%c0_261, %c0_262] : memref<8x32xf32, #tpu.memory_space<vmem>>, vector<8x32xf32>
    %462 = arith.mulf %452, %461 : vector<8x32xf32>
    %463 = arith.mulf %446, %454 : vector<8x32xf32>
    %464 = arith.addf %462, %463 : vector<8x32xf32>
    %465 = math.tanh %464 : vector<8x32xf32>
    %466 = arith.mulf %460, %465 : vector<8x32xf32>
    %c0_263 = arith.constant 0 : index
    %c0_264 = arith.constant 0 : index
    %467 = vector.load %arg18[%c0_263, %c0_264] : memref<8x32xf32, #tpu.memory_space<vmem>>, vector<8x32xf32>
    tpu.vector_store %arg18[%c0_263, %c0_264], %466 {strides = array<i32>} : memref<8x32xf32, #tpu.memory_space<vmem>>, vector<8x32xf32>,
    %c0_265 = arith.constant 0 : index
    %c0_266 = arith.constant 0 : index
    %468 = vector.load %arg19[%c0_265, %c0_266] : memref<8x32xf32, #tpu.memory_space<vmem>>, vector<8x32xf32>
    tpu.vector_store %arg19[%c0_265, %c0_266], %464 {strides = array<i32>} : memref<8x32xf32, #tpu.memory_space<vmem>>, vector<8x32xf32>,
    %c1_267 = arith.constant 1 : index
    %469 = arith.index_cast %433 : i32 to index
    %c0_268 = arith.constant 0 : index
    %c0_269 = arith.constant 0 : index
    %470 = vector.load %arg17[%c1_267, %469, %c0_268, %c0_269] : memref<2x8x8x32xf32, #tpu.memory_space<vmem>>, vector<1x1x8x32xf32>
    %471 = vector.shape_cast %470 : vector<1x1x8x32xf32> to vector<8x32xf32>
    %472 = vector.shape_cast %466 : vector<8x32xf32> to vector<1x1x8x32xf32>
    tpu.vector_store %arg17[%c1_267, %469, %c0_268, %c0_269], %472 {strides = array<i32>} : memref<2x8x8x32xf32, #tpu.memory_space<vmem>>, vector<1x1x8x32xf32>,
    %c3_i32_270 = arith.constant 3 : i32
    %c7_i32_271 = arith.constant 7 : i32
    %473 = arith.subi %c7_i32_271, %c3_i32_270 : i32
    %c1_272 = arith.constant 1 : index
    %474 = arith.index_cast %473 : i32 to index
    %c0_273 = arith.constant 0 : index
    %c0_274 = arith.constant 0 : index
    %475 = vector.load %arg16[%c1_272, %474, %c0_273, %c0_274] : memref<2x8x8x128xf32, #tpu.memory_space<vmem>>, vector<1x1x8x128xf32>
    %476 = vector.shape_cast %475 : vector<1x1x8x128xf32> to vector<8x128xf32>
    %c0_275 = arith.constant 0 : index
    %c0_276 = arith.constant 0 : index
    %477 = vector.load %arg18[%c0_275, %c0_276] : memref<8x32xf32, #tpu.memory_space<vmem>>, vector<8x32xf32>
    %c0_277 = arith.constant 0 : index
    %c0_278 = arith.constant 0 : index
    %478 = vector.load %arg5[%c0_277, %c0_278] : memref<32x128xf32, #tpu.memory_space<vmem>>, vector<32x128xf32>
    %cst_279 = arith.constant dense<0.000000e+00> : vector<8x128xf32>
    %479 = tpu.matmul %477, %478, %cst_279 {dimension_numbers = #tpu.dot_dimension_numbers<[1], [0], [0], [1], [0, 0, 1, 1], [], []>} : vector<8x32xf32>, vector<32x128xf32>, vector<8x128xf32> -> vector<8x128xf32>
    %480 = arith.addf %476, %479 : vector<8x128xf32>
    %481 = vector.extract_strided_slice %480 {offsets = [0, 0], sizes = [8, 32], strides = [1, 1]} : vector<8x128xf32> to vector<8x32xf32>
    %482 = arith.negf %481 : vector<8x32xf32>
    %483 = math.exp %482 : vector<8x32xf32>
    %cst_280 = arith.constant 1.000000e+00 : f32
    %484 = vector.broadcast %cst_280 : f32 to vector<8x32xf32>
    %485 = arith.addf %484, %483 : vector<8x32xf32>
    %486 = arith.divf %484, %485 : vector<8x32xf32>
    %487 = vector.extract_strided_slice %480 {offsets = [0, 32], sizes = [8, 32], strides = [1, 1]} : vector<8x128xf32> to vector<8x32xf32>
    %488 = arith.negf %487 : vector<8x32xf32>
    %489 = math.exp %488 : vector<8x32xf32>
    %cst_281 = arith.constant 1.000000e+00 : f32
    %490 = vector.broadcast %cst_281 : f32 to vector<8x32xf32>
    %491 = arith.addf %490, %489 : vector<8x32xf32>
    %492 = arith.divf %490, %491 : vector<8x32xf32>
    %493 = vector.extract_strided_slice %480 {offsets = [0, 64], sizes = [8, 32], strides = [1, 1]} : vector<8x128xf32> to vector<8x32xf32>
    %494 = math.tanh %493 : vector<8x32xf32>
    %495 = vector.extract_strided_slice %480 {offsets = [0, 96], sizes = [8, 32], strides = [1, 1]} : vector<8x128xf32> to vector<8x32xf32>
    %496 = arith.negf %495 : vector<8x32xf32>
    %497 = math.exp %496 : vector<8x32xf32>
    %cst_282 = arith.constant 1.000000e+00 : f32
    %498 = vector.broadcast %cst_282 : f32 to vector<8x32xf32>
    %499 = arith.addf %498, %497 : vector<8x32xf32>
    %500 = arith.divf %498, %499 : vector<8x32xf32>
    %c0_283 = arith.constant 0 : index
    %c0_284 = arith.constant 0 : index
    %501 = vector.load %arg19[%c0_283, %c0_284] : memref<8x32xf32, #tpu.memory_space<vmem>>, vector<8x32xf32>
    %502 = arith.mulf %492, %501 : vector<8x32xf32>
    %503 = arith.mulf %486, %494 : vector<8x32xf32>
    %504 = arith.addf %502, %503 : vector<8x32xf32>
    %505 = math.tanh %504 : vector<8x32xf32>
    %506 = arith.mulf %500, %505 : vector<8x32xf32>
    %c0_285 = arith.constant 0 : index
    %c0_286 = arith.constant 0 : index
    %507 = vector.load %arg18[%c0_285, %c0_286] : memref<8x32xf32, #tpu.memory_space<vmem>>, vector<8x32xf32>
    tpu.vector_store %arg18[%c0_285, %c0_286], %506 {strides = array<i32>} : memref<8x32xf32, #tpu.memory_space<vmem>>, vector<8x32xf32>,
    %c0_287 = arith.constant 0 : index
    %c0_288 = arith.constant 0 : index
    %508 = vector.load %arg19[%c0_287, %c0_288] : memref<8x32xf32, #tpu.memory_space<vmem>>, vector<8x32xf32>
    tpu.vector_store %arg19[%c0_287, %c0_288], %504 {strides = array<i32>} : memref<8x32xf32, #tpu.memory_space<vmem>>, vector<8x32xf32>,
    %c1_289 = arith.constant 1 : index
    %509 = arith.index_cast %473 : i32 to index
    %c0_290 = arith.constant 0 : index
    %c0_291 = arith.constant 0 : index
    %510 = vector.load %arg17[%c1_289, %509, %c0_290, %c0_291] : memref<2x8x8x32xf32, #tpu.memory_space<vmem>>, vector<1x1x8x32xf32>
    %511 = vector.shape_cast %510 : vector<1x1x8x32xf32> to vector<8x32xf32>
    %512 = vector.shape_cast %506 : vector<8x32xf32> to vector<1x1x8x32xf32>
    tpu.vector_store %arg17[%c1_289, %509, %c0_290, %c0_291], %512 {strides = array<i32>} : memref<2x8x8x32xf32, #tpu.memory_space<vmem>>, vector<1x1x8x32xf32>,
    %c4_i32_292 = arith.constant 4 : i32
    %c7_i32_293 = arith.constant 7 : i32
    %513 = arith.subi %c7_i32_293, %c4_i32_292 : i32
    %c1_294 = arith.constant 1 : index
    %514 = arith.index_cast %513 : i32 to index
    %c0_295 = arith.constant 0 : index
    %c0_296 = arith.constant 0 : index
    %515 = vector.load %arg16[%c1_294, %514, %c0_295, %c0_296] : memref<2x8x8x128xf32, #tpu.memory_space<vmem>>, vector<1x1x8x128xf32>
    %516 = vector.shape_cast %515 : vector<1x1x8x128xf32> to vector<8x128xf32>
    %c0_297 = arith.constant 0 : index
    %c0_298 = arith.constant 0 : index
    %517 = vector.load %arg18[%c0_297, %c0_298] : memref<8x32xf32, #tpu.memory_space<vmem>>, vector<8x32xf32>
    %c0_299 = arith.constant 0 : index
    %c0_300 = arith.constant 0 : index
    %518 = vector.load %arg5[%c0_299, %c0_300] : memref<32x128xf32, #tpu.memory_space<vmem>>, vector<32x128xf32>
    %cst_301 = arith.constant dense<0.000000e+00> : vector<8x128xf32>
    %519 = tpu.matmul %517, %518, %cst_301 {dimension_numbers = #tpu.dot_dimension_numbers<[1], [0], [0], [1], [0, 0, 1, 1], [], []>} : vector<8x32xf32>, vector<32x128xf32>, vector<8x128xf32> -> vector<8x128xf32>
    %520 = arith.addf %516, %519 : vector<8x128xf32>
    %521 = vector.extract_strided_slice %520 {offsets = [0, 0], sizes = [8, 32], strides = [1, 1]} : vector<8x128xf32> to vector<8x32xf32>
    %522 = arith.negf %521 : vector<8x32xf32>
    %523 = math.exp %522 : vector<8x32xf32>
    %cst_302 = arith.constant 1.000000e+00 : f32
    %524 = vector.broadcast %cst_302 : f32 to vector<8x32xf32>
    %525 = arith.addf %524, %523 : vector<8x32xf32>
    %526 = arith.divf %524, %525 : vector<8x32xf32>
    %527 = vector.extract_strided_slice %520 {offsets = [0, 32], sizes = [8, 32], strides = [1, 1]} : vector<8x128xf32> to vector<8x32xf32>
    %528 = arith.negf %527 : vector<8x32xf32>
    %529 = math.exp %528 : vector<8x32xf32>
    %cst_303 = arith.constant 1.000000e+00 : f32
    %530 = vector.broadcast %cst_303 : f32 to vector<8x32xf32>
    %531 = arith.addf %530, %529 : vector<8x32xf32>
    %532 = arith.divf %530, %531 : vector<8x32xf32>
    %533 = vector.extract_strided_slice %520 {offsets = [0, 64], sizes = [8, 32], strides = [1, 1]} : vector<8x128xf32> to vector<8x32xf32>
    %534 = math.tanh %533 : vector<8x32xf32>
    %535 = vector.extract_strided_slice %520 {offsets = [0, 96], sizes = [8, 32], strides = [1, 1]} : vector<8x128xf32> to vector<8x32xf32>
    %536 = arith.negf %535 : vector<8x32xf32>
    %537 = math.exp %536 : vector<8x32xf32>
    %cst_304 = arith.constant 1.000000e+00 : f32
    %538 = vector.broadcast %cst_304 : f32 to vector<8x32xf32>
    %539 = arith.addf %538, %537 : vector<8x32xf32>
    %540 = arith.divf %538, %539 : vector<8x32xf32>
    %c0_305 = arith.constant 0 : index
    %c0_306 = arith.constant 0 : index
    %541 = vector.load %arg19[%c0_305, %c0_306] : memref<8x32xf32, #tpu.memory_space<vmem>>, vector<8x32xf32>
    %542 = arith.mulf %532, %541 : vector<8x32xf32>
    %543 = arith.mulf %526, %534 : vector<8x32xf32>
    %544 = arith.addf %542, %543 : vector<8x32xf32>
    %545 = math.tanh %544 : vector<8x32xf32>
    %546 = arith.mulf %540, %545 : vector<8x32xf32>
    %c0_307 = arith.constant 0 : index
    %c0_308 = arith.constant 0 : index
    %547 = vector.load %arg18[%c0_307, %c0_308] : memref<8x32xf32, #tpu.memory_space<vmem>>, vector<8x32xf32>
    tpu.vector_store %arg18[%c0_307, %c0_308], %546 {strides = array<i32>} : memref<8x32xf32, #tpu.memory_space<vmem>>, vector<8x32xf32>,
    %c0_309 = arith.constant 0 : index
    %c0_310 = arith.constant 0 : index
    %548 = vector.load %arg19[%c0_309, %c0_310] : memref<8x32xf32, #tpu.memory_space<vmem>>, vector<8x32xf32>
    tpu.vector_store %arg19[%c0_309, %c0_310], %544 {strides = array<i32>} : memref<8x32xf32, #tpu.memory_space<vmem>>, vector<8x32xf32>,
    %c1_311 = arith.constant 1 : index
    %549 = arith.index_cast %513 : i32 to index
    %c0_312 = arith.constant 0 : index
    %c0_313 = arith.constant 0 : index
    %550 = vector.load %arg17[%c1_311, %549, %c0_312, %c0_313] : memref<2x8x8x32xf32, #tpu.memory_space<vmem>>, vector<1x1x8x32xf32>
    %551 = vector.shape_cast %550 : vector<1x1x8x32xf32> to vector<8x32xf32>
    %552 = vector.shape_cast %546 : vector<8x32xf32> to vector<1x1x8x32xf32>
    tpu.vector_store %arg17[%c1_311, %549, %c0_312, %c0_313], %552 {strides = array<i32>} : memref<2x8x8x32xf32, #tpu.memory_space<vmem>>, vector<1x1x8x32xf32>,
    %c5_i32_314 = arith.constant 5 : i32
    %c7_i32_315 = arith.constant 7 : i32
    %553 = arith.subi %c7_i32_315, %c5_i32_314 : i32
    %c1_316 = arith.constant 1 : index
    %554 = arith.index_cast %553 : i32 to index
    %c0_317 = arith.constant 0 : index
    %c0_318 = arith.constant 0 : index
    %555 = vector.load %arg16[%c1_316, %554, %c0_317, %c0_318] : memref<2x8x8x128xf32, #tpu.memory_space<vmem>>, vector<1x1x8x128xf32>
    %556 = vector.shape_cast %555 : vector<1x1x8x128xf32> to vector<8x128xf32>
    %c0_319 = arith.constant 0 : index
    %c0_320 = arith.constant 0 : index
    %557 = vector.load %arg18[%c0_319, %c0_320] : memref<8x32xf32, #tpu.memory_space<vmem>>, vector<8x32xf32>
    %c0_321 = arith.constant 0 : index
    %c0_322 = arith.constant 0 : index
    %558 = vector.load %arg5[%c0_321, %c0_322] : memref<32x128xf32, #tpu.memory_space<vmem>>, vector<32x128xf32>
    %cst_323 = arith.constant dense<0.000000e+00> : vector<8x128xf32>
    %559 = tpu.matmul %557, %558, %cst_323 {dimension_numbers = #tpu.dot_dimension_numbers<[1], [0], [0], [1], [0, 0, 1, 1], [], []>} : vector<8x32xf32>, vector<32x128xf32>, vector<8x128xf32> -> vector<8x128xf32>
    %560 = arith.addf %556, %559 : vector<8x128xf32>
    %561 = vector.extract_strided_slice %560 {offsets = [0, 0], sizes = [8, 32], strides = [1, 1]} : vector<8x128xf32> to vector<8x32xf32>
    %562 = arith.negf %561 : vector<8x32xf32>
    %563 = math.exp %562 : vector<8x32xf32>
    %cst_324 = arith.constant 1.000000e+00 : f32
    %564 = vector.broadcast %cst_324 : f32 to vector<8x32xf32>
    %565 = arith.addf %564, %563 : vector<8x32xf32>
    %566 = arith.divf %564, %565 : vector<8x32xf32>
    %567 = vector.extract_strided_slice %560 {offsets = [0, 32], sizes = [8, 32], strides = [1, 1]} : vector<8x128xf32> to vector<8x32xf32>
    %568 = arith.negf %567 : vector<8x32xf32>
    %569 = math.exp %568 : vector<8x32xf32>
    %cst_325 = arith.constant 1.000000e+00 : f32
    %570 = vector.broadcast %cst_325 : f32 to vector<8x32xf32>
    %571 = arith.addf %570, %569 : vector<8x32xf32>
    %572 = arith.divf %570, %571 : vector<8x32xf32>
    %573 = vector.extract_strided_slice %560 {offsets = [0, 64], sizes = [8, 32], strides = [1, 1]} : vector<8x128xf32> to vector<8x32xf32>
    %574 = math.tanh %573 : vector<8x32xf32>
    %575 = vector.extract_strided_slice %560 {offsets = [0, 96], sizes = [8, 32], strides = [1, 1]} : vector<8x128xf32> to vector<8x32xf32>
    %576 = arith.negf %575 : vector<8x32xf32>
    %577 = math.exp %576 : vector<8x32xf32>
    %cst_326 = arith.constant 1.000000e+00 : f32
    %578 = vector.broadcast %cst_326 : f32 to vector<8x32xf32>
    %579 = arith.addf %578, %577 : vector<8x32xf32>
    %580 = arith.divf %578, %579 : vector<8x32xf32>
    %c0_327 = arith.constant 0 : index
    %c0_328 = arith.constant 0 : index
    %581 = vector.load %arg19[%c0_327, %c0_328] : memref<8x32xf32, #tpu.memory_space<vmem>>, vector<8x32xf32>
    %582 = arith.mulf %572, %581 : vector<8x32xf32>
    %583 = arith.mulf %566, %574 : vector<8x32xf32>
    %584 = arith.addf %582, %583 : vector<8x32xf32>
    %585 = math.tanh %584 : vector<8x32xf32>
    %586 = arith.mulf %580, %585 : vector<8x32xf32>
    %c0_329 = arith.constant 0 : index
    %c0_330 = arith.constant 0 : index
    %587 = vector.load %arg18[%c0_329, %c0_330] : memref<8x32xf32, #tpu.memory_space<vmem>>, vector<8x32xf32>
    tpu.vector_store %arg18[%c0_329, %c0_330], %586 {strides = array<i32>} : memref<8x32xf32, #tpu.memory_space<vmem>>, vector<8x32xf32>,
    %c0_331 = arith.constant 0 : index
    %c0_332 = arith.constant 0 : index
    %588 = vector.load %arg19[%c0_331, %c0_332] : memref<8x32xf32, #tpu.memory_space<vmem>>, vector<8x32xf32>
    tpu.vector_store %arg19[%c0_331, %c0_332], %584 {strides = array<i32>} : memref<8x32xf32, #tpu.memory_space<vmem>>, vector<8x32xf32>,
    %c1_333 = arith.constant 1 : index
    %589 = arith.index_cast %553 : i32 to index
    %c0_334 = arith.constant 0 : index
    %c0_335 = arith.constant 0 : index
    %590 = vector.load %arg17[%c1_333, %589, %c0_334, %c0_335] : memref<2x8x8x32xf32, #tpu.memory_space<vmem>>, vector<1x1x8x32xf32>
    %591 = vector.shape_cast %590 : vector<1x1x8x32xf32> to vector<8x32xf32>
    %592 = vector.shape_cast %586 : vector<8x32xf32> to vector<1x1x8x32xf32>
    tpu.vector_store %arg17[%c1_333, %589, %c0_334, %c0_335], %592 {strides = array<i32>} : memref<2x8x8x32xf32, #tpu.memory_space<vmem>>, vector<1x1x8x32xf32>,
    %c6_i32_336 = arith.constant 6 : i32
    %c7_i32_337 = arith.constant 7 : i32
    %593 = arith.subi %c7_i32_337, %c6_i32_336 : i32
    %c1_338 = arith.constant 1 : index
    %594 = arith.index_cast %593 : i32 to index
    %c0_339 = arith.constant 0 : index
    %c0_340 = arith.constant 0 : index
    %595 = vector.load %arg16[%c1_338, %594, %c0_339, %c0_340] : memref<2x8x8x128xf32, #tpu.memory_space<vmem>>, vector<1x1x8x128xf32>
    %596 = vector.shape_cast %595 : vector<1x1x8x128xf32> to vector<8x128xf32>
    %c0_341 = arith.constant 0 : index
    %c0_342 = arith.constant 0 : index
    %597 = vector.load %arg18[%c0_341, %c0_342] : memref<8x32xf32, #tpu.memory_space<vmem>>, vector<8x32xf32>
    %c0_343 = arith.constant 0 : index
    %c0_344 = arith.constant 0 : index
    %598 = vector.load %arg5[%c0_343, %c0_344] : memref<32x128xf32, #tpu.memory_space<vmem>>, vector<32x128xf32>
    %cst_345 = arith.constant dense<0.000000e+00> : vector<8x128xf32>
    %599 = tpu.matmul %597, %598, %cst_345 {dimension_numbers = #tpu.dot_dimension_numbers<[1], [0], [0], [1], [0, 0, 1, 1], [], []>} : vector<8x32xf32>, vector<32x128xf32>, vector<8x128xf32> -> vector<8x128xf32>
    %600 = arith.addf %596, %599 : vector<8x128xf32>
    %601 = vector.extract_strided_slice %600 {offsets = [0, 0], sizes = [8, 32], strides = [1, 1]} : vector<8x128xf32> to vector<8x32xf32>
    %602 = arith.negf %601 : vector<8x32xf32>
    %603 = math.exp %602 : vector<8x32xf32>
    %cst_346 = arith.constant 1.000000e+00 : f32
    %604 = vector.broadcast %cst_346 : f32 to vector<8x32xf32>
    %605 = arith.addf %604, %603 : vector<8x32xf32>
    %606 = arith.divf %604, %605 : vector<8x32xf32>
    %607 = vector.extract_strided_slice %600 {offsets = [0, 32], sizes = [8, 32], strides = [1, 1]} : vector<8x128xf32> to vector<8x32xf32>
    %608 = arith.negf %607 : vector<8x32xf32>
    %609 = math.exp %608 : vector<8x32xf32>
    %cst_347 = arith.constant 1.000000e+00 : f32
    %610 = vector.broadcast %cst_347 : f32 to vector<8x32xf32>
    %611 = arith.addf %610, %609 : vector<8x32xf32>
    %612 = arith.divf %610, %611 : vector<8x32xf32>
    %613 = vector.extract_strided_slice %600 {offsets = [0, 64], sizes = [8, 32], strides = [1, 1]} : vector<8x128xf32> to vector<8x32xf32>
    %614 = math.tanh %613 : vector<8x32xf32>
    %615 = vector.extract_strided_slice %600 {offsets = [0, 96], sizes = [8, 32], strides = [1, 1]} : vector<8x128xf32> to vector<8x32xf32>
    %616 = arith.negf %615 : vector<8x32xf32>
    %617 = math.exp %616 : vector<8x32xf32>
    %cst_348 = arith.constant 1.000000e+00 : f32
    %618 = vector.broadcast %cst_348 : f32 to vector<8x32xf32>
    %619 = arith.addf %618, %617 : vector<8x32xf32>
    %620 = arith.divf %618, %619 : vector<8x32xf32>
    %c0_349 = arith.constant 0 : index
    %c0_350 = arith.constant 0 : index
    %621 = vector.load %arg19[%c0_349, %c0_350] : memref<8x32xf32, #tpu.memory_space<vmem>>, vector<8x32xf32>
    %622 = arith.mulf %612, %621 : vector<8x32xf32>
    %623 = arith.mulf %606, %614 : vector<8x32xf32>
    %624 = arith.addf %622, %623 : vector<8x32xf32>
    %625 = math.tanh %624 : vector<8x32xf32>
    %626 = arith.mulf %620, %625 : vector<8x32xf32>
    %c0_351 = arith.constant 0 : index
    %c0_352 = arith.constant 0 : index
    %627 = vector.load %arg18[%c0_351, %c0_352] : memref<8x32xf32, #tpu.memory_space<vmem>>, vector<8x32xf32>
    tpu.vector_store %arg18[%c0_351, %c0_352], %626 {strides = array<i32>} : memref<8x32xf32, #tpu.memory_space<vmem>>, vector<8x32xf32>,
    %c0_353 = arith.constant 0 : index
    %c0_354 = arith.constant 0 : index
    %628 = vector.load %arg19[%c0_353, %c0_354] : memref<8x32xf32, #tpu.memory_space<vmem>>, vector<8x32xf32>
    tpu.vector_store %arg19[%c0_353, %c0_354], %624 {strides = array<i32>} : memref<8x32xf32, #tpu.memory_space<vmem>>, vector<8x32xf32>,
    %c1_355 = arith.constant 1 : index
    %629 = arith.index_cast %593 : i32 to index
    %c0_356 = arith.constant 0 : index
    %c0_357 = arith.constant 0 : index
    %630 = vector.load %arg17[%c1_355, %629, %c0_356, %c0_357] : memref<2x8x8x32xf32, #tpu.memory_space<vmem>>, vector<1x1x8x32xf32>
    %631 = vector.shape_cast %630 : vector<1x1x8x32xf32> to vector<8x32xf32>
    %632 = vector.shape_cast %626 : vector<8x32xf32> to vector<1x1x8x32xf32>
    tpu.vector_store %arg17[%c1_355, %629, %c0_356, %c0_357], %632 {strides = array<i32>} : memref<2x8x8x32xf32, #tpu.memory_space<vmem>>, vector<1x1x8x32xf32>,
    %c7_i32_358 = arith.constant 7 : i32
    %c7_i32_359 = arith.constant 7 : i32
    %633 = arith.subi %c7_i32_359, %c7_i32_358 : i32
    %c1_360 = arith.constant 1 : index
    %634 = arith.index_cast %633 : i32 to index
    %c0_361 = arith.constant 0 : index
    %c0_362 = arith.constant 0 : index
    %635 = vector.load %arg16[%c1_360, %634, %c0_361, %c0_362] : memref<2x8x8x128xf32, #tpu.memory_space<vmem>>, vector<1x1x8x128xf32>
    %636 = vector.shape_cast %635 : vector<1x1x8x128xf32> to vector<8x128xf32>
    %c0_363 = arith.constant 0 : index
    %c0_364 = arith.constant 0 : index
    %637 = vector.load %arg18[%c0_363, %c0_364] : memref<8x32xf32, #tpu.memory_space<vmem>>, vector<8x32xf32>
    %c0_365 = arith.constant 0 : index
    %c0_366 = arith.constant 0 : index
    %638 = vector.load %arg5[%c0_365, %c0_366] : memref<32x128xf32, #tpu.memory_space<vmem>>, vector<32x128xf32>
    %cst_367 = arith.constant dense<0.000000e+00> : vector<8x128xf32>
    %639 = tpu.matmul %637, %638, %cst_367 {dimension_numbers = #tpu.dot_dimension_numbers<[1], [0], [0], [1], [0, 0, 1, 1], [], []>} : vector<8x32xf32>, vector<32x128xf32>, vector<8x128xf32> -> vector<8x128xf32>
    %640 = arith.addf %636, %639 : vector<8x128xf32>
    %641 = vector.extract_strided_slice %640 {offsets = [0, 0], sizes = [8, 32], strides = [1, 1]} : vector<8x128xf32> to vector<8x32xf32>
    %642 = arith.negf %641 : vector<8x32xf32>
    %643 = math.exp %642 : vector<8x32xf32>
    %cst_368 = arith.constant 1.000000e+00 : f32
    %644 = vector.broadcast %cst_368 : f32 to vector<8x32xf32>
    %645 = arith.addf %644, %643 : vector<8x32xf32>
    %646 = arith.divf %644, %645 : vector<8x32xf32>
    %647 = vector.extract_strided_slice %640 {offsets = [0, 32], sizes = [8, 32], strides = [1, 1]} : vector<8x128xf32> to vector<8x32xf32>
    %648 = arith.negf %647 : vector<8x32xf32>
    %649 = math.exp %648 : vector<8x32xf32>
    %cst_369 = arith.constant 1.000000e+00 : f32
    %650 = vector.broadcast %cst_369 : f32 to vector<8x32xf32>
    %651 = arith.addf %650, %649 : vector<8x32xf32>
    %652 = arith.divf %650, %651 : vector<8x32xf32>
    %653 = vector.extract_strided_slice %640 {offsets = [0, 64], sizes = [8, 32], strides = [1, 1]} : vector<8x128xf32> to vector<8x32xf32>
    %654 = math.tanh %653 : vector<8x32xf32>
    %655 = vector.extract_strided_slice %640 {offsets = [0, 96], sizes = [8, 32], strides = [1, 1]} : vector<8x128xf32> to vector<8x32xf32>
    %656 = arith.negf %655 : vector<8x32xf32>
    %657 = math.exp %656 : vector<8x32xf32>
    %cst_370 = arith.constant 1.000000e+00 : f32
    %658 = vector.broadcast %cst_370 : f32 to vector<8x32xf32>
    %659 = arith.addf %658, %657 : vector<8x32xf32>
    %660 = arith.divf %658, %659 : vector<8x32xf32>
    %c0_371 = arith.constant 0 : index
    %c0_372 = arith.constant 0 : index
    %661 = vector.load %arg19[%c0_371, %c0_372] : memref<8x32xf32, #tpu.memory_space<vmem>>, vector<8x32xf32>
    %662 = arith.mulf %652, %661 : vector<8x32xf32>
    %663 = arith.mulf %646, %654 : vector<8x32xf32>
    %664 = arith.addf %662, %663 : vector<8x32xf32>
    %665 = math.tanh %664 : vector<8x32xf32>
    %666 = arith.mulf %660, %665 : vector<8x32xf32>
    %c0_373 = arith.constant 0 : index
    %c0_374 = arith.constant 0 : index
    %667 = vector.load %arg18[%c0_373, %c0_374] : memref<8x32xf32, #tpu.memory_space<vmem>>, vector<8x32xf32>
    tpu.vector_store %arg18[%c0_373, %c0_374], %666 {strides = array<i32>} : memref<8x32xf32, #tpu.memory_space<vmem>>, vector<8x32xf32>,
    %c0_375 = arith.constant 0 : index
    %c0_376 = arith.constant 0 : index
    %668 = vector.load %arg19[%c0_375, %c0_376] : memref<8x32xf32, #tpu.memory_space<vmem>>, vector<8x32xf32>
    tpu.vector_store %arg19[%c0_375, %c0_376], %664 {strides = array<i32>} : memref<8x32xf32, #tpu.memory_space<vmem>>, vector<8x32xf32>,
    %c1_377 = arith.constant 1 : index
    %669 = arith.index_cast %633 : i32 to index
    %c0_378 = arith.constant 0 : index
    %c0_379 = arith.constant 0 : index
    %670 = vector.load %arg17[%c1_377, %669, %c0_378, %c0_379] : memref<2x8x8x32xf32, #tpu.memory_space<vmem>>, vector<1x1x8x32xf32>
    %671 = vector.shape_cast %670 : vector<1x1x8x32xf32> to vector<8x32xf32>
    %672 = vector.shape_cast %666 : vector<8x32xf32> to vector<1x1x8x32xf32>
    tpu.vector_store %arg17[%c1_377, %669, %c0_378, %c0_379], %672 {strides = array<i32>} : memref<2x8x8x32xf32, #tpu.memory_space<vmem>>, vector<1x1x8x32xf32>,
    %c8_i32_380 = arith.constant 8 : i32
    %c0_381 = arith.constant 0 : index
    %c0_382 = arith.constant 0 : index
    %673 = vector.load %arg18[%c0_381, %c0_382] : memref<8x32xf32, #tpu.memory_space<vmem>>, vector<8x32xf32>
    %cst_383 = arith.constant 0.000000e+00 : f32
    %674 = vector.broadcast %cst_383 : f32 to vector<8x32xf32>
    %675 = arith.maximumf %673, %674 : vector<8x32xf32>
    %c0_384 = arith.constant 0 : index
    %c0_385 = arith.constant 0 : index
    %676 = vector.load %arg13[%c0_384, %c0_385] : memref<32x128xf32, #tpu.memory_space<vmem>>, vector<32x128xf32>
    %cst_386 = arith.constant dense<0.000000e+00> : vector<8x128xf32>
    %677 = tpu.matmul %675, %676, %cst_386 {dimension_numbers = #tpu.dot_dimension_numbers<[1], [0], [0], [1], [0, 0, 1, 1], [], []>} : vector<8x32xf32>, vector<32x128xf32>, vector<8x128xf32> -> vector<8x128xf32>
    %c0_387 = arith.constant 0 : index
    %c0_388 = arith.constant 0 : index
    %678 = vector.load %arg14[%c0_387, %c0_388] : memref<1x128xf32, #tpu.memory_space<vmem>>, vector<1x128xf32>
    %679 = vector.broadcast %678 : vector<1x128xf32> to vector<8x128xf32>
    %680 = arith.addf %677, %679 : vector<8x128xf32>
    %c1_389 = arith.constant 1 : index
    %c0_390 = arith.constant 0 : index
    %c0_391 = arith.constant 0 : index
    %681 = vector.load %arg15[%c1_389, %c0_390, %c0_391] : memref<4x8x128xf32, #tpu.memory_space<vmem>>, vector<1x8x128xf32>
    %682 = vector.shape_cast %681 : vector<1x8x128xf32> to vector<8x128xf32>
    %683 = vector.shape_cast %680 : vector<8x128xf32> to vector<1x8x128xf32>
    tpu.vector_store %arg15[%c1_389, %c0_390, %c0_391], %683 {strides = array<i32>} : memref<4x8x128xf32, #tpu.memory_space<vmem>>, vector<1x8x128xf32>,
    %cst_392 = arith.constant 0.000000e+00 : f32
    %684 = vector.broadcast %cst_392 : f32 to vector<64x128xf32>
    %c0_393 = arith.constant 0 : index
    %c0_394 = arith.constant 0 : index
    %c0_395 = arith.constant 0 : index
    %c0_396 = arith.constant 0 : index
    %685 = vector.load %arg17[%c0_393, %c0_394, %c0_395, %c0_396] : memref<2x8x8x32xf32, #tpu.memory_space<vmem>>, vector<1x8x8x32xf32>
    %686 = vector.shape_cast %685 : vector<1x8x8x32xf32> to vector<8x8x32xf32>
    %687 = vector.shape_cast %686 : vector<8x8x32xf32> to vector<64x32xf32>
    %c0_397 = arith.constant 0 : index
    %c0_398 = arith.constant 0 : index
    %688 = vector.load %arg7[%c0_397, %c0_398] : memref<64x128xf32, #tpu.memory_space<vmem>>, vector<32x128xf32>
    %cst_399 = arith.constant dense<0.000000e+00> : vector<64x128xf32>
    %689 = tpu.matmul %687, %688, %cst_399 {dimension_numbers = #tpu.dot_dimension_numbers<[1], [0], [0], [1], [0, 0, 1, 1], [], []>} : vector<64x32xf32>, vector<32x128xf32>, vector<64x128xf32> -> vector<64x128xf32>
    %690 = arith.addf %684, %689 : vector<64x128xf32>
    %c1_400 = arith.constant 1 : index
    %c0_401 = arith.constant 0 : index
    %c0_402 = arith.constant 0 : index
    %c0_403 = arith.constant 0 : index
    %691 = vector.load %arg17[%c1_400, %c0_401, %c0_402, %c0_403] : memref<2x8x8x32xf32, #tpu.memory_space<vmem>>, vector<1x8x8x32xf32>
    %692 = vector.shape_cast %691 : vector<1x8x8x32xf32> to vector<8x8x32xf32>
    %693 = vector.shape_cast %692 : vector<8x8x32xf32> to vector<64x32xf32>
    %c32 = arith.constant 32 : index
    %c0_404 = arith.constant 0 : index
    %694 = vector.load %arg7[%c32, %c0_404] : memref<64x128xf32, #tpu.memory_space<vmem>>, vector<32x128xf32>
    %cst_405 = arith.constant dense<0.000000e+00> : vector<64x128xf32>
    %695 = tpu.matmul %693, %694, %cst_405 {dimension_numbers = #tpu.dot_dimension_numbers<[1], [0], [0], [1], [0, 0, 1, 1], [], []>} : vector<64x32xf32>, vector<32x128xf32>, vector<64x128xf32> -> vector<64x128xf32>
    %696 = arith.addf %690, %695 : vector<64x128xf32>
    %c0_406 = arith.constant 0 : index
    %c0_407 = arith.constant 0 : index
    %697 = vector.load %arg9[%c0_406, %c0_407] : memref<1x128xf32, #tpu.memory_space<vmem>>, vector<1x128xf32>
    %698 = vector.broadcast %697 : vector<1x128xf32> to vector<64x128xf32>
    %699 = arith.addf %696, %698 : vector<64x128xf32>
    %700 = vector.shape_cast %699 : vector<64x128xf32> to vector<8x8x128xf32>
    %c0_408 = arith.constant 0 : index
    %c0_409 = arith.constant 0 : index
    %c0_410 = arith.constant 0 : index
    %c0_411 = arith.constant 0 : index
    %701 = vector.load %arg16[%c0_408, %c0_409, %c0_410, %c0_411] : memref<2x8x8x128xf32, #tpu.memory_space<vmem>>, vector<1x8x8x128xf32>
    %702 = vector.shape_cast %701 : vector<1x8x8x128xf32> to vector<8x8x128xf32>
    %703 = vector.shape_cast %700 : vector<8x8x128xf32> to vector<1x8x8x128xf32>
    tpu.vector_store %arg16[%c0_408, %c0_409, %c0_410, %c0_411], %703 {strides = array<i32>} : memref<2x8x8x128xf32, #tpu.memory_space<vmem>>, vector<1x8x8x128xf32>,
    %cst_412 = arith.constant 0.000000e+00 : f32
    %704 = vector.broadcast %cst_412 : f32 to vector<64x128xf32>
    %c0_413 = arith.constant 0 : index
    %c0_414 = arith.constant 0 : index
    %c0_415 = arith.constant 0 : index
    %c0_416 = arith.constant 0 : index
    %705 = vector.load %arg17[%c0_413, %c0_414, %c0_415, %c0_416] : memref<2x8x8x32xf32, #tpu.memory_space<vmem>>, vector<1x8x8x32xf32>
    %706 = vector.shape_cast %705 : vector<1x8x8x32xf32> to vector<8x8x32xf32>
    %707 = vector.shape_cast %706 : vector<8x8x32xf32> to vector<64x32xf32>
    %c0_417 = arith.constant 0 : index
    %c0_418 = arith.constant 0 : index
    %708 = vector.load %arg10[%c0_417, %c0_418] : memref<64x128xf32, #tpu.memory_space<vmem>>, vector<32x128xf32>
    %cst_419 = arith.constant dense<0.000000e+00> : vector<64x128xf32>
    %709 = tpu.matmul %707, %708, %cst_419 {dimension_numbers = #tpu.dot_dimension_numbers<[1], [0], [0], [1], [0, 0, 1, 1], [], []>} : vector<64x32xf32>, vector<32x128xf32>, vector<64x128xf32> -> vector<64x128xf32>
    %710 = arith.addf %704, %709 : vector<64x128xf32>
    %c1_420 = arith.constant 1 : index
    %c0_421 = arith.constant 0 : index
    %c0_422 = arith.constant 0 : index
    %c0_423 = arith.constant 0 : index
    %711 = vector.load %arg17[%c1_420, %c0_421, %c0_422, %c0_423] : memref<2x8x8x32xf32, #tpu.memory_space<vmem>>, vector<1x8x8x32xf32>
    %712 = vector.shape_cast %711 : vector<1x8x8x32xf32> to vector<8x8x32xf32>
    %713 = vector.shape_cast %712 : vector<8x8x32xf32> to vector<64x32xf32>
    %c32_424 = arith.constant 32 : index
    %c0_425 = arith.constant 0 : index
    %714 = vector.load %arg10[%c32_424, %c0_425] : memref<64x128xf32, #tpu.memory_space<vmem>>, vector<32x128xf32>
    %cst_426 = arith.constant dense<0.000000e+00> : vector<64x128xf32>
    %715 = tpu.matmul %713, %714, %cst_426 {dimension_numbers = #tpu.dot_dimension_numbers<[1], [0], [0], [1], [0, 0, 1, 1], [], []>} : vector<64x32xf32>, vector<32x128xf32>, vector<64x128xf32> -> vector<64x128xf32>
    %716 = arith.addf %710, %715 : vector<64x128xf32>
    %c0_427 = arith.constant 0 : index
    %c0_428 = arith.constant 0 : index
    %717 = vector.load %arg12[%c0_427, %c0_428] : memref<1x128xf32, #tpu.memory_space<vmem>>, vector<1x128xf32>
    %718 = vector.broadcast %717 : vector<1x128xf32> to vector<64x128xf32>
    %719 = arith.addf %716, %718 : vector<64x128xf32>
    %720 = vector.shape_cast %719 : vector<64x128xf32> to vector<8x8x128xf32>
    %c1_429 = arith.constant 1 : index
    %c0_430 = arith.constant 0 : index
    %c0_431 = arith.constant 0 : index
    %c0_432 = arith.constant 0 : index
    %721 = vector.load %arg16[%c1_429, %c0_430, %c0_431, %c0_432] : memref<2x8x8x128xf32, #tpu.memory_space<vmem>>, vector<1x8x8x128xf32>
    %722 = vector.shape_cast %721 : vector<1x8x8x128xf32> to vector<8x8x128xf32>
    %723 = vector.shape_cast %720 : vector<8x8x128xf32> to vector<1x8x8x128xf32>
    tpu.vector_store %arg16[%c1_429, %c0_430, %c0_431, %c0_432], %723 {strides = array<i32>} : memref<2x8x8x128xf32, #tpu.memory_space<vmem>>, vector<1x8x8x128xf32>,
    %cst_433 = arith.constant 0.000000e+00 : f32
    %724 = vector.broadcast %cst_433 : f32 to vector<8x32xf32>
    %c0_434 = arith.constant 0 : index
    %c0_435 = arith.constant 0 : index
    %725 = vector.load %arg18[%c0_434, %c0_435] : memref<8x32xf32, #tpu.memory_space<vmem>>, vector<8x32xf32>
    tpu.vector_store %arg18[%c0_434, %c0_435], %724 {strides = array<i32>} : memref<8x32xf32, #tpu.memory_space<vmem>>, vector<8x32xf32>,
    %cst_436 = arith.constant 0.000000e+00 : f32
    %726 = vector.broadcast %cst_436 : f32 to vector<8x32xf32>
    %c0_437 = arith.constant 0 : index
    %c0_438 = arith.constant 0 : index
    %727 = vector.load %arg19[%c0_437, %c0_438] : memref<8x32xf32, #tpu.memory_space<vmem>>, vector<8x32xf32>
    tpu.vector_store %arg19[%c0_437, %c0_438], %726 {strides = array<i32>} : memref<8x32xf32, #tpu.memory_space<vmem>>, vector<8x32xf32>,
    %c0_i32_439 = arith.constant 0 : i32
    %c0_440 = arith.constant 0 : index
    %728 = arith.index_cast %c0_i32_439 : i32 to index
    %c0_441 = arith.constant 0 : index
    %c0_442 = arith.constant 0 : index
    %729 = vector.load %arg16[%c0_440, %728, %c0_441, %c0_442] : memref<2x8x8x128xf32, #tpu.memory_space<vmem>>, vector<1x1x8x128xf32>
    %730 = vector.shape_cast %729 : vector<1x1x8x128xf32> to vector<8x128xf32>
    %c0_443 = arith.constant 0 : index
    %c0_444 = arith.constant 0 : index
    %731 = vector.load %arg18[%c0_443, %c0_444] : memref<8x32xf32, #tpu.memory_space<vmem>>, vector<8x32xf32>
    %c0_445 = arith.constant 0 : index
    %c0_446 = arith.constant 0 : index
    %732 = vector.load %arg8[%c0_445, %c0_446] : memref<32x128xf32, #tpu.memory_space<vmem>>, vector<32x128xf32>
    %cst_447 = arith.constant dense<0.000000e+00> : vector<8x128xf32>
    %733 = tpu.matmul %731, %732, %cst_447 {dimension_numbers = #tpu.dot_dimension_numbers<[1], [0], [0], [1], [0, 0, 1, 1], [], []>} : vector<8x32xf32>, vector<32x128xf32>, vector<8x128xf32> -> vector<8x128xf32>
    %734 = arith.addf %730, %733 : vector<8x128xf32>
    %735 = vector.extract_strided_slice %734 {offsets = [0, 0], sizes = [8, 32], strides = [1, 1]} : vector<8x128xf32> to vector<8x32xf32>
    %736 = arith.negf %735 : vector<8x32xf32>
    %737 = math.exp %736 : vector<8x32xf32>
    %cst_448 = arith.constant 1.000000e+00 : f32
    %738 = vector.broadcast %cst_448 : f32 to vector<8x32xf32>
    %739 = arith.addf %738, %737 : vector<8x32xf32>
    %740 = arith.divf %738, %739 : vector<8x32xf32>
    %741 = vector.extract_strided_slice %734 {offsets = [0, 32], sizes = [8, 32], strides = [1, 1]} : vector<8x128xf32> to vector<8x32xf32>
    %742 = arith.negf %741 : vector<8x32xf32>
    %743 = math.exp %742 : vector<8x32xf32>
    %cst_449 = arith.constant 1.000000e+00 : f32
    %744 = vector.broadcast %cst_449 : f32 to vector<8x32xf32>
    %745 = arith.addf %744, %743 : vector<8x32xf32>
    %746 = arith.divf %744, %745 : vector<8x32xf32>
    %747 = vector.extract_strided_slice %734 {offsets = [0, 64], sizes = [8, 32], strides = [1, 1]} : vector<8x128xf32> to vector<8x32xf32>
    %748 = math.tanh %747 : vector<8x32xf32>
    %749 = vector.extract_strided_slice %734 {offsets = [0, 96], sizes = [8, 32], strides = [1, 1]} : vector<8x128xf32> to vector<8x32xf32>
    %750 = arith.negf %749 : vector<8x32xf32>
    %751 = math.exp %750 : vector<8x32xf32>
    %cst_450 = arith.constant 1.000000e+00 : f32
    %752 = vector.broadcast %cst_450 : f32 to vector<8x32xf32>
    %753 = arith.addf %752, %751 : vector<8x32xf32>
    %754 = arith.divf %752, %753 : vector<8x32xf32>
    %c0_451 = arith.constant 0 : index
    %c0_452 = arith.constant 0 : index
    %755 = vector.load %arg19[%c0_451, %c0_452] : memref<8x32xf32, #tpu.memory_space<vmem>>, vector<8x32xf32>
    %756 = arith.mulf %746, %755 : vector<8x32xf32>
    %757 = arith.mulf %740, %748 : vector<8x32xf32>
    %758 = arith.addf %756, %757 : vector<8x32xf32>
    %759 = math.tanh %758 : vector<8x32xf32>
    %760 = arith.mulf %754, %759 : vector<8x32xf32>
    %c0_453 = arith.constant 0 : index
    %c0_454 = arith.constant 0 : index
    %761 = vector.load %arg18[%c0_453, %c0_454] : memref<8x32xf32, #tpu.memory_space<vmem>>, vector<8x32xf32>
    tpu.vector_store %arg18[%c0_453, %c0_454], %760 {strides = array<i32>} : memref<8x32xf32, #tpu.memory_space<vmem>>, vector<8x32xf32>,
    %c0_455 = arith.constant 0 : index
    %c0_456 = arith.constant 0 : index
    %762 = vector.load %arg19[%c0_455, %c0_456] : memref<8x32xf32, #tpu.memory_space<vmem>>, vector<8x32xf32>
    tpu.vector_store %arg19[%c0_455, %c0_456], %758 {strides = array<i32>} : memref<8x32xf32, #tpu.memory_space<vmem>>, vector<8x32xf32>,
    %c0_457 = arith.constant 0 : index
    %763 = arith.index_cast %c0_i32_439 : i32 to index
    %c0_458 = arith.constant 0 : index
    %c0_459 = arith.constant 0 : index
    %764 = vector.load %arg17[%c0_457, %763, %c0_458, %c0_459] : memref<2x8x8x32xf32, #tpu.memory_space<vmem>>, vector<1x1x8x32xf32>
    %765 = vector.shape_cast %764 : vector<1x1x8x32xf32> to vector<8x32xf32>
    %766 = vector.shape_cast %760 : vector<8x32xf32> to vector<1x1x8x32xf32>
    tpu.vector_store %arg17[%c0_457, %763, %c0_458, %c0_459], %766 {strides = array<i32>} : memref<2x8x8x32xf32, #tpu.memory_space<vmem>>, vector<1x1x8x32xf32>,
    %c1_i32_460 = arith.constant 1 : i32
    %c0_461 = arith.constant 0 : index
    %767 = arith.index_cast %c1_i32_460 : i32 to index
    %c0_462 = arith.constant 0 : index
    %c0_463 = arith.constant 0 : index
    %768 = vector.load %arg16[%c0_461, %767, %c0_462, %c0_463] : memref<2x8x8x128xf32, #tpu.memory_space<vmem>>, vector<1x1x8x128xf32>
    %769 = vector.shape_cast %768 : vector<1x1x8x128xf32> to vector<8x128xf32>
    %c0_464 = arith.constant 0 : index
    %c0_465 = arith.constant 0 : index
    %770 = vector.load %arg18[%c0_464, %c0_465] : memref<8x32xf32, #tpu.memory_space<vmem>>, vector<8x32xf32>
    %c0_466 = arith.constant 0 : index
    %c0_467 = arith.constant 0 : index
    %771 = vector.load %arg8[%c0_466, %c0_467] : memref<32x128xf32, #tpu.memory_space<vmem>>, vector<32x128xf32>
    %cst_468 = arith.constant dense<0.000000e+00> : vector<8x128xf32>
    %772 = tpu.matmul %770, %771, %cst_468 {dimension_numbers = #tpu.dot_dimension_numbers<[1], [0], [0], [1], [0, 0, 1, 1], [], []>} : vector<8x32xf32>, vector<32x128xf32>, vector<8x128xf32> -> vector<8x128xf32>
    %773 = arith.addf %769, %772 : vector<8x128xf32>
    %774 = vector.extract_strided_slice %773 {offsets = [0, 0], sizes = [8, 32], strides = [1, 1]} : vector<8x128xf32> to vector<8x32xf32>
    %775 = arith.negf %774 : vector<8x32xf32>
    %776 = math.exp %775 : vector<8x32xf32>
    %cst_469 = arith.constant 1.000000e+00 : f32
    %777 = vector.broadcast %cst_469 : f32 to vector<8x32xf32>
    %778 = arith.addf %777, %776 : vector<8x32xf32>
    %779 = arith.divf %777, %778 : vector<8x32xf32>
    %780 = vector.extract_strided_slice %773 {offsets = [0, 32], sizes = [8, 32], strides = [1, 1]} : vector<8x128xf32> to vector<8x32xf32>
    %781 = arith.negf %780 : vector<8x32xf32>
    %782 = math.exp %781 : vector<8x32xf32>
    %cst_470 = arith.constant 1.000000e+00 : f32
    %783 = vector.broadcast %cst_470 : f32 to vector<8x32xf32>
    %784 = arith.addf %783, %782 : vector<8x32xf32>
    %785 = arith.divf %783, %784 : vector<8x32xf32>
    %786 = vector.extract_strided_slice %773 {offsets = [0, 64], sizes = [8, 32], strides = [1, 1]} : vector<8x128xf32> to vector<8x32xf32>
    %787 = math.tanh %786 : vector<8x32xf32>
    %788 = vector.extract_strided_slice %773 {offsets = [0, 96], sizes = [8, 32], strides = [1, 1]} : vector<8x128xf32> to vector<8x32xf32>
    %789 = arith.negf %788 : vector<8x32xf32>
    %790 = math.exp %789 : vector<8x32xf32>
    %cst_471 = arith.constant 1.000000e+00 : f32
    %791 = vector.broadcast %cst_471 : f32 to vector<8x32xf32>
    %792 = arith.addf %791, %790 : vector<8x32xf32>
    %793 = arith.divf %791, %792 : vector<8x32xf32>
    %c0_472 = arith.constant 0 : index
    %c0_473 = arith.constant 0 : index
    %794 = vector.load %arg19[%c0_472, %c0_473] : memref<8x32xf32, #tpu.memory_space<vmem>>, vector<8x32xf32>
    %795 = arith.mulf %785, %794 : vector<8x32xf32>
    %796 = arith.mulf %779, %787 : vector<8x32xf32>
    %797 = arith.addf %795, %796 : vector<8x32xf32>
    %798 = math.tanh %797 : vector<8x32xf32>
    %799 = arith.mulf %793, %798 : vector<8x32xf32>
    %c0_474 = arith.constant 0 : index
    %c0_475 = arith.constant 0 : index
    %800 = vector.load %arg18[%c0_474, %c0_475] : memref<8x32xf32, #tpu.memory_space<vmem>>, vector<8x32xf32>
    tpu.vector_store %arg18[%c0_474, %c0_475], %799 {strides = array<i32>} : memref<8x32xf32, #tpu.memory_space<vmem>>, vector<8x32xf32>,
    %c0_476 = arith.constant 0 : index
    %c0_477 = arith.constant 0 : index
    %801 = vector.load %arg19[%c0_476, %c0_477] : memref<8x32xf32, #tpu.memory_space<vmem>>, vector<8x32xf32>
    tpu.vector_store %arg19[%c0_476, %c0_477], %797 {strides = array<i32>} : memref<8x32xf32, #tpu.memory_space<vmem>>, vector<8x32xf32>,
    %c0_478 = arith.constant 0 : index
    %802 = arith.index_cast %c1_i32_460 : i32 to index
    %c0_479 = arith.constant 0 : index
    %c0_480 = arith.constant 0 : index
    %803 = vector.load %arg17[%c0_478, %802, %c0_479, %c0_480] : memref<2x8x8x32xf32, #tpu.memory_space<vmem>>, vector<1x1x8x32xf32>
    %804 = vector.shape_cast %803 : vector<1x1x8x32xf32> to vector<8x32xf32>
    %805 = vector.shape_cast %799 : vector<8x32xf32> to vector<1x1x8x32xf32>
    tpu.vector_store %arg17[%c0_478, %802, %c0_479, %c0_480], %805 {strides = array<i32>} : memref<2x8x8x32xf32, #tpu.memory_space<vmem>>, vector<1x1x8x32xf32>,
    %c2_i32_481 = arith.constant 2 : i32
    %c0_482 = arith.constant 0 : index
    %806 = arith.index_cast %c2_i32_481 : i32 to index
    %c0_483 = arith.constant 0 : index
    %c0_484 = arith.constant 0 : index
    %807 = vector.load %arg16[%c0_482, %806, %c0_483, %c0_484] : memref<2x8x8x128xf32, #tpu.memory_space<vmem>>, vector<1x1x8x128xf32>
    %808 = vector.shape_cast %807 : vector<1x1x8x128xf32> to vector<8x128xf32>
    %c0_485 = arith.constant 0 : index
    %c0_486 = arith.constant 0 : index
    %809 = vector.load %arg18[%c0_485, %c0_486] : memref<8x32xf32, #tpu.memory_space<vmem>>, vector<8x32xf32>
    %c0_487 = arith.constant 0 : index
    %c0_488 = arith.constant 0 : index
    %810 = vector.load %arg8[%c0_487, %c0_488] : memref<32x128xf32, #tpu.memory_space<vmem>>, vector<32x128xf32>
    %cst_489 = arith.constant dense<0.000000e+00> : vector<8x128xf32>
    %811 = tpu.matmul %809, %810, %cst_489 {dimension_numbers = #tpu.dot_dimension_numbers<[1], [0], [0], [1], [0, 0, 1, 1], [], []>} : vector<8x32xf32>, vector<32x128xf32>, vector<8x128xf32> -> vector<8x128xf32>
    %812 = arith.addf %808, %811 : vector<8x128xf32>
    %813 = vector.extract_strided_slice %812 {offsets = [0, 0], sizes = [8, 32], strides = [1, 1]} : vector<8x128xf32> to vector<8x32xf32>
    %814 = arith.negf %813 : vector<8x32xf32>
    %815 = math.exp %814 : vector<8x32xf32>
    %cst_490 = arith.constant 1.000000e+00 : f32
    %816 = vector.broadcast %cst_490 : f32 to vector<8x32xf32>
    %817 = arith.addf %816, %815 : vector<8x32xf32>
    %818 = arith.divf %816, %817 : vector<8x32xf32>
    %819 = vector.extract_strided_slice %812 {offsets = [0, 32], sizes = [8, 32], strides = [1, 1]} : vector<8x128xf32> to vector<8x32xf32>
    %820 = arith.negf %819 : vector<8x32xf32>
    %821 = math.exp %820 : vector<8x32xf32>
    %cst_491 = arith.constant 1.000000e+00 : f32
    %822 = vector.broadcast %cst_491 : f32 to vector<8x32xf32>
    %823 = arith.addf %822, %821 : vector<8x32xf32>
    %824 = arith.divf %822, %823 : vector<8x32xf32>
    %825 = vector.extract_strided_slice %812 {offsets = [0, 64], sizes = [8, 32], strides = [1, 1]} : vector<8x128xf32> to vector<8x32xf32>
    %826 = math.tanh %825 : vector<8x32xf32>
    %827 = vector.extract_strided_slice %812 {offsets = [0, 96], sizes = [8, 32], strides = [1, 1]} : vector<8x128xf32> to vector<8x32xf32>
    %828 = arith.negf %827 : vector<8x32xf32>
    %829 = math.exp %828 : vector<8x32xf32>
    %cst_492 = arith.constant 1.000000e+00 : f32
    %830 = vector.broadcast %cst_492 : f32 to vector<8x32xf32>
    %831 = arith.addf %830, %829 : vector<8x32xf32>
    %832 = arith.divf %830, %831 : vector<8x32xf32>
    %c0_493 = arith.constant 0 : index
    %c0_494 = arith.constant 0 : index
    %833 = vector.load %arg19[%c0_493, %c0_494] : memref<8x32xf32, #tpu.memory_space<vmem>>, vector<8x32xf32>
    %834 = arith.mulf %824, %833 : vector<8x32xf32>
    %835 = arith.mulf %818, %826 : vector<8x32xf32>
    %836 = arith.addf %834, %835 : vector<8x32xf32>
    %837 = math.tanh %836 : vector<8x32xf32>
    %838 = arith.mulf %832, %837 : vector<8x32xf32>
    %c0_495 = arith.constant 0 : index
    %c0_496 = arith.constant 0 : index
    %839 = vector.load %arg18[%c0_495, %c0_496] : memref<8x32xf32, #tpu.memory_space<vmem>>, vector<8x32xf32>
    tpu.vector_store %arg18[%c0_495, %c0_496], %838 {strides = array<i32>} : memref<8x32xf32, #tpu.memory_space<vmem>>, vector<8x32xf32>,
    %c0_497 = arith.constant 0 : index
    %c0_498 = arith.constant 0 : index
    %840 = vector.load %arg19[%c0_497, %c0_498] : memref<8x32xf32, #tpu.memory_space<vmem>>, vector<8x32xf32>
    tpu.vector_store %arg19[%c0_497, %c0_498], %836 {strides = array<i32>} : memref<8x32xf32, #tpu.memory_space<vmem>>, vector<8x32xf32>,
    %c0_499 = arith.constant 0 : index
    %841 = arith.index_cast %c2_i32_481 : i32 to index
    %c0_500 = arith.constant 0 : index
    %c0_501 = arith.constant 0 : index
    %842 = vector.load %arg17[%c0_499, %841, %c0_500, %c0_501] : memref<2x8x8x32xf32, #tpu.memory_space<vmem>>, vector<1x1x8x32xf32>
    %843 = vector.shape_cast %842 : vector<1x1x8x32xf32> to vector<8x32xf32>
    %844 = vector.shape_cast %838 : vector<8x32xf32> to vector<1x1x8x32xf32>
    tpu.vector_store %arg17[%c0_499, %841, %c0_500, %c0_501], %844 {strides = array<i32>} : memref<2x8x8x32xf32, #tpu.memory_space<vmem>>, vector<1x1x8x32xf32>,
    %c3_i32_502 = arith.constant 3 : i32
    %c0_503 = arith.constant 0 : index
    %845 = arith.index_cast %c3_i32_502 : i32 to index
    %c0_504 = arith.constant 0 : index
    %c0_505 = arith.constant 0 : index
    %846 = vector.load %arg16[%c0_503, %845, %c0_504, %c0_505] : memref<2x8x8x128xf32, #tpu.memory_space<vmem>>, vector<1x1x8x128xf32>
    %847 = vector.shape_cast %846 : vector<1x1x8x128xf32> to vector<8x128xf32>
    %c0_506 = arith.constant 0 : index
    %c0_507 = arith.constant 0 : index
    %848 = vector.load %arg18[%c0_506, %c0_507] : memref<8x32xf32, #tpu.memory_space<vmem>>, vector<8x32xf32>
    %c0_508 = arith.constant 0 : index
    %c0_509 = arith.constant 0 : index
    %849 = vector.load %arg8[%c0_508, %c0_509] : memref<32x128xf32, #tpu.memory_space<vmem>>, vector<32x128xf32>
    %cst_510 = arith.constant dense<0.000000e+00> : vector<8x128xf32>
    %850 = tpu.matmul %848, %849, %cst_510 {dimension_numbers = #tpu.dot_dimension_numbers<[1], [0], [0], [1], [0, 0, 1, 1], [], []>} : vector<8x32xf32>, vector<32x128xf32>, vector<8x128xf32> -> vector<8x128xf32>
    %851 = arith.addf %847, %850 : vector<8x128xf32>
    %852 = vector.extract_strided_slice %851 {offsets = [0, 0], sizes = [8, 32], strides = [1, 1]} : vector<8x128xf32> to vector<8x32xf32>
    %853 = arith.negf %852 : vector<8x32xf32>
    %854 = math.exp %853 : vector<8x32xf32>
    %cst_511 = arith.constant 1.000000e+00 : f32
    %855 = vector.broadcast %cst_511 : f32 to vector<8x32xf32>
    %856 = arith.addf %855, %854 : vector<8x32xf32>
    %857 = arith.divf %855, %856 : vector<8x32xf32>
    %858 = vector.extract_strided_slice %851 {offsets = [0, 32], sizes = [8, 32], strides = [1, 1]} : vector<8x128xf32> to vector<8x32xf32>
    %859 = arith.negf %858 : vector<8x32xf32>
    %860 = math.exp %859 : vector<8x32xf32>
    %cst_512 = arith.constant 1.000000e+00 : f32
    %861 = vector.broadcast %cst_512 : f32 to vector<8x32xf32>
    %862 = arith.addf %861, %860 : vector<8x32xf32>
    %863 = arith.divf %861, %862 : vector<8x32xf32>
    %864 = vector.extract_strided_slice %851 {offsets = [0, 64], sizes = [8, 32], strides = [1, 1]} : vector<8x128xf32> to vector<8x32xf32>
    %865 = math.tanh %864 : vector<8x32xf32>
    %866 = vector.extract_strided_slice %851 {offsets = [0, 96], sizes = [8, 32], strides = [1, 1]} : vector<8x128xf32> to vector<8x32xf32>
    %867 = arith.negf %866 : vector<8x32xf32>
    %868 = math.exp %867 : vector<8x32xf32>
    %cst_513 = arith.constant 1.000000e+00 : f32
    %869 = vector.broadcast %cst_513 : f32 to vector<8x32xf32>
    %870 = arith.addf %869, %868 : vector<8x32xf32>
    %871 = arith.divf %869, %870 : vector<8x32xf32>
    %c0_514 = arith.constant 0 : index
    %c0_515 = arith.constant 0 : index
    %872 = vector.load %arg19[%c0_514, %c0_515] : memref<8x32xf32, #tpu.memory_space<vmem>>, vector<8x32xf32>
    %873 = arith.mulf %863, %872 : vector<8x32xf32>
    %874 = arith.mulf %857, %865 : vector<8x32xf32>
    %875 = arith.addf %873, %874 : vector<8x32xf32>
    %876 = math.tanh %875 : vector<8x32xf32>
    %877 = arith.mulf %871, %876 : vector<8x32xf32>
    %c0_516 = arith.constant 0 : index
    %c0_517 = arith.constant 0 : index
    %878 = vector.load %arg18[%c0_516, %c0_517] : memref<8x32xf32, #tpu.memory_space<vmem>>, vector<8x32xf32>
    tpu.vector_store %arg18[%c0_516, %c0_517], %877 {strides = array<i32>} : memref<8x32xf32, #tpu.memory_space<vmem>>, vector<8x32xf32>,
    %c0_518 = arith.constant 0 : index
    %c0_519 = arith.constant 0 : index
    %879 = vector.load %arg19[%c0_518, %c0_519] : memref<8x32xf32, #tpu.memory_space<vmem>>, vector<8x32xf32>
    tpu.vector_store %arg19[%c0_518, %c0_519], %875 {strides = array<i32>} : memref<8x32xf32, #tpu.memory_space<vmem>>, vector<8x32xf32>,
    %c0_520 = arith.constant 0 : index
    %880 = arith.index_cast %c3_i32_502 : i32 to index
    %c0_521 = arith.constant 0 : index
    %c0_522 = arith.constant 0 : index
    %881 = vector.load %arg17[%c0_520, %880, %c0_521, %c0_522] : memref<2x8x8x32xf32, #tpu.memory_space<vmem>>, vector<1x1x8x32xf32>
    %882 = vector.shape_cast %881 : vector<1x1x8x32xf32> to vector<8x32xf32>
    %883 = vector.shape_cast %877 : vector<8x32xf32> to vector<1x1x8x32xf32>
    tpu.vector_store %arg17[%c0_520, %880, %c0_521, %c0_522], %883 {strides = array<i32>} : memref<2x8x8x32xf32, #tpu.memory_space<vmem>>, vector<1x1x8x32xf32>,
    %c4_i32_523 = arith.constant 4 : i32
    %c0_524 = arith.constant 0 : index
    %884 = arith.index_cast %c4_i32_523 : i32 to index
    %c0_525 = arith.constant 0 : index
    %c0_526 = arith.constant 0 : index
    %885 = vector.load %arg16[%c0_524, %884, %c0_525, %c0_526] : memref<2x8x8x128xf32, #tpu.memory_space<vmem>>, vector<1x1x8x128xf32>
    %886 = vector.shape_cast %885 : vector<1x1x8x128xf32> to vector<8x128xf32>
    %c0_527 = arith.constant 0 : index
    %c0_528 = arith.constant 0 : index
    %887 = vector.load %arg18[%c0_527, %c0_528] : memref<8x32xf32, #tpu.memory_space<vmem>>, vector<8x32xf32>
    %c0_529 = arith.constant 0 : index
    %c0_530 = arith.constant 0 : index
    %888 = vector.load %arg8[%c0_529, %c0_530] : memref<32x128xf32, #tpu.memory_space<vmem>>, vector<32x128xf32>
    %cst_531 = arith.constant dense<0.000000e+00> : vector<8x128xf32>
    %889 = tpu.matmul %887, %888, %cst_531 {dimension_numbers = #tpu.dot_dimension_numbers<[1], [0], [0], [1], [0, 0, 1, 1], [], []>} : vector<8x32xf32>, vector<32x128xf32>, vector<8x128xf32> -> vector<8x128xf32>
    %890 = arith.addf %886, %889 : vector<8x128xf32>
    %891 = vector.extract_strided_slice %890 {offsets = [0, 0], sizes = [8, 32], strides = [1, 1]} : vector<8x128xf32> to vector<8x32xf32>
    %892 = arith.negf %891 : vector<8x32xf32>
    %893 = math.exp %892 : vector<8x32xf32>
    %cst_532 = arith.constant 1.000000e+00 : f32
    %894 = vector.broadcast %cst_532 : f32 to vector<8x32xf32>
    %895 = arith.addf %894, %893 : vector<8x32xf32>
    %896 = arith.divf %894, %895 : vector<8x32xf32>
    %897 = vector.extract_strided_slice %890 {offsets = [0, 32], sizes = [8, 32], strides = [1, 1]} : vector<8x128xf32> to vector<8x32xf32>
    %898 = arith.negf %897 : vector<8x32xf32>
    %899 = math.exp %898 : vector<8x32xf32>
    %cst_533 = arith.constant 1.000000e+00 : f32
    %900 = vector.broadcast %cst_533 : f32 to vector<8x32xf32>
    %901 = arith.addf %900, %899 : vector<8x32xf32>
    %902 = arith.divf %900, %901 : vector<8x32xf32>
    %903 = vector.extract_strided_slice %890 {offsets = [0, 64], sizes = [8, 32], strides = [1, 1]} : vector<8x128xf32> to vector<8x32xf32>
    %904 = math.tanh %903 : vector<8x32xf32>
    %905 = vector.extract_strided_slice %890 {offsets = [0, 96], sizes = [8, 32], strides = [1, 1]} : vector<8x128xf32> to vector<8x32xf32>
    %906 = arith.negf %905 : vector<8x32xf32>
    %907 = math.exp %906 : vector<8x32xf32>
    %cst_534 = arith.constant 1.000000e+00 : f32
    %908 = vector.broadcast %cst_534 : f32 to vector<8x32xf32>
    %909 = arith.addf %908, %907 : vector<8x32xf32>
    %910 = arith.divf %908, %909 : vector<8x32xf32>
    %c0_535 = arith.constant 0 : index
    %c0_536 = arith.constant 0 : index
    %911 = vector.load %arg19[%c0_535, %c0_536] : memref<8x32xf32, #tpu.memory_space<vmem>>, vector<8x32xf32>
    %912 = arith.mulf %902, %911 : vector<8x32xf32>
    %913 = arith.mulf %896, %904 : vector<8x32xf32>
    %914 = arith.addf %912, %913 : vector<8x32xf32>
    %915 = math.tanh %914 : vector<8x32xf32>
    %916 = arith.mulf %910, %915 : vector<8x32xf32>
    %c0_537 = arith.constant 0 : index
    %c0_538 = arith.constant 0 : index
    %917 = vector.load %arg18[%c0_537, %c0_538] : memref<8x32xf32, #tpu.memory_space<vmem>>, vector<8x32xf32>
    tpu.vector_store %arg18[%c0_537, %c0_538], %916 {strides = array<i32>} : memref<8x32xf32, #tpu.memory_space<vmem>>, vector<8x32xf32>,
    %c0_539 = arith.constant 0 : index
    %c0_540 = arith.constant 0 : index
    %918 = vector.load %arg19[%c0_539, %c0_540] : memref<8x32xf32, #tpu.memory_space<vmem>>, vector<8x32xf32>
    tpu.vector_store %arg19[%c0_539, %c0_540], %914 {strides = array<i32>} : memref<8x32xf32, #tpu.memory_space<vmem>>, vector<8x32xf32>,
    %c0_541 = arith.constant 0 : index
    %919 = arith.index_cast %c4_i32_523 : i32 to index
    %c0_542 = arith.constant 0 : index
    %c0_543 = arith.constant 0 : index
    %920 = vector.load %arg17[%c0_541, %919, %c0_542, %c0_543] : memref<2x8x8x32xf32, #tpu.memory_space<vmem>>, vector<1x1x8x32xf32>
    %921 = vector.shape_cast %920 : vector<1x1x8x32xf32> to vector<8x32xf32>
    %922 = vector.shape_cast %916 : vector<8x32xf32> to vector<1x1x8x32xf32>
    tpu.vector_store %arg17[%c0_541, %919, %c0_542, %c0_543], %922 {strides = array<i32>} : memref<2x8x8x32xf32, #tpu.memory_space<vmem>>, vector<1x1x8x32xf32>,
    %c5_i32_544 = arith.constant 5 : i32
    %c0_545 = arith.constant 0 : index
    %923 = arith.index_cast %c5_i32_544 : i32 to index
    %c0_546 = arith.constant 0 : index
    %c0_547 = arith.constant 0 : index
    %924 = vector.load %arg16[%c0_545, %923, %c0_546, %c0_547] : memref<2x8x8x128xf32, #tpu.memory_space<vmem>>, vector<1x1x8x128xf32>
    %925 = vector.shape_cast %924 : vector<1x1x8x128xf32> to vector<8x128xf32>
    %c0_548 = arith.constant 0 : index
    %c0_549 = arith.constant 0 : index
    %926 = vector.load %arg18[%c0_548, %c0_549] : memref<8x32xf32, #tpu.memory_space<vmem>>, vector<8x32xf32>
    %c0_550 = arith.constant 0 : index
    %c0_551 = arith.constant 0 : index
    %927 = vector.load %arg8[%c0_550, %c0_551] : memref<32x128xf32, #tpu.memory_space<vmem>>, vector<32x128xf32>
    %cst_552 = arith.constant dense<0.000000e+00> : vector<8x128xf32>
    %928 = tpu.matmul %926, %927, %cst_552 {dimension_numbers = #tpu.dot_dimension_numbers<[1], [0], [0], [1], [0, 0, 1, 1], [], []>} : vector<8x32xf32>, vector<32x128xf32>, vector<8x128xf32> -> vector<8x128xf32>
    %929 = arith.addf %925, %928 : vector<8x128xf32>
    %930 = vector.extract_strided_slice %929 {offsets = [0, 0], sizes = [8, 32], strides = [1, 1]} : vector<8x128xf32> to vector<8x32xf32>
    %931 = arith.negf %930 : vector<8x32xf32>
    %932 = math.exp %931 : vector<8x32xf32>
    %cst_553 = arith.constant 1.000000e+00 : f32
    %933 = vector.broadcast %cst_553 : f32 to vector<8x32xf32>
    %934 = arith.addf %933, %932 : vector<8x32xf32>
    %935 = arith.divf %933, %934 : vector<8x32xf32>
    %936 = vector.extract_strided_slice %929 {offsets = [0, 32], sizes = [8, 32], strides = [1, 1]} : vector<8x128xf32> to vector<8x32xf32>
    %937 = arith.negf %936 : vector<8x32xf32>
    %938 = math.exp %937 : vector<8x32xf32>
    %cst_554 = arith.constant 1.000000e+00 : f32
    %939 = vector.broadcast %cst_554 : f32 to vector<8x32xf32>
    %940 = arith.addf %939, %938 : vector<8x32xf32>
    %941 = arith.divf %939, %940 : vector<8x32xf32>
    %942 = vector.extract_strided_slice %929 {offsets = [0, 64], sizes = [8, 32], strides = [1, 1]} : vector<8x128xf32> to vector<8x32xf32>
    %943 = math.tanh %942 : vector<8x32xf32>
    %944 = vector.extract_strided_slice %929 {offsets = [0, 96], sizes = [8, 32], strides = [1, 1]} : vector<8x128xf32> to vector<8x32xf32>
    %945 = arith.negf %944 : vector<8x32xf32>
    %946 = math.exp %945 : vector<8x32xf32>
    %cst_555 = arith.constant 1.000000e+00 : f32
    %947 = vector.broadcast %cst_555 : f32 to vector<8x32xf32>
    %948 = arith.addf %947, %946 : vector<8x32xf32>
    %949 = arith.divf %947, %948 : vector<8x32xf32>
    %c0_556 = arith.constant 0 : index
    %c0_557 = arith.constant 0 : index
    %950 = vector.load %arg19[%c0_556, %c0_557] : memref<8x32xf32, #tpu.memory_space<vmem>>, vector<8x32xf32>
    %951 = arith.mulf %941, %950 : vector<8x32xf32>
    %952 = arith.mulf %935, %943 : vector<8x32xf32>
    %953 = arith.addf %951, %952 : vector<8x32xf32>
    %954 = math.tanh %953 : vector<8x32xf32>
    %955 = arith.mulf %949, %954 : vector<8x32xf32>
    %c0_558 = arith.constant 0 : index
    %c0_559 = arith.constant 0 : index
    %956 = vector.load %arg18[%c0_558, %c0_559] : memref<8x32xf32, #tpu.memory_space<vmem>>, vector<8x32xf32>
    tpu.vector_store %arg18[%c0_558, %c0_559], %955 {strides = array<i32>} : memref<8x32xf32, #tpu.memory_space<vmem>>, vector<8x32xf32>,
    %c0_560 = arith.constant 0 : index
    %c0_561 = arith.constant 0 : index
    %957 = vector.load %arg19[%c0_560, %c0_561] : memref<8x32xf32, #tpu.memory_space<vmem>>, vector<8x32xf32>
    tpu.vector_store %arg19[%c0_560, %c0_561], %953 {strides = array<i32>} : memref<8x32xf32, #tpu.memory_space<vmem>>, vector<8x32xf32>,
    %c0_562 = arith.constant 0 : index
    %958 = arith.index_cast %c5_i32_544 : i32 to index
    %c0_563 = arith.constant 0 : index
    %c0_564 = arith.constant 0 : index
    %959 = vector.load %arg17[%c0_562, %958, %c0_563, %c0_564] : memref<2x8x8x32xf32, #tpu.memory_space<vmem>>, vector<1x1x8x32xf32>
    %960 = vector.shape_cast %959 : vector<1x1x8x32xf32> to vector<8x32xf32>
    %961 = vector.shape_cast %955 : vector<8x32xf32> to vector<1x1x8x32xf32>
    tpu.vector_store %arg17[%c0_562, %958, %c0_563, %c0_564], %961 {strides = array<i32>} : memref<2x8x8x32xf32, #tpu.memory_space<vmem>>, vector<1x1x8x32xf32>,
    %c6_i32_565 = arith.constant 6 : i32
    %c0_566 = arith.constant 0 : index
    %962 = arith.index_cast %c6_i32_565 : i32 to index
    %c0_567 = arith.constant 0 : index
    %c0_568 = arith.constant 0 : index
    %963 = vector.load %arg16[%c0_566, %962, %c0_567, %c0_568] : memref<2x8x8x128xf32, #tpu.memory_space<vmem>>, vector<1x1x8x128xf32>
    %964 = vector.shape_cast %963 : vector<1x1x8x128xf32> to vector<8x128xf32>
    %c0_569 = arith.constant 0 : index
    %c0_570 = arith.constant 0 : index
    %965 = vector.load %arg18[%c0_569, %c0_570] : memref<8x32xf32, #tpu.memory_space<vmem>>, vector<8x32xf32>
    %c0_571 = arith.constant 0 : index
    %c0_572 = arith.constant 0 : index
    %966 = vector.load %arg8[%c0_571, %c0_572] : memref<32x128xf32, #tpu.memory_space<vmem>>, vector<32x128xf32>
    %cst_573 = arith.constant dense<0.000000e+00> : vector<8x128xf32>
    %967 = tpu.matmul %965, %966, %cst_573 {dimension_numbers = #tpu.dot_dimension_numbers<[1], [0], [0], [1], [0, 0, 1, 1], [], []>} : vector<8x32xf32>, vector<32x128xf32>, vector<8x128xf32> -> vector<8x128xf32>
    %968 = arith.addf %964, %967 : vector<8x128xf32>
    %969 = vector.extract_strided_slice %968 {offsets = [0, 0], sizes = [8, 32], strides = [1, 1]} : vector<8x128xf32> to vector<8x32xf32>
    %970 = arith.negf %969 : vector<8x32xf32>
    %971 = math.exp %970 : vector<8x32xf32>
    %cst_574 = arith.constant 1.000000e+00 : f32
    %972 = vector.broadcast %cst_574 : f32 to vector<8x32xf32>
    %973 = arith.addf %972, %971 : vector<8x32xf32>
    %974 = arith.divf %972, %973 : vector<8x32xf32>
    %975 = vector.extract_strided_slice %968 {offsets = [0, 32], sizes = [8, 32], strides = [1, 1]} : vector<8x128xf32> to vector<8x32xf32>
    %976 = arith.negf %975 : vector<8x32xf32>
    %977 = math.exp %976 : vector<8x32xf32>
    %cst_575 = arith.constant 1.000000e+00 : f32
    %978 = vector.broadcast %cst_575 : f32 to vector<8x32xf32>
    %979 = arith.addf %978, %977 : vector<8x32xf32>
    %980 = arith.divf %978, %979 : vector<8x32xf32>
    %981 = vector.extract_strided_slice %968 {offsets = [0, 64], sizes = [8, 32], strides = [1, 1]} : vector<8x128xf32> to vector<8x32xf32>
    %982 = math.tanh %981 : vector<8x32xf32>
    %983 = vector.extract_strided_slice %968 {offsets = [0, 96], sizes = [8, 32], strides = [1, 1]} : vector<8x128xf32> to vector<8x32xf32>
    %984 = arith.negf %983 : vector<8x32xf32>
    %985 = math.exp %984 : vector<8x32xf32>
    %cst_576 = arith.constant 1.000000e+00 : f32
    %986 = vector.broadcast %cst_576 : f32 to vector<8x32xf32>
    %987 = arith.addf %986, %985 : vector<8x32xf32>
    %988 = arith.divf %986, %987 : vector<8x32xf32>
    %c0_577 = arith.constant 0 : index
    %c0_578 = arith.constant 0 : index
    %989 = vector.load %arg19[%c0_577, %c0_578] : memref<8x32xf32, #tpu.memory_space<vmem>>, vector<8x32xf32>
    %990 = arith.mulf %980, %989 : vector<8x32xf32>
    %991 = arith.mulf %974, %982 : vector<8x32xf32>
    %992 = arith.addf %990, %991 : vector<8x32xf32>
    %993 = math.tanh %992 : vector<8x32xf32>
    %994 = arith.mulf %988, %993 : vector<8x32xf32>
    %c0_579 = arith.constant 0 : index
    %c0_580 = arith.constant 0 : index
    %995 = vector.load %arg18[%c0_579, %c0_580] : memref<8x32xf32, #tpu.memory_space<vmem>>, vector<8x32xf32>
    tpu.vector_store %arg18[%c0_579, %c0_580], %994 {strides = array<i32>} : memref<8x32xf32, #tpu.memory_space<vmem>>, vector<8x32xf32>,
    %c0_581 = arith.constant 0 : index
    %c0_582 = arith.constant 0 : index
    %996 = vector.load %arg19[%c0_581, %c0_582] : memref<8x32xf32, #tpu.memory_space<vmem>>, vector<8x32xf32>
    tpu.vector_store %arg19[%c0_581, %c0_582], %992 {strides = array<i32>} : memref<8x32xf32, #tpu.memory_space<vmem>>, vector<8x32xf32>,
    %c0_583 = arith.constant 0 : index
    %997 = arith.index_cast %c6_i32_565 : i32 to index
    %c0_584 = arith.constant 0 : index
    %c0_585 = arith.constant 0 : index
    %998 = vector.load %arg17[%c0_583, %997, %c0_584, %c0_585] : memref<2x8x8x32xf32, #tpu.memory_space<vmem>>, vector<1x1x8x32xf32>
    %999 = vector.shape_cast %998 : vector<1x1x8x32xf32> to vector<8x32xf32>
    %1000 = vector.shape_cast %994 : vector<8x32xf32> to vector<1x1x8x32xf32>
    tpu.vector_store %arg17[%c0_583, %997, %c0_584, %c0_585], %1000 {strides = array<i32>} : memref<2x8x8x32xf32, #tpu.memory_space<vmem>>, vector<1x1x8x32xf32>,
    %c7_i32_586 = arith.constant 7 : i32
    %c0_587 = arith.constant 0 : index
    %1001 = arith.index_cast %c7_i32_586 : i32 to index
    %c0_588 = arith.constant 0 : index
    %c0_589 = arith.constant 0 : index
    %1002 = vector.load %arg16[%c0_587, %1001, %c0_588, %c0_589] : memref<2x8x8x128xf32, #tpu.memory_space<vmem>>, vector<1x1x8x128xf32>
    %1003 = vector.shape_cast %1002 : vector<1x1x8x128xf32> to vector<8x128xf32>
    %c0_590 = arith.constant 0 : index
    %c0_591 = arith.constant 0 : index
    %1004 = vector.load %arg18[%c0_590, %c0_591] : memref<8x32xf32, #tpu.memory_space<vmem>>, vector<8x32xf32>
    %c0_592 = arith.constant 0 : index
    %c0_593 = arith.constant 0 : index
    %1005 = vector.load %arg8[%c0_592, %c0_593] : memref<32x128xf32, #tpu.memory_space<vmem>>, vector<32x128xf32>
    %cst_594 = arith.constant dense<0.000000e+00> : vector<8x128xf32>
    %1006 = tpu.matmul %1004, %1005, %cst_594 {dimension_numbers = #tpu.dot_dimension_numbers<[1], [0], [0], [1], [0, 0, 1, 1], [], []>} : vector<8x32xf32>, vector<32x128xf32>, vector<8x128xf32> -> vector<8x128xf32>
    %1007 = arith.addf %1003, %1006 : vector<8x128xf32>
    %1008 = vector.extract_strided_slice %1007 {offsets = [0, 0], sizes = [8, 32], strides = [1, 1]} : vector<8x128xf32> to vector<8x32xf32>
    %1009 = arith.negf %1008 : vector<8x32xf32>
    %1010 = math.exp %1009 : vector<8x32xf32>
    %cst_595 = arith.constant 1.000000e+00 : f32
    %1011 = vector.broadcast %cst_595 : f32 to vector<8x32xf32>
    %1012 = arith.addf %1011, %1010 : vector<8x32xf32>
    %1013 = arith.divf %1011, %1012 : vector<8x32xf32>
    %1014 = vector.extract_strided_slice %1007 {offsets = [0, 32], sizes = [8, 32], strides = [1, 1]} : vector<8x128xf32> to vector<8x32xf32>
    %1015 = arith.negf %1014 : vector<8x32xf32>
    %1016 = math.exp %1015 : vector<8x32xf32>
    %cst_596 = arith.constant 1.000000e+00 : f32
    %1017 = vector.broadcast %cst_596 : f32 to vector<8x32xf32>
    %1018 = arith.addf %1017, %1016 : vector<8x32xf32>
    %1019 = arith.divf %1017, %1018 : vector<8x32xf32>
    %1020 = vector.extract_strided_slice %1007 {offsets = [0, 64], sizes = [8, 32], strides = [1, 1]} : vector<8x128xf32> to vector<8x32xf32>
    %1021 = math.tanh %1020 : vector<8x32xf32>
    %1022 = vector.extract_strided_slice %1007 {offsets = [0, 96], sizes = [8, 32], strides = [1, 1]} : vector<8x128xf32> to vector<8x32xf32>
    %1023 = arith.negf %1022 : vector<8x32xf32>
    %1024 = math.exp %1023 : vector<8x32xf32>
    %cst_597 = arith.constant 1.000000e+00 : f32
    %1025 = vector.broadcast %cst_597 : f32 to vector<8x32xf32>
    %1026 = arith.addf %1025, %1024 : vector<8x32xf32>
    %1027 = arith.divf %1025, %1026 : vector<8x32xf32>
    %c0_598 = arith.constant 0 : index
    %c0_599 = arith.constant 0 : index
    %1028 = vector.load %arg19[%c0_598, %c0_599] : memref<8x32xf32, #tpu.memory_space<vmem>>, vector<8x32xf32>
    %1029 = arith.mulf %1019, %1028 : vector<8x32xf32>
    %1030 = arith.mulf %1013, %1021 : vector<8x32xf32>
    %1031 = arith.addf %1029, %1030 : vector<8x32xf32>
    %1032 = math.tanh %1031 : vector<8x32xf32>
    %1033 = arith.mulf %1027, %1032 : vector<8x32xf32>
    %c0_600 = arith.constant 0 : index
    %c0_601 = arith.constant 0 : index
    %1034 = vector.load %arg18[%c0_600, %c0_601] : memref<8x32xf32, #tpu.memory_space<vmem>>, vector<8x32xf32>
    tpu.vector_store %arg18[%c0_600, %c0_601], %1033 {strides = array<i32>} : memref<8x32xf32, #tpu.memory_space<vmem>>, vector<8x32xf32>,
    %c0_602 = arith.constant 0 : index
    %c0_603 = arith.constant 0 : index
    %1035 = vector.load %arg19[%c0_602, %c0_603] : memref<8x32xf32, #tpu.memory_space<vmem>>, vector<8x32xf32>
    tpu.vector_store %arg19[%c0_602, %c0_603], %1031 {strides = array<i32>} : memref<8x32xf32, #tpu.memory_space<vmem>>, vector<8x32xf32>,
    %c0_604 = arith.constant 0 : index
    %1036 = arith.index_cast %c7_i32_586 : i32 to index
    %c0_605 = arith.constant 0 : index
    %c0_606 = arith.constant 0 : index
    %1037 = vector.load %arg17[%c0_604, %1036, %c0_605, %c0_606] : memref<2x8x8x32xf32, #tpu.memory_space<vmem>>, vector<1x1x8x32xf32>
    %1038 = vector.shape_cast %1037 : vector<1x1x8x32xf32> to vector<8x32xf32>
    %1039 = vector.shape_cast %1033 : vector<8x32xf32> to vector<1x1x8x32xf32>
    tpu.vector_store %arg17[%c0_604, %1036, %c0_605, %c0_606], %1039 {strides = array<i32>} : memref<2x8x8x32xf32, #tpu.memory_space<vmem>>, vector<1x1x8x32xf32>,
    %c8_i32_607 = arith.constant 8 : i32
    %c0_608 = arith.constant 0 : index
    %c0_609 = arith.constant 0 : index
    %1040 = vector.load %arg18[%c0_608, %c0_609] : memref<8x32xf32, #tpu.memory_space<vmem>>, vector<8x32xf32>
    %cst_610 = arith.constant 0.000000e+00 : f32
    %1041 = vector.broadcast %cst_610 : f32 to vector<8x32xf32>
    %1042 = arith.maximumf %1040, %1041 : vector<8x32xf32>
    %c0_611 = arith.constant 0 : index
    %c0_612 = arith.constant 0 : index
    %1043 = vector.load %arg13[%c0_611, %c0_612] : memref<32x128xf32, #tpu.memory_space<vmem>>, vector<32x128xf32>
    %cst_613 = arith.constant dense<0.000000e+00> : vector<8x128xf32>
    %1044 = tpu.matmul %1042, %1043, %cst_613 {dimension_numbers = #tpu.dot_dimension_numbers<[1], [0], [0], [1], [0, 0, 1, 1], [], []>} : vector<8x32xf32>, vector<32x128xf32>, vector<8x128xf32> -> vector<8x128xf32>
    %c0_614 = arith.constant 0 : index
    %c0_615 = arith.constant 0 : index
    %1045 = vector.load %arg14[%c0_614, %c0_615] : memref<1x128xf32, #tpu.memory_space<vmem>>, vector<1x128xf32>
    %1046 = vector.broadcast %1045 : vector<1x128xf32> to vector<8x128xf32>
    %1047 = arith.addf %1044, %1046 : vector<8x128xf32>
    %c2 = arith.constant 2 : index
    %c0_616 = arith.constant 0 : index
    %c0_617 = arith.constant 0 : index
    %1048 = vector.load %arg15[%c2, %c0_616, %c0_617] : memref<4x8x128xf32, #tpu.memory_space<vmem>>, vector<1x8x128xf32>
    %1049 = vector.shape_cast %1048 : vector<1x8x128xf32> to vector<8x128xf32>
    %1050 = vector.shape_cast %1047 : vector<8x128xf32> to vector<1x8x128xf32>
    tpu.vector_store %arg15[%c2, %c0_616, %c0_617], %1050 {strides = array<i32>} : memref<4x8x128xf32, #tpu.memory_space<vmem>>, vector<1x8x128xf32>,
    %cst_618 = arith.constant 0.000000e+00 : f32
    %1051 = vector.broadcast %cst_618 : f32 to vector<8x32xf32>
    %c0_619 = arith.constant 0 : index
    %c0_620 = arith.constant 0 : index
    %1052 = vector.load %arg18[%c0_619, %c0_620] : memref<8x32xf32, #tpu.memory_space<vmem>>, vector<8x32xf32>
    tpu.vector_store %arg18[%c0_619, %c0_620], %1051 {strides = array<i32>} : memref<8x32xf32, #tpu.memory_space<vmem>>, vector<8x32xf32>,
    %cst_621 = arith.constant 0.000000e+00 : f32
    %1053 = vector.broadcast %cst_621 : f32 to vector<8x32xf32>
    %c0_622 = arith.constant 0 : index
    %c0_623 = arith.constant 0 : index
    %1054 = vector.load %arg19[%c0_622, %c0_623] : memref<8x32xf32, #tpu.memory_space<vmem>>, vector<8x32xf32>
    tpu.vector_store %arg19[%c0_622, %c0_623], %1053 {strides = array<i32>} : memref<8x32xf32, #tpu.memory_space<vmem>>, vector<8x32xf32>,
    %c0_i32_624 = arith.constant 0 : i32
    %c7_i32_625 = arith.constant 7 : i32
    %1055 = arith.subi %c7_i32_625, %c0_i32_624 : i32
    %c1_626 = arith.constant 1 : index
    %1056 = arith.index_cast %1055 : i32 to index
    %c0_627 = arith.constant 0 : index
    %c0_628 = arith.constant 0 : index
    %1057 = vector.load %arg16[%c1_626, %1056, %c0_627, %c0_628] : memref<2x8x8x128xf32, #tpu.memory_space<vmem>>, vector<1x1x8x128xf32>
    %1058 = vector.shape_cast %1057 : vector<1x1x8x128xf32> to vector<8x128xf32>
    %c0_629 = arith.constant 0 : index
    %c0_630 = arith.constant 0 : index
    %1059 = vector.load %arg18[%c0_629, %c0_630] : memref<8x32xf32, #tpu.memory_space<vmem>>, vector<8x32xf32>
    %c0_631 = arith.constant 0 : index
    %c0_632 = arith.constant 0 : index
    %1060 = vector.load %arg11[%c0_631, %c0_632] : memref<32x128xf32, #tpu.memory_space<vmem>>, vector<32x128xf32>
    %cst_633 = arith.constant dense<0.000000e+00> : vector<8x128xf32>
    %1061 = tpu.matmul %1059, %1060, %cst_633 {dimension_numbers = #tpu.dot_dimension_numbers<[1], [0], [0], [1], [0, 0, 1, 1], [], []>} : vector<8x32xf32>, vector<32x128xf32>, vector<8x128xf32> -> vector<8x128xf32>
    %1062 = arith.addf %1058, %1061 : vector<8x128xf32>
    %1063 = vector.extract_strided_slice %1062 {offsets = [0, 0], sizes = [8, 32], strides = [1, 1]} : vector<8x128xf32> to vector<8x32xf32>
    %1064 = arith.negf %1063 : vector<8x32xf32>
    %1065 = math.exp %1064 : vector<8x32xf32>
    %cst_634 = arith.constant 1.000000e+00 : f32
    %1066 = vector.broadcast %cst_634 : f32 to vector<8x32xf32>
    %1067 = arith.addf %1066, %1065 : vector<8x32xf32>
    %1068 = arith.divf %1066, %1067 : vector<8x32xf32>
    %1069 = vector.extract_strided_slice %1062 {offsets = [0, 32], sizes = [8, 32], strides = [1, 1]} : vector<8x128xf32> to vector<8x32xf32>
    %1070 = arith.negf %1069 : vector<8x32xf32>
    %1071 = math.exp %1070 : vector<8x32xf32>
    %cst_635 = arith.constant 1.000000e+00 : f32
    %1072 = vector.broadcast %cst_635 : f32 to vector<8x32xf32>
    %1073 = arith.addf %1072, %1071 : vector<8x32xf32>
    %1074 = arith.divf %1072, %1073 : vector<8x32xf32>
    %1075 = vector.extract_strided_slice %1062 {offsets = [0, 64], sizes = [8, 32], strides = [1, 1]} : vector<8x128xf32> to vector<8x32xf32>
    %1076 = math.tanh %1075 : vector<8x32xf32>
    %1077 = vector.extract_strided_slice %1062 {offsets = [0, 96], sizes = [8, 32], strides = [1, 1]} : vector<8x128xf32> to vector<8x32xf32>
    %1078 = arith.negf %1077 : vector<8x32xf32>
    %1079 = math.exp %1078 : vector<8x32xf32>
    %cst_636 = arith.constant 1.000000e+00 : f32
    %1080 = vector.broadcast %cst_636 : f32 to vector<8x32xf32>
    %1081 = arith.addf %1080, %1079 : vector<8x32xf32>
    %1082 = arith.divf %1080, %1081 : vector<8x32xf32>
    %c0_637 = arith.constant 0 : index
    %c0_638 = arith.constant 0 : index
    %1083 = vector.load %arg19[%c0_637, %c0_638] : memref<8x32xf32, #tpu.memory_space<vmem>>, vector<8x32xf32>
    %1084 = arith.mulf %1074, %1083 : vector<8x32xf32>
    %1085 = arith.mulf %1068, %1076 : vector<8x32xf32>
    %1086 = arith.addf %1084, %1085 : vector<8x32xf32>
    %1087 = math.tanh %1086 : vector<8x32xf32>
    %1088 = arith.mulf %1082, %1087 : vector<8x32xf32>
    %c0_639 = arith.constant 0 : index
    %c0_640 = arith.constant 0 : index
    %1089 = vector.load %arg18[%c0_639, %c0_640] : memref<8x32xf32, #tpu.memory_space<vmem>>, vector<8x32xf32>
    tpu.vector_store %arg18[%c0_639, %c0_640], %1088 {strides = array<i32>} : memref<8x32xf32, #tpu.memory_space<vmem>>, vector<8x32xf32>,
    %c0_641 = arith.constant 0 : index
    %c0_642 = arith.constant 0 : index
    %1090 = vector.load %arg19[%c0_641, %c0_642] : memref<8x32xf32, #tpu.memory_space<vmem>>, vector<8x32xf32>
    tpu.vector_store %arg19[%c0_641, %c0_642], %1086 {strides = array<i32>} : memref<8x32xf32, #tpu.memory_space<vmem>>, vector<8x32xf32>,
    %c1_643 = arith.constant 1 : index
    %1091 = arith.index_cast %1055 : i32 to index
    %c0_644 = arith.constant 0 : index
    %c0_645 = arith.constant 0 : index
    %1092 = vector.load %arg17[%c1_643, %1091, %c0_644, %c0_645] : memref<2x8x8x32xf32, #tpu.memory_space<vmem>>, vector<1x1x8x32xf32>
    %1093 = vector.shape_cast %1092 : vector<1x1x8x32xf32> to vector<8x32xf32>
    %1094 = vector.shape_cast %1088 : vector<8x32xf32> to vector<1x1x8x32xf32>
    tpu.vector_store %arg17[%c1_643, %1091, %c0_644, %c0_645], %1094 {strides = array<i32>} : memref<2x8x8x32xf32, #tpu.memory_space<vmem>>, vector<1x1x8x32xf32>,
    %c1_i32_646 = arith.constant 1 : i32
    %c7_i32_647 = arith.constant 7 : i32
    %1095 = arith.subi %c7_i32_647, %c1_i32_646 : i32
    %c1_648 = arith.constant 1 : index
    %1096 = arith.index_cast %1095 : i32 to index
    %c0_649 = arith.constant 0 : index
    %c0_650 = arith.constant 0 : index
    %1097 = vector.load %arg16[%c1_648, %1096, %c0_649, %c0_650] : memref<2x8x8x128xf32, #tpu.memory_space<vmem>>, vector<1x1x8x128xf32>
    %1098 = vector.shape_cast %1097 : vector<1x1x8x128xf32> to vector<8x128xf32>
    %c0_651 = arith.constant 0 : index
    %c0_652 = arith.constant 0 : index
    %1099 = vector.load %arg18[%c0_651, %c0_652] : memref<8x32xf32, #tpu.memory_space<vmem>>, vector<8x32xf32>
    %c0_653 = arith.constant 0 : index
    %c0_654 = arith.constant 0 : index
    %1100 = vector.load %arg11[%c0_653, %c0_654] : memref<32x128xf32, #tpu.memory_space<vmem>>, vector<32x128xf32>
    %cst_655 = arith.constant dense<0.000000e+00> : vector<8x128xf32>
    %1101 = tpu.matmul %1099, %1100, %cst_655 {dimension_numbers = #tpu.dot_dimension_numbers<[1], [0], [0], [1], [0, 0, 1, 1], [], []>} : vector<8x32xf32>, vector<32x128xf32>, vector<8x128xf32> -> vector<8x128xf32>
    %1102 = arith.addf %1098, %1101 : vector<8x128xf32>
    %1103 = vector.extract_strided_slice %1102 {offsets = [0, 0], sizes = [8, 32], strides = [1, 1]} : vector<8x128xf32> to vector<8x32xf32>
    %1104 = arith.negf %1103 : vector<8x32xf32>
    %1105 = math.exp %1104 : vector<8x32xf32>
    %cst_656 = arith.constant 1.000000e+00 : f32
    %1106 = vector.broadcast %cst_656 : f32 to vector<8x32xf32>
    %1107 = arith.addf %1106, %1105 : vector<8x32xf32>
    %1108 = arith.divf %1106, %1107 : vector<8x32xf32>
    %1109 = vector.extract_strided_slice %1102 {offsets = [0, 32], sizes = [8, 32], strides = [1, 1]} : vector<8x128xf32> to vector<8x32xf32>
    %1110 = arith.negf %1109 : vector<8x32xf32>
    %1111 = math.exp %1110 : vector<8x32xf32>
    %cst_657 = arith.constant 1.000000e+00 : f32
    %1112 = vector.broadcast %cst_657 : f32 to vector<8x32xf32>
    %1113 = arith.addf %1112, %1111 : vector<8x32xf32>
    %1114 = arith.divf %1112, %1113 : vector<8x32xf32>
    %1115 = vector.extract_strided_slice %1102 {offsets = [0, 64], sizes = [8, 32], strides = [1, 1]} : vector<8x128xf32> to vector<8x32xf32>
    %1116 = math.tanh %1115 : vector<8x32xf32>
    %1117 = vector.extract_strided_slice %1102 {offsets = [0, 96], sizes = [8, 32], strides = [1, 1]} : vector<8x128xf32> to vector<8x32xf32>
    %1118 = arith.negf %1117 : vector<8x32xf32>
    %1119 = math.exp %1118 : vector<8x32xf32>
    %cst_658 = arith.constant 1.000000e+00 : f32
    %1120 = vector.broadcast %cst_658 : f32 to vector<8x32xf32>
    %1121 = arith.addf %1120, %1119 : vector<8x32xf32>
    %1122 = arith.divf %1120, %1121 : vector<8x32xf32>
    %c0_659 = arith.constant 0 : index
    %c0_660 = arith.constant 0 : index
    %1123 = vector.load %arg19[%c0_659, %c0_660] : memref<8x32xf32, #tpu.memory_space<vmem>>, vector<8x32xf32>
    %1124 = arith.mulf %1114, %1123 : vector<8x32xf32>
    %1125 = arith.mulf %1108, %1116 : vector<8x32xf32>
    %1126 = arith.addf %1124, %1125 : vector<8x32xf32>
    %1127 = math.tanh %1126 : vector<8x32xf32>
    %1128 = arith.mulf %1122, %1127 : vector<8x32xf32>
    %c0_661 = arith.constant 0 : index
    %c0_662 = arith.constant 0 : index
    %1129 = vector.load %arg18[%c0_661, %c0_662] : memref<8x32xf32, #tpu.memory_space<vmem>>, vector<8x32xf32>
    tpu.vector_store %arg18[%c0_661, %c0_662], %1128 {strides = array<i32>} : memref<8x32xf32, #tpu.memory_space<vmem>>, vector<8x32xf32>,
    %c0_663 = arith.constant 0 : index
    %c0_664 = arith.constant 0 : index
    %1130 = vector.load %arg19[%c0_663, %c0_664] : memref<8x32xf32, #tpu.memory_space<vmem>>, vector<8x32xf32>
    tpu.vector_store %arg19[%c0_663, %c0_664], %1126 {strides = array<i32>} : memref<8x32xf32, #tpu.memory_space<vmem>>, vector<8x32xf32>,
    %c1_665 = arith.constant 1 : index
    %1131 = arith.index_cast %1095 : i32 to index
    %c0_666 = arith.constant 0 : index
    %c0_667 = arith.constant 0 : index
    %1132 = vector.load %arg17[%c1_665, %1131, %c0_666, %c0_667] : memref<2x8x8x32xf32, #tpu.memory_space<vmem>>, vector<1x1x8x32xf32>
    %1133 = vector.shape_cast %1132 : vector<1x1x8x32xf32> to vector<8x32xf32>
    %1134 = vector.shape_cast %1128 : vector<8x32xf32> to vector<1x1x8x32xf32>
    tpu.vector_store %arg17[%c1_665, %1131, %c0_666, %c0_667], %1134 {strides = array<i32>} : memref<2x8x8x32xf32, #tpu.memory_space<vmem>>, vector<1x1x8x32xf32>,
    %c2_i32_668 = arith.constant 2 : i32
    %c7_i32_669 = arith.constant 7 : i32
    %1135 = arith.subi %c7_i32_669, %c2_i32_668 : i32
    %c1_670 = arith.constant 1 : index
    %1136 = arith.index_cast %1135 : i32 to index
    %c0_671 = arith.constant 0 : index
    %c0_672 = arith.constant 0 : index
    %1137 = vector.load %arg16[%c1_670, %1136, %c0_671, %c0_672] : memref<2x8x8x128xf32, #tpu.memory_space<vmem>>, vector<1x1x8x128xf32>
    %1138 = vector.shape_cast %1137 : vector<1x1x8x128xf32> to vector<8x128xf32>
    %c0_673 = arith.constant 0 : index
    %c0_674 = arith.constant 0 : index
    %1139 = vector.load %arg18[%c0_673, %c0_674] : memref<8x32xf32, #tpu.memory_space<vmem>>, vector<8x32xf32>
    %c0_675 = arith.constant 0 : index
    %c0_676 = arith.constant 0 : index
    %1140 = vector.load %arg11[%c0_675, %c0_676] : memref<32x128xf32, #tpu.memory_space<vmem>>, vector<32x128xf32>
    %cst_677 = arith.constant dense<0.000000e+00> : vector<8x128xf32>
    %1141 = tpu.matmul %1139, %1140, %cst_677 {dimension_numbers = #tpu.dot_dimension_numbers<[1], [0], [0], [1], [0, 0, 1, 1], [], []>} : vector<8x32xf32>, vector<32x128xf32>, vector<8x128xf32> -> vector<8x128xf32>
    %1142 = arith.addf %1138, %1141 : vector<8x128xf32>
    %1143 = vector.extract_strided_slice %1142 {offsets = [0, 0], sizes = [8, 32], strides = [1, 1]} : vector<8x128xf32> to vector<8x32xf32>
    %1144 = arith.negf %1143 : vector<8x32xf32>
    %1145 = math.exp %1144 : vector<8x32xf32>
    %cst_678 = arith.constant 1.000000e+00 : f32
    %1146 = vector.broadcast %cst_678 : f32 to vector<8x32xf32>
    %1147 = arith.addf %1146, %1145 : vector<8x32xf32>
    %1148 = arith.divf %1146, %1147 : vector<8x32xf32>
    %1149 = vector.extract_strided_slice %1142 {offsets = [0, 32], sizes = [8, 32], strides = [1, 1]} : vector<8x128xf32> to vector<8x32xf32>
    %1150 = arith.negf %1149 : vector<8x32xf32>
    %1151 = math.exp %1150 : vector<8x32xf32>
    %cst_679 = arith.constant 1.000000e+00 : f32
    %1152 = vector.broadcast %cst_679 : f32 to vector<8x32xf32>
    %1153 = arith.addf %1152, %1151 : vector<8x32xf32>
    %1154 = arith.divf %1152, %1153 : vector<8x32xf32>
    %1155 = vector.extract_strided_slice %1142 {offsets = [0, 64], sizes = [8, 32], strides = [1, 1]} : vector<8x128xf32> to vector<8x32xf32>
    %1156 = math.tanh %1155 : vector<8x32xf32>
    %1157 = vector.extract_strided_slice %1142 {offsets = [0, 96], sizes = [8, 32], strides = [1, 1]} : vector<8x128xf32> to vector<8x32xf32>
    %1158 = arith.negf %1157 : vector<8x32xf32>
    %1159 = math.exp %1158 : vector<8x32xf32>
    %cst_680 = arith.constant 1.000000e+00 : f32
    %1160 = vector.broadcast %cst_680 : f32 to vector<8x32xf32>
    %1161 = arith.addf %1160, %1159 : vector<8x32xf32>
    %1162 = arith.divf %1160, %1161 : vector<8x32xf32>
    %c0_681 = arith.constant 0 : index
    %c0_682 = arith.constant 0 : index
    %1163 = vector.load %arg19[%c0_681, %c0_682] : memref<8x32xf32, #tpu.memory_space<vmem>>, vector<8x32xf32>
    %1164 = arith.mulf %1154, %1163 : vector<8x32xf32>
    %1165 = arith.mulf %1148, %1156 : vector<8x32xf32>
    %1166 = arith.addf %1164, %1165 : vector<8x32xf32>
    %1167 = math.tanh %1166 : vector<8x32xf32>
    %1168 = arith.mulf %1162, %1167 : vector<8x32xf32>
    %c0_683 = arith.constant 0 : index
    %c0_684 = arith.constant 0 : index
    %1169 = vector.load %arg18[%c0_683, %c0_684] : memref<8x32xf32, #tpu.memory_space<vmem>>, vector<8x32xf32>
    tpu.vector_store %arg18[%c0_683, %c0_684], %1168 {strides = array<i32>} : memref<8x32xf32, #tpu.memory_space<vmem>>, vector<8x32xf32>,
    %c0_685 = arith.constant 0 : index
    %c0_686 = arith.constant 0 : index
    %1170 = vector.load %arg19[%c0_685, %c0_686] : memref<8x32xf32, #tpu.memory_space<vmem>>, vector<8x32xf32>
    tpu.vector_store %arg19[%c0_685, %c0_686], %1166 {strides = array<i32>} : memref<8x32xf32, #tpu.memory_space<vmem>>, vector<8x32xf32>,
    %c1_687 = arith.constant 1 : index
    %1171 = arith.index_cast %1135 : i32 to index
    %c0_688 = arith.constant 0 : index
    %c0_689 = arith.constant 0 : index
    %1172 = vector.load %arg17[%c1_687, %1171, %c0_688, %c0_689] : memref<2x8x8x32xf32, #tpu.memory_space<vmem>>, vector<1x1x8x32xf32>
    %1173 = vector.shape_cast %1172 : vector<1x1x8x32xf32> to vector<8x32xf32>
    %1174 = vector.shape_cast %1168 : vector<8x32xf32> to vector<1x1x8x32xf32>
    tpu.vector_store %arg17[%c1_687, %1171, %c0_688, %c0_689], %1174 {strides = array<i32>} : memref<2x8x8x32xf32, #tpu.memory_space<vmem>>, vector<1x1x8x32xf32>,
    %c3_i32_690 = arith.constant 3 : i32
    %c7_i32_691 = arith.constant 7 : i32
    %1175 = arith.subi %c7_i32_691, %c3_i32_690 : i32
    %c1_692 = arith.constant 1 : index
    %1176 = arith.index_cast %1175 : i32 to index
    %c0_693 = arith.constant 0 : index
    %c0_694 = arith.constant 0 : index
    %1177 = vector.load %arg16[%c1_692, %1176, %c0_693, %c0_694] : memref<2x8x8x128xf32, #tpu.memory_space<vmem>>, vector<1x1x8x128xf32>
    %1178 = vector.shape_cast %1177 : vector<1x1x8x128xf32> to vector<8x128xf32>
    %c0_695 = arith.constant 0 : index
    %c0_696 = arith.constant 0 : index
    %1179 = vector.load %arg18[%c0_695, %c0_696] : memref<8x32xf32, #tpu.memory_space<vmem>>, vector<8x32xf32>
    %c0_697 = arith.constant 0 : index
    %c0_698 = arith.constant 0 : index
    %1180 = vector.load %arg11[%c0_697, %c0_698] : memref<32x128xf32, #tpu.memory_space<vmem>>, vector<32x128xf32>
    %cst_699 = arith.constant dense<0.000000e+00> : vector<8x128xf32>
    %1181 = tpu.matmul %1179, %1180, %cst_699 {dimension_numbers = #tpu.dot_dimension_numbers<[1], [0], [0], [1], [0, 0, 1, 1], [], []>} : vector<8x32xf32>, vector<32x128xf32>, vector<8x128xf32> -> vector<8x128xf32>
    %1182 = arith.addf %1178, %1181 : vector<8x128xf32>
    %1183 = vector.extract_strided_slice %1182 {offsets = [0, 0], sizes = [8, 32], strides = [1, 1]} : vector<8x128xf32> to vector<8x32xf32>
    %1184 = arith.negf %1183 : vector<8x32xf32>
    %1185 = math.exp %1184 : vector<8x32xf32>
    %cst_700 = arith.constant 1.000000e+00 : f32
    %1186 = vector.broadcast %cst_700 : f32 to vector<8x32xf32>
    %1187 = arith.addf %1186, %1185 : vector<8x32xf32>
    %1188 = arith.divf %1186, %1187 : vector<8x32xf32>
    %1189 = vector.extract_strided_slice %1182 {offsets = [0, 32], sizes = [8, 32], strides = [1, 1]} : vector<8x128xf32> to vector<8x32xf32>
    %1190 = arith.negf %1189 : vector<8x32xf32>
    %1191 = math.exp %1190 : vector<8x32xf32>
    %cst_701 = arith.constant 1.000000e+00 : f32
    %1192 = vector.broadcast %cst_701 : f32 to vector<8x32xf32>
    %1193 = arith.addf %1192, %1191 : vector<8x32xf32>
    %1194 = arith.divf %1192, %1193 : vector<8x32xf32>
    %1195 = vector.extract_strided_slice %1182 {offsets = [0, 64], sizes = [8, 32], strides = [1, 1]} : vector<8x128xf32> to vector<8x32xf32>
    %1196 = math.tanh %1195 : vector<8x32xf32>
    %1197 = vector.extract_strided_slice %1182 {offsets = [0, 96], sizes = [8, 32], strides = [1, 1]} : vector<8x128xf32> to vector<8x32xf32>
    %1198 = arith.negf %1197 : vector<8x32xf32>
    %1199 = math.exp %1198 : vector<8x32xf32>
    %cst_702 = arith.constant 1.000000e+00 : f32
    %1200 = vector.broadcast %cst_702 : f32 to vector<8x32xf32>
    %1201 = arith.addf %1200, %1199 : vector<8x32xf32>
    %1202 = arith.divf %1200, %1201 : vector<8x32xf32>
    %c0_703 = arith.constant 0 : index
    %c0_704 = arith.constant 0 : index
    %1203 = vector.load %arg19[%c0_703, %c0_704] : memref<8x32xf32, #tpu.memory_space<vmem>>, vector<8x32xf32>
    %1204 = arith.mulf %1194, %1203 : vector<8x32xf32>
    %1205 = arith.mulf %1188, %1196 : vector<8x32xf32>
    %1206 = arith.addf %1204, %1205 : vector<8x32xf32>
    %1207 = math.tanh %1206 : vector<8x32xf32>
    %1208 = arith.mulf %1202, %1207 : vector<8x32xf32>
    %c0_705 = arith.constant 0 : index
    %c0_706 = arith.constant 0 : index
    %1209 = vector.load %arg18[%c0_705, %c0_706] : memref<8x32xf32, #tpu.memory_space<vmem>>, vector<8x32xf32>
    tpu.vector_store %arg18[%c0_705, %c0_706], %1208 {strides = array<i32>} : memref<8x32xf32, #tpu.memory_space<vmem>>, vector<8x32xf32>,
    %c0_707 = arith.constant 0 : index
    %c0_708 = arith.constant 0 : index
    %1210 = vector.load %arg19[%c0_707, %c0_708] : memref<8x32xf32, #tpu.memory_space<vmem>>, vector<8x32xf32>
    tpu.vector_store %arg19[%c0_707, %c0_708], %1206 {strides = array<i32>} : memref<8x32xf32, #tpu.memory_space<vmem>>, vector<8x32xf32>,
    %c1_709 = arith.constant 1 : index
    %1211 = arith.index_cast %1175 : i32 to index
    %c0_710 = arith.constant 0 : index
    %c0_711 = arith.constant 0 : index
    %1212 = vector.load %arg17[%c1_709, %1211, %c0_710, %c0_711] : memref<2x8x8x32xf32, #tpu.memory_space<vmem>>, vector<1x1x8x32xf32>
    %1213 = vector.shape_cast %1212 : vector<1x1x8x32xf32> to vector<8x32xf32>
    %1214 = vector.shape_cast %1208 : vector<8x32xf32> to vector<1x1x8x32xf32>
    tpu.vector_store %arg17[%c1_709, %1211, %c0_710, %c0_711], %1214 {strides = array<i32>} : memref<2x8x8x32xf32, #tpu.memory_space<vmem>>, vector<1x1x8x32xf32>,
    %c4_i32_712 = arith.constant 4 : i32
    %c7_i32_713 = arith.constant 7 : i32
    %1215 = arith.subi %c7_i32_713, %c4_i32_712 : i32
    %c1_714 = arith.constant 1 : index
    %1216 = arith.index_cast %1215 : i32 to index
    %c0_715 = arith.constant 0 : index
    %c0_716 = arith.constant 0 : index
    %1217 = vector.load %arg16[%c1_714, %1216, %c0_715, %c0_716] : memref<2x8x8x128xf32, #tpu.memory_space<vmem>>, vector<1x1x8x128xf32>
    %1218 = vector.shape_cast %1217 : vector<1x1x8x128xf32> to vector<8x128xf32>
    %c0_717 = arith.constant 0 : index
    %c0_718 = arith.constant 0 : index
    %1219 = vector.load %arg18[%c0_717, %c0_718] : memref<8x32xf32, #tpu.memory_space<vmem>>, vector<8x32xf32>
    %c0_719 = arith.constant 0 : index
    %c0_720 = arith.constant 0 : index
    %1220 = vector.load %arg11[%c0_719, %c0_720] : memref<32x128xf32, #tpu.memory_space<vmem>>, vector<32x128xf32>
    %cst_721 = arith.constant dense<0.000000e+00> : vector<8x128xf32>
    %1221 = tpu.matmul %1219, %1220, %cst_721 {dimension_numbers = #tpu.dot_dimension_numbers<[1], [0], [0], [1], [0, 0, 1, 1], [], []>} : vector<8x32xf32>, vector<32x128xf32>, vector<8x128xf32> -> vector<8x128xf32>
    %1222 = arith.addf %1218, %1221 : vector<8x128xf32>
    %1223 = vector.extract_strided_slice %1222 {offsets = [0, 0], sizes = [8, 32], strides = [1, 1]} : vector<8x128xf32> to vector<8x32xf32>
    %1224 = arith.negf %1223 : vector<8x32xf32>
    %1225 = math.exp %1224 : vector<8x32xf32>
    %cst_722 = arith.constant 1.000000e+00 : f32
    %1226 = vector.broadcast %cst_722 : f32 to vector<8x32xf32>
    %1227 = arith.addf %1226, %1225 : vector<8x32xf32>
    %1228 = arith.divf %1226, %1227 : vector<8x32xf32>
    %1229 = vector.extract_strided_slice %1222 {offsets = [0, 32], sizes = [8, 32], strides = [1, 1]} : vector<8x128xf32> to vector<8x32xf32>
    %1230 = arith.negf %1229 : vector<8x32xf32>
    %1231 = math.exp %1230 : vector<8x32xf32>
    %cst_723 = arith.constant 1.000000e+00 : f32
    %1232 = vector.broadcast %cst_723 : f32 to vector<8x32xf32>
    %1233 = arith.addf %1232, %1231 : vector<8x32xf32>
    %1234 = arith.divf %1232, %1233 : vector<8x32xf32>
    %1235 = vector.extract_strided_slice %1222 {offsets = [0, 64], sizes = [8, 32], strides = [1, 1]} : vector<8x128xf32> to vector<8x32xf32>
    %1236 = math.tanh %1235 : vector<8x32xf32>
    %1237 = vector.extract_strided_slice %1222 {offsets = [0, 96], sizes = [8, 32], strides = [1, 1]} : vector<8x128xf32> to vector<8x32xf32>
    %1238 = arith.negf %1237 : vector<8x32xf32>
    %1239 = math.exp %1238 : vector<8x32xf32>
    %cst_724 = arith.constant 1.000000e+00 : f32
    %1240 = vector.broadcast %cst_724 : f32 to vector<8x32xf32>
    %1241 = arith.addf %1240, %1239 : vector<8x32xf32>
    %1242 = arith.divf %1240, %1241 : vector<8x32xf32>
    %c0_725 = arith.constant 0 : index
    %c0_726 = arith.constant 0 : index
    %1243 = vector.load %arg19[%c0_725, %c0_726] : memref<8x32xf32, #tpu.memory_space<vmem>>, vector<8x32xf32>
    %1244 = arith.mulf %1234, %1243 : vector<8x32xf32>
    %1245 = arith.mulf %1228, %1236 : vector<8x32xf32>
    %1246 = arith.addf %1244, %1245 : vector<8x32xf32>
    %1247 = math.tanh %1246 : vector<8x32xf32>
    %1248 = arith.mulf %1242, %1247 : vector<8x32xf32>
    %c0_727 = arith.constant 0 : index
    %c0_728 = arith.constant 0 : index
    %1249 = vector.load %arg18[%c0_727, %c0_728] : memref<8x32xf32, #tpu.memory_space<vmem>>, vector<8x32xf32>
    tpu.vector_store %arg18[%c0_727, %c0_728], %1248 {strides = array<i32>} : memref<8x32xf32, #tpu.memory_space<vmem>>, vector<8x32xf32>,
    %c0_729 = arith.constant 0 : index
    %c0_730 = arith.constant 0 : index
    %1250 = vector.load %arg19[%c0_729, %c0_730] : memref<8x32xf32, #tpu.memory_space<vmem>>, vector<8x32xf32>
    tpu.vector_store %arg19[%c0_729, %c0_730], %1246 {strides = array<i32>} : memref<8x32xf32, #tpu.memory_space<vmem>>, vector<8x32xf32>,
    %c1_731 = arith.constant 1 : index
    %1251 = arith.index_cast %1215 : i32 to index
    %c0_732 = arith.constant 0 : index
    %c0_733 = arith.constant 0 : index
    %1252 = vector.load %arg17[%c1_731, %1251, %c0_732, %c0_733] : memref<2x8x8x32xf32, #tpu.memory_space<vmem>>, vector<1x1x8x32xf32>
    %1253 = vector.shape_cast %1252 : vector<1x1x8x32xf32> to vector<8x32xf32>
    %1254 = vector.shape_cast %1248 : vector<8x32xf32> to vector<1x1x8x32xf32>
    tpu.vector_store %arg17[%c1_731, %1251, %c0_732, %c0_733], %1254 {strides = array<i32>} : memref<2x8x8x32xf32, #tpu.memory_space<vmem>>, vector<1x1x8x32xf32>,
    %c5_i32_734 = arith.constant 5 : i32
    %c7_i32_735 = arith.constant 7 : i32
    %1255 = arith.subi %c7_i32_735, %c5_i32_734 : i32
    %c1_736 = arith.constant 1 : index
    %1256 = arith.index_cast %1255 : i32 to index
    %c0_737 = arith.constant 0 : index
    %c0_738 = arith.constant 0 : index
    %1257 = vector.load %arg16[%c1_736, %1256, %c0_737, %c0_738] : memref<2x8x8x128xf32, #tpu.memory_space<vmem>>, vector<1x1x8x128xf32>
    %1258 = vector.shape_cast %1257 : vector<1x1x8x128xf32> to vector<8x128xf32>
    %c0_739 = arith.constant 0 : index
    %c0_740 = arith.constant 0 : index
    %1259 = vector.load %arg18[%c0_739, %c0_740] : memref<8x32xf32, #tpu.memory_space<vmem>>, vector<8x32xf32>
    %c0_741 = arith.constant 0 : index
    %c0_742 = arith.constant 0 : index
    %1260 = vector.load %arg11[%c0_741, %c0_742] : memref<32x128xf32, #tpu.memory_space<vmem>>, vector<32x128xf32>
    %cst_743 = arith.constant dense<0.000000e+00> : vector<8x128xf32>
    %1261 = tpu.matmul %1259, %1260, %cst_743 {dimension_numbers = #tpu.dot_dimension_numbers<[1], [0], [0], [1], [0, 0, 1, 1], [], []>} : vector<8x32xf32>, vector<32x128xf32>, vector<8x128xf32> -> vector<8x128xf32>
    %1262 = arith.addf %1258, %1261 : vector<8x128xf32>
    %1263 = vector.extract_strided_slice %1262 {offsets = [0, 0], sizes = [8, 32], strides = [1, 1]} : vector<8x128xf32> to vector<8x32xf32>
    %1264 = arith.negf %1263 : vector<8x32xf32>
    %1265 = math.exp %1264 : vector<8x32xf32>
    %cst_744 = arith.constant 1.000000e+00 : f32
    %1266 = vector.broadcast %cst_744 : f32 to vector<8x32xf32>
    %1267 = arith.addf %1266, %1265 : vector<8x32xf32>
    %1268 = arith.divf %1266, %1267 : vector<8x32xf32>
    %1269 = vector.extract_strided_slice %1262 {offsets = [0, 32], sizes = [8, 32], strides = [1, 1]} : vector<8x128xf32> to vector<8x32xf32>
    %1270 = arith.negf %1269 : vector<8x32xf32>
    %1271 = math.exp %1270 : vector<8x32xf32>
    %cst_745 = arith.constant 1.000000e+00 : f32
    %1272 = vector.broadcast %cst_745 : f32 to vector<8x32xf32>
    %1273 = arith.addf %1272, %1271 : vector<8x32xf32>
    %1274 = arith.divf %1272, %1273 : vector<8x32xf32>
    %1275 = vector.extract_strided_slice %1262 {offsets = [0, 64], sizes = [8, 32], strides = [1, 1]} : vector<8x128xf32> to vector<8x32xf32>
    %1276 = math.tanh %1275 : vector<8x32xf32>
    %1277 = vector.extract_strided_slice %1262 {offsets = [0, 96], sizes = [8, 32], strides = [1, 1]} : vector<8x128xf32> to vector<8x32xf32>
    %1278 = arith.negf %1277 : vector<8x32xf32>
    %1279 = math.exp %1278 : vector<8x32xf32>
    %cst_746 = arith.constant 1.000000e+00 : f32
    %1280 = vector.broadcast %cst_746 : f32 to vector<8x32xf32>
    %1281 = arith.addf %1280, %1279 : vector<8x32xf32>
    %1282 = arith.divf %1280, %1281 : vector<8x32xf32>
    %c0_747 = arith.constant 0 : index
    %c0_748 = arith.constant 0 : index
    %1283 = vector.load %arg19[%c0_747, %c0_748] : memref<8x32xf32, #tpu.memory_space<vmem>>, vector<8x32xf32>
    %1284 = arith.mulf %1274, %1283 : vector<8x32xf32>
    %1285 = arith.mulf %1268, %1276 : vector<8x32xf32>
    %1286 = arith.addf %1284, %1285 : vector<8x32xf32>
    %1287 = math.tanh %1286 : vector<8x32xf32>
    %1288 = arith.mulf %1282, %1287 : vector<8x32xf32>
    %c0_749 = arith.constant 0 : index
    %c0_750 = arith.constant 0 : index
    %1289 = vector.load %arg18[%c0_749, %c0_750] : memref<8x32xf32, #tpu.memory_space<vmem>>, vector<8x32xf32>
    tpu.vector_store %arg18[%c0_749, %c0_750], %1288 {strides = array<i32>} : memref<8x32xf32, #tpu.memory_space<vmem>>, vector<8x32xf32>,
    %c0_751 = arith.constant 0 : index
    %c0_752 = arith.constant 0 : index
    %1290 = vector.load %arg19[%c0_751, %c0_752] : memref<8x32xf32, #tpu.memory_space<vmem>>, vector<8x32xf32>
    tpu.vector_store %arg19[%c0_751, %c0_752], %1286 {strides = array<i32>} : memref<8x32xf32, #tpu.memory_space<vmem>>, vector<8x32xf32>,
    %c1_753 = arith.constant 1 : index
    %1291 = arith.index_cast %1255 : i32 to index
    %c0_754 = arith.constant 0 : index
    %c0_755 = arith.constant 0 : index
    %1292 = vector.load %arg17[%c1_753, %1291, %c0_754, %c0_755] : memref<2x8x8x32xf32, #tpu.memory_space<vmem>>, vector<1x1x8x32xf32>
    %1293 = vector.shape_cast %1292 : vector<1x1x8x32xf32> to vector<8x32xf32>
    %1294 = vector.shape_cast %1288 : vector<8x32xf32> to vector<1x1x8x32xf32>
    tpu.vector_store %arg17[%c1_753, %1291, %c0_754, %c0_755], %1294 {strides = array<i32>} : memref<2x8x8x32xf32, #tpu.memory_space<vmem>>, vector<1x1x8x32xf32>,
    %c6_i32_756 = arith.constant 6 : i32
    %c7_i32_757 = arith.constant 7 : i32
    %1295 = arith.subi %c7_i32_757, %c6_i32_756 : i32
    %c1_758 = arith.constant 1 : index
    %1296 = arith.index_cast %1295 : i32 to index
    %c0_759 = arith.constant 0 : index
    %c0_760 = arith.constant 0 : index
    %1297 = vector.load %arg16[%c1_758, %1296, %c0_759, %c0_760] : memref<2x8x8x128xf32, #tpu.memory_space<vmem>>, vector<1x1x8x128xf32>
    %1298 = vector.shape_cast %1297 : vector<1x1x8x128xf32> to vector<8x128xf32>
    %c0_761 = arith.constant 0 : index
    %c0_762 = arith.constant 0 : index
    %1299 = vector.load %arg18[%c0_761, %c0_762] : memref<8x32xf32, #tpu.memory_space<vmem>>, vector<8x32xf32>
    %c0_763 = arith.constant 0 : index
    %c0_764 = arith.constant 0 : index
    %1300 = vector.load %arg11[%c0_763, %c0_764] : memref<32x128xf32, #tpu.memory_space<vmem>>, vector<32x128xf32>
    %cst_765 = arith.constant dense<0.000000e+00> : vector<8x128xf32>
    %1301 = tpu.matmul %1299, %1300, %cst_765 {dimension_numbers = #tpu.dot_dimension_numbers<[1], [0], [0], [1], [0, 0, 1, 1], [], []>} : vector<8x32xf32>, vector<32x128xf32>, vector<8x128xf32> -> vector<8x128xf32>
    %1302 = arith.addf %1298, %1301 : vector<8x128xf32>
    %1303 = vector.extract_strided_slice %1302 {offsets = [0, 0], sizes = [8, 32], strides = [1, 1]} : vector<8x128xf32> to vector<8x32xf32>
    %1304 = arith.negf %1303 : vector<8x32xf32>
    %1305 = math.exp %1304 : vector<8x32xf32>
    %cst_766 = arith.constant 1.000000e+00 : f32
    %1306 = vector.broadcast %cst_766 : f32 to vector<8x32xf32>
    %1307 = arith.addf %1306, %1305 : vector<8x32xf32>
    %1308 = arith.divf %1306, %1307 : vector<8x32xf32>
    %1309 = vector.extract_strided_slice %1302 {offsets = [0, 32], sizes = [8, 32], strides = [1, 1]} : vector<8x128xf32> to vector<8x32xf32>
    %1310 = arith.negf %1309 : vector<8x32xf32>
    %1311 = math.exp %1310 : vector<8x32xf32>
    %cst_767 = arith.constant 1.000000e+00 : f32
    %1312 = vector.broadcast %cst_767 : f32 to vector<8x32xf32>
    %1313 = arith.addf %1312, %1311 : vector<8x32xf32>
    %1314 = arith.divf %1312, %1313 : vector<8x32xf32>
    %1315 = vector.extract_strided_slice %1302 {offsets = [0, 64], sizes = [8, 32], strides = [1, 1]} : vector<8x128xf32> to vector<8x32xf32>
    %1316 = math.tanh %1315 : vector<8x32xf32>
    %1317 = vector.extract_strided_slice %1302 {offsets = [0, 96], sizes = [8, 32], strides = [1, 1]} : vector<8x128xf32> to vector<8x32xf32>
    %1318 = arith.negf %1317 : vector<8x32xf32>
    %1319 = math.exp %1318 : vector<8x32xf32>
    %cst_768 = arith.constant 1.000000e+00 : f32
    %1320 = vector.broadcast %cst_768 : f32 to vector<8x32xf32>
    %1321 = arith.addf %1320, %1319 : vector<8x32xf32>
    %1322 = arith.divf %1320, %1321 : vector<8x32xf32>
    %c0_769 = arith.constant 0 : index
    %c0_770 = arith.constant 0 : index
    %1323 = vector.load %arg19[%c0_769, %c0_770] : memref<8x32xf32, #tpu.memory_space<vmem>>, vector<8x32xf32>
    %1324 = arith.mulf %1314, %1323 : vector<8x32xf32>
    %1325 = arith.mulf %1308, %1316 : vector<8x32xf32>
    %1326 = arith.addf %1324, %1325 : vector<8x32xf32>
    %1327 = math.tanh %1326 : vector<8x32xf32>
    %1328 = arith.mulf %1322, %1327 : vector<8x32xf32>
    %c0_771 = arith.constant 0 : index
    %c0_772 = arith.constant 0 : index
    %1329 = vector.load %arg18[%c0_771, %c0_772] : memref<8x32xf32, #tpu.memory_space<vmem>>, vector<8x32xf32>
    tpu.vector_store %arg18[%c0_771, %c0_772], %1328 {strides = array<i32>} : memref<8x32xf32, #tpu.memory_space<vmem>>, vector<8x32xf32>,
    %c0_773 = arith.constant 0 : index
    %c0_774 = arith.constant 0 : index
    %1330 = vector.load %arg19[%c0_773, %c0_774] : memref<8x32xf32, #tpu.memory_space<vmem>>, vector<8x32xf32>
    tpu.vector_store %arg19[%c0_773, %c0_774], %1326 {strides = array<i32>} : memref<8x32xf32, #tpu.memory_space<vmem>>, vector<8x32xf32>,
    %c1_775 = arith.constant 1 : index
    %1331 = arith.index_cast %1295 : i32 to index
    %c0_776 = arith.constant 0 : index
    %c0_777 = arith.constant 0 : index
    %1332 = vector.load %arg17[%c1_775, %1331, %c0_776, %c0_777] : memref<2x8x8x32xf32, #tpu.memory_space<vmem>>, vector<1x1x8x32xf32>
    %1333 = vector.shape_cast %1332 : vector<1x1x8x32xf32> to vector<8x32xf32>
    %1334 = vector.shape_cast %1328 : vector<8x32xf32> to vector<1x1x8x32xf32>
    tpu.vector_store %arg17[%c1_775, %1331, %c0_776, %c0_777], %1334 {strides = array<i32>} : memref<2x8x8x32xf32, #tpu.memory_space<vmem>>, vector<1x1x8x32xf32>,
    %c7_i32_778 = arith.constant 7 : i32
    %c7_i32_779 = arith.constant 7 : i32
    %1335 = arith.subi %c7_i32_779, %c7_i32_778 : i32
    %c1_780 = arith.constant 1 : index
    %1336 = arith.index_cast %1335 : i32 to index
    %c0_781 = arith.constant 0 : index
    %c0_782 = arith.constant 0 : index
    %1337 = vector.load %arg16[%c1_780, %1336, %c0_781, %c0_782] : memref<2x8x8x128xf32, #tpu.memory_space<vmem>>, vector<1x1x8x128xf32>
    %1338 = vector.shape_cast %1337 : vector<1x1x8x128xf32> to vector<8x128xf32>
    %c0_783 = arith.constant 0 : index
    %c0_784 = arith.constant 0 : index
    %1339 = vector.load %arg18[%c0_783, %c0_784] : memref<8x32xf32, #tpu.memory_space<vmem>>, vector<8x32xf32>
    %c0_785 = arith.constant 0 : index
    %c0_786 = arith.constant 0 : index
    %1340 = vector.load %arg11[%c0_785, %c0_786] : memref<32x128xf32, #tpu.memory_space<vmem>>, vector<32x128xf32>
    %cst_787 = arith.constant dense<0.000000e+00> : vector<8x128xf32>
    %1341 = tpu.matmul %1339, %1340, %cst_787 {dimension_numbers = #tpu.dot_dimension_numbers<[1], [0], [0], [1], [0, 0, 1, 1], [], []>} : vector<8x32xf32>, vector<32x128xf32>, vector<8x128xf32> -> vector<8x128xf32>
    %1342 = arith.addf %1338, %1341 : vector<8x128xf32>
    %1343 = vector.extract_strided_slice %1342 {offsets = [0, 0], sizes = [8, 32], strides = [1, 1]} : vector<8x128xf32> to vector<8x32xf32>
    %1344 = arith.negf %1343 : vector<8x32xf32>
    %1345 = math.exp %1344 : vector<8x32xf32>
    %cst_788 = arith.constant 1.000000e+00 : f32
    %1346 = vector.broadcast %cst_788 : f32 to vector<8x32xf32>
    %1347 = arith.addf %1346, %1345 : vector<8x32xf32>
    %1348 = arith.divf %1346, %1347 : vector<8x32xf32>
    %1349 = vector.extract_strided_slice %1342 {offsets = [0, 32], sizes = [8, 32], strides = [1, 1]} : vector<8x128xf32> to vector<8x32xf32>
    %1350 = arith.negf %1349 : vector<8x32xf32>
    %1351 = math.exp %1350 : vector<8x32xf32>
    %cst_789 = arith.constant 1.000000e+00 : f32
    %1352 = vector.broadcast %cst_789 : f32 to vector<8x32xf32>
    %1353 = arith.addf %1352, %1351 : vector<8x32xf32>
    %1354 = arith.divf %1352, %1353 : vector<8x32xf32>
    %1355 = vector.extract_strided_slice %1342 {offsets = [0, 64], sizes = [8, 32], strides = [1, 1]} : vector<8x128xf32> to vector<8x32xf32>
    %1356 = math.tanh %1355 : vector<8x32xf32>
    %1357 = vector.extract_strided_slice %1342 {offsets = [0, 96], sizes = [8, 32], strides = [1, 1]} : vector<8x128xf32> to vector<8x32xf32>
    %1358 = arith.negf %1357 : vector<8x32xf32>
    %1359 = math.exp %1358 : vector<8x32xf32>
    %cst_790 = arith.constant 1.000000e+00 : f32
    %1360 = vector.broadcast %cst_790 : f32 to vector<8x32xf32>
    %1361 = arith.addf %1360, %1359 : vector<8x32xf32>
    %1362 = arith.divf %1360, %1361 : vector<8x32xf32>
    %c0_791 = arith.constant 0 : index
    %c0_792 = arith.constant 0 : index
    %1363 = vector.load %arg19[%c0_791, %c0_792] : memref<8x32xf32, #tpu.memory_space<vmem>>, vector<8x32xf32>
    %1364 = arith.mulf %1354, %1363 : vector<8x32xf32>
    %1365 = arith.mulf %1348, %1356 : vector<8x32xf32>
    %1366 = arith.addf %1364, %1365 : vector<8x32xf32>
    %1367 = math.tanh %1366 : vector<8x32xf32>
    %1368 = arith.mulf %1362, %1367 : vector<8x32xf32>
    %c0_793 = arith.constant 0 : index
    %c0_794 = arith.constant 0 : index
    %1369 = vector.load %arg18[%c0_793, %c0_794] : memref<8x32xf32, #tpu.memory_space<vmem>>, vector<8x32xf32>
    tpu.vector_store %arg18[%c0_793, %c0_794], %1368 {strides = array<i32>} : memref<8x32xf32, #tpu.memory_space<vmem>>, vector<8x32xf32>,
    %c0_795 = arith.constant 0 : index
    %c0_796 = arith.constant 0 : index
    %1370 = vector.load %arg19[%c0_795, %c0_796] : memref<8x32xf32, #tpu.memory_space<vmem>>, vector<8x32xf32>
    tpu.vector_store %arg19[%c0_795, %c0_796], %1366 {strides = array<i32>} : memref<8x32xf32, #tpu.memory_space<vmem>>, vector<8x32xf32>,
    %c1_797 = arith.constant 1 : index
    %1371 = arith.index_cast %1335 : i32 to index
    %c0_798 = arith.constant 0 : index
    %c0_799 = arith.constant 0 : index
    %1372 = vector.load %arg17[%c1_797, %1371, %c0_798, %c0_799] : memref<2x8x8x32xf32, #tpu.memory_space<vmem>>, vector<1x1x8x32xf32>
    %1373 = vector.shape_cast %1372 : vector<1x1x8x32xf32> to vector<8x32xf32>
    %1374 = vector.shape_cast %1368 : vector<8x32xf32> to vector<1x1x8x32xf32>
    tpu.vector_store %arg17[%c1_797, %1371, %c0_798, %c0_799], %1374 {strides = array<i32>} : memref<2x8x8x32xf32, #tpu.memory_space<vmem>>, vector<1x1x8x32xf32>,
    %c8_i32_800 = arith.constant 8 : i32
    %c0_801 = arith.constant 0 : index
    %c0_802 = arith.constant 0 : index
    %1375 = vector.load %arg18[%c0_801, %c0_802] : memref<8x32xf32, #tpu.memory_space<vmem>>, vector<8x32xf32>
    %cst_803 = arith.constant 0.000000e+00 : f32
    %1376 = vector.broadcast %cst_803 : f32 to vector<8x32xf32>
    %1377 = arith.maximumf %1375, %1376 : vector<8x32xf32>
    %c0_804 = arith.constant 0 : index
    %c0_805 = arith.constant 0 : index
    %1378 = vector.load %arg13[%c0_804, %c0_805] : memref<32x128xf32, #tpu.memory_space<vmem>>, vector<32x128xf32>
    %cst_806 = arith.constant dense<0.000000e+00> : vector<8x128xf32>
    %1379 = tpu.matmul %1377, %1378, %cst_806 {dimension_numbers = #tpu.dot_dimension_numbers<[1], [0], [0], [1], [0, 0, 1, 1], [], []>} : vector<8x32xf32>, vector<32x128xf32>, vector<8x128xf32> -> vector<8x128xf32>
    %c0_807 = arith.constant 0 : index
    %c0_808 = arith.constant 0 : index
    %1380 = vector.load %arg14[%c0_807, %c0_808] : memref<1x128xf32, #tpu.memory_space<vmem>>, vector<1x128xf32>
    %1381 = vector.broadcast %1380 : vector<1x128xf32> to vector<8x128xf32>
    %1382 = arith.addf %1379, %1381 : vector<8x128xf32>
    %c3 = arith.constant 3 : index
    %c0_809 = arith.constant 0 : index
    %c0_810 = arith.constant 0 : index
    %1383 = vector.load %arg15[%c3, %c0_809, %c0_810] : memref<4x8x128xf32, #tpu.memory_space<vmem>>, vector<1x8x128xf32>
    %1384 = vector.shape_cast %1383 : vector<1x8x128xf32> to vector<8x128xf32>
    %1385 = vector.shape_cast %1382 : vector<8x128xf32> to vector<1x8x128xf32>
    tpu.vector_store %arg15[%c3, %c0_809, %c0_810], %1385 {strides = array<i32>} : memref<4x8x128xf32, #tpu.memory_space<vmem>>, vector<1x8x128xf32>,
    return
  }
}

</mosaic_0001>

<bundles_post_ra>
// kernel: lstm_baseline_forward.1
= control target key start
LH: loop header
LB: loop body
LE: loop exit
PB: predicated region body
PF: predicated region fallthrough
CT: control target
= control target key end

     0   :  { %20 = vsyncpa [#allocation7], 0  ;;  %s8365_s0 = inlined_call_operand.hbm [shape: f32[8,8,16], index: 0, kind: input, shape index: {}]   ;;  %s8366_s1 = inlined_call_operand.hbm [shape: f32[16,128], index: 1, kind: input, shape index: {}]   ;;  %s8367_s2 = inlined_call_operand.hbm [shape: f32[32,128], index: 2, kind: input, shape index: {}]   ;;  %s8368_s3 = inlined_call_operand.hbm [shape: f32[1,128], index: 3, kind: input, shape index: {}]   ;;  %s8369_s4 = inlined_call_operand.hbm [shape: f32[16,128], index: 4, kind: input, shape index: {}]   ;;  %s8370_s5 = inlined_call_operand.hbm [shape: f32[32,128], index: 5, kind: input, shape index: {}]   ;;  %s8371_s6 = inlined_call_operand.hbm [shape: f32[1,128], index: 6, kind: input, shape index: {}]   ;;  %s8372_s7 = inlined_call_operand.hbm [shape: f32[64,128], index: 7, kind: input, shape index: {}]   ;;  %s8373_s8 = inlined_call_operand.hbm [shape: f32[32,128], index: 8, kind: input, shape index: {}]   ;;  %s8374_s9 = inlined_call_operand.hbm [shape: f32[1,128], index: 9, kind: input, shape index: {}]   ;;  %s8375_s10 = inlined_call_operand.hbm [shape: f32[64,128], index: 10, kind: input, shape index: {}]   ;;  %s8376_s11 = inlined_call_operand.hbm [shape: f32[32,128], index: 11, kind: input, shape index: {}]   ;;  %s8377_s12 = inlined_call_operand.hbm [shape: f32[1,128], index: 12, kind: input, shape index: {}]   ;;  %s8378_s13 = inlined_call_operand.hbm [shape: f32[32,128], index: 13, kind: input, shape index: {}]   ;;  %s8379_s14 = inlined_call_operand.hbm [shape: f32[1,128], index: 14, kind: input, shape index: {}]   ;;  %s8380_s15 = inlined_call_operand.hbm [shape: f32[4,8,128], index: 15, kind: output, shape index: {}]  }
   0x1   :  { %21 = vsyncpa [#allocation10], 0 }
   0x2   :  { %22 = vsyncpa [#allocation13], 0 }
   0x3   :  { %23 = vsyncpa [#allocation16], 0 }
   0x4   :  { %24 = vsyncpa [#allocation19], 0 }
   0x5   :  { %25 = vsyncpa [#allocation22], 0 }
   0x6   :  { %26 = vsyncpa [#allocation25], 0 }
   0x7   :  { %27 = vsyncpa [#allocation28], 0 }
   0x8   :  { %28 = vsyncpa [#allocation8], 0  ;;  %s7219_s18 = smov [#allocation9]   ;;  %s7220_s20 = smov [#allocation12]  }
   0x9   :  { %s46_s19 = sshll.u32 %s7219_s18, 4  ;;  %s71_s21 = sshll.u32 %s7220_s20, 4  ;;  %s47_s19 = int_to_ptr.vmem [resolvable:$true] %s46_s19  ;;  %s7323_s21 = int_to_ptr.vmem [resolvable:$true] %s71_s21 }
   0xa   :  { %s6849_s24 = scalar_lea.hbm %s8366_s1, 256 }
   0xb   :  { %p6850_p0 = scmp.ne.s32.totalorder %s8366_s1, %s6849_s24  ;;  %p6853_p1 = scmp.lt.u32.totalorder %s6849_s24, %s8366_s1 }
   0xd   :  { %p6855_p2 = pnand %p6853_p1, %p6850_p0 }
   0xf   :  { %6858 = shalt.err (!%p6855_p2)
}
  0x10   :  { %s6859_s29 = scalar_lea.vmem %s47_s19, 256  ;;  %p6864_p4 = scmp.lt.s32.totalorder %s47_s19, %s47_s19 }
  0x11   :  { %p6860_p3 = scmp.ne.s32.totalorder %s47_s19, %s6859_s29  ;;  %p6865_p5 = scmp.lt.s32.totalorder %s6859_s29, %s6859_s29 }
  0x13   :  { %p6866_p6 = por %p6865_p5, %p6864_p4 }
  0x15   :  { %p6867_p7 = pnand %p6866_p6, %p6860_p3 }
  0x17   :  { %6870 = shalt.err (!%p6867_p7)
}
  0x18   :  { %s7221_s30 = smov 128   ;;  %s7222_s16 = smov 8  }
  0x19   :  { %52 = dma.hbm_to_vmem [thread:$0]  %s8366_s1, 256, %s47_s19, [#allocation10], %s7221_s30, %s7221_s30, %s7222_s16  }
  0x1a   :  { %s6871_s23 = scalar_lea.hbm %s8368_s3, 16 }
  0x1b   :  { %p6872_p8 = scmp.ne.s32.totalorder %s8368_s3, %s6871_s23  ;;  %p6875_p9 = scmp.lt.u32.totalorder %s6871_s23, %s8368_s3 }
  0x1d   :  { %p6877_p10 = pnand %p6875_p9, %p6872_p8 }
  0x1f   :  { %6880 = shalt.err (!%p6877_p10)
}
  0x20   :  { %s6881_s28 = scalar_lea.vmem %s7323_s21, 16  ;;  %s6885_s1 = scalar_lea.vmem %s7323_s21, 32 }
  0x21   :  { %p6882_p11 = scmp.ne.s32.totalorder %s7323_s21, %s6881_s28  ;;  %p6886_p12 = scmp.lt.s32.totalorder %s7323_s21, %s7323_s21 }
  0x22   :  { %p6887_p13 = scmp.lt.s32.totalorder %s6885_s1, %s6881_s28 }
  0x24   :  { %p6888_p0 = por %p6887_p13, %p6886_p12 }
  0x26   :  { %p6889_p1 = pnand %p6888_p0, %p6882_p11 }
  0x28   :  { %6892 = shalt.err (!%p6889_p1)
}
  0x29   :  { %74 = dma.hbm_to_vmem [thread:$0]  %s8368_s3, 16, %s7323_s21, [#allocation13]  }
  0x2a   :  { %s7223_s17 = smov [#allocation15]   ;;  %s7224_s20 = smov [#allocation18]  }
  0x2b   :  { %s92_s18 = sshll.u32 %s7223_s17, 4  ;;  %s114_s22 = sshll.u32 %s7224_s20, 4  ;;  %s93_s18 = int_to_ptr.vmem [resolvable:$true] %s92_s18  ;;  %s7358_s22 = int_to_ptr.vmem [resolvable:$true] %s114_s22 }
  0x2c   :  { %s6893_s25 = scalar_lea.hbm %s8370_s5, 512 }
  0x2d   :  { %p6894_p2 = scmp.ne.s32.totalorder %s8370_s5, %s6893_s25  ;;  %p6897_p3 = scmp.lt.u32.totalorder %s6893_s25, %s8370_s5 }
  0x2f   :  { %p6899_p4 = pnand %p6897_p3, %p6894_p2 }
  0x31   :  { %6902 = shalt.err (!%p6899_p4)
}
  0x32   :  { %s6903_s3 = scalar_lea.vmem %s93_s18, 512  ;;  %p6908_p6 = scmp.lt.s32.totalorder %s93_s18, %s93_s18 }
  0x33   :  { %p6904_p5 = scmp.ne.s32.totalorder %s93_s18, %s6903_s3  ;;  %p6909_p7 = scmp.lt.s32.totalorder %s6903_s3, %s6903_s3 }
  0x35   :  { %p6910_p8 = por %p6909_p7, %p6908_p6 }
  0x37   :  { %p6911_p9 = pnand %p6910_p8, %p6904_p5 }
  0x39   :  { %6914 = shalt.err (!%p6911_p9)
}
  0x3a   :  { %98 = dma.hbm_to_vmem [thread:$0]  %s8370_s5, 512, %s93_s18, [#allocation16], %s7221_s30, %s7221_s30, %s7222_s16  }
  0x3b   :  { %s6915_s20 = scalar_lea.hbm %s8372_s7, 1024 }
  0x3c   :  { %p6916_p10 = scmp.ne.s32.totalorder %s8372_s7, %s6915_s20  ;;  %p6919_p11 = scmp.lt.u32.totalorder %s6915_s20, %s8372_s7 }
  0x3e   :  { %p6921_p12 = pnand %p6919_p11, %p6916_p10 }
  0x40   :  { %6924 = shalt.err (!%p6921_p12)
}
  0x41   :  { %s6925_s27 = scalar_lea.vmem %s7358_s22, 1024  ;;  %p6930_p0 = scmp.lt.s32.totalorder %s7358_s22, %s7358_s22 }
  0x42   :  { %p6926_p13 = scmp.ne.s32.totalorder %s7358_s22, %s6925_s27  ;;  %p6931_p1 = scmp.lt.s32.totalorder %s6925_s27, %s6925_s27 }
  0x44   :  { %p6932_p2 = por %p6931_p1, %p6930_p0 }
  0x46   :  { %p6933_p3 = pnand %p6932_p2, %p6926_p13 }
  0x48   :  { %6936 = shalt.err (!%p6933_p3)
}
  0x49   :  { %120 = dma.hbm_to_vmem [thread:$0]  %s8372_s7, 1024, %s7358_s22, [#allocation19], %s7221_s30, %s7221_s30, %s7222_s16  }
  0x4a   :  { %s7225_s28 = smov [#allocation21]   ;;  %s7226_s3 = smov [#allocation24]  }
  0x4b   :  { %s139_s1 = sshll.u32 %s7225_s28, 4  ;;  %s160_s21 = sshll.u32 %s7226_s3, 4  ;;  %s140_s1 = int_to_ptr.vmem [resolvable:$true] %s139_s1  ;;  %s7395_s21 = int_to_ptr.vmem [resolvable:$true] %s160_s21 }
  0x4c   :  { %s6937_s17 = scalar_lea.hbm %s8374_s9, 16 }
  0x4d   :  { %p6938_p4 = scmp.ne.s32.totalorder %s8374_s9, %s6937_s17  ;;  %p6941_p5 = scmp.lt.u32.totalorder %s6937_s17, %s8374_s9 }
  0x4f   :  { %p6943_p6 = pnand %p6941_p5, %p6938_p4 }
  0x51   :  { %6946 = shalt.err (!%p6943_p6)
}
  0x52   :  { %s6947_s7 = scalar_lea.vmem %s140_s1, 16  ;;  %s6951_s22 = scalar_lea.vmem %s140_s1, 32 }
  0x53   :  { %p6948_p7 = scmp.ne.s32.totalorder %s140_s1, %s6947_s7  ;;  %p6952_p8 = scmp.lt.s32.totalorder %s140_s1, %s140_s1 }
  0x54   :  { %p6953_p9 = scmp.lt.s32.totalorder %s6951_s22, %s6947_s7 }
  0x56   :  { %p6954_p10 = por %p6953_p9, %p6952_p8 }
  0x58   :  { %p6955_p11 = pnand %p6954_p10, %p6948_p7 }
  0x5a   :  { %6958 = shalt.err (!%p6955_p11)
}
  0x5b   :  { %142 = dma.hbm_to_vmem [thread:$0]  %s8374_s9, 16, %s140_s1, [#allocation22]  }
  0x5c   :  { %s6959_s28 = scalar_lea.hbm %s8376_s11, 512 }
  0x5d   :  { %p6960_p12 = scmp.ne.s32.totalorder %s8376_s11, %s6959_s28  ;;  %p6963_p13 = scmp.lt.u32.totalorder %s6959_s28, %s8376_s11 }
  0x5f   :  { %p6965_p0 = pnand %p6963_p13, %p6960_p12 }
  0x61   :  { %6968 = shalt.err (!%p6965_p0)
}
  0x62   :  { %s6969_s20 = scalar_lea.vmem %s7395_s21, 512  ;;  %p6974_p2 = scmp.lt.s32.totalorder %s7395_s21, %s7395_s21 }
  0x63   :  { %p6970_p1 = scmp.ne.s32.totalorder %s7395_s21, %s6969_s20  ;;  %p6975_p3 = scmp.lt.s32.totalorder %s6969_s20, %s6969_s20 }
  0x65   :  { %p6976_p4 = por %p6975_p3, %p6974_p2 }
  0x67   :  { %p6977_p5 = pnand %p6976_p4, %p6970_p1 }
  0x69   :  { %6980 = shalt.err (!%p6977_p5)
}
  0x6a   :  { %166 = dma.hbm_to_vmem [thread:$0]  %s8376_s11, 512, %s7395_s21, [#allocation25], %s7221_s30, %s7221_s30, %s7222_s16  }
  0x6b   :  { %s7227_s23 = smov [#allocation27]   ;;  %s7228_s25 = smov [#allocation6]  }
  0x6c   :  { %s182_s24 = sshll.u32 %s7227_s23, 4  ;;  %s34_s7 = sshll.u32 %s7228_s25, 4  ;;  %s183_s24 = int_to_ptr.vmem [resolvable:$true] %s182_s24  ;;  %s7429_s7 = int_to_ptr.vmem [resolvable:$true] %s34_s7 }
  0x6d   :  { %s6981_s27 = scalar_lea.hbm %s8378_s13, 512 }
  0x6e   :  { %p6982_p6 = scmp.ne.s32.totalorder %s8378_s13, %s6981_s27  ;;  %p6985_p7 = scmp.lt.u32.totalorder %s6981_s27, %s8378_s13 }
  0x70   :  { %p6987_p8 = pnand %p6985_p7, %p6982_p6 }
  0x72   :  { %6990 = shalt.err (!%p6987_p8)
}
  0x73   :  { %s6991_s11 = scalar_lea.vmem %s183_s24, 512  ;;  %p6996_p10 = scmp.lt.s32.totalorder %s183_s24, %s183_s24 }
  0x74   :  { %p6992_p9 = scmp.ne.s32.totalorder %s183_s24, %s6991_s11  ;;  %p6997_p11 = scmp.lt.s32.totalorder %s6991_s11, %s6991_s11 }
  0x76   :  { %p6998_p12 = por %p6997_p11, %p6996_p10 }
  0x78   :  { %p6999_p13 = pnand %p6998_p12, %p6992_p9 }
  0x7a   :  { %7002 = shalt.err (!%p6999_p13)
}
  0x7b   :  { %188 = dma.hbm_to_vmem [thread:$0]  %s8378_s13, 512, %s183_s24, [#allocation28], %s7221_s30, %s7221_s30, %s7222_s16  }
  0x7c   :  { %s7003_s20 = scalar_lea.hbm %s8365_s0, 1024 }
  0x7d   :  { %p7004_p0 = scmp.ne.s32.totalorder %s8365_s0, %s7003_s20  ;;  %p7007_p1 = scmp.lt.u32.totalorder %s7003_s20, %s8365_s0 }
  0x7f   :  { %p7009_p2 = pnand %p7007_p1, %p7004_p0 }
  0x81   :  { %7012 = shalt.err (!%p7009_p2)
}
  0x82   :  { %s7013_s22 = scalar_lea.vmem %s7429_s7, 1024  ;;  %p7018_p4 = scmp.lt.s32.totalorder %s7429_s7, %s7429_s7 }
  0x83   :  { %p7014_p3 = scmp.ne.s32.totalorder %s7429_s7, %s7013_s22  ;;  %p7019_p5 = scmp.lt.s32.totalorder %s7013_s22, %s7013_s22 }
  0x85   :  { %p7020_p6 = por %p7019_p5, %p7018_p4 }
  0x87   :  { %p7021_p7 = pnand %p7020_p6, %p7014_p3 }
  0x89   :  { %7024 = shalt.err (!%p7021_p7)
}
  0x8a   :  { %40 = dma.hbm_to_vmem [thread:$0]  %s8365_s0, 1024, %s7429_s7, [#allocation7], %s7221_s30, %s7221_s30, %s7222_s16  }
  0x8b   :  { %s7229_s26 = smov [#allocation11]   ;;  %s7230_s5 = smov [#allocation14]  }
  0x8c   :  { %s58_s27 = sshll.u32 %s7229_s26, 4  ;;  %s80_s18 = sshll.u32 %s7230_s5, 4  ;;  %s59_s27 = int_to_ptr.vmem [resolvable:$true] %s58_s27  ;;  %s7466_s18 = int_to_ptr.vmem [resolvable:$true] %s80_s18 }
  0x8d   :  { %s7025_s11 = scalar_lea.hbm %s8367_s2, 512 }
  0x8e   :  { %p7026_p8 = scmp.ne.s32.totalorder %s8367_s2, %s7025_s11  ;;  %p7029_p9 = scmp.lt.u32.totalorder %s7025_s11, %s8367_s2 }
  0x90   :  { %p7031_p10 = pnand %p7029_p9, %p7026_p8 }
  0x92   :  { %7034 = shalt.err (!%p7031_p10)
}
  0x93   :  { %s7035_s0 = scalar_lea.vmem %s59_s27, 512  ;;  %p7040_p12 = scmp.lt.s32.totalorder %s59_s27, %s59_s27 }
  0x94   :  { %p7036_p11 = scmp.ne.s32.totalorder %s59_s27, %s7035_s0  ;;  %p7041_p13 = scmp.lt.s32.totalorder %s7035_s0, %s7035_s0 }
  0x96   :  { %p7042_p0 = por %p7041_p13, %p7040_p12 }
  0x98   :  { %p7043_p1 = pnand %p7042_p0, %p7036_p11 }
  0x9a   :  { %7046 = shalt.err (!%p7043_p1)
}
  0x9b   :  { %64 = dma.hbm_to_vmem [thread:$0]  %s8367_s2, 512, %s59_s27, [#allocation10], %s7221_s30, %s7221_s30, %s7222_s16  }
  0x9c   :  { %s7047_s23 = scalar_lea.hbm %s8369_s4, 256 }
  0x9d   :  { %p7048_p2 = scmp.ne.s32.totalorder %s8369_s4, %s7047_s23  ;;  %p7051_p3 = scmp.lt.u32.totalorder %s7047_s23, %s8369_s4 }
  0x9f   :  { %p7053_p4 = pnand %p7051_p3, %p7048_p2 }
  0xa1   :  { %7056 = shalt.err (!%p7053_p4)
}
  0xa2   :  { %s7057_s26 = scalar_lea.vmem %s7466_s18, 256  ;;  %p7062_p6 = scmp.lt.s32.totalorder %s7466_s18, %s7466_s18 }
  0xa3   :  { %p7058_p5 = scmp.ne.s32.totalorder %s7466_s18, %s7057_s26  ;;  %p7063_p7 = scmp.lt.s32.totalorder %s7057_s26, %s7057_s26 }
  0xa5   :  { %p7064_p8 = por %p7063_p7, %p7062_p6 }
  0xa7   :  { %p7065_p9 = pnand %p7064_p8, %p7058_p5 }
  0xa9   :  { %7068 = shalt.err (!%p7065_p9)
}
  0xaa   :  { %86 = dma.hbm_to_vmem [thread:$0]  %s8369_s4, 256, %s7466_s18, [#allocation13], %s7221_s30, %s7221_s30, %s7222_s16  }
  0xab   :  { %s7231_s5 = smov [#allocation17]   ;;  %s7232_s3 = smov [#allocation20]  }
  0xac   :  { %s105_s28 = sshll.u32 %s7231_s5, 4  ;;  %s126_s11 = sshll.u32 %s7232_s3, 4  ;;  %s106_s28 = int_to_ptr.vmem [resolvable:$true] %s105_s28  ;;  %s7503_s11 = int_to_ptr.vmem [resolvable:$true] %s126_s11 }
  0xad   :  { %s7069_s29 = scalar_lea.hbm %s8371_s6, 16 }
  0xae   :  { %p7070_p10 = scmp.ne.s32.totalorder %s8371_s6, %s7069_s29  ;;  %p7073_p11 = scmp.lt.u32.totalorder %s7069_s29, %s8371_s6 }
  0xb0   :  { %p7075_p12 = pnand %p7073_p11, %p7070_p10 }
  0xb2   :  { %7078 = shalt.err (!%p7075_p12)
}
  0xb3   :  { %s7079_s4 = scalar_lea.vmem %s106_s28, 16  ;;  %s7083_s18 = scalar_lea.vmem %s106_s28, 32 }
  0xb4   :  { %p7080_p13 = scmp.ne.s32.totalorder %s106_s28, %s7079_s4  ;;  %p7084_p0 = scmp.lt.s32.totalorder %s106_s28, %s106_s28 }
  0xb5   :  { %p7085_p1 = scmp.lt.s32.totalorder %s7083_s18, %s7079_s4 }
  0xb7   :  { %p7086_p2 = por %p7085_p1, %p7084_p0 }
  0xb9   :  { %p7087_p3 = pnand %p7086_p2, %p7080_p13 }
  0xbb   :  { %7090 = shalt.err (!%p7087_p3)
}
  0xbc   :  { %108 = dma.hbm_to_vmem [thread:$0]  %s8371_s6, 16, %s106_s28, [#allocation16]  }
  0xbd   :  { %s7091_s22 = scalar_lea.hbm %s8373_s8, 512 }
  0xbe   :  { %p7092_p4 = scmp.ne.s32.totalorder %s8373_s8, %s7091_s22  ;;  %p7095_p5 = scmp.lt.u32.totalorder %s7091_s22, %s8373_s8 }
  0xc0   :  { %p7097_p6 = pnand %p7095_p5, %p7092_p4 }
  0xc2   :  { %7100 = shalt.err (!%p7097_p6)
}
  0xc3   :  { %s7101_s27 = scalar_lea.vmem %s7503_s11, 512  ;;  %p7106_p8 = scmp.lt.s32.totalorder %s7503_s11, %s7503_s11 }
  0xc4   :  { %p7102_p7 = scmp.ne.s32.totalorder %s7503_s11, %s7101_s27  ;;  %p7107_p9 = scmp.lt.s32.totalorder %s7101_s27, %s7101_s27 }
  0xc6   :  { %p7108_p10 = por %p7107_p9, %p7106_p8 }
  0xc8   :  { %p7109_p11 = pnand %p7108_p10, %p7102_p7 }
  0xca   :  { %7112 = shalt.err (!%p7109_p11)
}
  0xcb   :  { %132 = dma.hbm_to_vmem [thread:$0]  %s8373_s8, 512, %s7503_s11, [#allocation19], %s7221_s30, %s7221_s30, %s7222_s16  }
  0xcc   :  { %s7233_s28 = smov [#allocation23]   ;;  %s7234_s21 = smov [#allocation26]  }
  0xcd   :  { %s148_s3 = sshll.u32 %s7233_s28, 4  ;;  %s173_s19 = sshll.u32 %s7234_s21, 4  ;;  %s149_s3 = int_to_ptr.vmem [resolvable:$true] %s148_s3  ;;  %s174_s19 = int_to_ptr.vmem [resolvable:$true] %s173_s19 }
  0xce   :  { %s7113_s0 = scalar_lea.hbm %s8375_s10, 1024 }
  0xcf   :  { %p7114_p12 = scmp.ne.s32.totalorder %s8375_s10, %s7113_s0  ;;  %p7117_p13 = scmp.lt.u32.totalorder %s7113_s0, %s8375_s10 }
  0xd1   :  { %p7119_p0 = pnand %p7117_p13, %p7114_p12 }
  0xd3   :  { %7122 = shalt.err (!%p7119_p0)
}
  0xd4   :  { %s7123_s8 = scalar_lea.vmem %s149_s3, 1024  ;;  %p7128_p2 = scmp.lt.s32.totalorder %s149_s3, %s149_s3 }
  0xd5   :  { %p7124_p1 = scmp.ne.s32.totalorder %s149_s3, %s7123_s8  ;;  %p7129_p3 = scmp.lt.s32.totalorder %s7123_s8, %s7123_s8 }
  0xd7   :  { %p7130_p4 = por %p7129_p3, %p7128_p2 }
  0xd9   :  { %p7131_p5 = pnand %p7130_p4, %p7124_p1 }
  0xdb   :  { %7134 = shalt.err (!%p7131_p5)
}
  0xdc   :  { %154 = dma.hbm_to_vmem [thread:$0]  %s8375_s10, 1024, %s149_s3, [#allocation22], %s7221_s30, %s7221_s30, %s7222_s16  }
  0xdd   :  { %s7135_s25 = scalar_lea.hbm %s8377_s12, 16 }
  0xde   :  { %p7136_p6 = scmp.ne.s32.totalorder %s8377_s12, %s7135_s25  ;;  %p7139_p7 = scmp.lt.u32.totalorder %s7135_s25, %s8377_s12 }
  0xe0   :  { %p7141_p8 = pnand %p7139_p7, %p7136_p6 }
  0xe2   :  { %7144 = shalt.err (!%p7141_p8)
}
  0xe3   :  { %s7145_s2 = scalar_lea.vmem %s174_s19, 16  ;;  %s7149_s27 = scalar_lea.vmem %s174_s19, 32 }
  0xe4   :  { %p7146_p9 = scmp.ne.s32.totalorder %s174_s19, %s7145_s2  ;;  %p7150_p10 = scmp.lt.s32.totalorder %s174_s19, %s174_s19 }
  0xe5   :  { %p7151_p11 = scmp.lt.s32.totalorder %s7149_s27, %s7145_s2 }
  0xe7   :  { %p7152_p12 = por %p7151_p11, %p7150_p10 }
  0xe9   :  { %p7153_p13 = pnand %p7152_p12, %p7146_p9 }
  0xeb   :  { %7156 = shalt.err (!%p7153_p13)
}
  0xec   :  { %176 = dma.hbm_to_vmem [thread:$0]  %s8377_s12, 16, %s174_s19, [#allocation25]  }
  0xed   :  { %s7235_s5 = smov [#allocation29]   ;;  %s7157_s29 = scalar_lea.hbm %s8379_s14, 16 }
  0xee   :  { %s195_s28 = sshll.u32 %s7235_s5, 4  ;;  %p7158_p0 = scmp.ne.s32.totalorder %s8379_s14, %s7157_s29  ;;  %s196_s28 = int_to_ptr.vmem [resolvable:$true] %s195_s28 }
  0xef   :  { %p7161_p1 = scmp.lt.u32.totalorder %s7157_s29, %s8379_s14 }
  0xf1   :  { %p7163_p2 = pnand %p7161_p1, %p7158_p0 }
  0xf3   :  { %7166 = shalt.err (!%p7163_p2)
}
  0xf4   :  { %s7167_s4 = scalar_lea.vmem %s196_s28, 16  ;;  %s7171_s12 = scalar_lea.vmem %s196_s28, 32 }
  0xf5   :  { %p7168_p3 = scmp.ne.s32.totalorder %s196_s28, %s7167_s4  ;;  %p7172_p4 = scmp.lt.s32.totalorder %s196_s28, %s196_s28 }
  0xf6   :  { %p7173_p5 = scmp.lt.s32.totalorder %s7171_s12, %s7167_s4 }
  0xf8   :  { %p7174_p6 = por %p7173_p5, %p7172_p4 }
  0xfa   :  { %p7175_p7 = pnand %p7174_p6, %p7168_p3 }
  0xfc   :  { %7178 = shalt.err (!%p7175_p7)
}
  0xfd   :  { %198 = dma.hbm_to_vmem [thread:$0]  %s8379_s14, 16, %s196_s28, [#allocation28]  }
  0xfe   :  { %7201 = dma.done.wait [#allocation7], 1024  }
  0xff   :  { %7202 = vsyncadd [#allocation7], 4294966272 }
 0x100   :  { %7203 = dma.done.wait [#allocation10], 768  }
 0x101   :  { %7204 = vsyncadd [#allocation10], 4294966528 }
 0x102   :  { %7205 = dma.done.wait [#allocation13], 272  }
 0x103   :  { %7206 = vsyncadd [#allocation13], 4294967024 }
 0x104   :  { %7207 = dma.done.wait [#allocation16], 528  }
 0x105   :  { %7208 = vsyncadd [#allocation16], 4294966768 }
 0x106   :  { %7209 = dma.done.wait [#allocation19], 1536  }
 0x107   :  { %7210 = vsyncadd [#allocation19], 4294965760 }
 0x108   :  { %7211 = dma.done.wait [#allocation22], 1040  }
 0x109   :  { %7212 = vsyncadd [#allocation22], 4294966256 }
 0x10a   :  { %7213 = dma.done.wait [#allocation25], 528  }
 0x10b   :  { %7214 = vsyncadd [#allocation25], 4294966768 }
 0x10c   :  { %7215 = dma.done.wait [#allocation28], 528  }
 0x10d   :  { %7216 = vsyncadd [#allocation28], 4294966768  ;;  %vm554_vm0 = vcmask 261120   ;;  %v7236_v0 = vmov 0.0   ;;  %vm261_vm1 = vcmask 130048   ;;  %v252_v1 = vld [vmem:[#allocation9] sm:$0xff] }
 0x10e   :  { %555 = vst.msk [vmem:[#allocation4] sm:$0xff] %vm554_vm0, %v7236_v0  ;;  %556 = vst.msk [vmem:[#allocation5] sm:$0xff] %vm554_vm0, %v7236_v0  ;;  %v253_v2 = vld [vmem:[#allocation9 + $0x8] sm:$0xff]  ;;  %v244_v3 = vld [vmem:[#allocation6] sm:$0xff]  ;;  %v7237_v9 = vmov 0.0|0.0   ;;  %vm7238_vm2 = vmmov 0  }
 0x10f   :  { %v6297_v4 = vpack.c.bf16 %v253_v2, %v252_v1  ;;  %5793 = vmatprep.mubr.msk.f32.mxu0 %vm261_vm1, %v244_v3  ;;  %v559_v5 = vld [vmem:[#allocation11] sm:$0xff]  ;;  %v560_v6 = vld [vmem:[#allocation11 + $0x8] sm:$0xff]  ;;  %5809 = vmatprep.mubr.msk.f32.mxu1 %vm261_vm1, %v244_v3  ;;  %v7582_v7 = vld [vmem:[#allocation6 + $0x8] sm:$0xff]  ;;  %s7239_s14 = smov 64   ;;  %s7240_s8 = smov 32  }
 0x110   :  { %v7584_v8 = vpack.c.bf16 %v560_v6, %v559_v5  ;;  %v7587_v10 = vld [vmem:[#allocation6 + $0x10] sm:$0xff]  ;;  %v561_v11 = vld [vmem:[#allocation11 + $0x10] sm:$0xff]  ;;  %v562_v12 = vld [vmem:[#allocation11 + $0x18] sm:$0xff]  ;;  %s7241_s11 = smov 96   ;;  %s7242_s9 = smov [#allocation30]  }
 0x111   :  { %6298 = vmatprep.subr.bf16.mxu0 %v6297_v4  ;;  %v7594_v13 = vld [vmem:[#allocation6 + $0x18] sm:$0xff]  ;;  %v7596_v14 = vpack.c.bf16 %v562_v12, %v561_v11  ;;  %v7598_v15 = vld [vmem:[#allocation6 + $0x20] sm:$0xff]  ;;  %v7605_v16 = vld [vmem:[#allocation6 + $0x28] sm:$0xff]  ;;  %s5398_s1 = sshll.u32 %s7242_s9, 4  ;;  %s5399_s1 = int_to_ptr.vmem [resolvable:$true] %s5398_s1 }
 0x112   :  { %6300 = vmatpush3.bf16.msra.mxu0 %v6297_v4  ;;  %v7608_v17 = vld [vmem:[#allocation6 + $0x30] sm:$0xff]  ;;  %v7615_v18 = vld [vmem:[#allocation6 + $0x38] sm:$0xff]  ;;  %v7671_v60 = vld [vmem:[#allocation17] ss:$0 sm:$0xff]  ;;  %s7179_s23 = scalar_lea.vmem %s5399_s1, 512  ;;  %p7184_p9 = scmp.lt.s32.totalorder %s5399_s1, %s5399_s1 }
 0x113   :  { %6305 = vmatprep.subr.bf16.mxu0 %v7237_v9  ;;  %v5417_v20 = vld [vmem:[#allocation12] ss:$0 sm:$0xff]  ;;  %v407_v53 = vld [vmem:[#allocation14] sm:$0xff]  ;;  %v408_v54 = vld [vmem:[#allocation14 + $0x8] sm:$0xff]  ;;  %p7180_p8 = scmp.ne.s32.totalorder %s5399_s1, %s7179_s23  ;;  %p7185_p10 = scmp.lt.s32.totalorder %s7179_s23, %s7179_s23 }
 0x114   :  { %v6301_v55 = vpack.c.bf16 %v408_v54, %v407_v53 }
 0x115   :  { %5794 = vmatmul.mubr.msk.f32.vlgmr.msra.gmra.mrb[0].mxu0 %vm261_vm1, %v7582_v7  ;;  %v558_v19 = vld [vmem:[#allocation4] sm:$0xff]  ;;  %v644_v41 = vld [vmem:[#allocation5] sm:$0xff]  ;;  %p7186_p11 = por %p7185_p10, %p7184_p9 }
 0x116   :  { %6307 = vmatpush3.bf16.msra.mxu0 %v7584_v8  ;;  %5796 = vmatprep.mubr.msk.f32.mxu0 %vm261_vm1, %v7587_v10 }
 0x117   :  { %6308 = vmatprep.subr.bf16.mxu0 %v7237_v9  ;;  %6302 = vmatprep.subr.bf16.mxu1 %v6301_v55  ;;  %p7187_p12 = pnand %p7186_p11, %p7180_p8 }
 0x118   :  { %6304 = vmatpush3.bf16.msra.mxu1 %v6301_v55 }
 0x119   :  { %5797 = vmatmul.mubr.msk.f32.gmra.mrb[2].mxu0 %vm261_vm1, %v7594_v13  ;;  %6311 = vmatprep.subr.bf16.mxu1 %v7237_v9 }
 0x11a   :  { %5799 = vmatprep.mubr.msk.f32.mxu0 %vm261_vm1, %v7598_v15  ;;  %6310 = vmatpush3.bf16.msra.mxu0 %v7596_v14 }
 0x11b   :  { %6317 = vmatprep.subr.bf16.mxu0 %v7237_v9  ;;  %5810 = vmatmul.mubr.msk.f32.vlgmr.msra.gmra.mrb[0].mxu1 %vm261_vm1, %v7582_v7 }
 0x11c   :  { %6313 = vmatpush3.bf16.msra.mxu1 %v7584_v8  ;;  %5812 = vmatprep.mubr.msk.f32.mxu1 %vm261_vm1, %v7587_v10 }
 0x11d   :  { %5800 = vmatmul.mubr.msk.f32.gmra.mrb[4].mxu0 %vm261_vm1, %v7605_v16  ;;  %6314 = vmatprep.subr.bf16.mxu1 %v7237_v9 }
 0x11e   :  { %5802 = vmatprep.mubr.msk.f32.mxu0 %vm261_vm1, %v7608_v17 }
 0x11f   :  { %5813 = vmatmul.mubr.msk.f32.gmra.mrb[2].mxu1 %vm261_vm1, %v7594_v13 }
 0x120   :  { %5815 = vmatprep.mubr.msk.f32.mxu1 %vm261_vm1, %v7598_v15  ;;  %6316 = vmatpush3.bf16.msra.mxu1 %v7596_v14 }
 0x121   :  { %5803 = vmatmul.mubr.msk.f32.gmra.mrb[6].mxu0 %vm261_vm1, %v7615_v18  ;;  %6323 = vmatprep.subr.bf16.mxu1 %v7237_v9 }
 0x122   :  { %5829 = vmatprep.mubr.msk.f32.mxu0 %vm7238_vm2, %v7236_v0 }
 0x123   :  { %5816 = vmatmul.mubr.msk.f32.gmra.mrb[4].mxu1 %vm261_vm1, %v7605_v16 }
 0x124   :  { %5818 = vmatprep.mubr.msk.f32.mxu1 %vm261_vm1, %v7608_v17 }
 0x125   :  { %5830 = vmatmul.mubr.msk.f32.vlgmr.msra.gmra.mrb[8].mxu0 %vm554_vm0, %v558_v19 }
 0x126   :  { %6319 = vmatpush3.bf16.msra.mxu0 %v7584_v8  ;;  %5851 = vmatprep.mubr.msk.f32.mxu0 %vm7238_vm2, %v7236_v0 }
 0x127   :  { %6320 = vmatprep.subr.bf16.mxu0 %v7237_v9  ;;  %5819 = vmatmul.mubr.msk.f32.gmra.mrb[6].mxu1 %vm261_vm1, %v7615_v18 }
 0x128   :  { %5840 = vmatprep.mubr.msk.f32.mxu1 %vm7238_vm2, %v7236_v0 }
 0x12a   :  { %6322 = vmatpush3.bf16.msra.mxu0 %v7596_v14 }
 0x12b   :  { %6329 = vmatprep.subr.bf16.mxu0 %v7237_v9 }
 0x1e8   :  { %v5795_v21 = vpop.f32.mrb[0].mxu0 }
 0x1e9   :  { %v7628_v22 = vadd.f32 %v5795_v21, %v5417_v20  ;;  %v352_v23 = vpop.f32.mrb[1].mxu0 }
 0x1ea   :  { %v353_v36 = vadd.f32 %v5417_v20, %v352_v23 }
 0x1ec   :  { %v5798_v24 = vpop.f32.mrb[2].mxu0 }
 0x1ed   :  { %v7630_v25 = vadd.f32 %v5798_v24, %v5417_v20  ;;  %v362_v26 = vpop.f32.mrb[3].mxu0 }
 0x1ee   :  { %v7632_v27 = vadd.f32 %v5417_v20, %v362_v26  ;;  %v5811_v61 = vpop.f32.mrb[0].mxu1 }
 0x1ef   :  { %v7674_v62 = vadd.f32 %v5811_v61, %v7671_v60  ;;  %v506_v63 = vpop.f32.mrb[1].mxu1 }
 0x1f0   :  { %v5801_v28 = vpop.f32.mrb[4].mxu0  ;;  %v7677_v1 = vadd.f32 %v7671_v60, %v506_v63 }
 0x1f1   :  { %v7634_v29 = vadd.f32 %v5801_v28, %v5417_v20  ;;  %v372_v30 = vpop.f32.mrb[5].mxu0 }
 0x1f2   :  { %v7636_v31 = vadd.f32 %v5417_v20, %v372_v30  ;;  %v5814_v2 = vpop.f32.mrb[2].mxu1 }
 0x1f3   :  { %v7680_v3 = vadd.f32 %v5814_v2, %v7671_v60  ;;  %v516_v4 = vpop.f32.mrb[3].mxu1 }
 0x1f4   :  { %v5804_v32 = vpop.f32.mrb[6].mxu0  ;;  %v7683_v5 = vadd.f32 %v7671_v60, %v516_v4 }
 0x1f5   :  { %v7638_v33 = vadd.f32 %v5804_v32, %v5417_v20  ;;  %v382_v34 = vpop.f32.mrb[7].mxu0 }
 0x1f6   :  { %v7640_v35 = vadd.f32 %v5417_v20, %v382_v34  ;;  %v5817_v6 = vpop.f32.mrb[4].mxu1 }
 0x1f7   :  { %v7686_v7 = vadd.f32 %v5817_v6, %v7671_v60  ;;  %v526_v10 = vpop.f32.mrb[5].mxu1 }
 0x1f8   :  { %v632_v37 = vpop.f32.mrb[8].mxu0  ;;  %v7689_v11 = vadd.f32 %v7671_v60, %v526_v10 }
 0x1f9   :  { %v636_v38 = vadd.f32 %v632_v37, %v353_v36  ;;  %v5831_v39 = vpop.f32.mrb[9].mxu0 }
 0x1fa   :  { %v7691_v12 = vpop.f32.mrb[6].mxu1 }
 0x1fb   :  { %6593 = vtanh.f32 %v636_v38  ;;  %v5436_v42 = vmul.f32 -1.442695, %v636_v38  ;;  %v536_v13 = vpop.f32.mrb[7].mxu1 }
 0x1fc   :  { %v7694_v16 = vadd.f32 %v7671_v60, %v536_v13 }
 0x1fd   :  { %6595 = vpow2.f32 %v5436_v42 }
 0x205   :  { %v6594_v40 = vpop.eup %6593 }
 0x206   :  { %651 = vrot.lane.b32.xlu0 %v6594_v40, %s7239_s14 }
 0x207   :  { %v6596_v43 = vpop.eup %6595 }
 0x208   :  { %v640_v44 = vadd.f32 1.0, %v6596_v43 }
 0x20a   :  { %646 = vrot.lane.b32.xlu0 %v644_v41, %s7240_s8  ;;  %6597 = vrcp.f32 %v640_v44 }
 0x214   :  { %v6598_v45 = vpop.eup %6597 }
 0x278   :  { %v652_v46 = vpop.permute.xlu0 %651 }
 0x279   :  { %v654_v47 = vmul.f32 %v6598_v45, %v652_v46 }
 0x27b   :  { %656 = vrot.lane.b32.xlu1 %v654_v47, %s7240_s8 }
 0x27c   :  { %v647_v48 = vpop.permute.xlu0 %646 }
 0x27d   :  { %v649_v49 = vmul.f32 %v6598_v45, %v647_v48 }
 0x2ed   :  { %v657_v50 = vpop.permute.xlu1 %656 }
 0x2ee   :  { %v659_v51 = vadd.f32 %v657_v50, %v649_v49 }
 0x2f0   :  { %6599 = vtanh.f32 %v659_v51 }
 0x2fa   :  { %v6600_v52 = vpop.eup %6599 }
 0x2fb   :  { %662 = vrot.lane.b32.xlu1 %v6600_v52, %s7239_s14 }
 0x2ff   :  { %672 = vrot.lane.b32.xlu1 %v659_v51, %s7241_s11 }
 0x36d   :  { %v663_v56 = vpop.permute.xlu1 %662 }
 0x36e   :  { %v665_v57 = vmul.f32 %v6598_v45, %v663_v56 }
 0x370   :  { %667 = vrot.lane.b32.xlu0 %v665_v57, %s7240_s8 }
 0x371   :  { %v673_v58 = vpop.permute.xlu1 %672 }
 0x372   :  { %675 = vst.msk [vmem:[#allocation5] sm:$0xff] %vm554_vm0, %v673_v58 }
 0x379   :  { %v765_v59 = vld [vmem:[#allocation5] sm:$0xff] }
 0x37a   :  { %767 = vrot.lane.b32.xlu1 %v765_v59, %s7240_s8 }
 0x3e2   :  { %v668_v15 = vpop.permute.xlu0 %667 }
 0x3e3   :  { %670 = vst.msk [vmem:[#allocation4] sm:$0xff] %vm554_vm0, %v668_v15  ;;  %676 = vst.msk [vmem:[#allocation3] sm:$0xff] %vm554_vm0, %v668_v15 }
 0x3ea   :  { %v679_v17 = vld [vmem:[#allocation4] sm:$0xff] }
 0x3eb   :  { %5841 = vmatmul.mubr.msk.f32.vlgmr.msra.gmra.mrb[8].mxu1 %vm554_vm0, %v679_v17 }
 0x3ec   :  { %6325 = vmatpush3.bf16.msra.mxu1 %v7584_v8  ;;  %5862 = vmatprep.mubr.msk.f32.mxu1 %vm7238_vm2, %v7236_v0  ;;  %v768_v34 = vpop.permute.xlu1 %767 }
 0x3ed   :  { %6326 = vmatprep.subr.bf16.mxu1 %v7237_v9 }
 0x3f0   :  { %6328 = vmatpush3.bf16.msra.mxu1 %v7596_v14 }
 0x3f1   :  { %6335 = vmatprep.subr.bf16.mxu1 %v7237_v9 }
 0x4be   :  { %v753_v18 = vpop.f32.mrb[8].mxu1 }
 0x4bf   :  { %v757_v19 = vadd.f32 %v753_v18, %v7628_v22  ;;  %v5842_v20 = vpop.f32.mrb[9].mxu1 }
 0x4c1   :  { %6601 = vtanh.f32 %v757_v19  ;;  %v5438_v23 = vmul.f32 -1.442695, %v757_v19 }
 0x4c3   :  { %6603 = vpow2.f32 %v5438_v23 }
 0x4cb   :  { %v6602_v21 = vpop.eup %6601 }
 0x4cc   :  { %772 = vrot.lane.b32.xlu0 %v6602_v21, %s7239_s14 }
 0x4cd   :  { %v6604_v24 = vpop.eup %6603 }
 0x4ce   :  { %v761_v26 = vadd.f32 1.0, %v6604_v24 }
 0x4d0   :  { %6605 = vrcp.f32 %v761_v26 }
 0x4da   :  { %v6606_v28 = vpop.eup %6605 }
 0x4db   :  { %v770_v36 = vmul.f32 %v6606_v28, %v768_v34 }
 0x53e   :  { %v773_v30 = vpop.permute.xlu0 %772 }
 0x53f   :  { %v775_v32 = vmul.f32 %v6606_v28, %v773_v30 }
 0x541   :  { %777 = vrot.lane.b32.xlu0 %v775_v32, %s7240_s8 }
 0x5b3   :  { %v778_v37 = vpop.permute.xlu0 %777 }
 0x5b4   :  { %v780_v38 = vadd.f32 %v778_v37, %v770_v36 }
 0x5b6   :  { %6607 = vtanh.f32 %v780_v38 }
 0x5c0   :  { %v6608_v22 = vpop.eup %6607 }
 0x5c1   :  { %783 = vrot.lane.b32.xlu1 %v6608_v22, %s7239_s14 }
 0x5c5   :  { %793 = vrot.lane.b32.xlu1 %v780_v38, %s7241_s11 }
 0x633   :  { %v784_v39 = vpop.permute.xlu1 %783 }
 0x634   :  { %v786_v40 = vmul.f32 %v6606_v28, %v784_v39 }
 0x636   :  { %788 = vrot.lane.b32.xlu0 %v786_v40, %s7240_s8 }
 0x637   :  { %v794_v41 = vpop.permute.xlu1 %793 }
 0x638   :  { %796 = vst.msk [vmem:[#allocation5] sm:$0xff] %vm554_vm0, %v794_v41 }
 0x63f   :  { %v887_v42 = vld [vmem:[#allocation5] sm:$0xff] }
 0x640   :  { %889 = vrot.lane.b32.xlu1 %v887_v42, %s7240_s8 }
 0x6a8   :  { %v789_v43 = vpop.permute.xlu0 %788 }
 0x6a9   :  { %791 = vst.msk [vmem:[#allocation4] sm:$0xff] %vm554_vm0, %v789_v43  ;;  %798 = vst.msk [vmem:[#allocation3 + $0x8] sm:$0xff] %vm554_vm0, %v789_v43 }
 0x6b0   :  { %v801_v44 = vld [vmem:[#allocation4] sm:$0xff] }
 0x6b1   :  { %5852 = vmatmul.mubr.msk.f32.vlgmr.msra.gmra.mrb[10].mxu0 %vm554_vm0, %v801_v44 }
 0x6b2   :  { %6331 = vmatpush3.bf16.msra.mxu0 %v7584_v8  ;;  %5873 = vmatprep.mubr.msk.f32.mxu0 %vm7238_vm2, %v7236_v0  ;;  %v890_v55 = vpop.permute.xlu1 %889 }
 0x6b3   :  { %6332 = vmatprep.subr.bf16.mxu0 %v7237_v9 }
 0x6b6   :  { %6334 = vmatpush3.bf16.msra.mxu0 %v7596_v14 }
 0x6b7   :  { %6341 = vmatprep.subr.bf16.mxu0 %v7237_v9 }
 0x784   :  { %v875_v45 = vpop.f32.mrb[10].mxu0 }
 0x785   :  { %v879_v46 = vadd.f32 %v875_v45, %v7632_v27  ;;  %v5853_v47 = vpop.f32.mrb[11].mxu0 }
 0x787   :  { %6609 = vtanh.f32 %v879_v46  ;;  %v5440_v49 = vmul.f32 -1.442695, %v879_v46 }
 0x789   :  { %6611 = vpow2.f32 %v5440_v49 }
 0x791   :  { %v6610_v48 = vpop.eup %6609 }
 0x792   :  { %894 = vrot.lane.b32.xlu0 %v6610_v48, %s7239_s14 }
 0x793   :  { %v6612_v50 = vpop.eup %6611 }
 0x794   :  { %v883_v51 = vadd.f32 1.0, %v6612_v50 }
 0x796   :  { %6613 = vrcp.f32 %v883_v51 }
 0x7a0   :  { %v6614_v52 = vpop.eup %6613 }
 0x7a1   :  { %v892_v56 = vmul.f32 %v6614_v52, %v890_v55 }
 0x804   :  { %v895_v53 = vpop.permute.xlu0 %894 }
 0x805   :  { %v897_v54 = vmul.f32 %v6614_v52, %v895_v53 }
 0x807   :  { %899 = vrot.lane.b32.xlu0 %v897_v54, %s7240_s8 }
 0x879   :  { %v900_v57 = vpop.permute.xlu0 %899 }
 0x87a   :  { %v902_v58 = vadd.f32 %v900_v57, %v892_v56 }
 0x87c   :  { %6615 = vtanh.f32 %v902_v58 }
 0x886   :  { %v6616_v27 = vpop.eup %6615 }
 0x887   :  { %905 = vrot.lane.b32.xlu1 %v6616_v27, %s7239_s14 }
 0x88b   :  { %915 = vrot.lane.b32.xlu1 %v902_v58, %s7241_s11 }
 0x8f9   :  { %v906_v59 = vpop.permute.xlu1 %905 }
 0x8fa   :  { %v908_v61 = vmul.f32 %v6614_v52, %v906_v59 }
 0x8fc   :  { %910 = vrot.lane.b32.xlu0 %v908_v61, %s7240_s8 }
 0x8fd   :  { %v916_v63 = vpop.permute.xlu1 %915 }
 0x8fe   :  { %918 = vst.msk [vmem:[#allocation5] sm:$0xff] %vm554_vm0, %v916_v63 }
 0x905   :  { %v1009_v2 = vld [vmem:[#allocation5] sm:$0xff] }
 0x906   :  { %1011 = vrot.lane.b32.xlu1 %v1009_v2, %s7240_s8 }
 0x96e   :  { %v911_v4 = vpop.permute.xlu0 %910 }
 0x96f   :  { %913 = vst.msk [vmem:[#allocation4] sm:$0xff] %vm554_vm0, %v911_v4  ;;  %920 = vst.msk [vmem:[#allocation3 + $0x10] sm:$0xff] %vm554_vm0, %v911_v4 }
 0x976   :  { %v923_v6 = vld [vmem:[#allocation4] sm:$0xff] }
 0x977   :  { %5863 = vmatmul.mubr.msk.f32.vlgmr.msra.gmra.mrb[10].mxu1 %vm554_vm0, %v923_v6 }
 0x978   :  { %6337 = vmatpush3.bf16.msra.mxu1 %v7584_v8  ;;  %5884 = vmatprep.mubr.msk.f32.mxu1 %vm7238_vm2, %v7236_v0  ;;  %v1012_v26 = vpop.permute.xlu1 %1011 }
 0x979   :  { %6338 = vmatprep.subr.bf16.mxu1 %v7237_v9 }
 0x97c   :  { %6340 = vmatpush3.bf16.msra.mxu1 %v7596_v14 }
 0x97d   :  { %6347 = vmatprep.subr.bf16.mxu1 %v7237_v9 }
 0xa4a   :  { %v997_v10 = vpop.f32.mrb[10].mxu1 }
 0xa4b   :  { %v1001_v13 = vadd.f32 %v997_v10, %v7630_v25  ;;  %v5864_v15 = vpop.f32.mrb[11].mxu1 }
 0xa4d   :  { %6617 = vtanh.f32 %v1001_v13  ;;  %v5442_v18 = vmul.f32 -1.442695, %v1001_v13 }
 0xa4f   :  { %6619 = vpow2.f32 %v5442_v18 }
 0xa57   :  { %v6618_v17 = vpop.eup %6617 }
 0xa58   :  { %1016 = vrot.lane.b32.xlu0 %v6618_v17, %s7239_s14 }
 0xa59   :  { %v6620_v19 = vpop.eup %6619 }
 0xa5a   :  { %v1005_v20 = vadd.f32 1.0, %v6620_v19 }
 0xa5c   :  { %6621 = vrcp.f32 %v1005_v20 }
 0xa66   :  { %v6622_v21 = vpop.eup %6621 }
 0xa67   :  { %v1014_v28 = vmul.f32 %v6622_v21, %v1012_v26 }
 0xaca   :  { %v1017_v23 = vpop.permute.xlu0 %1016 }
 0xacb   :  { %v1019_v24 = vmul.f32 %v6622_v21, %v1017_v23 }
 0xacd   :  { %1021 = vrot.lane.b32.xlu0 %v1019_v24, %s7240_s8 }
 0xb3f   :  { %v1022_v30 = vpop.permute.xlu0 %1021 }
 0xb40   :  { %v1024_v32 = vadd.f32 %v1022_v30, %v1014_v28 }
 0xb42   :  { %6623 = vtanh.f32 %v1024_v32 }
 0xb4c   :  { %v6624_v25 = vpop.eup %6623 }
 0xb4d   :  { %1027 = vrot.lane.b32.xlu1 %v6624_v25, %s7239_s14 }
 0xb51   :  { %1037 = vrot.lane.b32.xlu1 %v1024_v32, %s7241_s11 }
 0xbbf   :  { %v1028_v34 = vpop.permute.xlu1 %1027 }
 0xbc0   :  { %v1030_v36 = vmul.f32 %v6622_v21, %v1028_v34 }
 0xbc2   :  { %1032 = vrot.lane.b32.xlu0 %v1030_v36, %s7240_s8 }
 0xbc3   :  { %v1038_v37 = vpop.permute.xlu1 %1037 }
 0xbc4   :  { %1040 = vst.msk [vmem:[#allocation5] sm:$0xff] %vm554_vm0, %v1038_v37 }
 0xbcb   :  { %v1131_v38 = vld [vmem:[#allocation5] sm:$0xff] }
 0xbcc   :  { %1133 = vrot.lane.b32.xlu1 %v1131_v38, %s7240_s8 }
 0xc34   :  { %v1033_v22 = vpop.permute.xlu0 %1032 }
 0xc35   :  { %1035 = vst.msk [vmem:[#allocation4] sm:$0xff] %vm554_vm0, %v1033_v22  ;;  %1042 = vst.msk [vmem:[#allocation3 + $0x18] sm:$0xff] %vm554_vm0, %v1033_v22 }
 0xc3c   :  { %v1045_v39 = vld [vmem:[#allocation4] sm:$0xff] }
 0xc3d   :  { %5874 = vmatmul.mubr.msk.f32.vlgmr.msra.gmra.mrb[12].mxu0 %vm554_vm0, %v1045_v39 }
 0xc3e   :  { %6343 = vmatpush3.bf16.msra.mxu0 %v7584_v8  ;;  %5895 = vmatprep.mubr.msk.f32.mxu0 %vm7238_vm2, %v7236_v0  ;;  %v1134_v50 = vpop.permute.xlu1 %1133 }
 0xc3f   :  { %6344 = vmatprep.subr.bf16.mxu0 %v7237_v9 }
 0xc42   :  { %6346 = vmatpush3.bf16.msra.mxu0 %v7596_v14 }
 0xc43   :  { %6353 = vmatprep.subr.bf16.mxu0 %v7237_v9 }
 0xd10   :  { %v1119_v40 = vpop.f32.mrb[12].mxu0 }
 0xd11   :  { %v1123_v41 = vadd.f32 %v1119_v40, %v7636_v31  ;;  %v5875_v42 = vpop.f32.mrb[13].mxu0 }
 0xd13   :  { %6625 = vtanh.f32 %v1123_v41  ;;  %v5444_v44 = vmul.f32 -1.442695, %v1123_v41 }
 0xd15   :  { %6627 = vpow2.f32 %v5444_v44 }
 0xd1d   :  { %v6626_v43 = vpop.eup %6625 }
 0xd1e   :  { %1138 = vrot.lane.b32.xlu0 %v6626_v43, %s7239_s14 }
 0xd1f   :  { %v6628_v45 = vpop.eup %6627 }
 0xd20   :  { %v1127_v46 = vadd.f32 1.0, %v6628_v45 }
 0xd22   :  { %6629 = vrcp.f32 %v1127_v46 }
 0xd2c   :  { %v6630_v47 = vpop.eup %6629 }
 0xd2d   :  { %v1136_v51 = vmul.f32 %v6630_v47, %v1134_v50 }
 0xd90   :  { %v1139_v48 = vpop.permute.xlu0 %1138 }
 0xd91   :  { %v1141_v49 = vmul.f32 %v6630_v47, %v1139_v48 }
 0xd93   :  { %1143 = vrot.lane.b32.xlu0 %v1141_v49, %s7240_s8 }
 0xe05   :  { %v1144_v52 = vpop.permute.xlu0 %1143 }
 0xe06   :  { %v1146_v53 = vadd.f32 %v1144_v52, %v1136_v51 }
 0xe08   :  { %6631 = vtanh.f32 %v1146_v53 }
 0xe12   :  { %v6632_v31 = vpop.eup %6631 }
 0xe13   :  { %1149 = vrot.lane.b32.xlu1 %v6632_v31, %s7239_s14 }
 0xe17   :  { %1159 = vrot.lane.b32.xlu1 %v1146_v53, %s7241_s11 }
 0xe85   :  { %v1150_v54 = vpop.permute.xlu1 %1149 }
 0xe86   :  { %v1152_v55 = vmul.f32 %v6630_v47, %v1150_v54 }
 0xe88   :  { %1154 = vrot.lane.b32.xlu0 %v1152_v55, %s7240_s8 }
 0xe89   :  { %v1160_v56 = vpop.permute.xlu1 %1159 }
 0xe8a   :  { %1162 = vst.msk [vmem:[#allocation5] sm:$0xff] %vm554_vm0, %v1160_v56 }
 0xe91   :  { %v1253_v57 = vld [vmem:[#allocation5] sm:$0xff] }
 0xe92   :  { %1255 = vrot.lane.b32.xlu1 %v1253_v57, %s7240_s8 }
 0xefa   :  { %v1155_v58 = vpop.permute.xlu0 %1154 }
 0xefb   :  { %1157 = vst.msk [vmem:[#allocation4] sm:$0xff] %vm554_vm0, %v1155_v58  ;;  %1164 = vst.msk [vmem:[#allocation3 + $0x20] sm:$0xff] %vm554_vm0, %v1155_v58 }
 0xf02   :  { %v1167_v27 = vld [vmem:[#allocation4] sm:$0xff] }
 0xf03   :  { %5885 = vmatmul.mubr.msk.f32.vlgmr.msra.gmra.mrb[12].mxu1 %vm554_vm0, %v1167_v27 }
 0xf04   :  { %6349 = vmatpush3.bf16.msra.mxu1 %v7584_v8  ;;  %5906 = vmatprep.mubr.msk.f32.mxu1 %vm7238_vm2, %v7236_v0 }
 0xf05   :  { %6350 = vmatprep.subr.bf16.mxu1 %v7237_v9 }
 0xf08   :  { %6352 = vmatpush3.bf16.msra.mxu1 %v7596_v14  ;;  %v1256_v14 = vpop.permute.xlu1 %1255 }
 0xf09   :  { %6359 = vmatprep.subr.bf16.mxu1 %v7237_v9 }
 0xfd6   :  { %v1241_v59 = vpop.f32.mrb[12].mxu1 }
 0xfd7   :  { %v1245_v61 = vadd.f32 %v1241_v59, %v7634_v29  ;;  %v5886_v63 = vpop.f32.mrb[13].mxu1 }
 0xfd9   :  { %6633 = vtanh.f32 %v1245_v61  ;;  %v5446_v4 = vmul.f32 -1.442695, %v1245_v61 }
 0xfdb   :  { %6635 = vpow2.f32 %v5446_v4  ;;  %v1533_v4 = vld [vmem:[#allocation27] sm:$0xff] }
 0xfe3   :  { %v6634_v2 = vpop.eup %6633 }
 0xfe4   :  { %1260 = vrot.lane.b32.xlu0 %v6634_v2, %s7239_s14 }
 0xfe5   :  { %v6636_v8 = vpop.eup %6635 }
 0xfe6   :  { %v1249_v6 = vadd.f32 1.0, %v6636_v8  ;;  %v1534_v8 = vld [vmem:[#allocation27 + $0x8] sm:$0xff] }
 0xfe8   :  { %6637 = vrcp.f32 %v1249_v6  ;;  %v7804_v6 = vpack.c.bf16 %v1534_v8, %v1533_v4 }
 0xff2   :  { %v6638_v10 = vpop.eup %6637 }
 0xff3   :  { %v1258_v17 = vmul.f32 %v6638_v10, %v1256_v14  ;;  %v1623_v14 = vld [vmem:[#allocation15] sm:$0xff] }
0x1056   :  { %v1261_v13 = vpop.permute.xlu0 %1260 }
0x1057   :  { %v1263_v15 = vmul.f32 %v6638_v10, %v1261_v13  ;;  %v1536_v13 = vld [vmem:[#allocation27 + $0x18] sm:$0xff] }
0x1059   :  { %1265 = vrot.lane.b32.xlu0 %v1263_v15, %s7240_s8 }
0x10cb   :  { %v1266_v18 = vpop.permute.xlu0 %1265 }
0x10cc   :  { %v1268_v19 = vadd.f32 %v1266_v18, %v1258_v17  ;;  %v1624_v17 = vld [vmem:[#allocation15 + $0x8] sm:$0xff] }
0x10cd   :  { %v7811_v18 = vpack.c.bf16 %v1624_v17, %v1623_v14 }
0x10ce   :  { %6639 = vtanh.f32 %v1268_v19 }
0x10d8   :  { %v6640_v29 = vpop.eup %6639 }
0x10d9   :  { %1271 = vrot.lane.b32.xlu1 %v6640_v29, %s7239_s14  ;;  %v1625_v29 = vld [vmem:[#allocation15 + $0x10] sm:$0xff] }
0x10dd   :  { %1281 = vrot.lane.b32.xlu1 %v1268_v19, %s7241_s11 }
0x114b   :  { %v1272_v20 = vpop.permute.xlu1 %1271 }
0x114c   :  { %v1274_v21 = vmul.f32 %v6638_v10, %v1272_v20  ;;  %v1535_v10 = vld [vmem:[#allocation27 + $0x10] sm:$0xff] }
0x114d   :  { %v7808_v15 = vpack.c.bf16 %v1536_v13, %v1535_v10  ;;  %v1626_v20 = vld [vmem:[#allocation15 + $0x18] sm:$0xff] }
0x114e   :  { %1276 = vrot.lane.b32.xlu0 %v1274_v21, %s7240_s8 }
0x114f   :  { %v1282_v23 = vpop.permute.xlu1 %1281 }
0x1150   :  { %1284 = vst.msk [vmem:[#allocation5] sm:$0xff] %vm554_vm0, %v1282_v23  ;;  %v7816_v23 = vpack.c.bf16 %v1626_v20, %v1625_v29 }
0x1157   :  { %v1375_v24 = vld [vmem:[#allocation5] sm:$0xff] }
0x1158   :  { %1377 = vrot.lane.b32.xlu1 %v1375_v24, %s7240_s8 }
0x11c0   :  { %v1277_v26 = vpop.permute.xlu0 %1276 }
0x11c1   :  { %1279 = vst.msk [vmem:[#allocation4] sm:$0xff] %vm554_vm0, %v1277_v26  ;;  %1286 = vst.msk [vmem:[#allocation3 + $0x28] sm:$0xff] %vm554_vm0, %v1277_v26 }
0x11c8   :  { %v1289_v28 = vld [vmem:[#allocation4] sm:$0xff] }
0x11c9   :  { %5896 = vmatmul.mubr.msk.f32.vlgmr.msra.gmra.mrb[14].mxu0 %vm554_vm0, %v1289_v28 }
0x11ca   :  { %5917 = vmatprep.mubr.msk.f32.mxu0 %vm7238_vm2, %v7236_v0  ;;  %v1378_v41 = vpop.permute.xlu1 %1377  ;;  %6355 = vmatpush3.bf16.msra.mxu0 %v7804_v6 }
0x11cb   :  { %6356 = vmatprep.subr.bf16.mxu0 %v7237_v9 }
0x11ce   :  { %6358 = vmatpush3.bf16.msra.mxu0 %v7808_v15 }
0x11cf   :  { %6365 = vmatprep.subr.bf16.mxu0 %v7237_v9 }
0x129c   :  { %v1363_v30 = vpop.f32.mrb[14].mxu0 }
0x129d   :  { %v1367_v32 = vadd.f32 %v1363_v30, %v7640_v35  ;;  %v5897_v25 = vpop.f32.mrb[15].mxu0 }
0x129f   :  { %6641 = vtanh.f32 %v1367_v32  ;;  %v5448_v36 = vmul.f32 -1.442695, %v1367_v32 }
0x12a1   :  { %6643 = vpow2.f32 %v5448_v36 }
0x12a9   :  { %v6642_v34 = vpop.eup %6641 }
0x12aa   :  { %1382 = vrot.lane.b32.xlu0 %v6642_v34, %s7239_s14  ;;  %v7843_v34 = vld [vmem:[#allocation29] ss:$0 sm:$0xff] }
0x12ab   :  { %v6644_v37 = vpop.eup %6643 }
0x12ac   :  { %v1371_v38 = vadd.f32 1.0, %v6644_v37 }
0x12ae   :  { %6645 = vrcp.f32 %v1371_v38 }
0x12b8   :  { %v6646_v22 = vpop.eup %6645 }
0x12b9   :  { %v1380_v42 = vmul.f32 %v6646_v22, %v1378_v41 }
0x131c   :  { %v1383_v39 = vpop.permute.xlu0 %1382 }
0x131d   :  { %v1385_v40 = vmul.f32 %v6646_v22, %v1383_v39 }
0x131f   :  { %1387 = vrot.lane.b32.xlu0 %v1385_v40, %s7240_s8 }
0x1391   :  { %v1388_v43 = vpop.permute.xlu0 %1387 }
0x1392   :  { %v1390_v44 = vadd.f32 %v1388_v43, %v1380_v42 }
0x1394   :  { %6647 = vtanh.f32 %v1390_v44 }
0x139e   :  { %v6648_v35 = vpop.eup %6647 }
0x139f   :  { %1393 = vrot.lane.b32.xlu1 %v6648_v35, %s7239_s14 }
0x13a3   :  { %1403 = vrot.lane.b32.xlu1 %v1390_v44, %s7241_s11 }
0x1411   :  { %v1394_v45 = vpop.permute.xlu1 %1393 }
0x1412   :  { %v1396_v46 = vmul.f32 %v6646_v22, %v1394_v45  ;;  %v542_v22 = vadd.f32 %v7691_v12, %v7671_v60 }
0x1414   :  { %1398 = vrot.lane.b32.xlu0 %v1396_v46, %s7240_s8 }
0x1415   :  { %v1404_v47 = vpop.permute.xlu1 %1403 }
0x1416   :  { %1406 = vst.msk [vmem:[#allocation5] sm:$0xff] %vm554_vm0, %v1404_v47 }
0x141d   :  { %v1497_v48 = vld [vmem:[#allocation5] sm:$0xff] }
0x141e   :  { %1499 = vrot.lane.b32.xlu1 %v1497_v48, %s7240_s8 }
0x1486   :  { %v1399_v49 = vpop.permute.xlu0 %1398 }
0x1487   :  { %1401 = vst.msk [vmem:[#allocation4] sm:$0xff] %vm554_vm0, %v1399_v49  ;;  %1408 = vst.msk [vmem:[#allocation3 + $0x30] sm:$0xff] %vm554_vm0, %v1399_v49 }
0x148e   :  { %v1411_v50 = vld [vmem:[#allocation4] sm:$0xff] }
0x148f   :  { %5907 = vmatmul.mubr.msk.f32.vlgmr.msra.gmra.mrb[14].mxu1 %vm554_vm0, %v1411_v50 }
0x1490   :  { %5928 = vmatprep.mubr.msk.f32.mxu1 %vm7238_vm2, %v7236_v0  ;;  %v1500_v59 = vpop.permute.xlu1 %1499  ;;  %6361 = vmatpush3.bf16.msra.mxu1 %v7811_v18 }
0x1491   :  { %6362 = vmatprep.subr.bf16.mxu1 %v7237_v9 }
0x1494   :  { %6364 = vmatpush3.bf16.msra.mxu1 %v7816_v23 }
0x1495   :  { %6371 = vmatprep.subr.bf16.mxu1 %v7237_v9 }
0x1562   :  { %v1485_v51 = vpop.f32.mrb[14].mxu1 }
0x1563   :  { %v1489_v52 = vadd.f32 %v1485_v51, %v7638_v33  ;;  %v5908_v53 = vpop.f32.mrb[15].mxu1 }
0x1565   :  { %6649 = vtanh.f32 %v1489_v52  ;;  %v5450_v54 = vmul.f32 -1.442695, %v1489_v52 }
0x1567   :  { %6651 = vpow2.f32 %v5450_v54 }
0x156f   :  { %v6650_v31 = vpop.eup %6649 }
0x1570   :  { %1504 = vrot.lane.b32.xlu0 %v6650_v31, %s7239_s14 }
0x1571   :  { %v6652_v55 = vpop.eup %6651 }
0x1572   :  { %v1493_v56 = vadd.f32 1.0, %v6652_v55 }
0x1574   :  { %6653 = vrcp.f32 %v1493_v56 }
0x157e   :  { %v6654_v57 = vpop.eup %6653 }
0x157f   :  { %v1502_v61 = vmul.f32 %v6654_v57, %v1500_v59 }
0x15e2   :  { %v1505_v58 = vpop.permute.xlu0 %1504 }
0x15e3   :  { %v1507_v27 = vmul.f32 %v6654_v57, %v1505_v58 }
0x15e5   :  { %1509 = vrot.lane.b32.xlu0 %v1507_v27, %s7240_s8 }
0x1657   :  { %v1510_v63 = vpop.permute.xlu0 %1509 }
0x1658   :  { %v1512_v2 = vadd.f32 %v1510_v63, %v1502_v61 }
0x165a   :  { %6655 = vtanh.f32 %v1512_v2 }
0x1664   :  { %v6656_v33 = vpop.eup %6655 }
0x1665   :  { %1515 = vrot.lane.b32.xlu1 %v6656_v33, %s7239_s14 }
0x1669   :  { %1525 = vrot.lane.b32.xlu1 %v1512_v2, %s7241_s11 }
0x16d7   :  { %v1516_v19 = vpop.permute.xlu1 %1515 }
0x16d8   :  { %v1518_v21 = vmul.f32 %v6654_v57, %v1516_v19 }
0x16da   :  { %1520 = vrot.lane.b32.xlu0 %v1518_v21, %s7240_s8 }
0x16db   :  { %v1526_v24 = vpop.permute.xlu1 %1525 }
0x16dc   :  { %1528 = vst.msk [vmem:[#allocation5] sm:$0xff] %vm554_vm0, %v1526_v24 }
0x16dd   :  { %1619 = vst.msk [vmem:[#allocation5] sm:$0xff] %vm554_vm0, %v7236_v0 }
0x16e4   :  { %v1708_v26 = vld [vmem:[#allocation5] sm:$0xff] }
0x16e5   :  { %1710 = vrot.lane.b32.xlu1 %v1708_v26, %s7240_s8 }
0x174c   :  { %v1521_v28 = vpop.permute.xlu0 %1520 }
0x174d   :  { %1523 = vst.msk [vmem:[#allocation4] sm:$0xff] %vm554_vm0, %v1521_v28  ;;  %1530 = vst.msk [vmem:[#allocation3 + $0x38] sm:$0xff] %vm554_vm0, %v1521_v28 }
0x1754   :  { %v1531_v30 = vld [vmem:[#allocation4] sm:$0xff] }
0x1755   :  { %1618 = vst.msk [vmem:[#allocation4] sm:$0xff] %vm554_vm0, %v7236_v0  ;;  %v1532_v32 = vmax.f32 %v1531_v30, 0.0 }
0x1757   :  { %5918 = vmatmul.mubr.msk.f32.vlgmr.msra.gmra.mrb[16].mxu0 %vm554_vm0, %v1532_v32  ;;  %v1711_v48 = vpop.permute.xlu1 %1710 }
0x1758   :  { %6367 = vmatpush3.bf16.msra.mxu0 %v7811_v18  ;;  %5939 = vmatprep.mubr.msk.f32.mxu0 %vm7238_vm2, %v7236_v0 }
0x1759   :  { %6368 = vmatprep.subr.bf16.mxu0 %v7237_v9 }
0x175c   :  { %v1622_v25 = vld [vmem:[#allocation4] sm:$0xff]  ;;  %6370 = vmatpush3.bf16.msra.mxu0 %v7816_v23 }
0x175d   :  { %5929 = vmatmul.mubr.msk.f32.vlgmr.msra.gmra.mrb[16].mxu1 %vm554_vm0, %v1622_v25  ;;  %6377 = vmatprep.subr.bf16.mxu0 %v7237_v9 }
0x175e   :  { %6373 = vmatpush3.bf16.msra.mxu1 %v7811_v18  ;;  %5950 = vmatprep.mubr.msk.f32.mxu1 %vm7238_vm2, %v7236_v0 }
0x175f   :  { %6374 = vmatprep.subr.bf16.mxu1 %v7237_v9 }
0x1762   :  { %6376 = vmatpush3.bf16.msra.mxu1 %v7816_v23 }
0x1763   :  { %6383 = vmatprep.subr.bf16.mxu1 %v7237_v9 }
0x182a   :  { %v1613_v36 = vpop.f32.mrb[16].mxu0 }
0x182b   :  { %v1614_v37 = vadd.f32 %v7843_v34, %v1613_v36  ;;  %v5919_v38 = vpop.f32.mrb[17].mxu0 }
0x182d   :  { %1617 = vst [vmem:[#allocation30] sm:$0xff] %v1614_v37 }
0x1830   :  { %v1696_v39 = vpop.f32.mrb[16].mxu1 }
0x1831   :  { %v1700_v40 = vadd.f32 %v1696_v39, %v542_v22  ;;  %v5930_v41 = vpop.f32.mrb[17].mxu1 }
0x1833   :  { %6657 = vtanh.f32 %v1700_v40  ;;  %v5454_v43 = vmul.f32 -1.442695, %v1700_v40 }
0x1835   :  { %6659 = vpow2.f32 %v5454_v43 }
0x183d   :  { %v6658_v42 = vpop.eup %6657 }
0x183e   :  { %1715 = vrot.lane.b32.xlu0 %v6658_v42, %s7239_s14 }
0x183f   :  { %v6660_v44 = vpop.eup %6659 }
0x1840   :  { %v1704_v35 = vadd.f32 1.0, %v6660_v44 }
0x1842   :  { %6661 = vrcp.f32 %v1704_v35 }
0x184c   :  { %v6662_v45 = vpop.eup %6661 }
0x184d   :  { %v1713_v49 = vmul.f32 %v6662_v45, %v1711_v48 }
0x18b0   :  { %v1716_v46 = vpop.permute.xlu0 %1715 }
0x18b1   :  { %v1718_v47 = vmul.f32 %v6662_v45, %v1716_v46 }
0x18b3   :  { %1720 = vrot.lane.b32.xlu0 %v1718_v47, %s7240_s8 }
0x1925   :  { %v1721_v60 = vpop.permute.xlu0 %1720 }
0x1926   :  { %v1723_v12 = vadd.f32 %v1721_v60, %v1713_v49 }
0x1928   :  { %6663 = vtanh.f32 %v1723_v12 }
0x1932   :  { %v6664_v50 = vpop.eup %6663 }
0x1933   :  { %1726 = vrot.lane.b32.xlu1 %v6664_v50, %s7239_s14 }
0x1937   :  { %1736 = vrot.lane.b32.xlu1 %v1723_v12, %s7241_s11 }
0x19a5   :  { %v1727_v51 = vpop.permute.xlu1 %1726 }
0x19a6   :  { %v1729_v52 = vmul.f32 %v6662_v45, %v1727_v51 }
0x19a8   :  { %1731 = vrot.lane.b32.xlu0 %v1729_v52, %s7240_s8 }
0x19a9   :  { %v1737_v53 = vpop.permute.xlu1 %1736 }
0x19aa   :  { %1739 = vst.msk [vmem:[#allocation5] sm:$0xff] %vm554_vm0, %v1737_v53 }
0x19b1   :  { %v1830_v31 = vld [vmem:[#allocation5] sm:$0xff] }
0x19b2   :  { %1832 = vrot.lane.b32.xlu1 %v1830_v31, %s7240_s8 }
0x1a1a   :  { %v1732_v54 = vpop.permute.xlu0 %1731 }
0x1a1b   :  { %1734 = vst.msk [vmem:[#allocation4] sm:$0xff] %vm554_vm0, %v1732_v54  ;;  %1741 = vst.msk [vmem:[#allocation3 + $0x78] sm:$0xff] %vm554_vm0, %v1732_v54 }
0x1a22   :  { %v1744_v55 = vld [vmem:[#allocation4] sm:$0xff] }
0x1a23   :  { %5940 = vmatmul.mubr.msk.f32.vlgmr.msra.gmra.mrb[18].mxu0 %vm554_vm0, %v1744_v55 }
0x1a24   :  { %6379 = vmatpush3.bf16.msra.mxu0 %v7811_v18  ;;  %5961 = vmatprep.mubr.msk.f32.mxu0 %vm7238_vm2, %v7236_v0  ;;  %v1833_v8 = vpop.permute.xlu1 %1832 }
0x1a25   :  { %6380 = vmatprep.subr.bf16.mxu0 %v7237_v9 }
0x1a28   :  { %6382 = vmatpush3.bf16.msra.mxu0 %v7816_v23 }
0x1a29   :  { %6389 = vmatprep.subr.bf16.mxu0 %v7237_v9 }
0x1af6   :  { %v1818_v56 = vpop.f32.mrb[18].mxu0 }
0x1af7   :  { %v1822_v57 = vadd.f32 %v1818_v56, %v7694_v16  ;;  %v5941_v58 = vpop.f32.mrb[19].mxu0 }
0x1af9   :  { %6665 = vtanh.f32 %v1822_v57  ;;  %v5456_v59 = vmul.f32 -1.442695, %v1822_v57 }
0x1afb   :  { %6667 = vpow2.f32 %v5456_v59 }
0x1b03   :  { %v6666_v27 = vpop.eup %6665 }
0x1b04   :  { %1837 = vrot.lane.b32.xlu0 %v6666_v27, %s7239_s14 }
0x1b05   :  { %v6668_v61 = vpop.eup %6667 }
0x1b06   :  { %v1826_v63 = vadd.f32 1.0, %v6668_v61 }
0x1b08   :  { %6669 = vrcp.f32 %v1826_v63 }
0x1b12   :  { %v6670_v2 = vpop.eup %6669 }
0x1b13   :  { %v1835_v10 = vmul.f32 %v6670_v2, %v1833_v8 }
0x1b76   :  { %v1838_v33 = vpop.permute.xlu0 %1837 }
0x1b77   :  { %v1840_v4 = vmul.f32 %v6670_v2, %v1838_v33 }
0x1b79   :  { %1842 = vrot.lane.b32.xlu0 %v1840_v4, %s7240_s8 }
0x1beb   :  { %v1843_v13 = vpop.permute.xlu0 %1842 }
0x1bec   :  { %v1845_v14 = vadd.f32 %v1843_v13, %v1835_v10 }
0x1bee   :  { %6671 = vtanh.f32 %v1845_v14 }
0x1bf8   :  { %v6672_v16 = vpop.eup %6671 }
0x1bf9   :  { %1848 = vrot.lane.b32.xlu1 %v6672_v16, %s7239_s14 }
0x1bfd   :  { %1858 = vrot.lane.b32.xlu1 %v1845_v14, %s7241_s11 }
0x1c6b   :  { %v1849_v17 = vpop.permute.xlu1 %1848 }
0x1c6c   :  { %v1851_v19 = vmul.f32 %v6670_v2, %v1849_v17 }
0x1c6e   :  { %1853 = vrot.lane.b32.xlu0 %v1851_v19, %s7240_s8 }
0x1c6f   :  { %v1859_v29 = vpop.permute.xlu1 %1858 }
0x1c70   :  { %1861 = vst.msk [vmem:[#allocation5] sm:$0xff] %vm554_vm0, %v1859_v29 }
0x1c77   :  { %v1952_v20 = vld [vmem:[#allocation5] sm:$0xff] }
0x1c78   :  { %1954 = vrot.lane.b32.xlu1 %v1952_v20, %s7240_s8 }
0x1ce0   :  { %v1854_v21 = vpop.permute.xlu0 %1853 }
0x1ce1   :  { %1856 = vst.msk [vmem:[#allocation4] sm:$0xff] %vm554_vm0, %v1854_v21  ;;  %1863 = vst.msk [vmem:[#allocation3 + $0x70] sm:$0xff] %vm554_vm0, %v1854_v21 }
0x1ce8   :  { %v1866_v24 = vld [vmem:[#allocation4] sm:$0xff] }
0x1ce9   :  { %5951 = vmatmul.mubr.msk.f32.vlgmr.msra.gmra.mrb[18].mxu1 %vm554_vm0, %v1866_v24 }
0x1cea   :  { %6385 = vmatpush3.bf16.msra.mxu1 %v7811_v18  ;;  %5972 = vmatprep.mubr.msk.f32.mxu1 %vm7238_vm2, %v7236_v0  ;;  %v1955_v40 = vpop.permute.xlu1 %1954 }
0x1ceb   :  { %6386 = vmatprep.subr.bf16.mxu1 %v7237_v9 }
0x1cee   :  { %6388 = vmatpush3.bf16.msra.mxu1 %v7816_v23 }
0x1cef   :  { %6395 = vmatprep.subr.bf16.mxu1 %v7237_v9 }
0x1dbc   :  { %v1940_v26 = vpop.f32.mrb[18].mxu1 }
0x1dbd   :  { %v1944_v28 = vadd.f32 %v1940_v26, %v7686_v7  ;;  %v5952_v30 = vpop.f32.mrb[19].mxu1 }
0x1dbf   :  { %6673 = vtanh.f32 %v1944_v28  ;;  %v5458_v25 = vmul.f32 -1.442695, %v1944_v28 }
0x1dc1   :  { %6675 = vpow2.f32 %v5458_v25 }
0x1dc9   :  { %v6674_v32 = vpop.eup %6673 }
0x1dca   :  { %1959 = vrot.lane.b32.xlu0 %v6674_v32, %s7239_s14 }
0x1dcb   :  { %v6676_v36 = vpop.eup %6675 }
0x1dcc   :  { %v1948_v37 = vadd.f32 1.0, %v6676_v36 }
0x1dce   :  { %6677 = vrcp.f32 %v1948_v37 }
0x1dd8   :  { %v6678_v38 = vpop.eup %6677 }
0x1dd9   :  { %v1957_v41 = vmul.f32 %v6678_v38, %v1955_v40 }
0x1e3c   :  { %v1960_v22 = vpop.permute.xlu0 %1959 }
0x1e3d   :  { %v1962_v39 = vmul.f32 %v6678_v38, %v1960_v22 }
0x1e3f   :  { %1964 = vrot.lane.b32.xlu0 %v1962_v39, %s7240_s8 }
0x1eb1   :  { %v1965_v42 = vpop.permute.xlu0 %1964 }
0x1eb2   :  { %v1967_v43 = vadd.f32 %v1965_v42, %v1957_v41 }
0x1eb4   :  { %6679 = vtanh.f32 %v1967_v43 }
0x1ebe   :  { %v6680_v7 = vpop.eup %6679 }
0x1ebf   :  { %1970 = vrot.lane.b32.xlu1 %v6680_v7, %s7239_s14 }
0x1ec3   :  { %1980 = vrot.lane.b32.xlu1 %v1967_v43, %s7241_s11 }
0x1f31   :  { %v1971_v44 = vpop.permute.xlu1 %1970 }
0x1f32   :  { %v1973_v35 = vmul.f32 %v6678_v38, %v1971_v44 }
0x1f34   :  { %1975 = vrot.lane.b32.xlu0 %v1973_v35, %s7240_s8 }
0x1f35   :  { %v1981_v45 = vpop.permute.xlu1 %1980 }
0x1f36   :  { %1983 = vst.msk [vmem:[#allocation5] sm:$0xff] %vm554_vm0, %v1981_v45 }
0x1f3d   :  { %v2074_v46 = vld [vmem:[#allocation5] sm:$0xff] }
0x1f3e   :  { %2076 = vrot.lane.b32.xlu1 %v2074_v46, %s7240_s8 }
0x1fa6   :  { %v1976_v47 = vpop.permute.xlu0 %1975 }
0x1fa7   :  { %1978 = vst.msk [vmem:[#allocation4] sm:$0xff] %vm554_vm0, %v1976_v47  ;;  %1985 = vst.msk [vmem:[#allocation3 + $0x68] sm:$0xff] %vm554_vm0, %v1976_v47 }
0x1fae   :  { %v1988_v48 = vld [vmem:[#allocation4] sm:$0xff] }
0x1faf   :  { %5962 = vmatmul.mubr.msk.f32.vlgmr.msra.gmra.mrb[20].mxu0 %vm554_vm0, %v1988_v48 }
0x1fb0   :  { %6391 = vmatpush3.bf16.msra.mxu0 %v7811_v18  ;;  %5983 = vmatprep.mubr.msk.f32.mxu0 %vm7238_vm2, %v7236_v0  ;;  %v2077_v56 = vpop.permute.xlu1 %2076 }
0x1fb1   :  { %6392 = vmatprep.subr.bf16.mxu0 %v7237_v9 }
0x1fb4   :  { %6394 = vmatpush3.bf16.msra.mxu0 %v7816_v23 }
0x1fb5   :  { %6401 = vmatprep.subr.bf16.mxu0 %v7237_v9 }
0x2082   :  { %v2062_v49 = vpop.f32.mrb[20].mxu0 }
0x2083   :  { %v2066_v60 = vadd.f32 %v2062_v49, %v7689_v11  ;;  %v5963_v12 = vpop.f32.mrb[21].mxu0 }
0x2085   :  { %6681 = vtanh.f32 %v2066_v60  ;;  %v5460_v51 = vmul.f32 -1.442695, %v2066_v60 }
0x2087   :  { %6683 = vpow2.f32 %v5460_v51 }
0x208f   :  { %v6682_v50 = vpop.eup %6681 }
0x2090   :  { %2081 = vrot.lane.b32.xlu0 %v6682_v50, %s7239_s14 }
0x2091   :  { %v6684_v52 = vpop.eup %6683 }
0x2092   :  { %v2070_v53 = vadd.f32 1.0, %v6684_v52 }
0x2094   :  { %6685 = vrcp.f32 %v2070_v53 }
0x209e   :  { %v6686_v31 = vpop.eup %6685 }
0x209f   :  { %v2079_v57 = vmul.f32 %v6686_v31, %v2077_v56 }
0x2102   :  { %v2082_v54 = vpop.permute.xlu0 %2081 }
0x2103   :  { %v2084_v55 = vmul.f32 %v6686_v31, %v2082_v54 }
0x2105   :  { %2086 = vrot.lane.b32.xlu0 %v2084_v55, %s7240_s8 }
0x2177   :  { %v2087_v58 = vpop.permute.xlu0 %2086 }
0x2178   :  { %v2089_v27 = vadd.f32 %v2087_v58, %v2079_v57 }
0x217a   :  { %6687 = vtanh.f32 %v2089_v27 }
0x2184   :  { %v6688_v11 = vpop.eup %6687 }
0x2185   :  { %2092 = vrot.lane.b32.xlu1 %v6688_v11, %s7239_s14 }
0x2189   :  { %2102 = vrot.lane.b32.xlu1 %v2089_v27, %s7241_s11 }
0x21f7   :  { %v2093_v59 = vpop.permute.xlu1 %2092 }
0x21f8   :  { %v2095_v61 = vmul.f32 %v6686_v31, %v2093_v59 }
0x21fa   :  { %2097 = vrot.lane.b32.xlu0 %v2095_v61, %s7240_s8 }
0x21fb   :  { %v2103_v63 = vpop.permute.xlu1 %2102 }
0x21fc   :  { %2105 = vst.msk [vmem:[#allocation5] sm:$0xff] %vm554_vm0, %v2103_v63 }
0x2203   :  { %v2196_v2 = vld [vmem:[#allocation5] sm:$0xff] }
0x2204   :  { %2198 = vrot.lane.b32.xlu1 %v2196_v2, %s7240_s8 }
0x226c   :  { %v2098_v33 = vpop.permute.xlu0 %2097 }
0x226d   :  { %2100 = vst.msk [vmem:[#allocation4] sm:$0xff] %vm554_vm0, %v2098_v33  ;;  %2107 = vst.msk [vmem:[#allocation3 + $0x60] sm:$0xff] %vm554_vm0, %v2098_v33 }
0x2274   :  { %v2110_v4 = vld [vmem:[#allocation4] sm:$0xff] }
0x2275   :  { %5973 = vmatmul.mubr.msk.f32.vlgmr.msra.gmra.mrb[20].mxu1 %vm554_vm0, %v2110_v4 }
0x2276   :  { %6397 = vmatpush3.bf16.msra.mxu1 %v7811_v18  ;;  %5994 = vmatprep.mubr.msk.f32.mxu1 %vm7238_vm2, %v7236_v0  ;;  %v2199_v24 = vpop.permute.xlu1 %2198 }
0x2277   :  { %6398 = vmatprep.subr.bf16.mxu1 %v7237_v9 }
0x227a   :  { %6400 = vmatpush3.bf16.msra.mxu1 %v7816_v23 }
0x227b   :  { %6407 = vmatprep.subr.bf16.mxu1 %v7237_v9 }
0x2348   :  { %v2184_v8 = vpop.f32.mrb[20].mxu1 }
0x2349   :  { %v2188_v10 = vadd.f32 %v2184_v8, %v7680_v3  ;;  %v5974_v13 = vpop.f32.mrb[21].mxu1 }
0x234b   :  { %6689 = vtanh.f32 %v2188_v10  ;;  %v5462_v16 = vmul.f32 -1.442695, %v2188_v10 }
0x234d   :  { %6691 = vpow2.f32 %v5462_v16 }
0x2355   :  { %v6690_v14 = vpop.eup %6689 }
0x2356   :  { %2203 = vrot.lane.b32.xlu0 %v6690_v14, %s7239_s14 }
0x2357   :  { %v6692_v17 = vpop.eup %6691 }
0x2358   :  { %v2192_v19 = vadd.f32 1.0, %v6692_v17 }
0x235a   :  { %6693 = vrcp.f32 %v2192_v19 }
0x2364   :  { %v6694_v29 = vpop.eup %6693 }
0x2365   :  { %v2201_v26 = vmul.f32 %v6694_v29, %v2199_v24 }
0x23c8   :  { %v2204_v20 = vpop.permute.xlu0 %2203 }
0x23c9   :  { %v2206_v21 = vmul.f32 %v6694_v29, %v2204_v20 }
0x23cb   :  { %2208 = vrot.lane.b32.xlu0 %v2206_v21, %s7240_s8 }
0x243d   :  { %v2209_v28 = vpop.permute.xlu0 %2208 }
0x243e   :  { %v2211_v30 = vadd.f32 %v2209_v28, %v2201_v26 }
0x2440   :  { %6695 = vtanh.f32 %v2211_v30 }
0x244a   :  { %v6696_v3 = vpop.eup %6695 }
0x244b   :  { %2214 = vrot.lane.b32.xlu1 %v6696_v3, %s7239_s14 }
0x244f   :  { %2224 = vrot.lane.b32.xlu1 %v2211_v30, %s7241_s11 }
0x24bd   :  { %v2215_v32 = vpop.permute.xlu1 %2214 }
0x24be   :  { %v2217_v25 = vmul.f32 %v6694_v29, %v2215_v32 }
0x24c0   :  { %2219 = vrot.lane.b32.xlu0 %v2217_v25, %s7240_s8 }
0x24c1   :  { %v2225_v36 = vpop.permute.xlu1 %2224 }
0x24c2   :  { %2227 = vst.msk [vmem:[#allocation5] sm:$0xff] %vm554_vm0, %v2225_v36  ;;  %v2703_v36 = vld [vmem:[#allocation18 + $0x20] sm:$0xff] }
0x24c9   :  { %v2318_v37 = vld [vmem:[#allocation5] sm:$0xff] }
0x24ca   :  { %2320 = vrot.lane.b32.xlu1 %v2318_v37, %s7240_s8  ;;  %v2704_v37 = vld [vmem:[#allocation18 + $0x28] sm:$0xff] }
0x2532   :  { %v2220_v38 = vpop.permute.xlu0 %2219 }
0x2533   :  { %2222 = vst.msk [vmem:[#allocation4] sm:$0xff] %vm554_vm0, %v2220_v38  ;;  %2229 = vst.msk [vmem:[#allocation3 + $0x58] sm:$0xff] %vm554_vm0, %v2220_v38  ;;  %v6413_v38 = vpack.c.bf16 %v2704_v37, %v2703_v36 }
0x253a   :  { %v2232_v22 = vld [vmem:[#allocation4] sm:$0xff] }
0x253b   :  { %5984 = vmatmul.mubr.msk.f32.vlgmr.msra.gmra.mrb[22].mxu0 %vm554_vm0, %v2232_v22  ;;  %v2705_v22 = vld [vmem:[#allocation18 + $0x30] sm:$0xff] }
0x253c   :  { %6403 = vmatpush3.bf16.msra.mxu0 %v7811_v18  ;;  %6005 = vmatprep.mubr.msk.f32.mxu0 %vm7238_vm2, %v7236_v0  ;;  %v2321_v46 = vpop.permute.xlu1 %2320 }
0x253d   :  { %6404 = vmatprep.subr.bf16.mxu0 %v7237_v9 }
0x2540   :  { %6406 = vmatpush3.bf16.msra.mxu0 %v7816_v23 }
0x2541   :  { %6414 = vmatprep.subr.bf16.mxu0 %v6413_v38 }
0x260e   :  { %v2306_v39 = vpop.f32.mrb[22].mxu0 }
0x260f   :  { %v2310_v40 = vadd.f32 %v2306_v39, %v7683_v5  ;;  %v5985_v41 = vpop.f32.mrb[23].mxu0  ;;  %v2706_v39 = vld [vmem:[#allocation18 + $0x38] sm:$0xff] }
0x2610   :  { %v3008_v41 = vld [vmem:[#allocation23 + $0x20] sm:$0xff] }
0x2611   :  { %6697 = vtanh.f32 %v2310_v40  ;;  %v5464_v43 = vmul.f32 -1.442695, %v2310_v40  ;;  %v6417_v40 = vpack.c.bf16 %v2706_v39, %v2705_v22  ;;  %v8037_v39 = vld [vmem:[#allocation26] ss:$0 sm:$0xff] }
0x2613   :  { %6699 = vpow2.f32 %v5464_v43 }
0x261b   :  { %v6698_v42 = vpop.eup %6697 }
0x261c   :  { %2325 = vrot.lane.b32.xlu0 %v6698_v42, %s7239_s14  ;;  %v3009_v42 = vld [vmem:[#allocation23 + $0x28] sm:$0xff] }
0x261d   :  { %v6700_v7 = vpop.eup %6699  ;;  %v6429_v43 = vpack.c.bf16 %v3009_v42, %v3008_v41 }
0x261e   :  { %v2314_v44 = vadd.f32 1.0, %v6700_v7  ;;  %v2691_v7 = vld [vmem:[#allocation18] sm:$0xff] }
0x2620   :  { %6701 = vrcp.f32 %v2314_v44  ;;  %v2692_v44 = vld [vmem:[#allocation18 + $0x8] sm:$0xff] }
0x262a   :  { %v6702_v18 = vpop.eup %6701 }
0x262b   :  { %v2323_v23 = vmul.f32 %v6702_v18, %v2321_v46 }
0x268e   :  { %v2326_v35 = vpop.permute.xlu0 %2325 }
0x268f   :  { %v2328_v45 = vmul.f32 %v6702_v18, %v2326_v35  ;;  %v6421_v35 = vpack.c.bf16 %v2692_v44, %v2691_v7 }
0x2691   :  { %2330 = vrot.lane.b32.xlu0 %v2328_v45, %s7240_s8 }
0x2703   :  { %v2331_v47 = vpop.permute.xlu0 %2330 }
0x2704   :  { %v2333_v48 = vadd.f32 %v2331_v47, %v2323_v23 }
0x2706   :  { %6703 = vtanh.f32 %v2333_v48 }
0x2710   :  { %v6704_v5 = vpop.eup %6703 }
0x2711   :  { %2336 = vrot.lane.b32.xlu1 %v6704_v5, %s7239_s14  ;;  %v3011_v5 = vld [vmem:[#allocation23 + $0x38] sm:$0xff] }
0x2715   :  { %2346 = vrot.lane.b32.xlu1 %v2333_v48, %s7241_s11  ;;  %v3010_v48 = vld [vmem:[#allocation23 + $0x30] sm:$0xff] }
0x2783   :  { %v2337_v49 = vpop.permute.xlu1 %2336 }
0x2784   :  { %v2339_v60 = vmul.f32 %v6702_v18, %v2337_v49  ;;  %v2693_v49 = vld [vmem:[#allocation18 + $0x10] sm:$0xff] }
0x2786   :  { %2341 = vrot.lane.b32.xlu0 %v2339_v60, %s7240_s8  ;;  %v2694_v60 = vld [vmem:[#allocation18 + $0x18] sm:$0xff] }
0x2787   :  { %v2347_v12 = vpop.permute.xlu1 %2346 }
0x2788   :  { %2349 = vst.msk [vmem:[#allocation5] sm:$0xff] %vm554_vm0, %v2347_v12 }
0x278f   :  { %v2440_v50 = vld [vmem:[#allocation5] sm:$0xff] }
0x2790   :  { %2442 = vrot.lane.b32.xlu1 %v2440_v50, %s7240_s8 }
0x27f8   :  { %v2342_v51 = vpop.permute.xlu0 %2341 }
0x27f9   :  { %2344 = vst.msk [vmem:[#allocation4] sm:$0xff] %vm554_vm0, %v2342_v51  ;;  %2351 = vst.msk [vmem:[#allocation3 + $0x50] sm:$0xff] %vm554_vm0, %v2342_v51 }
0x2800   :  { %v2354_v52 = vld [vmem:[#allocation4] sm:$0xff] }
0x2801   :  { %5995 = vmatmul.mubr.msk.f32.vlgmr.msra.gmra.mrb[22].mxu1 %vm554_vm0, %v2354_v52 }
0x2802   :  { %6409 = vmatpush3.bf16.msra.mxu1 %v7804_v6  ;;  %6016 = vmatprep.mubr.msk.f32.mxu1 %vm7238_vm2, %v7236_v0  ;;  %v2443_v59 = vpop.permute.xlu1 %2442 }
0x2803   :  { %6410 = vmatprep.subr.bf16.mxu1 %v7237_v9 }
0x2806   :  { %6412 = vmatpush3.bf16.msra.mxu1 %v7808_v15 }
0x2807   :  { %6430 = vmatprep.subr.bf16.mxu1 %v6429_v43 }
0x28d4   :  { %v2428_v53 = vpop.f32.mrb[22].mxu1 }
0x28d5   :  { %v2432_v31 = vadd.f32 %v2428_v53, %v7674_v62  ;;  %v5996_v54 = vpop.f32.mrb[23].mxu1  ;;  %v6433_v53 = vpack.c.bf16 %v3011_v5, %v3010_v48 }
0x28d6   :  { %v6425_v54 = vpack.c.bf16 %v2694_v60, %v2693_v49 }
0x28d7   :  { %6705 = vtanh.f32 %v2432_v31  ;;  %v5466_v56 = vmul.f32 -1.442695, %v2432_v31  ;;  %v2697_v31 = vld [vmem:[#allocation3 + $0x50] sm:$0xff] }
0x28d9   :  { %6707 = vpow2.f32 %v5466_v56  ;;  %v2997_v56 = vld [vmem:[#allocation23 + $0x8] sm:$0xff] }
0x28e1   :  { %v6706_v55 = vpop.eup %6705 }
0x28e2   :  { %2447 = vrot.lane.b32.xlu0 %v6706_v55, %s7239_s14  ;;  %v2996_v55 = vld [vmem:[#allocation23] sm:$0xff] }
0x28e3   :  { %v6708_v57 = vpop.eup %6707 }
0x28e4   :  { %v2436_v58 = vadd.f32 1.0, %v6708_v57  ;;  %v2698_v57 = vld [vmem:[#allocation3 + $0x58] sm:$0xff] }
0x28e6   :  { %6709 = vrcp.f32 %v2436_v58  ;;  %v6437_v58 = vpack.c.bf16 %v2997_v56, %v2996_v55 }
0x28f0   :  { %v6710_v6 = vpop.eup %6709 }
0x28f1   :  { %v2445_v15 = vmul.f32 %v6710_v6, %v2443_v59  ;;  %v2700_v59 = vld [vmem:[#allocation3 + $0x68] sm:$0xff] }
0x2954   :  { %v2448_v27 = vpop.permute.xlu0 %2447 }
0x2955   :  { %v2450_v11 = vmul.f32 %v6710_v6, %v2448_v27  ;;  %v2998_v27 = vld [vmem:[#allocation23 + $0x10] sm:$0xff] }
0x2957   :  { %2452 = vrot.lane.b32.xlu0 %v2450_v11, %s7240_s8  ;;  %v2999_v11 = vld [vmem:[#allocation23 + $0x18] sm:$0xff] }
0x29c9   :  { %v2453_v61 = vpop.permute.xlu0 %2452 }
0x29ca   :  { %v2455_v63 = vadd.f32 %v2453_v61, %v2445_v15  ;;  %v6441_v15 = vpack.c.bf16 %v2999_v11, %v2998_v27  ;;  %v2701_v61 = vld [vmem:[#allocation3 + $0x70] sm:$0xff] }
0x29cc   :  { %6711 = vtanh.f32 %v2455_v63 }
0x29d6   :  { %v6712_v62 = vpop.eup %6711 }
0x29d7   :  { %2458 = vrot.lane.b32.xlu1 %v6712_v62, %s7239_s14  ;;  %v3297_v62 = vld [vmem:[#allocation20] sm:$0xff] }
0x29db   :  { %2468 = vrot.lane.b32.xlu1 %v2455_v63, %s7241_s11  ;;  %v2702_v63 = vld [vmem:[#allocation3 + $0x78] sm:$0xff] }
0x2a49   :  { %v2459_v2 = vpop.permute.xlu1 %2458 }
0x2a4a   :  { %v2461_v33 = vmul.f32 %v6710_v6, %v2459_v2  ;;  %v2699_v6 = vld [vmem:[#allocation3 + $0x60] sm:$0xff] }
0x2a4b   :  { %v3298_v2 = vld [vmem:[#allocation20 + $0x8] sm:$0xff] }
0x2a4c   :  { %2463 = vrot.lane.b32.xlu0 %v2461_v33, %s7240_s8  ;;  %v2683_v33 = vld [vmem:[#allocation3] sm:$0xff] }
0x2a4d   :  { %v2469_v4 = vpop.permute.xlu1 %2468 }
0x2a4e   :  { %2471 = vst.msk [vmem:[#allocation5] sm:$0xff] %vm554_vm0, %v2469_v4  ;;  %v7988_v4 = vpack.c.bf16 %v3298_v2, %v3297_v62 }
0x2a55   :  { %v2561_v8 = vld [vmem:[#allocation5] sm:$0xff] }
0x2a56   :  { %2563 = vrot.lane.b32.xlu1 %v2561_v8, %s7240_s8  ;;  %v2684_v8 = vld [vmem:[#allocation3 + $0x8] sm:$0xff] }
0x2abe   :  { %v2464_v10 = vpop.permute.xlu0 %2463 }
0x2abf   :  { %2466 = vst.msk [vmem:[#allocation4] sm:$0xff] %vm554_vm0, %v2464_v10  ;;  %2473 = vst.msk [vmem:[#allocation3 + $0x48] sm:$0xff] %vm554_vm0, %v2464_v10  ;;  %v3299_v10 = vld [vmem:[#allocation20 + $0x10] sm:$0xff] }
0x2ac6   :  { %v2475_v13 = vld [vmem:[#allocation4] sm:$0xff]  ;;  %v2696_v51 = vld [vmem:[#allocation3 + $0x48] sm:$0xff] }
0x2ac7   :  { %6006 = vmatmul.mubr.msk.f32.vlgmr.msra.gmra.mrb[24].mxu0 %vm554_vm0, %v2475_v13  ;;  %v3300_v13 = vld [vmem:[#allocation20 + $0x18] sm:$0xff] }
0x2ac8   :  { %v2564_v30 = vpop.permute.xlu1 %2563  ;;  %6416 = vmatpush3.bf16.msra.mxu0 %v6413_v38 }
0x2ac9   :  { %6418 = vmatprep.subr.bf16.mxu0 %v6417_v40 }
0x2acc   :  { %6420 = vmatpush3.bf16.msra.mxu0 %v6417_v40 }
0x2acd   :  { %6422 = vmatprep.subr.bf16.mxu0 %v6421_v35 }
0x2b9a   :  { %v2549_v14 = vpop.f32.mrb[24].mxu0 }
0x2b9b   :  { %v2553_v16 = vadd.f32 %v2549_v14, %v7677_v1  ;;  %v6007_v17 = vpop.f32.mrb[25].mxu0  ;;  %v2685_v14 = vld [vmem:[#allocation3 + $0x10] sm:$0xff] }
0x2b9c   :  { %v2686_v17 = vld [vmem:[#allocation3 + $0x18] sm:$0xff] }
0x2b9d   :  { %6713 = vtanh.f32 %v2553_v16  ;;  %v5468_v29 = vmul.f32 -1.442695, %v2553_v16  ;;  %v7996_v16 = vpack.c.bf16 %v3300_v13, %v3299_v10 }
0x2b9f   :  { %6715 = vpow2.f32 %v5468_v29  ;;  %v2688_v29 = vld [vmem:[#allocation3 + $0x28] sm:$0xff] }
0x2ba7   :  { %v6714_v19 = vpop.eup %6713 }
0x2ba8   :  { %2568 = vrot.lane.b32.xlu0 %v6714_v19, %s7239_s14  ;;  %v2687_v19 = vld [vmem:[#allocation3 + $0x20] sm:$0xff] }
0x2ba9   :  { %v6716_v20 = vpop.eup %6715 }
0x2baa   :  { %v2557_v21 = vadd.f32 1.0, %v6716_v20  ;;  %v2689_v20 = vld [vmem:[#allocation3 + $0x30] sm:$0xff] }
0x2bac   :  { %6717 = vrcp.f32 %v2557_v21  ;;  %v2690_v21 = vld [vmem:[#allocation3 + $0x38] sm:$0xff] }
0x2bb6   :  { %v6718_v24 = vpop.eup %6717 }
0x2bb7   :  { %v2566_v3 = vmul.f32 %v6718_v24, %v2564_v30 }
0x2c1a   :  { %v2569_v26 = vpop.permute.xlu0 %2568 }
0x2c1b   :  { %v2571_v28 = vmul.f32 %v6718_v24, %v2569_v26 }
0x2c1d   :  { %2573 = vrot.lane.b32.xlu0 %v2571_v28, %s7240_s8 }
0x2c8f   :  { %v2574_v32 = vpop.permute.xlu0 %2573 }
0x2c90   :  { %v2576_v25 = vadd.f32 %v2574_v32, %v2566_v3  ;;  %v5487_v3 = vld [vmem:[#allocation21] ss:$0 sm:$0xff] }
0x2c92   :  { %6719 = vtanh.f32 %v2576_v25 }
0x2c9c   :  { %v6720_v1 = vpop.eup %6719 }
0x2c9d   :  { %2579 = vrot.lane.b32.xlu1 %v6720_v1, %s7239_s14 }
0x2ca1   :  { %2589 = vrot.lane.b32.xlu1 %v2576_v25, %s7241_s11 }
0x2d0f   :  { %v2580_v18 = vpop.permute.xlu1 %2579 }
0x2d10   :  { %v2582_v45 = vmul.f32 %v6718_v24, %v2580_v18 }
0x2d12   :  { %2584 = vrot.lane.b32.xlu0 %v2582_v45, %s7240_s8 }
0x2d13   :  { %v2590_v46 = vpop.permute.xlu1 %2589 }
0x2d14   :  { %2592 = vst.msk [vmem:[#allocation5] sm:$0xff] %vm554_vm0, %v2590_v46 }
0x2d15   :  { %3294 = vst.msk [vmem:[#allocation5] sm:$0xff] %vm554_vm0, %v7236_v0 }
0x2d1c   :  { %v3382_v23 = vld [vmem:[#allocation5] sm:$0xff] }
0x2d1d   :  { %3384 = vrot.lane.b32.xlu1 %v3382_v23, %s7240_s8 }
0x2d84   :  { %v2585_v47 = vpop.permute.xlu0 %2584 }
0x2d85   :  { %2587 = vst.msk [vmem:[#allocation4] sm:$0xff] %vm554_vm0, %v2585_v47  ;;  %2594 = vst.msk [vmem:[#allocation3 + $0x40] sm:$0xff] %vm554_vm0, %v2585_v47 }
0x2d8c   :  { %v2595_v12 = vld [vmem:[#allocation4] sm:$0xff] }
0x2d8d   :  { %v2695_v50 = vld [vmem:[#allocation3 + $0x40] sm:$0xff]  ;;  %3293 = vst.msk [vmem:[#allocation4] sm:$0xff] %vm554_vm0, %v7236_v0  ;;  %v2596_v52 = vmax.f32 %v2595_v12, 0.0 }
0x2d8e   :  { %6027 = vmatprep.mubr.msk.f32.mxu0 %vm554_vm0, %v2695_v50 }
0x2d8f   :  { %6028 = vmatmul.mubr.msk.f32.vlgmr.msra.gmra.mrb[26].mxu0 %vm554_vm0, %v2696_v51  ;;  %6017 = vmatmul.mubr.msk.f32.vlgmr.msra.gmra.mrb[24].mxu1 %vm554_vm0, %v2596_v52 }
0x2d90   :  { %6030 = vmatprep.mubr.msk.f32.mxu0 %vm554_vm0, %v2697_v31  ;;  %6424 = vmatpush3.bf16.msra.mxu0 %v6421_v35 }
0x2d91   :  { %6432 = vmatpush3.bf16.msra.mxu1 %v6429_v43  ;;  %6067 = vmatprep.mubr.msk.f32.mxu1 %vm554_vm0, %v2695_v50 }
0x2d92   :  { %6434 = vmatprep.subr.bf16.mxu1 %v6433_v53  ;;  %6426 = vmatprep.subr.bf16.mxu0 %v6425_v54 }
0x2d93   :  { %6031 = vmatmul.mubr.msk.f32.gmra.mrb[28].mxu0 %vm554_vm0, %v2698_v57 }
0x2d94   :  { %6033 = vmatprep.mubr.msk.f32.mxu0 %vm554_vm0, %v2699_v6  ;;  %6428 = vmatpush3.bf16.msra.mxu0 %v6425_v54  ;;  %v3296_v24 = vld [vmem:[#allocation4] sm:$0xff] }
0x2d95   :  { %6436 = vmatpush3.bf16.msra.mxu1 %v6433_v53  ;;  %6445 = vmatprep.subr.bf16.mxu0 %v7237_v9 }
0x2d96   :  { %6438 = vmatprep.subr.bf16.mxu1 %v6437_v58 }
0x2d97   :  { %6034 = vmatmul.mubr.msk.f32.gmra.mrb[30].mxu0 %vm554_vm0, %v2700_v59 }
0x2d98   :  { %6068 = vmatmul.mubr.msk.f32.vlgmr.msra.gmra.mrb[26].mxu1 %vm554_vm0, %v2696_v51  ;;  %6036 = vmatprep.mubr.msk.f32.mxu0 %vm554_vm0, %v2701_v61 }
0x2d99   :  { %6070 = vmatprep.mubr.msk.f32.mxu1 %vm554_vm0, %v2697_v31  ;;  %6440 = vmatpush3.bf16.msra.mxu1 %v6437_v58 }
0x2d9a   :  { %6442 = vmatprep.subr.bf16.mxu1 %v6441_v15 }
0x2d9b   :  { %6037 = vmatmul.mubr.msk.f32.gmra.mrb[32].mxu0 %vm554_vm0, %v2702_v63 }
0x2d9c   :  { %6071 = vmatmul.mubr.msk.f32.gmra.mrb[28].mxu1 %vm554_vm0, %v2698_v57  ;;  %6047 = vmatprep.mubr.msk.f32.mxu0 %vm554_vm0, %v2683_v33 }
0x2d9d   :  { %6073 = vmatprep.mubr.msk.f32.mxu1 %vm554_vm0, %v2699_v6  ;;  %6444 = vmatpush3.bf16.msra.mxu1 %v6441_v15 }
0x2d9e   :  { %6451 = vmatprep.subr.bf16.mxu1 %v7237_v9 }
0x2d9f   :  { %6048 = vmatmul.mubr.msk.f32.vlgmr.msra.gmra.mrb[26].mxu0 %vm554_vm0, %v2684_v8 }
0x2da0   :  { %6074 = vmatmul.mubr.msk.f32.gmra.mrb[30].mxu1 %vm554_vm0, %v2700_v59  ;;  %6050 = vmatprep.mubr.msk.f32.mxu0 %vm554_vm0, %v2685_v14 }
0x2da1   :  { %6076 = vmatprep.mubr.msk.f32.mxu1 %vm554_vm0, %v2701_v61  ;;  %6447 = vmatpush3.bf16.msra.mxu0 %v7988_v4 }
0x2da2   :  { %6448 = vmatprep.subr.bf16.mxu0 %v7237_v9 }
0x2da3   :  { %6051 = vmatmul.mubr.msk.f32.gmra.mrb[28].mxu0 %vm554_vm0, %v2686_v17 }
0x2da4   :  { %6077 = vmatmul.mubr.msk.f32.gmra.mrb[32].mxu1 %vm554_vm0, %v2702_v63  ;;  %6053 = vmatprep.mubr.msk.f32.mxu0 %vm554_vm0, %v2687_v19  ;;  %v3385_v63 = vpop.permute.xlu1 %3384 }
0x2da5   :  { %6087 = vmatprep.mubr.msk.f32.mxu1 %vm554_vm0, %v2683_v33  ;;  %6450 = vmatpush3.bf16.msra.mxu0 %v7996_v16 }
0x2da6   :  { %6457 = vmatprep.subr.bf16.mxu0 %v7237_v9 }
0x2da7   :  { %6054 = vmatmul.mubr.msk.f32.gmra.mrb[30].mxu0 %vm554_vm0, %v2688_v29 }
0x2da8   :  { %6088 = vmatmul.mubr.msk.f32.vlgmr.msra.gmra.mrb[26].mxu1 %vm554_vm0, %v2684_v8  ;;  %6056 = vmatprep.mubr.msk.f32.mxu0 %vm554_vm0, %v2689_v20 }
0x2da9   :  { %6090 = vmatprep.mubr.msk.f32.mxu1 %vm554_vm0, %v2685_v14  ;;  %6453 = vmatpush3.bf16.msra.mxu1 %v7988_v4 }
0x2daa   :  { %6454 = vmatprep.subr.bf16.mxu1 %v7237_v9 }
0x2dab   :  { %6057 = vmatmul.mubr.msk.f32.gmra.mrb[32].mxu0 %vm554_vm0, %v2690_v21 }
0x2dac   :  { %6091 = vmatmul.mubr.msk.f32.gmra.mrb[28].mxu1 %vm554_vm0, %v2686_v17  ;;  %6107 = vmatprep.mubr.msk.f32.mxu0 %vm7238_vm2, %v7236_v0 }
0x2dad   :  { %6093 = vmatprep.mubr.msk.f32.mxu1 %vm554_vm0, %v2687_v19  ;;  %6456 = vmatpush3.bf16.msra.mxu1 %v7996_v16 }
0x2dae   :  { %6463 = vmatprep.subr.bf16.mxu1 %v7237_v9 }
0x2daf   :  { %6108 = vmatmul.mubr.msk.f32.vlgmr.msra.gmra.mrb[34].mxu0 %vm554_vm0, %v3296_v24 }
0x2db0   :  { %6094 = vmatmul.mubr.msk.f32.gmra.mrb[30].mxu1 %vm554_vm0, %v2688_v29  ;;  %6459 = vmatpush3.bf16.msra.mxu0 %v7988_v4 }
0x2db1   :  { %6096 = vmatprep.mubr.msk.f32.mxu1 %vm554_vm0, %v2689_v20  ;;  %6460 = vmatprep.subr.bf16.mxu0 %v7237_v9 }
0x2db2   :  { %6129 = vmatprep.mubr.msk.f32.mxu0 %vm7238_vm2, %v7236_v0 }
0x2db4   :  { %6097 = vmatmul.mubr.msk.f32.gmra.mrb[32].mxu1 %vm554_vm0, %v2690_v21  ;;  %6462 = vmatpush3.bf16.msra.mxu0 %v7996_v16 }
0x2db5   :  { %6118 = vmatprep.mubr.msk.f32.mxu1 %vm7238_vm2, %v7236_v0  ;;  %6469 = vmatprep.subr.bf16.mxu0 %v7237_v9 }
0x2e62   :  { %v2677_v26 = vpop.f32.mrb[24].mxu1 }
0x2e63   :  { %v2678_v28 = vadd.f32 %v7843_v34, %v2677_v26  ;;  %v6018_v30 = vpop.f32.mrb[25].mxu1 }
0x2e65   :  { %2682 = vst [vmem:[#allocation30 + $0x8] sm:$0xff] %v2678_v28 }
0x2e72   :  { %v6049_v32 = vpop.f32.mrb[26].mxu0 }
0x2e73   :  { %v8031_v25 = vadd.f32 %v6049_v32, %v5487_v3  ;;  %v2926_v1 = vpop.f32.mrb[27].mxu0 }
0x2e74   :  { %v2972_v49 = vadd.f32 %v5487_v3, %v2926_v1 }
0x2e76   :  { %v6052_v36 = vpop.f32.mrb[28].mxu0 }
0x2e77   :  { %v8033_v37 = vadd.f32 %v6052_v36, %v5487_v3  ;;  %v2936_v38 = vpop.f32.mrb[29].mxu0 }
0x2e78   :  { %v8035_v22 = vadd.f32 %v5487_v3, %v2936_v38 }
0x2e7a   :  { %v6055_v40 = vpop.f32.mrb[30].mxu0 }
0x2e7b   :  { %v8039_v41 = vadd.f32 %v6055_v40, %v5487_v3  ;;  %v6089_v42 = vpop.f32.mrb[26].mxu1  ;;  %v2946_v34 = vpop.f32.mrb[31].mxu0 }
0x2e7c   :  { %v8042_v43 = vadd.f32 %v6089_v42, %v8037_v39  ;;  %v8044_v7 = vadd.f32 %v5487_v3, %v2946_v34  ;;  %v3231_v44 = vpop.f32.mrb[27].mxu1 }
0x2e7d   :  { %v8047_v18 = vadd.f32 %v8037_v39, %v3231_v44 }
0x2e7e   :  { %v6058_v35 = vpop.f32.mrb[32].mxu0 }
0x2e7f   :  { %v8049_v45 = vadd.f32 %v6058_v35, %v5487_v3  ;;  %v6092_v46 = vpop.f32.mrb[28].mxu1  ;;  %v2956_v23 = vpop.f32.mrb[33].mxu0 }
0x2e80   :  { %v8052_v47 = vadd.f32 %v6092_v46, %v8037_v39  ;;  %v8054_v48 = vadd.f32 %v5487_v3, %v2956_v23  ;;  %v3241_v5 = vpop.f32.mrb[29].mxu1 }
0x2e81   :  { %v8057_v60 = vadd.f32 %v8037_v39, %v3241_v5 }
0x2e82   :  { %v3370_v12 = vpop.f32.mrb[34].mxu0 }
0x2e83   :  { %v6095_v50 = vpop.f32.mrb[30].mxu1  ;;  %v3374_v51 = vadd.f32 %v3370_v12, %v2972_v49  ;;  %v6109_v52 = vpop.f32.mrb[35].mxu0 }
0x2e84   :  { %v8060_v53 = vadd.f32 %v6095_v50, %v8037_v39  ;;  %v3251_v31 = vpop.f32.mrb[31].mxu1 }
0x2e85   :  { %6721 = vtanh.f32 %v3374_v51  ;;  %v8063_v54 = vadd.f32 %v8037_v39, %v3251_v31  ;;  %v5506_v6 = vmul.f32 -1.442695, %v3374_v51 }
0x2e87   :  { %v8065_v55 = vpop.f32.mrb[32].mxu1  ;;  %6723 = vpow2.f32 %v5506_v6 }
0x2e88   :  { %v3261_v56 = vpop.f32.mrb[33].mxu1 }
0x2e89   :  { %v8068_v57 = vadd.f32 %v8037_v39, %v3261_v56 }
0x2e8f   :  { %v6722_v58 = vpop.eup %6721 }
0x2e90   :  { %3389 = vrot.lane.b32.xlu0 %v6722_v58, %s7239_s14 }
0x2e91   :  { %v6724_v27 = vpop.eup %6723 }
0x2e92   :  { %v3378_v11 = vadd.f32 1.0, %v6724_v27 }
0x2e94   :  { %6725 = vrcp.f32 %v3378_v11 }
0x2e9e   :  { %v6726_v59 = vpop.eup %6725 }
0x2e9f   :  { %v3387_v62 = vmul.f32 %v6726_v59, %v3385_v63 }
0x2f02   :  { %v3390_v15 = vpop.permute.xlu0 %3389 }
0x2f03   :  { %v3392_v61 = vmul.f32 %v6726_v59, %v3390_v15 }
0x2f05   :  { %3394 = vrot.lane.b32.xlu0 %v3392_v61, %s7240_s8 }
0x2f77   :  { %v3395_v2 = vpop.permute.xlu0 %3394 }
0x2f78   :  { %v3397_v33 = vadd.f32 %v3395_v2, %v3387_v62 }
0x2f7a   :  { %6727 = vtanh.f32 %v3397_v33 }
0x2f84   :  { %v6728_v8 = vpop.eup %6727 }
0x2f85   :  { %3400 = vrot.lane.b32.xlu1 %v6728_v8, %s7239_s14 }
0x2f89   :  { %3410 = vrot.lane.b32.xlu1 %v3397_v33, %s7241_s11 }
0x2ff7   :  { %v3401_v10 = vpop.permute.xlu1 %3400 }
0x2ff8   :  { %v3403_v13 = vmul.f32 %v6726_v59, %v3401_v10 }
0x2ffa   :  { %3405 = vrot.lane.b32.xlu0 %v3403_v13, %s7240_s8 }
0x2ffb   :  { %v3411_v14 = vpop.permute.xlu1 %3410 }
0x2ffc   :  { %3413 = vst.msk [vmem:[#allocation5] sm:$0xff] %vm554_vm0, %v3411_v14 }
0x3003   :  { %v3502_v17 = vld [vmem:[#allocation5] sm:$0xff] }
0x3004   :  { %3504 = vrot.lane.b32.xlu1 %v3502_v17, %s7240_s8 }
0x306c   :  { %v3406_v19 = vpop.permute.xlu0 %3405 }
0x306d   :  { %3408 = vst.msk [vmem:[#allocation4] sm:$0xff] %vm554_vm0, %v3406_v19  ;;  %3414 = vst.msk [vmem:[#allocation3] sm:$0xff] %vm554_vm0, %v3406_v19 }
0x3074   :  { %v3416_v29 = vld [vmem:[#allocation4] sm:$0xff] }
0x3075   :  { %6119 = vmatmul.mubr.msk.f32.vlgmr.msra.gmra.mrb[34].mxu1 %vm554_vm0, %v3416_v29 }
0x3076   :  { %6465 = vmatpush3.bf16.msra.mxu1 %v7988_v4  ;;  %6140 = vmatprep.mubr.msk.f32.mxu1 %vm7238_vm2, %v7236_v0  ;;  %v3505_v38 = vpop.permute.xlu1 %3504 }
0x3077   :  { %6466 = vmatprep.subr.bf16.mxu1 %v7237_v9 }
0x307a   :  { %6468 = vmatpush3.bf16.msra.mxu1 %v7996_v16 }
0x307b   :  { %6475 = vmatprep.subr.bf16.mxu1 %v7237_v9 }
0x3148   :  { %v3490_v20 = vpop.f32.mrb[34].mxu1 }
0x3149   :  { %v3494_v21 = vadd.f32 %v3490_v20, %v8031_v25  ;;  %v6120_v24 = vpop.f32.mrb[35].mxu1 }
0x314b   :  { %6729 = vtanh.f32 %v3494_v21  ;;  %v5508_v28 = vmul.f32 -1.442695, %v3494_v21 }
0x314d   :  { %6731 = vpow2.f32 %v5508_v28 }
0x3155   :  { %v6730_v26 = vpop.eup %6729 }
0x3156   :  { %3509 = vrot.lane.b32.xlu0 %v6730_v26, %s7239_s14 }
0x3157   :  { %v6732_v30 = vpop.eup %6731 }
0x3158   :  { %v3498_v3 = vadd.f32 1.0, %v6732_v30 }
0x315a   :  { %6733 = vrcp.f32 %v3498_v3 }
0x3164   :  { %v6734_v32 = vpop.eup %6733 }
0x3165   :  { %v3507_v40 = vmul.f32 %v6734_v32, %v3505_v38 }
0x31c8   :  { %v3510_v1 = vpop.permute.xlu0 %3509 }
0x31c9   :  { %v3512_v36 = vmul.f32 %v6734_v32, %v3510_v1 }
0x31cb   :  { %3514 = vrot.lane.b32.xlu0 %v3512_v36, %s7240_s8 }
0x323d   :  { %v3515_v42 = vpop.permute.xlu0 %3514 }
0x323e   :  { %v3517_v34 = vadd.f32 %v3515_v42, %v3507_v40 }
0x3240   :  { %6735 = vtanh.f32 %v3517_v34 }
0x324a   :  { %v6736_v25 = vpop.eup %6735 }
0x324b   :  { %3520 = vrot.lane.b32.xlu1 %v6736_v25, %s7239_s14 }
0x324f   :  { %3530 = vrot.lane.b32.xlu1 %v3517_v34, %s7241_s11 }
0x32bd   :  { %v3521_v44 = vpop.permute.xlu1 %3520 }
0x32be   :  { %v3523_v35 = vmul.f32 %v6734_v32, %v3521_v44 }
0x32c0   :  { %3525 = vrot.lane.b32.xlu0 %v3523_v35, %s7240_s8 }
0x32c1   :  { %v3531_v46 = vpop.permute.xlu1 %3530 }
0x32c2   :  { %3533 = vst.msk [vmem:[#allocation5] sm:$0xff] %vm554_vm0, %v3531_v46 }
0x32c9   :  { %v3622_v23 = vld [vmem:[#allocation5] sm:$0xff] }
0x32ca   :  { %3624 = vrot.lane.b32.xlu1 %v3622_v23, %s7240_s8 }
0x3332   :  { %v3526_v5 = vpop.permute.xlu0 %3525 }
0x3333   :  { %3528 = vst.msk [vmem:[#allocation4] sm:$0xff] %vm554_vm0, %v3526_v5  ;;  %3534 = vst.msk [vmem:[#allocation3 + $0x8] sm:$0xff] %vm554_vm0, %v3526_v5 }
0x333a   :  { %v3536_v49 = vld [vmem:[#allocation4] sm:$0xff] }
0x333b   :  { %6130 = vmatmul.mubr.msk.f32.vlgmr.msra.gmra.mrb[36].mxu0 %vm554_vm0, %v3536_v49 }
0x333c   :  { %6471 = vmatpush3.bf16.msra.mxu0 %v7988_v4  ;;  %6151 = vmatprep.mubr.msk.f32.mxu0 %vm7238_vm2, %v7236_v0  ;;  %v3625_v59 = vpop.permute.xlu1 %3624 }
0x333d   :  { %6472 = vmatprep.subr.bf16.mxu0 %v7237_v9 }
0x3340   :  { %6474 = vmatpush3.bf16.msra.mxu0 %v7996_v16 }
0x3341   :  { %6481 = vmatprep.subr.bf16.mxu0 %v7237_v9 }
0x340e   :  { %v3610_v12 = vpop.f32.mrb[36].mxu0 }
0x340f   :  { %v3614_v50 = vadd.f32 %v3610_v12, %v8035_v22  ;;  %v6131_v51 = vpop.f32.mrb[37].mxu0 }
0x3411   :  { %6737 = vtanh.f32 %v3614_v50  ;;  %v5510_v31 = vmul.f32 -1.442695, %v3614_v50 }
0x3413   :  { %6739 = vpow2.f32 %v5510_v31 }
0x341b   :  { %v6738_v52 = vpop.eup %6737 }
0x341c   :  { %3629 = vrot.lane.b32.xlu0 %v6738_v52, %s7239_s14 }
0x341d   :  { %v6740_v56 = vpop.eup %6739 }
0x341e   :  { %v3618_v58 = vadd.f32 1.0, %v6740_v56 }
0x3420   :  { %6741 = vrcp.f32 %v3618_v58 }
0x342a   :  { %v6742_v6 = vpop.eup %6741 }
0x342b   :  { %v3627_v15 = vmul.f32 %v6742_v6, %v3625_v59 }
0x348e   :  { %v3630_v27 = vpop.permute.xlu0 %3629 }
0x348f   :  { %v3632_v11 = vmul.f32 %v6742_v6, %v3630_v27 }
0x3491   :  { %3634 = vrot.lane.b32.xlu0 %v3632_v11, %s7240_s8 }
0x3503   :  { %v3635_v61 = vpop.permute.xlu0 %3634 }
0x3504   :  { %v3637_v63 = vadd.f32 %v3635_v61, %v3627_v15 }
0x3506   :  { %6743 = vtanh.f32 %v3637_v63 }
0x3510   :  { %v6744_v22 = vpop.eup %6743 }
0x3511   :  { %3640 = vrot.lane.b32.xlu1 %v6744_v22, %s7239_s14 }
0x3515   :  { %3650 = vrot.lane.b32.xlu1 %v3637_v63, %s7241_s11 }
0x3583   :  { %v3641_v62 = vpop.permute.xlu1 %3640 }
0x3584   :  { %v3643_v2 = vmul.f32 %v6742_v6, %v3641_v62 }
0x3586   :  { %3645 = vrot.lane.b32.xlu0 %v3643_v2, %s7240_s8 }
0x3587   :  { %v3651_v33 = vpop.permute.xlu1 %3650 }
0x3588   :  { %3653 = vst.msk [vmem:[#allocation5] sm:$0xff] %vm554_vm0, %v3651_v33 }
0x358f   :  { %v3742_v8 = vld [vmem:[#allocation5] sm:$0xff] }
0x3590   :  { %3744 = vrot.lane.b32.xlu1 %v3742_v8, %s7240_s8 }
0x35f8   :  { %v3646_v10 = vpop.permute.xlu0 %3645 }
0x35f9   :  { %3648 = vst.msk [vmem:[#allocation4] sm:$0xff] %vm554_vm0, %v3646_v10  ;;  %3654 = vst.msk [vmem:[#allocation3 + $0x10] sm:$0xff] %vm554_vm0, %v3646_v10 }
0x3600   :  { %v3656_v13 = vld [vmem:[#allocation4] sm:$0xff] }
0x3601   :  { %6141 = vmatmul.mubr.msk.f32.vlgmr.msra.gmra.mrb[36].mxu1 %vm554_vm0, %v3656_v13 }
0x3602   :  { %6477 = vmatpush3.bf16.msra.mxu1 %v7988_v4  ;;  %6162 = vmatprep.mubr.msk.f32.mxu1 %vm7238_vm2, %v7236_v0  ;;  %v3745_v3 = vpop.permute.xlu1 %3744 }
0x3603   :  { %6478 = vmatprep.subr.bf16.mxu1 %v7237_v9 }
0x3606   :  { %6480 = vmatpush3.bf16.msra.mxu1 %v7996_v16 }
0x3607   :  { %6487 = vmatprep.subr.bf16.mxu1 %v7237_v9 }
0x36d4   :  { %v3730_v14 = vpop.f32.mrb[36].mxu1 }
0x36d5   :  { %v3734_v17 = vadd.f32 %v3730_v14, %v8033_v37  ;;  %v6142_v19 = vpop.f32.mrb[37].mxu1 }
0x36d7   :  { %6745 = vtanh.f32 %v3734_v17  ;;  %v5512_v20 = vmul.f32 -1.442695, %v3734_v17 }
0x36d9   :  { %6747 = vpow2.f32 %v5512_v20 }
0x36e1   :  { %v6746_v29 = vpop.eup %6745 }
0x36e2   :  { %3749 = vrot.lane.b32.xlu0 %v6746_v29, %s7239_s14 }
0x36e3   :  { %v6748_v21 = vpop.eup %6747 }
0x36e4   :  { %v3738_v24 = vadd.f32 1.0, %v6748_v21 }
0x36e6   :  { %6749 = vrcp.f32 %v3738_v24 }
0x36f0   :  { %v6750_v26 = vpop.eup %6749 }
0x36f1   :  { %v3747_v32 = vmul.f32 %v6750_v26, %v3745_v3 }
0x3754   :  { %v3750_v28 = vpop.permute.xlu0 %3749 }
0x3755   :  { %v3752_v30 = vmul.f32 %v6750_v26, %v3750_v28 }
0x3757   :  { %3754 = vrot.lane.b32.xlu0 %v3752_v30, %s7240_s8 }
0x37c9   :  { %v3755_v1 = vpop.permute.xlu0 %3754 }
0x37ca   :  { %v3757_v36 = vadd.f32 %v3755_v1, %v3747_v32 }
0x37cc   :  { %6751 = vtanh.f32 %v3757_v36 }
0x37d6   :  { %v6752_v37 = vpop.eup %6751 }
0x37d7   :  { %3760 = vrot.lane.b32.xlu1 %v6752_v37, %s7239_s14 }
0x37db   :  { %3770 = vrot.lane.b32.xlu1 %v3757_v36, %s7241_s11 }
0x3849   :  { %v3761_v38 = vpop.permute.xlu1 %3760 }
0x384a   :  { %v3763_v40 = vmul.f32 %v6750_v26, %v3761_v38 }
0x384c   :  { %3765 = vrot.lane.b32.xlu0 %v3763_v40, %s7240_s8 }
0x384d   :  { %v3771_v42 = vpop.permute.xlu1 %3770 }
0x384e   :  { %3773 = vst.msk [vmem:[#allocation5] sm:$0xff] %vm554_vm0, %v3771_v42 }
0x3855   :  { %v3862_v34 = vld [vmem:[#allocation5] sm:$0xff] }
0x3856   :  { %3864 = vrot.lane.b32.xlu1 %v3862_v34, %s7240_s8 }
0x38be   :  { %v3766_v25 = vpop.permute.xlu0 %3765 }
0x38bf   :  { %3768 = vst.msk [vmem:[#allocation4] sm:$0xff] %vm554_vm0, %v3766_v25  ;;  %3774 = vst.msk [vmem:[#allocation3 + $0x18] sm:$0xff] %vm554_vm0, %v3766_v25 }
0x38c6   :  { %v3776_v44 = vld [vmem:[#allocation4] sm:$0xff] }
0x38c7   :  { %6152 = vmatmul.mubr.msk.f32.vlgmr.msra.gmra.mrb[38].mxu0 %vm554_vm0, %v3776_v44 }
0x38c8   :  { %6483 = vmatpush3.bf16.msra.mxu0 %v7988_v4  ;;  %6173 = vmatprep.mubr.msk.f32.mxu0 %vm7238_vm2, %v7236_v0  ;;  %v3865_v56 = vpop.permute.xlu1 %3864 }
0x38c9   :  { %6484 = vmatprep.subr.bf16.mxu0 %v7237_v9 }
0x38cc   :  { %6486 = vmatpush3.bf16.msra.mxu0 %v7996_v16 }
0x38cd   :  { %6493 = vmatprep.subr.bf16.mxu0 %v7237_v9 }
0x399a   :  { %v3850_v35 = vpop.f32.mrb[38].mxu0 }
0x399b   :  { %v3854_v46 = vadd.f32 %v3850_v35, %v8044_v7  ;;  %v6153_v23 = vpop.f32.mrb[39].mxu0 }
0x399d   :  { %6753 = vtanh.f32 %v3854_v46  ;;  %v5514_v49 = vmul.f32 -1.442695, %v3854_v46 }
0x399f   :  { %6755 = vpow2.f32 %v5514_v49 }
0x39a7   :  { %v6754_v5 = vpop.eup %6753 }
0x39a8   :  { %3869 = vrot.lane.b32.xlu0 %v6754_v5, %s7239_s14 }
0x39a9   :  { %v6756_v12 = vpop.eup %6755 }
0x39aa   :  { %v3858_v50 = vadd.f32 1.0, %v6756_v12 }
0x39ac   :  { %6757 = vrcp.f32 %v3858_v50 }
0x39b6   :  { %v6758_v51 = vpop.eup %6757 }
0x39b7   :  { %v3867_v58 = vmul.f32 %v6758_v51, %v3865_v56 }
0x3a1a   :  { %v3870_v52 = vpop.permute.xlu0 %3869 }
0x3a1b   :  { %v3872_v31 = vmul.f32 %v6758_v51, %v3870_v52 }
0x3a1d   :  { %3874 = vrot.lane.b32.xlu0 %v3872_v31, %s7240_s8 }
0x3a8f   :  { %v3875_v6 = vpop.permute.xlu0 %3874 }
0x3a90   :  { %v3877_v27 = vadd.f32 %v3875_v6, %v3867_v58 }
0x3a92   :  { %6759 = vtanh.f32 %v3877_v27 }
0x3a9c   :  { %v6760_v7 = vpop.eup %6759 }
0x3a9d   :  { %3880 = vrot.lane.b32.xlu1 %v6760_v7, %s7239_s14 }
0x3aa1   :  { %3890 = vrot.lane.b32.xlu1 %v3877_v27, %s7241_s11 }
0x3b0f   :  { %v3881_v11 = vpop.permute.xlu1 %3880 }
0x3b10   :  { %v3883_v59 = vmul.f32 %v6758_v51, %v3881_v11 }
0x3b12   :  { %3885 = vrot.lane.b32.xlu0 %v3883_v59, %s7240_s8 }
0x3b13   :  { %v3891_v15 = vpop.permute.xlu1 %3890 }
0x3b14   :  { %3893 = vst.msk [vmem:[#allocation5] sm:$0xff] %vm554_vm0, %v3891_v15 }
0x3b1b   :  { %v3982_v61 = vld [vmem:[#allocation5] sm:$0xff] }
0x3b1c   :  { %3984 = vrot.lane.b32.xlu1 %v3982_v61, %s7240_s8 }
0x3b84   :  { %v3886_v63 = vpop.permute.xlu0 %3885 }
0x3b85   :  { %3888 = vst.msk [vmem:[#allocation4] sm:$0xff] %vm554_vm0, %v3886_v63  ;;  %3894 = vst.msk [vmem:[#allocation3 + $0x20] sm:$0xff] %vm554_vm0, %v3886_v63 }
0x3b8c   :  { %v3896_v22 = vld [vmem:[#allocation4] sm:$0xff] }
0x3b8d   :  { %6163 = vmatmul.mubr.msk.f32.vlgmr.msra.gmra.mrb[38].mxu1 %vm554_vm0, %v3896_v22 }
0x3b8e   :  { %6489 = vmatpush3.bf16.msra.mxu1 %v7988_v4  ;;  %6184 = vmatprep.mubr.msk.f32.mxu1 %vm7238_vm2, %v7236_v0 }
0x3b8f   :  { %6490 = vmatprep.subr.bf16.mxu1 %v7237_v9 }
0x3b92   :  { %6492 = vmatpush3.bf16.msra.mxu1 %v7996_v16  ;;  %v3985_v16 = vpop.permute.xlu1 %3984 }
0x3b93   :  { %6499 = vmatprep.subr.bf16.mxu1 %v7237_v9 }
0x3c60   :  { %v3970_v62 = vpop.f32.mrb[38].mxu1 }
0x3c61   :  { %v3974_v2 = vadd.f32 %v3970_v62, %v8039_v41  ;;  %v6164_v33 = vpop.f32.mrb[39].mxu1 }
0x3c63   :  { %6761 = vtanh.f32 %v3974_v2  ;;  %v5516_v10 = vmul.f32 -1.442695, %v3974_v2 }
0x3c65   :  { %6763 = vpow2.f32 %v5516_v10  ;;  %v4257_v10 = vld [vmem:[#allocation27] sm:$0xff] }
0x3c6d   :  { %v6762_v8 = vpop.eup %6761 }
0x3c6e   :  { %3989 = vrot.lane.b32.xlu0 %v6762_v8, %s7239_s14 }
0x3c6f   :  { %v6764_v4 = vpop.eup %6763 }
0x3c70   :  { %v3978_v13 = vadd.f32 1.0, %v6764_v4  ;;  %v4258_v4 = vld [vmem:[#allocation27 + $0x8] sm:$0xff] }
0x3c72   :  { %6765 = vrcp.f32 %v3978_v13  ;;  %v8185_v13 = vpack.c.bf16 %v4258_v4, %v4257_v10 }
0x3c7c   :  { %v6766_v14 = vpop.eup %6765 }
0x3c7d   :  { %v3987_v29 = vmul.f32 %v6766_v14, %v3985_v16  ;;  %v4347_v16 = vld [vmem:[#allocation24] sm:$0xff] }
0x3ce0   :  { %v3990_v17 = vpop.permute.xlu0 %3989 }
0x3ce1   :  { %v3992_v19 = vmul.f32 %v6766_v14, %v3990_v17  ;;  %v4260_v17 = vld [vmem:[#allocation27 + $0x18] sm:$0xff] }
0x3ce3   :  { %3994 = vrot.lane.b32.xlu0 %v3992_v19, %s7240_s8 }
0x3d55   :  { %v3995_v20 = vpop.permute.xlu0 %3994 }
0x3d56   :  { %v3997_v21 = vadd.f32 %v3995_v20, %v3987_v29  ;;  %v4348_v29 = vld [vmem:[#allocation24 + $0x8] sm:$0xff] }
0x3d57   :  { %v8192_v20 = vpack.c.bf16 %v4348_v29, %v4347_v16 }
0x3d58   :  { %6767 = vtanh.f32 %v3997_v21 }
0x3d62   :  { %v6768_v41 = vpop.eup %6767 }
0x3d63   :  { %4000 = vrot.lane.b32.xlu1 %v6768_v41, %s7239_s14  ;;  %v4349_v41 = vld [vmem:[#allocation24 + $0x10] sm:$0xff] }
0x3d67   :  { %4010 = vrot.lane.b32.xlu1 %v3997_v21, %s7241_s11 }
0x3dd5   :  { %v4001_v24 = vpop.permute.xlu1 %4000 }
0x3dd6   :  { %v4003_v26 = vmul.f32 %v6766_v14, %v4001_v24  ;;  %v4259_v14 = vld [vmem:[#allocation27 + $0x10] sm:$0xff] }
0x3dd7   :  { %v8189_v19 = vpack.c.bf16 %v4260_v17, %v4259_v14  ;;  %v4350_v24 = vld [vmem:[#allocation24 + $0x18] sm:$0xff] }
0x3dd8   :  { %4005 = vrot.lane.b32.xlu0 %v4003_v26, %s7240_s8 }
0x3dd9   :  { %v4011_v28 = vpop.permute.xlu1 %4010 }
0x3dda   :  { %4013 = vst.msk [vmem:[#allocation5] sm:$0xff] %vm554_vm0, %v4011_v28  ;;  %v8197_v28 = vpack.c.bf16 %v4350_v24, %v4349_v41 }
0x3de1   :  { %v4102_v30 = vld [vmem:[#allocation5] sm:$0xff] }
0x3de2   :  { %4104 = vrot.lane.b32.xlu1 %v4102_v30, %s7240_s8 }
0x3e4a   :  { %v4006_v3 = vpop.permute.xlu0 %4005 }
0x3e4b   :  { %4008 = vst.msk [vmem:[#allocation4] sm:$0xff] %vm554_vm0, %v4006_v3  ;;  %4014 = vst.msk [vmem:[#allocation3 + $0x28] sm:$0xff] %vm554_vm0, %v4006_v3 }
0x3e52   :  { %v4016_v32 = vld [vmem:[#allocation4] sm:$0xff] }
0x3e53   :  { %6174 = vmatmul.mubr.msk.f32.vlgmr.msra.gmra.mrb[40].mxu0 %vm554_vm0, %v4016_v32 }
0x3e54   :  { %6195 = vmatprep.mubr.msk.f32.mxu0 %vm7238_vm2, %v7236_v0  ;;  %v4105_v46 = vpop.permute.xlu1 %4104  ;;  %6495 = vmatpush3.bf16.msra.mxu0 %v8185_v13 }
0x3e55   :  { %6496 = vmatprep.subr.bf16.mxu0 %v7237_v9 }
0x3e58   :  { %6498 = vmatpush3.bf16.msra.mxu0 %v8189_v19 }
0x3e59   :  { %6505 = vmatprep.subr.bf16.mxu0 %v7237_v9 }
0x3f26   :  { %v4090_v1 = vpop.f32.mrb[40].mxu0 }
0x3f27   :  { %v4094_v36 = vadd.f32 %v4090_v1, %v8054_v48  ;;  %v6175_v37 = vpop.f32.mrb[41].mxu0 }
0x3f29   :  { %6769 = vtanh.f32 %v4094_v36  ;;  %v5518_v40 = vmul.f32 -1.442695, %v4094_v36 }
0x3f2b   :  { %6771 = vpow2.f32 %v5518_v40 }
0x3f33   :  { %v6770_v38 = vpop.eup %6769 }
0x3f34   :  { %4109 = vrot.lane.b32.xlu0 %v6770_v38, %s7239_s14  ;;  %v8224_v38 = vld [vmem:[#allocation29] ss:$0 sm:$0xff] }
0x3f35   :  { %v6772_v42 = vpop.eup %6771 }
0x3f36   :  { %v4098_v34 = vadd.f32 1.0, %v6772_v42 }
0x3f38   :  { %6773 = vrcp.f32 %v4098_v34 }
0x3f42   :  { %v6774_v25 = vpop.eup %6773 }
0x3f43   :  { %v4107_v23 = vmul.f32 %v6774_v25, %v4105_v46 }
0x3fa6   :  { %v4110_v44 = vpop.permute.xlu0 %4109 }
0x3fa7   :  { %v4112_v35 = vmul.f32 %v6774_v25, %v4110_v44 }
0x3fa9   :  { %4114 = vrot.lane.b32.xlu0 %v4112_v35, %s7240_s8 }
0x401b   :  { %v4115_v5 = vpop.permute.xlu0 %4114 }
0x401c   :  { %v4117_v49 = vadd.f32 %v4115_v5, %v4107_v23 }
0x401e   :  { %6775 = vtanh.f32 %v4117_v49 }
0x4028   :  { %v6776_v48 = vpop.eup %6775 }
0x4029   :  { %4120 = vrot.lane.b32.xlu1 %v6776_v48, %s7239_s14 }
0x402d   :  { %4130 = vrot.lane.b32.xlu1 %v4117_v49, %s7241_s11 }
0x409b   :  { %v4121_v12 = vpop.permute.xlu1 %4120 }
0x409c   :  { %v4123_v50 = vmul.f32 %v6774_v25, %v4121_v12  ;;  %v3284_v25 = vadd.f32 %v8065_v55, %v8037_v39 }
0x409e   :  { %4125 = vrot.lane.b32.xlu0 %v4123_v50, %s7240_s8 }
0x409f   :  { %v4131_v51 = vpop.permute.xlu1 %4130 }
0x40a0   :  { %4133 = vst.msk [vmem:[#allocation5] sm:$0xff] %vm554_vm0, %v4131_v51 }
0x40a7   :  { %v4222_v52 = vld [vmem:[#allocation5] sm:$0xff] }
0x40a8   :  { %4224 = vrot.lane.b32.xlu1 %v4222_v52, %s7240_s8 }
0x4110   :  { %v4126_v31 = vpop.permute.xlu0 %4125 }
0x4111   :  { %4128 = vst.msk [vmem:[#allocation4] sm:$0xff] %vm554_vm0, %v4126_v31  ;;  %4134 = vst.msk [vmem:[#allocation3 + $0x30] sm:$0xff] %vm554_vm0, %v4126_v31 }
0x4118   :  { %v4136_v56 = vld [vmem:[#allocation4] sm:$0xff] }
0x4119   :  { %6185 = vmatmul.mubr.msk.f32.vlgmr.msra.gmra.mrb[40].mxu1 %vm554_vm0, %v4136_v56 }
0x411a   :  { %6206 = vmatprep.mubr.msk.f32.mxu1 %vm7238_vm2, %v7236_v0  ;;  %v4225_v62 = vpop.permute.xlu1 %4224  ;;  %6501 = vmatpush3.bf16.msra.mxu1 %v8192_v20 }
0x411b   :  { %6502 = vmatprep.subr.bf16.mxu1 %v7237_v9 }
0x411e   :  { %6504 = vmatpush3.bf16.msra.mxu1 %v8197_v28 }
0x411f   :  { %6511 = vmatprep.subr.bf16.mxu1 %v7237_v9 }
0x41ec   :  { %v4210_v58 = vpop.f32.mrb[40].mxu1 }
0x41ed   :  { %v4214_v6 = vadd.f32 %v4210_v58, %v8049_v45  ;;  %v6186_v27 = vpop.f32.mrb[41].mxu1 }
0x41ef   :  { %6777 = vtanh.f32 %v4214_v6  ;;  %v5520_v11 = vmul.f32 -1.442695, %v4214_v6 }
0x41f1   :  { %6779 = vpow2.f32 %v5520_v11 }
0x41f9   :  { %v6778_v7 = vpop.eup %6777 }
0x41fa   :  { %4229 = vrot.lane.b32.xlu0 %v6778_v7, %s7239_s14 }
0x41fb   :  { %v6780_v59 = vpop.eup %6779 }
0x41fc   :  { %v4218_v15 = vadd.f32 1.0, %v6780_v59 }
0x41fe   :  { %6781 = vrcp.f32 %v4218_v15 }
0x4208   :  { %v6782_v61 = vpop.eup %6781 }
0x4209   :  { %v4227_v2 = vmul.f32 %v6782_v61, %v4225_v62 }
0x426c   :  { %v4230_v63 = vpop.permute.xlu0 %4229 }
0x426d   :  { %v4232_v22 = vmul.f32 %v6782_v61, %v4230_v63 }
0x426f   :  { %4234 = vrot.lane.b32.xlu0 %v4232_v22, %s7240_s8 }
0x42e1   :  { %v4235_v33 = vpop.permute.xlu0 %4234 }
0x42e2   :  { %v4237_v8 = vadd.f32 %v4235_v33, %v4227_v2 }
0x42e4   :  { %6783 = vtanh.f32 %v4237_v8 }
0x42ee   :  { %v6784_v45 = vpop.eup %6783 }
0x42ef   :  { %4240 = vrot.lane.b32.xlu1 %v6784_v45, %s7239_s14 }
0x42f3   :  { %4250 = vrot.lane.b32.xlu1 %v4237_v8, %s7241_s11 }
0x4361   :  { %v4241_v21 = vpop.permute.xlu1 %4240 }
0x4362   :  { %v4243_v26 = vmul.f32 %v6782_v61, %v4241_v21 }
0x4364   :  { %4245 = vrot.lane.b32.xlu0 %v4243_v26, %s7240_s8 }
0x4365   :  { %v4251_v30 = vpop.permute.xlu1 %4250 }
0x4366   :  { %4253 = vst.msk [vmem:[#allocation5] sm:$0xff] %vm554_vm0, %v4251_v30 }
0x4367   :  { %4344 = vst.msk [vmem:[#allocation5] sm:$0xff] %vm554_vm0, %v7236_v0 }
0x436e   :  { %v4432_v3 = vld [vmem:[#allocation5] sm:$0xff] }
0x436f   :  { %4434 = vrot.lane.b32.xlu1 %v4432_v3, %s7240_s8 }
0x43d6   :  { %v4246_v32 = vpop.permute.xlu0 %4245 }
0x43d7   :  { %4248 = vst.msk [vmem:[#allocation4] sm:$0xff] %vm554_vm0, %v4246_v32  ;;  %4254 = vst.msk [vmem:[#allocation3 + $0x38] sm:$0xff] %vm554_vm0, %v4246_v32 }
0x43de   :  { %v4255_v1 = vld [vmem:[#allocation4] sm:$0xff] }
0x43df   :  { %4343 = vst.msk [vmem:[#allocation4] sm:$0xff] %vm554_vm0, %v7236_v0  ;;  %v4256_v36 = vmax.f32 %v4255_v1, 0.0 }
0x43e1   :  { %6196 = vmatmul.mubr.msk.f32.vlgmr.msra.gmra.mrb[42].mxu0 %vm554_vm0, %v4256_v36  ;;  %v4435_v52 = vpop.permute.xlu1 %4434 }
0x43e2   :  { %6507 = vmatpush3.bf16.msra.mxu0 %v8192_v20  ;;  %6217 = vmatprep.mubr.msk.f32.mxu0 %vm7238_vm2, %v7236_v0 }
0x43e3   :  { %6508 = vmatprep.subr.bf16.mxu0 %v7237_v9 }
0x43e6   :  { %v4346_v37 = vld [vmem:[#allocation4] sm:$0xff]  ;;  %6510 = vmatpush3.bf16.msra.mxu0 %v8197_v28 }
0x43e7   :  { %6207 = vmatmul.mubr.msk.f32.vlgmr.msra.gmra.mrb[42].mxu1 %vm554_vm0, %v4346_v37  ;;  %6517 = vmatprep.subr.bf16.mxu0 %v7237_v9 }
0x43e8   :  { %6513 = vmatpush3.bf16.msra.mxu1 %v8192_v20  ;;  %6228 = vmatprep.mubr.msk.f32.mxu1 %vm7238_vm2, %v7236_v0 }
0x43e9   :  { %6514 = vmatprep.subr.bf16.mxu1 %v7237_v9 }
0x43ec   :  { %6516 = vmatpush3.bf16.msra.mxu1 %v8197_v28 }
0x43ed   :  { %6523 = vmatprep.subr.bf16.mxu1 %v7237_v9 }
0x44b4   :  { %v4337_v40 = vpop.f32.mrb[42].mxu0 }
0x44b5   :  { %v4338_v42 = vadd.f32 %v8224_v38, %v4337_v40  ;;  %v6197_v34 = vpop.f32.mrb[43].mxu0 }
0x44b7   :  { %4342 = vst [vmem:[#allocation30 + $0x10] sm:$0xff] %v4338_v42 }
0x44ba   :  { %v4420_v44 = vpop.f32.mrb[42].mxu1 }
0x44bb   :  { %v4424_v35 = vadd.f32 %v4420_v44, %v3284_v25  ;;  %v6208_v46 = vpop.f32.mrb[43].mxu1 }
0x44bd   :  { %6785 = vtanh.f32 %v4424_v35  ;;  %v5524_v5 = vmul.f32 -1.442695, %v4424_v35 }
0x44bf   :  { %6787 = vpow2.f32 %v5524_v5 }
0x44c7   :  { %v6786_v23 = vpop.eup %6785 }
0x44c8   :  { %4439 = vrot.lane.b32.xlu0 %v6786_v23, %s7239_s14 }
0x44c9   :  { %v6788_v49 = vpop.eup %6787 }
0x44ca   :  { %v4428_v48 = vadd.f32 1.0, %v6788_v49 }
0x44cc   :  { %6789 = vrcp.f32 %v4428_v48 }
0x44d6   :  { %v6790_v12 = vpop.eup %6789 }
0x44d7   :  { %v4437_v31 = vmul.f32 %v6790_v12, %v4435_v52 }
0x453a   :  { %v4440_v50 = vpop.permute.xlu0 %4439 }
0x453b   :  { %v4442_v51 = vmul.f32 %v6790_v12, %v4440_v50 }
0x453d   :  { %4444 = vrot.lane.b32.xlu0 %v4442_v51, %s7240_s8 }
0x45af   :  { %v4445_v39 = vpop.permute.xlu0 %4444 }
0x45b0   :  { %v4447_v55 = vadd.f32 %v4445_v39, %v4437_v31 }
0x45b2   :  { %6791 = vtanh.f32 %v4447_v55 }
0x45bc   :  { %v6792_v56 = vpop.eup %6791 }
0x45bd   :  { %4450 = vrot.lane.b32.xlu1 %v6792_v56, %s7239_s14 }
0x45c1   :  { %4460 = vrot.lane.b32.xlu1 %v4447_v55, %s7241_s11 }
0x462f   :  { %v4451_v58 = vpop.permute.xlu1 %4450 }
0x4630   :  { %v4453_v6 = vmul.f32 %v6790_v12, %v4451_v58 }
0x4632   :  { %4455 = vrot.lane.b32.xlu0 %v4453_v6, %s7240_s8 }
0x4633   :  { %v4461_v27 = vpop.permute.xlu1 %4460 }
0x4634   :  { %4463 = vst.msk [vmem:[#allocation5] sm:$0xff] %vm554_vm0, %v4461_v27 }
0x463b   :  { %v4552_v7 = vld [vmem:[#allocation5] sm:$0xff] }
0x463c   :  { %4554 = vrot.lane.b32.xlu1 %v4552_v7, %s7240_s8 }
0x46a4   :  { %v4456_v11 = vpop.permute.xlu0 %4455 }
0x46a5   :  { %4458 = vst.msk [vmem:[#allocation4] sm:$0xff] %vm554_vm0, %v4456_v11  ;;  %4464 = vst.msk [vmem:[#allocation3 + $0x78] sm:$0xff] %vm554_vm0, %v4456_v11 }
0x46ac   :  { %v4466_v59 = vld [vmem:[#allocation4] sm:$0xff] }
0x46ad   :  { %6218 = vmatmul.mubr.msk.f32.vlgmr.msra.gmra.mrb[44].mxu0 %vm554_vm0, %v4466_v59 }
0x46ae   :  { %6519 = vmatpush3.bf16.msra.mxu0 %v8192_v20  ;;  %6239 = vmatprep.mubr.msk.f32.mxu0 %vm7238_vm2, %v7236_v0  ;;  %v4555_v4 = vpop.permute.xlu1 %4554 }
0x46af   :  { %6520 = vmatprep.subr.bf16.mxu0 %v7237_v9 }
0x46b2   :  { %6522 = vmatpush3.bf16.msra.mxu0 %v8197_v28 }
0x46b3   :  { %6529 = vmatprep.subr.bf16.mxu0 %v7237_v9 }
0x4780   :  { %v4540_v15 = vpop.f32.mrb[44].mxu0 }
0x4781   :  { %v4544_v61 = vadd.f32 %v4540_v15, %v8068_v57  ;;  %v6219_v63 = vpop.f32.mrb[45].mxu0 }
0x4783   :  { %6793 = vtanh.f32 %v4544_v61  ;;  %v5526_v62 = vmul.f32 -1.442695, %v4544_v61 }
0x4785   :  { %6795 = vpow2.f32 %v5526_v62 }
0x478d   :  { %v6794_v22 = vpop.eup %6793 }
0x478e   :  { %4559 = vrot.lane.b32.xlu0 %v6794_v22, %s7239_s14 }
0x478f   :  { %v6796_v2 = vpop.eup %6795 }
0x4790   :  { %v4548_v33 = vadd.f32 1.0, %v6796_v2 }
0x4792   :  { %6797 = vrcp.f32 %v4548_v33 }
0x479c   :  { %v6798_v8 = vpop.eup %6797 }
0x479d   :  { %v4557_v14 = vmul.f32 %v6798_v8, %v4555_v4 }
0x4800   :  { %v4560_v45 = vpop.permute.xlu0 %4559 }
0x4801   :  { %v4562_v10 = vmul.f32 %v6798_v8, %v4560_v45 }
0x4803   :  { %4564 = vrot.lane.b32.xlu0 %v4562_v10, %s7240_s8 }
0x4875   :  { %v4565_v17 = vpop.permute.xlu0 %4564 }
0x4876   :  { %v4567_v16 = vadd.f32 %v4565_v17, %v4557_v14 }
0x4878   :  { %6799 = vtanh.f32 %v4567_v16 }
0x4882   :  { %v6800_v57 = vpop.eup %6799 }
0x4883   :  { %4570 = vrot.lane.b32.xlu1 %v6800_v57, %s7239_s14 }
0x4887   :  { %4580 = vrot.lane.b32.xlu1 %v4567_v16, %s7241_s11 }
0x48f5   :  { %v4571_v29 = vpop.permute.xlu1 %4570 }
0x48f6   :  { %v4573_v21 = vmul.f32 %v6798_v8, %v4571_v29 }
0x48f8   :  { %4575 = vrot.lane.b32.xlu0 %v4573_v21, %s7240_s8 }
0x48f9   :  { %v4581_v41 = vpop.permute.xlu1 %4580 }
0x48fa   :  { %4583 = vst.msk [vmem:[#allocation5] sm:$0xff] %vm554_vm0, %v4581_v41 }
0x4901   :  { %v4672_v24 = vld [vmem:[#allocation5] sm:$0xff] }
0x4902   :  { %4674 = vrot.lane.b32.xlu1 %v4672_v24, %s7240_s8 }
0x496a   :  { %v4576_v26 = vpop.permute.xlu0 %4575 }
0x496b   :  { %4578 = vst.msk [vmem:[#allocation4] sm:$0xff] %vm554_vm0, %v4576_v26  ;;  %4584 = vst.msk [vmem:[#allocation3 + $0x70] sm:$0xff] %vm554_vm0, %v4576_v26 }
0x4972   :  { %v4586_v30 = vld [vmem:[#allocation4] sm:$0xff] }
0x4973   :  { %6229 = vmatmul.mubr.msk.f32.vlgmr.msra.gmra.mrb[44].mxu1 %vm554_vm0, %v4586_v30 }
0x4974   :  { %6525 = vmatpush3.bf16.msra.mxu1 %v8192_v20  ;;  %6250 = vmatprep.mubr.msk.f32.mxu1 %vm7238_vm2, %v7236_v0  ;;  %v4675_v35 = vpop.permute.xlu1 %4674 }
0x4975   :  { %6526 = vmatprep.subr.bf16.mxu1 %v7237_v9 }
0x4978   :  { %6528 = vmatpush3.bf16.msra.mxu1 %v8197_v28 }
0x4979   :  { %6535 = vmatprep.subr.bf16.mxu1 %v7237_v9 }
0x4a46   :  { %v4660_v3 = vpop.f32.mrb[44].mxu1 }
0x4a47   :  { %v4664_v32 = vadd.f32 %v4660_v3, %v8060_v53  ;;  %v6230_v1 = vpop.f32.mrb[45].mxu1 }
0x4a49   :  { %6801 = vtanh.f32 %v4664_v32  ;;  %v5528_v37 = vmul.f32 -1.442695, %v4664_v32 }
0x4a4b   :  { %6803 = vpow2.f32 %v5528_v37 }
0x4a53   :  { %v6802_v36 = vpop.eup %6801 }
0x4a54   :  { %4679 = vrot.lane.b32.xlu0 %v6802_v36, %s7239_s14 }
0x4a55   :  { %v6804_v40 = vpop.eup %6803 }
0x4a56   :  { %v4668_v42 = vadd.f32 1.0, %v6804_v40 }
0x4a58   :  { %6805 = vrcp.f32 %v4668_v42 }
0x4a62   :  { %v6806_v34 = vpop.eup %6805 }
0x4a63   :  { %v4677_v46 = vmul.f32 %v6806_v34, %v4675_v35 }
0x4ac6   :  { %v4680_v25 = vpop.permute.xlu0 %4679 }
0x4ac7   :  { %v4682_v44 = vmul.f32 %v6806_v34, %v4680_v25 }
0x4ac9   :  { %4684 = vrot.lane.b32.xlu0 %v4682_v44, %s7240_s8 }
0x4b3b   :  { %v4685_v23 = vpop.permute.xlu0 %4684 }
0x4b3c   :  { %v4687_v5 = vadd.f32 %v4685_v23, %v4677_v46 }
0x4b3e   :  { %6807 = vtanh.f32 %v4687_v5 }
0x4b48   :  { %v6808_v53 = vpop.eup %6807 }
0x4b49   :  { %4690 = vrot.lane.b32.xlu1 %v6808_v53, %s7239_s14 }
0x4b4d   :  { %4700 = vrot.lane.b32.xlu1 %v4687_v5, %s7241_s11 }
0x4bbb   :  { %v4691_v49 = vpop.permute.xlu1 %4690 }
0x4bbc   :  { %v4693_v48 = vmul.f32 %v6806_v34, %v4691_v49 }
0x4bbe   :  { %4695 = vrot.lane.b32.xlu0 %v4693_v48, %s7240_s8 }
0x4bbf   :  { %v4701_v12 = vpop.permute.xlu1 %4700 }
0x4bc0   :  { %4703 = vst.msk [vmem:[#allocation5] sm:$0xff] %vm554_vm0, %v4701_v12 }
0x4bc7   :  { %v4792_v50 = vld [vmem:[#allocation5] sm:$0xff] }
0x4bc8   :  { %4794 = vrot.lane.b32.xlu1 %v4792_v50, %s7240_s8 }
0x4c30   :  { %v4696_v51 = vpop.permute.xlu0 %4695 }
0x4c31   :  { %4698 = vst.msk [vmem:[#allocation4] sm:$0xff] %vm554_vm0, %v4696_v51  ;;  %4704 = vst.msk [vmem:[#allocation3 + $0x68] sm:$0xff] %vm554_vm0, %v4696_v51 }
0x4c38   :  { %v4706_v52 = vld [vmem:[#allocation4] sm:$0xff] }
0x4c39   :  { %6240 = vmatmul.mubr.msk.f32.vlgmr.msra.gmra.mrb[46].mxu0 %vm554_vm0, %v4706_v52 }
0x4c3a   :  { %6531 = vmatpush3.bf16.msra.mxu0 %v8192_v20  ;;  %6261 = vmatprep.mubr.msk.f32.mxu0 %vm7238_vm2, %v7236_v0  ;;  %v4795_v15 = vpop.permute.xlu1 %4794 }
0x4c3b   :  { %6532 = vmatprep.subr.bf16.mxu0 %v7237_v9 }
0x4c3e   :  { %6534 = vmatpush3.bf16.msra.mxu0 %v8197_v28 }
0x4c3f   :  { %6541 = vmatprep.subr.bf16.mxu0 %v7237_v9 }
0x4d0c   :  { %v4780_v31 = vpop.f32.mrb[46].mxu0 }
0x4d0d   :  { %v4784_v39 = vadd.f32 %v4780_v31, %v8063_v54  ;;  %v6241_v55 = vpop.f32.mrb[47].mxu0 }
0x4d0f   :  { %6809 = vtanh.f32 %v4784_v39  ;;  %v5530_v58 = vmul.f32 -1.442695, %v4784_v39 }
0x4d11   :  { %6811 = vpow2.f32 %v5530_v58 }
0x4d19   :  { %v6810_v56 = vpop.eup %6809 }
0x4d1a   :  { %4799 = vrot.lane.b32.xlu0 %v6810_v56, %s7239_s14 }
0x4d1b   :  { %v6812_v6 = vpop.eup %6811 }
0x4d1c   :  { %v4788_v27 = vadd.f32 1.0, %v6812_v6 }
0x4d1e   :  { %6813 = vrcp.f32 %v4788_v27 }
0x4d28   :  { %v6814_v7 = vpop.eup %6813 }
0x4d29   :  { %v4797_v61 = vmul.f32 %v6814_v7, %v4795_v15 }
0x4d8c   :  { %v4800_v11 = vpop.permute.xlu0 %4799 }
0x4d8d   :  { %v4802_v59 = vmul.f32 %v6814_v7, %v4800_v11 }
0x4d8f   :  { %4804 = vrot.lane.b32.xlu0 %v4802_v59, %s7240_s8 }
0x4e01   :  { %v4805_v63 = vpop.permute.xlu0 %4804 }
0x4e02   :  { %v4807_v22 = vadd.f32 %v4805_v63, %v4797_v61 }
0x4e04   :  { %6815 = vtanh.f32 %v4807_v22 }
0x4e0e   :  { %v6816_v54 = vpop.eup %6815 }
0x4e0f   :  { %4810 = vrot.lane.b32.xlu1 %v6816_v54, %s7239_s14 }
0x4e13   :  { %4820 = vrot.lane.b32.xlu1 %v4807_v22, %s7241_s11 }
0x4e81   :  { %v4811_v62 = vpop.permute.xlu1 %4810 }
0x4e82   :  { %v4813_v2 = vmul.f32 %v6814_v7, %v4811_v62 }
0x4e84   :  { %4815 = vrot.lane.b32.xlu0 %v4813_v2, %s7240_s8 }
0x4e85   :  { %v4821_v33 = vpop.permute.xlu1 %4820 }
0x4e86   :  { %4823 = vst.msk [vmem:[#allocation5] sm:$0xff] %vm554_vm0, %v4821_v33 }
0x4e8d   :  { %v4912_v8 = vld [vmem:[#allocation5] sm:$0xff] }
0x4e8e   :  { %4914 = vrot.lane.b32.xlu1 %v4912_v8, %s7240_s8 }
0x4ef6   :  { %v4816_v45 = vpop.permute.xlu0 %4815 }
0x4ef7   :  { %4818 = vst.msk [vmem:[#allocation4] sm:$0xff] %vm554_vm0, %v4816_v45  ;;  %4824 = vst.msk [vmem:[#allocation3 + $0x60] sm:$0xff] %vm554_vm0, %v4816_v45 }
0x4efe   :  { %v4826_v10 = vld [vmem:[#allocation4] sm:$0xff] }
0x4eff   :  { %6251 = vmatmul.mubr.msk.f32.vlgmr.msra.gmra.mrb[46].mxu1 %vm554_vm0, %v4826_v10 }
0x4f00   :  { %6537 = vmatpush3.bf16.msra.mxu1 %v8192_v20  ;;  %6272 = vmatprep.mubr.msk.f32.mxu1 %vm7238_vm2, %v7236_v0  ;;  %v4915_v30 = vpop.permute.xlu1 %4914 }
0x4f01   :  { %6538 = vmatprep.subr.bf16.mxu1 %v7237_v9 }
0x4f04   :  { %6540 = vmatpush3.bf16.msra.mxu1 %v8197_v28 }
0x4f05   :  { %6547 = vmatprep.subr.bf16.mxu1 %v7237_v9 }
0x4fd2   :  { %v4900_v4 = vpop.f32.mrb[46].mxu1 }
0x4fd3   :  { %v4904_v14 = vadd.f32 %v4900_v4, %v8052_v47  ;;  %v6252_v17 = vpop.f32.mrb[47].mxu1 }
0x4fd5   :  { %6817 = vtanh.f32 %v4904_v14  ;;  %v5532_v57 = vmul.f32 -1.442695, %v4904_v14 }
0x4fd7   :  { %6819 = vpow2.f32 %v5532_v57 }
0x4fdf   :  { %v6818_v16 = vpop.eup %6817 }
0x4fe0   :  { %4919 = vrot.lane.b32.xlu0 %v6818_v16, %s7239_s14 }
0x4fe1   :  { %v6820_v29 = vpop.eup %6819 }
0x4fe2   :  { %v4908_v21 = vadd.f32 1.0, %v6820_v29 }
0x4fe4   :  { %6821 = vrcp.f32 %v4908_v21 }
0x4fee   :  { %v6822_v41 = vpop.eup %6821 }
0x4fef   :  { %v4917_v3 = vmul.f32 %v6822_v41, %v4915_v30 }
0x5052   :  { %v4920_v24 = vpop.permute.xlu0 %4919 }
0x5053   :  { %v4922_v26 = vmul.f32 %v6822_v41, %v4920_v24 }
0x5055   :  { %4924 = vrot.lane.b32.xlu0 %v4922_v26, %s7240_s8 }
0x50c7   :  { %v4925_v32 = vpop.permute.xlu0 %4924 }
0x50c8   :  { %v4927_v1 = vadd.f32 %v4925_v32, %v4917_v3 }
0x50ca   :  { %6823 = vtanh.f32 %v4927_v1 }
0x50d4   :  { %v6824_v47 = vpop.eup %6823 }
0x50d5   :  { %4930 = vrot.lane.b32.xlu1 %v6824_v47, %s7239_s14 }
0x50d9   :  { %4940 = vrot.lane.b32.xlu1 %v4927_v1, %s7241_s11 }
0x5147   :  { %v4931_v36 = vpop.permute.xlu1 %4930 }
0x5148   :  { %v4933_v37 = vmul.f32 %v6822_v41, %v4931_v36 }
0x514a   :  { %4935 = vrot.lane.b32.xlu0 %v4933_v37, %s7240_s8 }
0x514b   :  { %v4941_v40 = vpop.permute.xlu1 %4940 }
0x514c   :  { %4943 = vst.msk [vmem:[#allocation5] sm:$0xff] %vm554_vm0, %v4941_v40 }
0x5153   :  { %v5032_v42 = vld [vmem:[#allocation5] sm:$0xff] }
0x5154   :  { %5034 = vrot.lane.b32.xlu1 %v5032_v42, %s7240_s8 }
0x51bc   :  { %v4936_v34 = vpop.permute.xlu0 %4935 }
0x51bd   :  { %4938 = vst.msk [vmem:[#allocation4] sm:$0xff] %vm554_vm0, %v4936_v34  ;;  %4944 = vst.msk [vmem:[#allocation3 + $0x58] sm:$0xff] %vm554_vm0, %v4936_v34 }
0x51c4   :  { %v4946_v25 = vld [vmem:[#allocation4] sm:$0xff] }
0x51c5   :  { %6262 = vmatmul.mubr.msk.f32.vlgmr.msra.gmra.mrb[48].mxu0 %vm554_vm0, %v4946_v25 }
0x51c6   :  { %6543 = vmatpush3.bf16.msra.mxu0 %v8192_v20  ;;  %6283 = vmatprep.mubr.msk.f32.mxu0 %vm7238_vm2, %v7236_v0  ;;  %v5035_v50 = vpop.permute.xlu1 %5034 }
0x51c7   :  { %6544 = vmatprep.subr.bf16.mxu0 %v7237_v9 }
0x51ca   :  { %6546 = vmatpush3.bf16.msra.mxu0 %v8197_v28 }
0x5298   :  { %v5020_v44 = vpop.f32.mrb[48].mxu0 }
0x5299   :  { %v5024_v35 = vadd.f32 %v5020_v44, %v8057_v60  ;;  %v6263_v46 = vpop.f32.mrb[49].mxu0 }
0x529b   :  { %6825 = vtanh.f32 %v5024_v35  ;;  %v5534_v5 = vmul.f32 -1.442695, %v5024_v35 }
0x529d   :  { %6827 = vpow2.f32 %v5534_v5 }
0x52a5   :  { %v6826_v23 = vpop.eup %6825 }
0x52a6   :  { %5039 = vrot.lane.b32.xlu0 %v6826_v23, %s7239_s14 }
0x52a7   :  { %v6828_v53 = vpop.eup %6827 }
0x52a8   :  { %v5028_v49 = vadd.f32 1.0, %v6828_v53 }
0x52aa   :  { %6829 = vrcp.f32 %v5028_v49 }
0x52b4   :  { %v6830_v20 = vpop.eup %6829 }
0x52b5   :  { %v5037_v28 = vmul.f32 %v6830_v20, %v5035_v50 }
0x5318   :  { %v5040_v48 = vpop.permute.xlu0 %5039 }
0x5319   :  { %v5042_v12 = vmul.f32 %v6830_v20, %v5040_v48 }
0x531b   :  { %5044 = vrot.lane.b32.xlu0 %v5042_v12, %s7240_s8 }
0x538d   :  { %v5045_v51 = vpop.permute.xlu0 %5044 }
0x538e   :  { %v5047_v52 = vadd.f32 %v5045_v51, %v5037_v28 }
0x5390   :  { %6831 = vtanh.f32 %v5047_v52 }
0x539a   :  { %v6832_v60 = vpop.eup %6831 }
0x539b   :  { %5050 = vrot.lane.b32.xlu1 %v6832_v60, %s7239_s14 }
0x539f   :  { %5060 = vrot.lane.b32.xlu1 %v5047_v52, %s7241_s11 }
0x540d   :  { %v5051_v31 = vpop.permute.xlu1 %5050 }
0x540e   :  { %v5053_v39 = vmul.f32 %v6830_v20, %v5051_v31 }
0x5410   :  { %5055 = vrot.lane.b32.xlu0 %v5053_v39, %s7240_s8 }
0x5411   :  { %v5061_v55 = vpop.permute.xlu1 %5060 }
0x5412   :  { %5063 = vst.msk [vmem:[#allocation5] sm:$0xff] %vm554_vm0, %v5061_v55 }
0x5419   :  { %v5152_v56 = vld [vmem:[#allocation5] sm:$0xff] }
0x541a   :  { %5154 = vrot.lane.b32.xlu1 %v5152_v56, %s7240_s8 }
0x5482   :  { %v5056_v58 = vpop.permute.xlu0 %5055 }
0x5483   :  { %5058 = vst.msk [vmem:[#allocation4] sm:$0xff] %vm554_vm0, %v5056_v58  ;;  %5064 = vst.msk [vmem:[#allocation3 + $0x50] sm:$0xff] %vm554_vm0, %v5056_v58 }
0x548a   :  { %v5066_v6 = vld [vmem:[#allocation4] sm:$0xff] }
0x548b   :  { %6273 = vmatmul.mubr.msk.f32.vlgmr.msra.gmra.mrb[48].mxu1 %vm554_vm0, %v5066_v6 }
0x548c   :  { %6549 = vmatpush3.bf16.msra.mxu1 %v8185_v13  ;;  %6294 = vmatprep.mubr.msk.f32.mxu1 %vm7238_vm2, %v7236_v0 }
0x548d   :  { %6550 = vmatprep.subr.bf16.mxu1 %v7237_v9  ;;  %v5155_v9 = vpop.permute.xlu1 %5154 }
0x5490   :  { %6552 = vmatpush3.bf16.msra.mxu1 %v8189_v19 }
0x555e   :  { %v5140_v27 = vpop.f32.mrb[48].mxu1 }
0x555f   :  { %v5144_v7 = vadd.f32 %v5140_v27, %v8042_v43  ;;  %v6274_v11 = vpop.f32.mrb[49].mxu1 }
0x5561   :  { %6833 = vtanh.f32 %v5144_v7  ;;  %v5536_v15 = vmul.f32 -1.442695, %v5144_v7 }
0x5563   :  { %6835 = vpow2.f32 %v5536_v15 }
0x556b   :  { %v6834_v59 = vpop.eup %6833 }
0x556c   :  { %5159 = vrot.lane.b32.xlu0 %v6834_v59, %s7239_s14 }
0x556d   :  { %v6836_v61 = vpop.eup %6835 }
0x556e   :  { %v5148_v63 = vadd.f32 1.0, %v6836_v61 }
0x5570   :  { %6837 = vrcp.f32 %v5148_v63 }
0x557a   :  { %v6838_v13 = vpop.eup %6837 }
0x557b   :  { %v5157_v19 = vmul.f32 %v6838_v13, %v5155_v9 }
0x55de   :  { %v5160_v22 = vpop.permute.xlu0 %5159 }
0x55df   :  { %v5162_v0 = vmul.f32 %v6838_v13, %v5160_v22 }
0x55e1   :  { %5164 = vrot.lane.b32.xlu0 %v5162_v0, %s7240_s8 }
0x5653   :  { %v5165_v54 = vpop.permute.xlu0 %5164 }
0x5654   :  { %v5167_v62 = vadd.f32 %v5165_v54, %v5157_v19 }
0x5656   :  { %6839 = vtanh.f32 %v5167_v62 }
0x5660   :  { %v6840_v43 = vpop.eup %6839 }
0x5661   :  { %5170 = vrot.lane.b32.xlu1 %v6840_v43, %s7239_s14 }
0x5665   :  { %5180 = vrot.lane.b32.xlu1 %v5167_v62, %s7241_s11 }
0x56d3   :  { %v5171_v2 = vpop.permute.xlu1 %5170 }
0x56d4   :  { %v5173_v33 = vmul.f32 %v6838_v13, %v5171_v2 }
0x56d6   :  { %5175 = vrot.lane.b32.xlu0 %v5173_v33, %s7240_s8 }
0x56d7   :  { %v5181_v8 = vpop.permute.xlu1 %5180 }
0x56d8   :  { %5183 = vst.msk [vmem:[#allocation5] sm:$0xff] %vm554_vm0, %v5181_v8 }
0x56df   :  { %v5272_v45 = vld [vmem:[#allocation5] sm:$0xff] }
0x56e0   :  { %5274 = vrot.lane.b32.xlu1 %v5272_v45, %s7240_s8 }
0x5748   :  { %v5176_v10 = vpop.permute.xlu0 %5175 }
0x5749   :  { %5178 = vst.msk [vmem:[#allocation4] sm:$0xff] %vm554_vm0, %v5176_v10  ;;  %5184 = vst.msk [vmem:[#allocation3 + $0x48] sm:$0xff] %vm554_vm0, %v5176_v10 }
0x5750   :  { %v5186_v4 = vld [vmem:[#allocation4] sm:$0xff] }
0x5751   :  { %6284 = vmatmul.mubr.msk.f32.vlgmr.msra.gmra.mrb[50].mxu0 %vm554_vm0, %v5186_v4 }
0x5752   :  { %v5275_v3 = vpop.permute.xlu1 %5274 }
0x5824   :  { %v5260_v14 = vpop.f32.mrb[50].mxu0 }
0x5825   :  { %v5264_v17 = vadd.f32 %v5260_v14, %v8047_v18  ;;  %v6285_v16 = vpop.f32.mrb[51].mxu0 }
0x5827   :  { %6841 = vtanh.f32 %v5264_v17  ;;  %v5538_v29 = vmul.f32 -1.442695, %v5264_v17 }
0x5829   :  { %6843 = vpow2.f32 %v5538_v29 }
0x5831   :  { %v6842_v57 = vpop.eup %6841 }
0x5832   :  { %5279 = vrot.lane.b32.xlu0 %v6842_v57, %s7239_s14 }
0x5833   :  { %v6844_v21 = vpop.eup %6843 }
0x5834   :  { %v5268_v41 = vadd.f32 1.0, %v6844_v21 }
0x5836   :  { %6845 = vrcp.f32 %v5268_v41 }
0x5840   :  { %v6846_v24 = vpop.eup %6845 }
0x5841   :  { %v5277_v32 = vmul.f32 %v6846_v24, %v5275_v3 }
0x58a4   :  { %v5280_v26 = vpop.permute.xlu0 %5279 }
0x58a5   :  { %v5282_v30 = vmul.f32 %v6846_v24, %v5280_v26 }
0x58a7   :  { %5284 = vrot.lane.b32.xlu0 %v5282_v30, %s7240_s8 }
0x5919   :  { %v5285_v1 = vpop.permute.xlu0 %5284 }
0x591a   :  { %v5287_v47 = vadd.f32 %v5285_v1, %v5277_v32 }
0x591c   :  { %6847 = vtanh.f32 %v5287_v47 }
0x5926   :  { %v6848_v18 = vpop.eup %6847 }
0x5927   :  { %5290 = vrot.lane.b32.xlu1 %v6848_v18, %s7239_s14 }
0x592b   :  { %5300 = vrot.lane.b32.xlu1 %v5287_v47, %s7241_s11 }
0x5999   :  { %v5291_v36 = vpop.permute.xlu1 %5290 }
0x599a   :  { %v5293_v37 = vmul.f32 %v6846_v24, %v5291_v36 }
0x599c   :  { %5295 = vrot.lane.b32.xlu0 %v5293_v37, %s7240_s8 }
0x599d   :  { %v5301_v40 = vpop.permute.xlu1 %5300 }
0x599e   :  { %5303 = vst.msk [vmem:[#allocation5] sm:$0xff] %vm554_vm0, %v5301_v40 }
0x5a0e   :  { %v5296_v42 = vpop.permute.xlu0 %5295 }
0x5a0f   :  { %5298 = vst.msk [vmem:[#allocation4] sm:$0xff] %vm554_vm0, %v5296_v42  ;;  %5304 = vst.msk [vmem:[#allocation3 + $0x40] sm:$0xff] %vm554_vm0, %v5296_v42 }
0x5a16   :  { %v5305_v34 = vld [vmem:[#allocation4] sm:$0xff] }
0x5a17   :  { %v5306_v25 = vmax.f32 %v5305_v34, 0.0 }
0x5a19   :  { %6295 = vmatmul.mubr.msk.f32.vlgmr.msra.gmra.mrb[50].mxu1 %vm554_vm0, %v5306_v25 }
0x5aec   :  { %v5387_v44 = vpop.f32.mrb[50].mxu1 }
0x5aed   :  { %v5388_v35 = vadd.f32 %v8224_v38, %v5387_v44  ;;  %v6296_v46 = vpop.f32.mrb[51].mxu1 }
0x5aef   :  { %5392 = vst [vmem:[#allocation30 + $0x18] sm:$0xff] %v5388_v35 }
0x5af0   :  { %7190 = shalt.err (!%p7187_p12)
}
0x5af1   :  { %s7191_s13 = scalar_lea.hbm %s8380_s15, 512 }
0x5af2   :  { %p7192_p13 = scmp.ne.s32.totalorder %s8380_s15, %s7191_s13  ;;  %p7195_p0 = scmp.lt.u32.totalorder %s7191_s13, %s8380_s15 }
0x5af4   :  { %p7197_p1 = pnand %p7195_p0, %p7192_p13 }
0x5af6   :  { %7200 = shalt.err (!%p7197_p1)
}
0x5af7   :  { %5404 = dma.vmem_to_hbm [thread:$0]  %s5399_s1, 512, %s8380_s15, [#allocation8], %s7221_s30, %s7221_s30, %s7222_s16  }
0x5af8   :  { %7217 = dma.done.wait [#allocation8], 512  }
0x5af9   :  { %7218 = vsyncadd [#allocation8], 4294966784 }
0x5afa   :  { %5408 = vsyncpa [#allocation7], 1 }
0x5afb   :  { %5409 = vsyncpa [#allocation10], 1 }
0x5afc   :  { %5410 = vsyncpa [#allocation13], 1 }
0x5afd   :  { %5411 = vsyncpa [#allocation16], 1 }
0x5afe   :  { %5412 = vsyncpa [#allocation19], 1 }
0x5aff   :  { %5413 = vsyncpa [#allocation22], 1 }
0x5b00   :  { %5414 = vsyncpa [#allocation25], 1 }
0x5b01   :  { %5415 = vsyncpa [#allocation28], 1 }
0x5b02   :  { %5416 = vsyncpa [#allocation8], 1 }

</bundles_post_ra>
